<compile_context>
chip_gen: v7x
topology: tpu7x:2x2x1
jax: 0.10.0
libtpu: 0.0.40
codegen_flags: <defaults>
</compile_context>

<pallas_src>
import functools

import jax
import jax.numpy as jnp
from jax.experimental import pallas as pl
from jax.experimental.pallas import tpu as pltpu


# -----------------------------------------------------------------------------
# Pallas kernels
# -----------------------------------------------------------------------------
def _matmul_bn_kernel(x_ref, w_ref, scale_ref, bias_ref, o_ref, *, apply_relu):
    """o = (x @ w) * scale + bias  [+ ReLU].  Taps already folded into K."""
    y = jnp.dot(x_ref[...], w_ref[...], preferred_element_type=jnp.float32)
    y = y * scale_ref[...] + bias_ref[...]
    if apply_relu:
        y = jnp.maximum(y, 0.0)
    o_ref[...] = y.astype(o_ref.dtype)


def _matmul_bn_res_relu_kernel(x_ref, w_ref, scale_ref, bias_ref, res_ref, o_ref):
    """RFB_m epilogue: relu(conv_bn(x) + residual) fused in one kernel."""
    y = jnp.dot(x_ref[...], w_ref[...], preferred_element_type=jnp.float32)
    y = y * scale_ref[...] + bias_ref[...] + res_ref[...].astype(jnp.float32)
    o_ref[...] = jnp.maximum(y, 0.0).astype(o_ref.dtype)


def _branch_final_kernel(x0_ref, t1_ref, t2_ref, t3_ref, w_ref, scale_ref,
                         bias_ref, o_ref):
    """Three dilated-3x3 conv+BN (one per branch) + branch0 pass-through,
    written directly into a lane-dense (tm, 4*C) concat block."""
    c = x0_ref.shape[-1]
    o_ref[:, :c] = x0_ref[...].astype(o_ref.dtype)
    for g, t_ref in enumerate((t1_ref, t2_ref, t3_ref)):
        y = jnp.dot(t_ref[...], w_ref[g], preferred_element_type=jnp.float32)
        y = y * scale_ref[:, g * c:(g + 1) * c] + bias_ref[:, g * c:(g + 1) * c]
        o_ref[:, (g + 1) * c:(g + 2) * c] = y.astype(o_ref.dtype)


# -----------------------------------------------------------------------------
# pallas_call wrappers
# -----------------------------------------------------------------------------
def _pick_row_tile(m: int, target: int = 256) -> int:
    """Largest multiple-of-8 divisor of m that is <= target (fallback: m).
    target=256 keeps >= 2 parallel grid steps at M=512 (v7x: 2 TensorCores)."""
    tm = min(m, target)
    tm -= tm % 8
    while tm >= 8:
        if m % tm == 0:
            return tm
        tm -= 8
    return m


def _matmul_bn_call(x2d, w2d, scale, bias, *, relu=False, residual=None,
                    row_tile=256):
    """x2d: (M, K), w2d: (K, N), scale/bias: (1, N), residual: (M, N) or None."""
    m, k = x2d.shape
    k2, n = w2d.shape
    assert k == k2
    tm = _pick_row_tile(m, row_tile)
    grid = (m // tm,)

    in_specs = [
        pl.BlockSpec((tm, k), lambda i: (i, 0)),
        pl.BlockSpec((k, n), lambda i: (0, 0)),
        pl.BlockSpec((1, n), lambda i: (0, 0)),
        pl.BlockSpec((1, n), lambda i: (0, 0)),
    ]
    args = [x2d, w2d, scale, bias]
    if residual is None:
        kernel = functools.partial(_matmul_bn_kernel, apply_relu=relu)
    else:
        in_specs.append(pl.BlockSpec((tm, n), lambda i: (i, 0)))
        args.append(residual)
        kernel = _matmul_bn_res_relu_kernel

    return pl.pallas_call(
        kernel,
        out_shape=jax.ShapeDtypeStruct((m, n), x2d.dtype),
        grid=grid,
        in_specs=in_specs,
        out_specs=pl.BlockSpec((tm, n), lambda i: (i, 0)),
        compiler_params=pltpu.CompilerParams(dimension_semantics=("parallel",)),
    )(*args)


def _branch_final_call(x0, t1, t2, t3, w, scale, bias, *, row_tile=256):
    """x0: (M, C). t*: (M, 9C). w: (3, 9C, C). scale/bias: (1, 3C).
    Returns (M, 4C) = concat([x0, conv1(t1), conv2(t2), conv3(t3)], -1)."""
    m, c = x0.shape
    kt = t1.shape[1]
    n = 4 * c
    tm = _pick_row_tile(m, row_tile)
    grid = (m // tm,)
    return pl.pallas_call(
        _branch_final_kernel,
        out_shape=jax.ShapeDtypeStruct((m, n), x0.dtype),
        grid=grid,
        in_specs=[
            pl.BlockSpec((tm, c), lambda i: (i, 0)),
            pl.BlockSpec((tm, kt), lambda i: (i, 0)),
            pl.BlockSpec((tm, kt), lambda i: (i, 0)),
            pl.BlockSpec((tm, kt), lambda i: (i, 0)),
            pl.BlockSpec((3, kt, c), lambda i: (0, 0, 0)),
            pl.BlockSpec((1, 3 * c), lambda i: (0, 0)),
            pl.BlockSpec((1, 3 * c), lambda i: (0, 0)),
        ],
        out_specs=pl.BlockSpec((tm, n), lambda i: (i, 0)),
        compiler_params=pltpu.CompilerParams(dimension_semantics=("parallel",)),
    )(x0, t1, t2, t3, w, scale, bias)


# -----------------------------------------------------------------------------
# im2col (taps folded into the contraction dim) and conv wrapper
# -----------------------------------------------------------------------------
def _im2col(x, kh, kw, ph, pw, dh, dw):
    """x: (B, H, W, Cin) -> (B*H*W, kh*kw*Cin) for a stride-1 'same' conv."""
    b, h, w, cin = x.shape
    assert 2 * ph == dh * (kh - 1) and 2 * pw == dw * (kw - 1)
    m = b * h * w
    if kh == 1 and kw == 1:
        return x.reshape(m, cin)
    xp = jnp.pad(x, ((0, 0), (ph, ph), (pw, pw), (0, 0)))
    taps = [xp[:, r * dh:r * dh + h, s * dw:s * dw + w, :]
            for r in range(kh) for s in range(kw)]
    return jnp.concatenate(taps, axis=-1).reshape(m, kh * kw * cin)


def conv2d_bn(x, p, *, padding=(0, 0), dilation=(1, 1), relu=False,
              residual=None, row_tile=256):
    """x: (B, H, W, Cin). p['w']: (kh, kw, Cin, Cout). Stride-1 'same' conv+BN."""
    b, h, w, cin = x.shape
    kh, kw, wcin, cout = p["w"].shape
    assert wcin == cin
    cols = _im2col(x, kh, kw, padding[0], padding[1], dilation[0], dilation[1])
    res2d = None if residual is None else residual.reshape(b * h * w, cout)
    out = _matmul_bn_call(cols, p["w"].reshape(kh * kw * cin, cout),
                          p["scale"], p["bias"],
                          relu=relu, residual=res2d, row_tile=row_tile)
    return out.reshape(b, h, w, cout)


def _grouped_1d_params(params, names, cout, *, horizontal):
    """Block-diagonal (1,7) or (7,1) weight implementing three independent
    (1,k)/(k,1) convs (k in {3,5,7}) on the channel-concatenated input."""
    kmax = 7
    ng = len(names)
    wb = jnp.zeros((kmax, ng * cout, ng * cout), jnp.float32)
    for g, name in enumerate(names):
        w = params[name]["w"]
        k = w.shape[1] if horizontal else w.shape[0]
        taps = w.reshape(k, cout, cout)
        off = (kmax - k) // 2  # zero-weight taps emulate the smaller kernel
        wb = wb.at[off:off + k,
                   g * cout:(g + 1) * cout,
                   g * cout:(g + 1) * cout].set(taps)
    wb = wb.reshape(1, kmax, ng * cout, ng * cout) if horizontal \
        else wb.reshape(kmax, 1, ng * cout, ng * cout)
    scale = jnp.concatenate([params[n]["scale"] for n in names], axis=-1)
    bias = jnp.concatenate([params[n]["bias"] for n in names], axis=-1)
    return {"w": wb, "scale": scale, "bias": bias}


# -----------------------------------------------------------------------------
# RFB_m forward (Pallas path) and parameter initialization
# -----------------------------------------------------------------------------
def init_rfb_m_params(key, in_ch, out_ch, eps=1e-5):
    def conv_bn_params(k, kh, kw, cin, cout):
        k_w, k_g, k_b, k_m, k_v = jax.random.split(k, 5)
        fan_in = kh * kw * cin
        w = jax.random.normal(k_w, (kh, kw, cin, cout), jnp.float32) / jnp.sqrt(fan_in)
        gamma = 1.0 + 0.1 * jax.random.normal(k_g, (cout,), jnp.float32)
        beta = 0.1 * jax.random.normal(k_b, (cout,), jnp.float32)
        running_mean = 0.1 * jax.random.normal(k_m, (cout,), jnp.float32)
        running_var = 1.0 + 0.5 * jax.random.uniform(k_v, (cout,), jnp.float32)
        scale = gamma / jnp.sqrt(running_var + eps)       # eval-mode BN fold
        bias = beta - running_mean * scale
        return {"w": w, "scale": scale.reshape(1, cout), "bias": bias.reshape(1, cout)}

    specs = {
        "b0_0": (1, 1, in_ch, out_ch),
        "b1_0": (1, 1, in_ch, out_ch), "b1_1": (1, 3, out_ch, out_ch),
        "b1_2": (3, 1, out_ch, out_ch), "b1_3": (3, 3, out_ch, out_ch),
        "b2_0": (1, 1, in_ch, out_ch), "b2_1": (1, 5, out_ch, out_ch),
        "b2_2": (5, 1, out_ch, out_ch), "b2_3": (3, 3, out_ch, out_ch),
        "b3_0": (1, 1, in_ch, out_ch), "b3_1": (1, 7, out_ch, out_ch),
        "b3_2": (7, 1, out_ch, out_ch), "b3_3": (3, 3, out_ch, out_ch),
        "cat": (3, 3, 4 * out_ch, out_ch),
        "res": (1, 1, in_ch, out_ch),
    }
    keys = jax.random.split(key, len(specs))
    return {name: conv_bn_params(k, *spec)
            for k, (name, spec) in zip(keys, specs.items())}


def rfb_m_forward(x_nchw, params):
    """RFB_m forward: (B, Cin, H, W) -> (B, Cout, H, W)."""
    x = jnp.transpose(x_nchw, (0, 2, 3, 1))   # NHWC internally (lane-dense C)
    b, h, w, cin = x.shape
    m = b * h * w
    cout = params["b0_0"]["w"].shape[-1]

    # ---- Stage A: five 1x1 conv+BN on x, batched along Cout (one pallas_call).
    names_a = ("b0_0", "b1_0", "b2_0", "b3_0", "res")
    w_a = jnp.concatenate([params[n]["w"].reshape(cin, cout) for n in names_a], axis=-1)
    s_a = jnp.concatenate([params[n]["scale"] for n in names_a], axis=-1)
    b_a = jnp.concatenate([params[n]["bias"] for n in names_a], axis=-1)
    ya = _matmul_bn_call(x.reshape(m, cin), w_a, s_a, b_a)        # (M, 5*cout)

    x0 = ya[:, :cout]                                              # branch0 output
    z = ya[:, cout:4 * cout].reshape(b, h, w, 3 * cout)            # [x1|x2|x3] inputs
    x_res = ya[:, 4 * cout:]                                       # conv_res output

    # ---- Stage B: grouped 1-D convs across branches ((1,3)/(1,5)/(1,7) then
    #      (3,1)/(5,1)/(7,1)), each as ONE block-diagonal conv.
    p_row = _grouped_1d_params(params, ("b1_1", "b2_1", "b3_1"), cout, horizontal=True)
    p_col = _grouped_1d_params(params, ("b1_2", "b2_2", "b3_2"), cout, horizontal=False)
    z = conv2d_bn(z, p_row, padding=(0, 3))
    z = conv2d_bn(z, p_col, padding=(3, 0))

    # ---- Stage C: dilated 3x3 convs (d=3,5,7) + branch0 pass-through written
    #      directly into a lane-dense (M, 4*cout) concat slab (one pallas_call).
    t1 = _im2col(z[..., :cout],             3, 3, 3, 3, 3, 3)
    t2 = _im2col(z[..., cout:2 * cout],     3, 3, 5, 5, 5, 5)
    t3 = _im2col(z[..., 2 * cout:],         3, 3, 7, 7, 7, 7)
    names_c = ("b1_3", "b2_3", "b3_3")
    w_c = jnp.stack([params[n]["w"].reshape(9 * cout, cout) for n in names_c], axis=0)
    s_c = jnp.concatenate([params[n]["scale"] for n in names_c], axis=-1)
    b_c = jnp.concatenate([params[n]["bias"] for n in names_c], axis=-1)
    x_cat = _branch_final_call(x0, t1, t2, t3, w_c, s_c, b_c)      # (M, 4*cout)

    # ---- conv_cat (3x3, Cin=4*cout) fused with residual add + ReLU.
    y = conv2d_bn(x_cat.reshape(b, h, w, 4 * cout), params["cat"], padding=(1, 1),
                  residual=x_res.reshape(b, h, w, cout))
    return jnp.transpose(y, (0, 3, 1, 2))


# -----------------------------------------------------------------------------
# Pure-JAX reference (mirrors the PyTorch forward, full f32 precision)
# -----------------------------------------------------------------------------
def _conv_bn_ref(x, p, *, padding=(0, 0), dilation=(1, 1)):
    y = jax.lax.conv_general_dilated(
        x, p["w"], window_strides=(1, 1),
        padding=[(padding[0], padding[0]), (padding[1], padding[1])],
        rhs_dilation=dilation,
        dimension_numbers=("NHWC", "HWIO", "NHWC"),
        precision=jax.lax.Precision.HIGHEST,
    )
    return y * p["scale"][0] + p["bias"][0]


def rfb_m_reference(x_nchw, params):
    x = jnp.transpose(x_nchw, (0, 2, 3, 1))
    x0 = _conv_bn_ref(x, params["b0_0"])
    x1 = _conv_bn_ref(x, params["b1_0"])
    x1 = _conv_bn_ref(x1, params["b1_1"], padding=(0, 1))
    x1 = _conv_bn_ref(x1, params["b1_2"], padding=(1, 0))
    x1 = _conv_bn_ref(x1, params["b1_3"], padding=(3, 3), dilation=(3, 3))
    x2 = _conv_bn_ref(x, params["b2_0"])
    x2 = _conv_bn_ref(x2, params["b2_1"], padding=(0, 2))
    x2 = _conv_bn_ref(x2, params["b2_2"], padding=(2, 0))
    x2 = _conv_bn_ref(x2, params["b2_3"], padding=(5, 5), dilation=(5, 5))
    x3 = _conv_bn_ref(x, params["b3_0"])
    x3 = _conv_bn_ref(x3, params["b3_1"], padding=(0, 3))
    x3 = _conv_bn_ref(x3, params["b3_2"], padding=(3, 0))
    x3 = _conv_bn_ref(x3, params["b3_3"], padding=(7, 7), dilation=(7, 7))
    x_cat = jnp.concatenate([x0, x1, x2, x3], axis=-1)
    y = _conv_bn_ref(x_cat, params["cat"], padding=(1, 1)) + _conv_bn_ref(x, params["res"])
    y = jnp.maximum(y, 0.0)
    return jnp.transpose(y, (0, 3, 1, 2))


if __name__ == "__main__":
    key = jax.random.PRNGKey(0)
    k_x, k_p = jax.random.split(key)

    in_ch, out_ch = 32, 32
    batch, height, width = 2, 16, 16

    x = jax.random.normal(k_x, (batch, in_ch, height, width), dtype=jnp.float32)
    params = init_rfb_m_params(k_p, in_ch, out_ch)

    out = jax.jit(rfb_m_forward)(x, params)
    out = jax.block_until_ready(out)

    ref = rfb_m_reference(x, params)
    assert out.shape == ref.shape == (batch, out_ch, height, width)
    assert out.dtype == ref.dtype
    max_err = float(jnp.max(jnp.abs(out - ref)))
    # Kernel uses default (native-MXU) matmul precision vs the f32-HIGHEST
    # reference, so the tolerance is looser than the old HIGHEST-vs-HIGHEST check.
    assert jnp.allclose(out, ref, atol=5e-2, rtol=5e-2), f"mismatch vs reference: {max_err}"

    print("KERNEL_OK")
</pallas_src>

<mosaic_0001>
module attributes {stable_mosaic.version = 11 : i64} {
  func.func @_matmul_bn_kernel(%arg0: i32, %arg1: memref<256x32xf32, #tpu.memory_space<vmem>>, %arg2: memref<32x160xf32, #tpu.memory_space<vmem>>, %arg3: memref<1x160xf32, #tpu.memory_space<vmem>>, %arg4: memref<1x160xf32, #tpu.memory_space<vmem>>, %arg5: memref<256x160xf32, #tpu.memory_space<vmem>>) attributes {dimension_semantics = [#tpu.dimension_semantics<parallel>], iteration_bounds = array<i64: 2>, scalar_prefetch = 0 : i64, scratch_operands = 0 : i64, tpu.core_type = #tpu.core_type<tc>, window_params = [{transform_indices = @transform_0, window_bounds = array<i64: 256, 32>}, {pipeline_mode = #tpu.pipeline_mode<synchronous>, transform_indices = @transform_1, window_bounds = array<i64: 32, 160>}, {pipeline_mode = #tpu.pipeline_mode<synchronous>, transform_indices = @transform_2, window_bounds = array<i64: 1, 160>}, {pipeline_mode = #tpu.pipeline_mode<synchronous>, transform_indices = @transform_3, window_bounds = array<i64: 1, 160>}, {transform_indices = @transform_4, window_bounds = array<i64: 256, 160>}]} {
    %c0 = arith.constant 0 : index
    %c0_0 = arith.constant 0 : index
    %0 = vector.load %arg1[%c0, %c0_0] : memref<256x32xf32, #tpu.memory_space<vmem>>, vector<256x32xf32>
    %c0_1 = arith.constant 0 : index
    %c0_2 = arith.constant 0 : index
    %1 = vector.load %arg2[%c0_1, %c0_2] : memref<32x160xf32, #tpu.memory_space<vmem>>, vector<32x160xf32>
    %cst = arith.constant dense<0.000000e+00> : vector<256x160xf32>
    %2 = tpu.matmul %0, %1, %cst {dimension_numbers = #tpu.dot_dimension_numbers<[1], [0], [0], [1], [0, 0, 1, 1], [], []>} : vector<256x32xf32>, vector<32x160xf32>, vector<256x160xf32> -> vector<256x160xf32>
    %c0_3 = arith.constant 0 : index
    %c0_4 = arith.constant 0 : index
    %3 = vector.load %arg3[%c0_3, %c0_4] : memref<1x160xf32, #tpu.memory_space<vmem>>, vector<1x160xf32>
    %4 = vector.broadcast %3 : vector<1x160xf32> to vector<256x160xf32>
    %5 = arith.mulf %2, %4 : vector<256x160xf32>
    %c0_5 = arith.constant 0 : index
    %c0_6 = arith.constant 0 : index
    %6 = vector.load %arg4[%c0_5, %c0_6] : memref<1x160xf32, #tpu.memory_space<vmem>>, vector<1x160xf32>
    %7 = vector.broadcast %6 : vector<1x160xf32> to vector<256x160xf32>
    %8 = arith.addf %5, %7 : vector<256x160xf32>
    %c0_7 = arith.constant 0 : index
    %c0_8 = arith.constant 0 : index
    %9 = vector.load %arg5[%c0_7, %c0_8] : memref<256x160xf32, #tpu.memory_space<vmem>>, vector<256x160xf32>
    tpu.vector_store %arg5[%c0_7, %c0_8], %8 {strides = array<i32>} : memref<256x160xf32, #tpu.memory_space<vmem>>, vector<256x160xf32>,
    return
  }
  func.func @transform_0(%arg0: i32) -> (i32, i32) {
    %c0_i32 = arith.constant 0 : i32
    %c0_i32_0 = arith.constant 0 : i32
    return %arg0, %c0_i32 : i32, i32
  }
  func.func @transform_1(%arg0: i32) -> (i32, i32) {
    %c0_i32 = arith.constant 0 : i32
    %c0_i32_0 = arith.constant 0 : i32
    %c0_i32_1 = arith.constant 0 : i32
    return %c0_i32, %c0_i32_0 : i32, i32
  }
  func.func @transform_2(%arg0: i32) -> (i32, i32) {
    %c0_i32 = arith.constant 0 : i32
    %c0_i32_0 = arith.constant 0 : i32
    %c0_i32_1 = arith.constant 0 : i32
    return %c0_i32, %c0_i32_0 : i32, i32
  }
  func.func @transform_3(%arg0: i32) -> (i32, i32) {
    %c0_i32 = arith.constant 0 : i32
    %c0_i32_0 = arith.constant 0 : i32
    %c0_i32_1 = arith.constant 0 : i32
    return %c0_i32, %c0_i32_0 : i32, i32
  }
  func.func @transform_4(%arg0: i32) -> (i32, i32) {
    %c0_i32 = arith.constant 0 : i32
    %c0_i32_0 = arith.constant 0 : i32
    return %arg0, %c0_i32 : i32, i32
  }
}

module attributes {stable_mosaic.version = 11 : i64} {
  func.func @_matmul_bn_kernel(%arg0: i32, %arg1: memref<256x672xf32, #tpu.memory_space<vmem>>, %arg2: memref<672x96xf32, #tpu.memory_space<vmem>>, %arg3: memref<1x96xf32, #tpu.memory_space<vmem>>, %arg4: memref<1x96xf32, #tpu.memory_space<vmem>>, %arg5: memref<256x96xf32, #tpu.memory_space<vmem>>) attributes {dimension_semantics = [#tpu.dimension_semantics<parallel>], iteration_bounds = array<i64: 2>, scalar_prefetch = 0 : i64, scratch_operands = 0 : i64, tpu.core_type = #tpu.core_type<tc>, window_params = [{transform_indices = @transform_0, window_bounds = array<i64: 256, 672>}, {pipeline_mode = #tpu.pipeline_mode<synchronous>, transform_indices = @transform_1, window_bounds = array<i64: 672, 96>}, {pipeline_mode = #tpu.pipeline_mode<synchronous>, transform_indices = @transform_2, window_bounds = array<i64: 1, 96>}, {pipeline_mode = #tpu.pipeline_mode<synchronous>, transform_indices = @transform_3, window_bounds = array<i64: 1, 96>}, {transform_indices = @transform_4, window_bounds = array<i64: 256, 96>}]} {
    %c0 = arith.constant 0 : index
    %c0_0 = arith.constant 0 : index
    %0 = vector.load %arg1[%c0, %c0_0] : memref<256x672xf32, #tpu.memory_space<vmem>>, vector<256x672xf32>
    %c0_1 = arith.constant 0 : index
    %c0_2 = arith.constant 0 : index
    %1 = vector.load %arg2[%c0_1, %c0_2] : memref<672x96xf32, #tpu.memory_space<vmem>>, vector<672x96xf32>
    %cst = arith.constant dense<0.000000e+00> : vector<256x96xf32>
    %2 = tpu.matmul %0, %1, %cst {dimension_numbers = #tpu.dot_dimension_numbers<[1], [0], [0], [1], [0, 0, 1, 1], [], []>} : vector<256x672xf32>, vector<672x96xf32>, vector<256x96xf32> -> vector<256x96xf32>
    %c0_3 = arith.constant 0 : index
    %c0_4 = arith.constant 0 : index
    %3 = vector.load %arg3[%c0_3, %c0_4] : memref<1x96xf32, #tpu.memory_space<vmem>>, vector<1x96xf32>
    %4 = vector.broadcast %3 : vector<1x96xf32> to vector<256x96xf32>
    %5 = arith.mulf %2, %4 : vector<256x96xf32>
    %c0_5 = arith.constant 0 : index
    %c0_6 = arith.constant 0 : index
    %6 = vector.load %arg4[%c0_5, %c0_6] : memref<1x96xf32, #tpu.memory_space<vmem>>, vector<1x96xf32>
    %7 = vector.broadcast %6 : vector<1x96xf32> to vector<256x96xf32>
    %8 = arith.addf %5, %7 : vector<256x96xf32>
    %c0_7 = arith.constant 0 : index
    %c0_8 = arith.constant 0 : index
    %9 = vector.load %arg5[%c0_7, %c0_8] : memref<256x96xf32, #tpu.memory_space<vmem>>, vector<256x96xf32>
    tpu.vector_store %arg5[%c0_7, %c0_8], %8 {strides = array<i32>} : memref<256x96xf32, #tpu.memory_space<vmem>>, vector<256x96xf32>,
    return
  }
  func.func @transform_0(%arg0: i32) -> (i32, i32) {
    %c0_i32 = arith.constant 0 : i32
    %c0_i32_0 = arith.constant 0 : i32
    return %arg0, %c0_i32 : i32, i32
  }
  func.func @transform_1(%arg0: i32) -> (i32, i32) {
    %c0_i32 = arith.constant 0 : i32
    %c0_i32_0 = arith.constant 0 : i32
    %c0_i32_1 = arith.constant 0 : i32
    return %c0_i32, %c0_i32_0 : i32, i32
  }
  func.func @transform_2(%arg0: i32) -> (i32, i32) {
    %c0_i32 = arith.constant 0 : i32
    %c0_i32_0 = arith.constant 0 : i32
    %c0_i32_1 = arith.constant 0 : i32
    return %c0_i32, %c0_i32_0 : i32, i32
  }
  func.func @transform_3(%arg0: i32) -> (i32, i32) {
    %c0_i32 = arith.constant 0 : i32
    %c0_i32_0 = arith.constant 0 : i32
    %c0_i32_1 = arith.constant 0 : i32
    return %c0_i32, %c0_i32_0 : i32, i32
  }
  func.func @transform_4(%arg0: i32) -> (i32, i32) {
    %c0_i32 = arith.constant 0 : i32
    %c0_i32_0 = arith.constant 0 : i32
    return %arg0, %c0_i32 : i32, i32
  }
}

module attributes {stable_mosaic.version = 11 : i64} {
  func.func @_branch_final_kernel(%arg0: i32, %arg1: memref<256x32xf32, #tpu.memory_space<vmem>>, %arg2: memref<256x288xf32, #tpu.memory_space<vmem>>, %arg3: memref<256x288xf32, #tpu.memory_space<vmem>>, %arg4: memref<256x288xf32, #tpu.memory_space<vmem>>, %arg5: memref<3x288x32xf32, #tpu.memory_space<vmem>>, %arg6: memref<1x96xf32, #tpu.memory_space<vmem>>, %arg7: memref<1x96xf32, #tpu.memory_space<vmem>>, %arg8: memref<256x128xf32, #tpu.memory_space<vmem>>) attributes {dimension_semantics = [#tpu.dimension_semantics<parallel>], iteration_bounds = array<i64: 2>, scalar_prefetch = 0 : i64, scratch_operands = 0 : i64, tpu.core_type = #tpu.core_type<tc>, window_params = [{transform_indices = @transform_0, window_bounds = array<i64: 256, 32>}, {transform_indices = @transform_1, window_bounds = array<i64: 256, 288>}, {transform_indices = @transform_2, window_bounds = array<i64: 256, 288>}, {transform_indices = @transform_3, window_bounds = array<i64: 256, 288>}, {pipeline_mode = #tpu.pipeline_mode<synchronous>, transform_indices = @transform_4, window_bounds = array<i64: 3, 288, 32>}, {pipeline_mode = #tpu.pipeline_mode<synchronous>, transform_indices = @transform_5, window_bounds = array<i64: 1, 96>}, {pipeline_mode = #tpu.pipeline_mode<synchronous>, transform_indices = @transform_6, window_bounds = array<i64: 1, 96>}, {transform_indices = @transform_7, window_bounds = array<i64: 256, 128>}]} {
    %c0 = arith.constant 0 : index
    %c0_0 = arith.constant 0 : index
    %0 = vector.load %arg1[%c0, %c0_0] : memref<256x32xf32, #tpu.memory_space<vmem>>, vector<256x32xf32>
    %c0_1 = arith.constant 0 : index
    %c0_2 = arith.constant 0 : index
    %1 = vector.load %arg8[%c0_1, %c0_2] : memref<256x128xf32, #tpu.memory_space<vmem>>, vector<256x32xf32>
    tpu.vector_store %arg8[%c0_1, %c0_2], %0 {strides = array<i32>} : memref<256x128xf32, #tpu.memory_space<vmem>>, vector<256x32xf32>,
    %c0_3 = arith.constant 0 : index
    %c0_4 = arith.constant 0 : index
    %2 = vector.load %arg2[%c0_3, %c0_4] : memref<256x288xf32, #tpu.memory_space<vmem>>, vector<256x288xf32>
    %c0_5 = arith.constant 0 : index
    %c0_6 = arith.constant 0 : index
    %c0_7 = arith.constant 0 : index
    %3 = vector.load %arg5[%c0_5, %c0_6, %c0_7] : memref<3x288x32xf32, #tpu.memory_space<vmem>>, vector<1x288x32xf32>
    %4 = vector.shape_cast %3 : vector<1x288x32xf32> to vector<288x32xf32>
    %cst = arith.constant dense<0.000000e+00> : vector<256x32xf32>
    %5 = tpu.matmul %2, %4, %cst {dimension_numbers = #tpu.dot_dimension_numbers<[1], [0], [0], [1], [0, 0, 1, 1], [], []>} : vector<256x288xf32>, vector<288x32xf32>, vector<256x32xf32> -> vector<256x32xf32>
    %c0_8 = arith.constant 0 : index
    %c0_9 = arith.constant 0 : index
    %6 = vector.load %arg6[%c0_8, %c0_9] : memref<1x96xf32, #tpu.memory_space<vmem>>, vector<1x32xf32>
    %7 = vector.broadcast %6 : vector<1x32xf32> to vector<256x32xf32>
    %8 = arith.mulf %5, %7 : vector<256x32xf32>
    %c0_10 = arith.constant 0 : index
    %c0_11 = arith.constant 0 : index
    %9 = vector.load %arg7[%c0_10, %c0_11] : memref<1x96xf32, #tpu.memory_space<vmem>>, vector<1x32xf32>
    %10 = vector.broadcast %9 : vector<1x32xf32> to vector<256x32xf32>
    %11 = arith.addf %8, %10 : vector<256x32xf32>
    %c0_12 = arith.constant 0 : index
    %c32 = arith.constant 32 : index
    %12 = vector.load %arg8[%c0_12, %c32] : memref<256x128xf32, #tpu.memory_space<vmem>>, vector<256x32xf32>
    tpu.vector_store %arg8[%c0_12, %c32], %11 {strides = array<i32>} : memref<256x128xf32, #tpu.memory_space<vmem>>, vector<256x32xf32>,
    %c0_13 = arith.constant 0 : index
    %c0_14 = arith.constant 0 : index
    %13 = vector.load %arg3[%c0_13, %c0_14] : memref<256x288xf32, #tpu.memory_space<vmem>>, vector<256x288xf32>
    %c1 = arith.constant 1 : index
    %c0_15 = arith.constant 0 : index
    %c0_16 = arith.constant 0 : index
    %14 = vector.load %arg5[%c1, %c0_15, %c0_16] : memref<3x288x32xf32, #tpu.memory_space<vmem>>, vector<1x288x32xf32>
    %15 = vector.shape_cast %14 : vector<1x288x32xf32> to vector<288x32xf32>
    %cst_17 = arith.constant dense<0.000000e+00> : vector<256x32xf32>
    %16 = tpu.matmul %13, %15, %cst_17 {dimension_numbers = #tpu.dot_dimension_numbers<[1], [0], [0], [1], [0, 0, 1, 1], [], []>} : vector<256x288xf32>, vector<288x32xf32>, vector<256x32xf32> -> vector<256x32xf32>
    %c0_18 = arith.constant 0 : index
    %c32_19 = arith.constant 32 : index
    %17 = vector.load %arg6[%c0_18, %c32_19] : memref<1x96xf32, #tpu.memory_space<vmem>>, vector<1x32xf32>
    %18 = vector.broadcast %17 : vector<1x32xf32> to vector<256x32xf32>
    %19 = arith.mulf %16, %18 : vector<256x32xf32>
    %c0_20 = arith.constant 0 : index
    %c32_21 = arith.constant 32 : index
    %20 = vector.load %arg7[%c0_20, %c32_21] : memref<1x96xf32, #tpu.memory_space<vmem>>, vector<1x32xf32>
    %21 = vector.broadcast %20 : vector<1x32xf32> to vector<256x32xf32>
    %22 = arith.addf %19, %21 : vector<256x32xf32>
    %c0_22 = arith.constant 0 : index
    %c64 = arith.constant 64 : index
    %23 = vector.load %arg8[%c0_22, %c64] : memref<256x128xf32, #tpu.memory_space<vmem>>, vector<256x32xf32>
    tpu.vector_store %arg8[%c0_22, %c64], %22 {strides = array<i32>} : memref<256x128xf32, #tpu.memory_space<vmem>>, vector<256x32xf32>,
    %c0_23 = arith.constant 0 : index
    %c0_24 = arith.constant 0 : index
    %24 = vector.load %arg4[%c0_23, %c0_24] : memref<256x288xf32, #tpu.memory_space<vmem>>, vector<256x288xf32>
    %c2 = arith.constant 2 : index
    %c0_25 = arith.constant 0 : index
    %c0_26 = arith.constant 0 : index
    %25 = vector.load %arg5[%c2, %c0_25, %c0_26] : memref<3x288x32xf32, #tpu.memory_space<vmem>>, vector<1x288x32xf32>
    %26 = vector.shape_cast %25 : vector<1x288x32xf32> to vector<288x32xf32>
    %cst_27 = arith.constant dense<0.000000e+00> : vector<256x32xf32>
    %27 = tpu.matmul %24, %26, %cst_27 {dimension_numbers = #tpu.dot_dimension_numbers<[1], [0], [0], [1], [0, 0, 1, 1], [], []>} : vector<256x288xf32>, vector<288x32xf32>, vector<256x32xf32> -> vector<256x32xf32>
    %c0_28 = arith.constant 0 : index
    %c64_29 = arith.constant 64 : index
    %28 = vector.load %arg6[%c0_28, %c64_29] : memref<1x96xf32, #tpu.memory_space<vmem>>, vector<1x32xf32>
    %29 = vector.broadcast %28 : vector<1x32xf32> to vector<256x32xf32>
    %30 = arith.mulf %27, %29 : vector<256x32xf32>
    %c0_30 = arith.constant 0 : index
    %c64_31 = arith.constant 64 : index
    %31 = vector.load %arg7[%c0_30, %c64_31] : memref<1x96xf32, #tpu.memory_space<vmem>>, vector<1x32xf32>
    %32 = vector.broadcast %31 : vector<1x32xf32> to vector<256x32xf32>
    %33 = arith.addf %30, %32 : vector<256x32xf32>
    %c0_32 = arith.constant 0 : index
    %c96 = arith.constant 96 : index
    %34 = vector.load %arg8[%c0_32, %c96] : memref<256x128xf32, #tpu.memory_space<vmem>>, vector<256x32xf32>
    tpu.vector_store %arg8[%c0_32, %c96], %33 {strides = array<i32>} : memref<256x128xf32, #tpu.memory_space<vmem>>, vector<256x32xf32>,
    return
  }
  func.func @transform_0(%arg0: i32) -> (i32, i32) {
    %c0_i32 = arith.constant 0 : i32
    %c0_i32_0 = arith.constant 0 : i32
    return %arg0, %c0_i32 : i32, i32
  }
  func.func @transform_1(%arg0: i32) -> (i32, i32) {
    %c0_i32 = arith.constant 0 : i32
    %c0_i32_0 = arith.constant 0 : i32
    return %arg0, %c0_i32 : i32, i32
  }
  func.func @transform_2(%arg0: i32) -> (i32, i32) {
    %c0_i32 = arith.constant 0 : i32
    %c0_i32_0 = arith.constant 0 : i32
    return %arg0, %c0_i32 : i32, i32
  }
  func.func @transform_3(%arg0: i32) -> (i32, i32) {
    %c0_i32 = arith.constant 0 : i32
    %c0_i32_0 = arith.constant 0 : i32
    return %arg0, %c0_i32 : i32, i32
  }
  func.func @transform_4(%arg0: i32) -> (i32, i32, i32) {
    %c0_i32 = arith.constant 0 : i32
    %c0_i32_0 = arith.constant 0 : i32
    %c0_i32_1 = arith.constant 0 : i32
    %c0_i32_2 = arith.constant 0 : i32
    return %c0_i32, %c0_i32_0, %c0_i32_1 : i32, i32, i32
  }
  func.func @transform_5(%arg0: i32) -> (i32, i32) {
    %c0_i32 = arith.constant 0 : i32
    %c0_i32_0 = arith.constant 0 : i32
    %c0_i32_1 = arith.constant 0 : i32
    return %c0_i32, %c0_i32_0 : i32, i32
  }
  func.func @transform_6(%arg0: i32) -> (i32, i32) {
    %c0_i32 = arith.constant 0 : i32
    %c0_i32_0 = arith.constant 0 : i32
    %c0_i32_1 = arith.constant 0 : i32
    return %c0_i32, %c0_i32_0 : i32, i32
  }
  func.func @transform_7(%arg0: i32) -> (i32, i32) {
    %c0_i32 = arith.constant 0 : i32
    %c0_i32_0 = arith.constant 0 : i32
    return %arg0, %c0_i32 : i32, i32
  }
}

module attributes {stable_mosaic.version = 11 : i64} {
  func.func @_matmul_bn_res_relu_kernel(%arg0: i32, %arg1: memref<256x1152xf32, #tpu.memory_space<vmem>>, %arg2: memref<1152x32xf32, #tpu.memory_space<vmem>>, %arg3: memref<1x32xf32, #tpu.memory_space<vmem>>, %arg4: memref<1x32xf32, #tpu.memory_space<vmem>>, %arg5: memref<256x32xf32, #tpu.memory_space<vmem>>, %arg6: memref<256x32xf32, #tpu.memory_space<vmem>>) attributes {dimension_semantics = [#tpu.dimension_semantics<parallel>], iteration_bounds = array<i64: 2>, scalar_prefetch = 0 : i64, scratch_operands = 0 : i64, tpu.core_type = #tpu.core_type<tc>, window_params = [{transform_indices = @transform_0, window_bounds = array<i64: 256, 1152>}, {pipeline_mode = #tpu.pipeline_mode<synchronous>, transform_indices = @transform_1, window_bounds = array<i64: 1152, 32>}, {pipeline_mode = #tpu.pipeline_mode<synchronous>, transform_indices = @transform_2, window_bounds = array<i64: 1, 32>}, {pipeline_mode = #tpu.pipeline_mode<synchronous>, transform_indices = @transform_3, window_bounds = array<i64: 1, 32>}, {transform_indices = @transform_4, window_bounds = array<i64: 256, 32>}, {transform_indices = @transform_5, window_bounds = array<i64: 256, 32>}]} {
    %c0 = arith.constant 0 : index
    %c0_0 = arith.constant 0 : index
    %0 = vector.load %arg1[%c0, %c0_0] : memref<256x1152xf32, #tpu.memory_space<vmem>>, vector<256x1152xf32>
    %c0_1 = arith.constant 0 : index
    %c0_2 = arith.constant 0 : index
    %1 = vector.load %arg2[%c0_1, %c0_2] : memref<1152x32xf32, #tpu.memory_space<vmem>>, vector<1152x32xf32>
    %cst = arith.constant dense<0.000000e+00> : vector<256x32xf32>
    %2 = tpu.matmul %0, %1, %cst {dimension_numbers = #tpu.dot_dimension_numbers<[1], [0], [0], [1], [0, 0, 1, 1], [], []>} : vector<256x1152xf32>, vector<1152x32xf32>, vector<256x32xf32> -> vector<256x32xf32>
    %c0_3 = arith.constant 0 : index
    %c0_4 = arith.constant 0 : index
    %3 = vector.load %arg3[%c0_3, %c0_4] : memref<1x32xf32, #tpu.memory_space<vmem>>, vector<1x32xf32>
    %4 = vector.broadcast %3 : vector<1x32xf32> to vector<256x32xf32>
    %5 = arith.mulf %2, %4 : vector<256x32xf32>
    %c0_5 = arith.constant 0 : index
    %c0_6 = arith.constant 0 : index
    %6 = vector.load %arg4[%c0_5, %c0_6] : memref<1x32xf32, #tpu.memory_space<vmem>>, vector<1x32xf32>
    %7 = vector.broadcast %6 : vector<1x32xf32> to vector<256x32xf32>
    %8 = arith.addf %5, %7 : vector<256x32xf32>
    %c0_7 = arith.constant 0 : index
    %c0_8 = arith.constant 0 : index
    %9 = vector.load %arg5[%c0_7, %c0_8] : memref<256x32xf32, #tpu.memory_space<vmem>>, vector<256x32xf32>
    %10 = arith.addf %8, %9 : vector<256x32xf32>
    %cst_9 = arith.constant 0.000000e+00 : f32
    %11 = vector.broadcast %cst_9 : f32 to vector<256x32xf32>
    %12 = arith.maximumf %10, %11 : vector<256x32xf32>
    %c0_10 = arith.constant 0 : index
    %c0_11 = arith.constant 0 : index
    %13 = vector.load %arg6[%c0_10, %c0_11] : memref<256x32xf32, #tpu.memory_space<vmem>>, vector<256x32xf32>
    tpu.vector_store %arg6[%c0_10, %c0_11], %12 {strides = array<i32>} : memref<256x32xf32, #tpu.memory_space<vmem>>, vector<256x32xf32>,
    return
  }
  func.func @transform_0(%arg0: i32) -> (i32, i32) {
    %c0_i32 = arith.constant 0 : i32
    %c0_i32_0 = arith.constant 0 : i32
    return %arg0, %c0_i32 : i32, i32
  }
  func.func @transform_1(%arg0: i32) -> (i32, i32) {
    %c0_i32 = arith.constant 0 : i32
    %c0_i32_0 = arith.constant 0 : i32
    %c0_i32_1 = arith.constant 0 : i32
    return %c0_i32, %c0_i32_0 : i32, i32
  }
  func.func @transform_2(%arg0: i32) -> (i32, i32) {
    %c0_i32 = arith.constant 0 : i32
    %c0_i32_0 = arith.constant 0 : i32
    %c0_i32_1 = arith.constant 0 : i32
    return %c0_i32, %c0_i32_0 : i32, i32
  }
  func.func @transform_3(%arg0: i32) -> (i32, i32) {
    %c0_i32 = arith.constant 0 : i32
    %c0_i32_0 = arith.constant 0 : i32
    %c0_i32_1 = arith.constant 0 : i32
    return %c0_i32, %c0_i32_0 : i32, i32
  }
  func.func @transform_4(%arg0: i32) -> (i32, i32) {
    %c0_i32 = arith.constant 0 : i32
    %c0_i32_0 = arith.constant 0 : i32
    return %arg0, %c0_i32 : i32, i32
  }
  func.func @transform_5(%arg0: i32) -> (i32, i32) {
    %c0_i32 = arith.constant 0 : i32
    %c0_i32_0 = arith.constant 0 : i32
    return %arg0, %c0_i32 : i32, i32
  }
}

</mosaic_0001>

<bundles_post_ra>
// kernel: rfb_m_forward.5
= control target key start
LH: loop header
LB: loop body
LE: loop exit
PB: predicated region body
PF: predicated region fallthrough
CT: control target
= control target key end

     0   :  { %9 = vsyncpa [#allocation3], 0  ;;  %s1567_s0 = inlined_call_operand.hbm [shape: f32[512,32], index: 0, kind: input, shape index: {}]   ;;  %s1568_s1 = inlined_call_operand.vmem [shape: f32[32,160], index: 1, kind: input, shape index: {}]   ;;  %s1569_s2 = inlined_call_operand.vmem [shape: f32[1,160], index: 2, kind: input, shape index: {}]   ;;  %s1570_s3 = inlined_call_operand.vmem [shape: f32[1,160], index: 3, kind: input, shape index: {}]   ;;  %s1571_s4 = inlined_call_operand.vmem [shape: f32[512,160], index: 4, kind: output, shape index: {}]  }
   0x1   :  { %11 = vsyncpa [#allocation3 + $0x1], 0  ;;  %s1098_s15 = smov 0   ;;  %s1100_s16 = smov 0  }
   0x2   :  { %s1102_s17 = smov 0   ;;  %s1104_s18 = smov 0  }
   0x3 LB: > { %s901_s19 = sadd.s32 4294967295, %s1067_s18   ;;  %s1118_s20 = sadd.s32 1, %s1067_s18   ;;  %s1067_s18 = sphi %s1104_s18, %s1578_s18   ;;  %s1063_s17 = sphi %s1102_s17, %s1577_s17   ;;  %s1059_s16 = sphi %s1100_s16, %s1576_s16   ;;  %s1055_s15 = sphi %s1098_s15, %s1575_s15  }
   0x4   : > { %s21_s21 = ssub.s32 %s1067_s18, %s1118_s20  ;;  %s24_s22 = sadd.s32 1, %s1063_s17 }
   0x5   : > { %p22_p0 = scmp.eq.s32.totalorder %s21_s21, 0  ;;  %p31_p1 = scmp.ne.s32.totalorder %s1063_s17, %s1059_s16 }
   0x6   : > { %p32_p2 = scmp.eq.s32.totalorder %s1067_s18, 0  ;;  %p37_p3 = scmp.ne.s32.totalorder %s1059_s16, %s1055_s15 }
   0x7   : > { %s1128_s23 = scalar_select %p22_p0, %s1063_s17, %s24_s22  }
   0x8   : > { %p33_p4 = por %p32_p2, %p31_p1  ;;  %p38_p5 = scmp.eq.s32.totalorder %s901_s19, 0 }
   0x9   : > { %p967_p6 = scmp.lt.s32.totalorder %s1067_s18, 2  ;;  %s159_s25 = sand.u32 1, %s1063_s17  }
   0xa   : > { %p1133_p7 = por %p38_p5, %p37_p3  ;;  %s905_s26 = sshll.u32 %s159_s25, 8 }
   0xb   : > { %s947_s27 = sshll.u32 %s1067_s18, 12  ;;  %s163_s5 = scalar_lea.vmem [#allocation2], %s905_s26 }
   0xc   : > { %s1142_s30 = scalar_lea.hbm %s1567_s0, %s947_s27  ;;  %s170_s6 = sshll.u32 %s163_s5, 4  ;;  %s1144_s6 = int_to_ptr.vmem [resolvable:$true] %s170_s6 }
   0xd   : > { %p1146_p8 = pnand %p967_p6, %p33_p4  ;;  %s1151_s8 = scalar_lea.sflag [#allocation3], %s159_s25 }
   0xe   : > { %s1003_s9 = scalar_lea.hbm %s1142_s30, 4096  ;;  %s1008_s12 = scalar_lea.hbm %s1567_s0, 8192 }
   0xf   : > { %p1004_p10 = scmp.ne.s32.totalorder %s1142_s30, %s1003_s9  ;;  %p1005_p11 = pneg %p1146_p8 }
  0x10   : > { %p1009_p0 = scmp.lt.u32.totalorder %s1142_s30, %s1567_s0  ;;  %p1010_p1 = scmp.lt.u32.totalorder %s1008_s12, %s1003_s9 }
  0x11   : > { %p1006_p12 = pnand %p1005_p11, %p1004_p10  ;;  %p1012_p3 = scmp.lt.u32.totalorder %s1003_s9, %s1142_s30 }
  0x12   : > { %p1011_p2 = por %p1010_p1, %p1009_p0 }
  0x13   : > { %p1007_p13 = pneg %p1006_p12 }
  0x14   : > { %p1013_p4 = por %p1012_p3, %p1011_p2 }
  0x16   : > { %p1014_p5 = pnand %p1013_p4, %p1007_p13 }
  0x18   : > { %1017 = shalt.err (!%p1014_p5)
}
  0x19   : > { %s1018_s15 = scalar_lea.vmem %s1144_s6, 4096  ;;  %s1069_s21 = smov [#allocation2]  }
  0x1a   : > { %p1019_p6 = scmp.ne.s32.totalorder %s1144_s6, %s1018_s15  ;;  %s1023_s22 = sshll.u32 %s1069_s21, 4  ;;  %s1024_s22 = int_to_ptr.vmem [resolvable:$false] %s1023_s22 }
  0x1b   : > { %s1025_s25 = scalar_lea.vmem %s1024_s22, 8192  ;;  %p1026_p9 = scmp.lt.s32.totalorder %s1144_s6, %s1024_s22 }
  0x1c   : > { %p1021_p10 = pnand %p1019_p6, %p1005_p11  ;;  %p1027_p0 = scmp.lt.s32.totalorder %s1025_s25, %s1018_s15 }
  0x1e   : > { %p1022_p12 = pneg %p1021_p10  ;;  %p1028_p1 = por %p1027_p0, %p1026_p9 }
  0x20   : > { %p1029_p2 = pnand %p1028_p1, %p1022_p12 }
  0x22   : > { %1032 = shalt.err (!%p1029_p2)
}
  0x23   : > { %s1070_s26 = smov 128   ;;  %s1071_s27 = smov 8  }
  0x24   : > { %966 = dma.hbm_to_vmem [thread:$0]  (!%p1146_p8), %s1142_s30, 4096, %s1144_s6, %s1151_s8, %s1070_s26, %s1070_s26, %s1071_s27  }
  0x25   : > { %p178_p11 = scmp.lt.s32.totalorder %s1067_s18, 3  ;;  %p1574_p13 = scmp.ge.s32.totalorder %s1067_s18, 1 }
  0x27   : > { %p179_p3 = pnand %p1574_p13, %p178_p11 }
  0x28   : > { %s184_s28 = sand.u32 (!%p179_p3), 1, %s1059_s16  }
  0x29   : > { %182 = sbr.rel (%p179_p3) target bundleno = 338 (0x152), region = 36  ;;  %s909_s29 = sshll.u32 (!%p179_p3), %s184_s28, 8 }
  0x2a   : > { %s185_s5 = scalar_lea.sflag (!%p179_p3), [#allocation3], %s184_s28  ;;  %s1183_s9 = scalar_lea.vmem (!%p179_p3), [#allocation2], %s909_s29 }
  0x30   : > { %1050 = dma.done.wait (%p1133_p7), %s185_s5, 4096  }
  0x31   : > { %1052 = vsyncadd (%p1133_p7), %s185_s5, 4294963200  ;;  %v1072_v0 = vmov 0.0   ;;  %v255_v1 = vld [vmem:[%s1568_s1 + $0x8] sm:$0xff]  ;;  %v257_v2 = vld [vmem:[%s1568_s1 + $0x18] sm:$0xff]  ;;  %vm262_vm0 = vcmask 261120   ;;  %v618_v45 = vlaneseq  ;;  %s910_s28 = sshll.u32 %s901_s19, 5 }
  0x32   : > { %423 = vmatprep.mubr.f32.mxu0 %v1072_v0  ;;  %519 = vmatprep.mubr.f32.mxu1 %v1072_v0  ;;  %v254_v3 = vld [vmem:[%s1568_s1] sm:$0xff]  ;;  %v949_v4 = vpack.c.bf16 %v257_v2, %v255_v1  ;;  %v256_v5 = vld [vmem:[%s1568_s1 + $0x10] sm:$0xff]  ;;  %v259_v6 = vld [vmem:[%s1568_s1 + $0x28] sm:$0xff]  ;;  %p216_p7 = scmp.lt.s32.totalorder %s910_s28, 63 }
  0x33   : > { %v261_v7 = vld [vmem:[%s1568_s1 + $0x38] sm:$0xff]  ;;  %v951_v8 = vpack.c.bf16 %v256_v5, %v254_v3  ;;  %v258_v10 = vld [vmem:[%s1568_s1 + $0x20] sm:$0xff]  ;;  %v260_v11 = vld [vmem:[%s1568_s1 + $0x30] sm:$0xff]  ;;  %v619_v46 = vshrl.u32 %v618_v45, 7 }
  0x34   : > { %v953_v9 = vpack.c.bf16 %v261_v7, %v259_v6  ;;  %950 = vmatprep.subr.bf16.mxu0 %v949_v4  ;;  %957 = vmatprep.subr.bf16.mxu1 %v949_v4  ;;  %v955_v12 = vpack.c.bf16 %v260_v11, %v258_v10  ;;  %v222_v13 = vld [vmem:[%s1183_s9] sm:$0xff]  ;;  %v223_v15 = vld [vmem:[%s1183_s9 + $0x8] sm:$0xff]  ;;  %v224_v17 = vld [vmem:[%s1183_s9 + $0x10] sm:$0xff]  ;;  %s1580_s28 = smov (!%p216_p7, %s910_s28), 63 }
  0x35   : > { %952 = vmatpush1.bf16.msra.mxu0 %v951_v8  ;;  %959 = vmatpush1.bf16.msra.mxu1 %v951_v8  ;;  %v238_v14 = vld [vmem:[%s1183_s9 + $0x80] sm:$0xff]  ;;  %v239_v16 = vld [vmem:[%s1183_s9 + $0x88] sm:$0xff]  ;;  %v240_v18 = vld [vmem:[%s1183_s9 + $0x90] sm:$0xff]  ;;  %v620_v47 = vsub.s32 0, %v619_v46  ;;  %v624_v49 = vsub.s32 1, %v619_v46 }
  0x36   : > { %954 = vmatprep.subr.bf16.mxu0 %v953_v9  ;;  %958 = vmatprep.subr.bf16.mxu1 %v953_v9  ;;  %v225_v19 = vld [vmem:[%s1183_s9 + $0x18] sm:$0xff]  ;;  %v226_v21 = vld [vmem:[%s1183_s9 + $0x20] sm:$0xff]  ;;  %v227_v23 = vld [vmem:[%s1183_s9 + $0x28] sm:$0xff] }
  0x37   : > { %v241_v20 = vld [vmem:[%s1183_s9 + $0x98] sm:$0xff]  ;;  %v242_v22 = vld [vmem:[%s1183_s9 + $0xa0] sm:$0xff]  ;;  %v243_v24 = vld [vmem:[%s1183_s9 + $0xa8] sm:$0xff] }
  0x38   : > { %v228_v25 = vld [vmem:[%s1183_s9 + $0x30] sm:$0xff]  ;;  %v229_v27 = vld [vmem:[%s1183_s9 + $0x38] sm:$0xff]  ;;  %v230_v29 = vld [vmem:[%s1183_s9 + $0x40] sm:$0xff] }
  0x39   : > { %956 = vmatpush1.bf16.msra.mxu0 %v955_v12  ;;  %960 = vmatpush1.bf16.msra.mxu1 %v955_v12  ;;  %v244_v26 = vld [vmem:[%s1183_s9 + $0xb0] sm:$0xff]  ;;  %v245_v28 = vld [vmem:[%s1183_s9 + $0xb8] sm:$0xff]  ;;  %v246_v30 = vld [vmem:[%s1183_s9 + $0xc0] sm:$0xff] }
  0x3a   : > { %v231_v31 = vld [vmem:[%s1183_s9 + $0x48] sm:$0xff]  ;;  %v232_v33 = vld [vmem:[%s1183_s9 + $0x50] sm:$0xff]  ;;  %v233_v35 = vld [vmem:[%s1183_s9 + $0x58] sm:$0xff] }
  0x3b   : > { %v247_v32 = vld [vmem:[%s1183_s9 + $0xc8] sm:$0xff]  ;;  %v248_v34 = vld [vmem:[%s1183_s9 + $0xd0] sm:$0xff]  ;;  %v249_v36 = vld [vmem:[%s1183_s9 + $0xd8] sm:$0xff] }
  0x3c   : > { %913 = vmatmul.mubr.msk.f32.vlgmr.msra.gmra.mrb[0].mxu0 %vm262_vm0, %v222_v13  ;;  %929 = vmatmul.mubr.msk.f32.vlgmr.msra.gmra.mrb[0].mxu1 %vm262_vm0, %v238_v14  ;;  %v234_v37 = vld [vmem:[%s1183_s9 + $0x60] sm:$0xff]  ;;  %v235_v39 = vld [vmem:[%s1183_s9 + $0x68] sm:$0xff]  ;;  %v236_v41 = vld [vmem:[%s1183_s9 + $0x70] sm:$0xff] }
  0x3d   : > { %429 = vmatprep.mubr.f32.mxu0 %v1072_v0  ;;  %525 = vmatprep.mubr.f32.mxu1 %v1072_v0  ;;  %v250_v38 = vld [vmem:[%s1183_s9 + $0xe0] sm:$0xff]  ;;  %v251_v40 = vld [vmem:[%s1183_s9 + $0xe8] sm:$0xff]  ;;  %v252_v42 = vld [vmem:[%s1183_s9 + $0xf0] sm:$0xff] }
  0x3e   : > { %v237_v43 = vld [vmem:[%s1183_s9 + $0x78] sm:$0xff]  ;;  %v616_v48 = vld [vmem:[%s1569_s2] sm:$0x3] }
  0x3f   : > { %v253_v44 = vld [vmem:[%s1183_s9 + $0xf8] sm:$0xff]  ;;  %v692_v50 = vld [vmem:[%s1570_s3] sm:$0x3]  ;;  %v1317_v51 = vrot.slane %v616_v48, %v620_v47  ;;  %v1319_v52 = vrot.slane %v616_v48, %v624_v49  ;;  %s948_s9 = sshll.u32 %s1580_s28, 4 }
  0x40   : > { %914 = vmatmul.mubr.msk.f32.gmra.mrb[2].mxu0 %vm262_vm0, %v223_v15  ;;  %930 = vmatmul.mubr.msk.f32.gmra.mrb[2].mxu1 %vm262_vm0, %v239_v16  ;;  %v1321_v53 = vrot.slane %v692_v50, %v620_v47  ;;  %v1323_v56 = vrot.slane %v692_v50, %v624_v49  ;;  %s1330_s7 = scalar_lea.vmem %s1571_s4, %s948_s9 }
  0x41   : > { %435 = vmatprep.mubr.f32.mxu0 %v1072_v0  ;;  %531 = vmatprep.mubr.f32.mxu1 %v1072_v0 }
  0x44   : > { %915 = vmatmul.mubr.msk.f32.gmra.mrb[4].mxu0 %vm262_vm0, %v224_v17  ;;  %931 = vmatmul.mubr.msk.f32.gmra.mrb[4].mxu1 %vm262_vm0, %v240_v18 }
  0x45   : > { %441 = vmatprep.mubr.f32.mxu0 %v1072_v0  ;;  %537 = vmatprep.mubr.f32.mxu1 %v1072_v0 }
  0x48   : > { %916 = vmatmul.mubr.msk.f32.gmra.mrb[6].mxu0 %vm262_vm0, %v225_v19  ;;  %932 = vmatmul.mubr.msk.f32.gmra.mrb[6].mxu1 %vm262_vm0, %v241_v20 }
  0x49   : > { %447 = vmatprep.mubr.f32.mxu0 %v1072_v0  ;;  %543 = vmatprep.mubr.f32.mxu1 %v1072_v0 }
  0x4c   : > { %917 = vmatmul.mubr.msk.f32.gmra.mrb[8].mxu0 %vm262_vm0, %v226_v21  ;;  %933 = vmatmul.mubr.msk.f32.gmra.mrb[8].mxu1 %vm262_vm0, %v242_v22 }
  0x4d   : > { %453 = vmatprep.mubr.f32.mxu0 %v1072_v0  ;;  %549 = vmatprep.mubr.f32.mxu1 %v1072_v0 }
  0x50   : > { %918 = vmatmul.mubr.msk.f32.gmra.mrb[10].mxu0 %vm262_vm0, %v227_v23  ;;  %934 = vmatmul.mubr.msk.f32.gmra.mrb[10].mxu1 %vm262_vm0, %v243_v24 }
  0x51   : > { %459 = vmatprep.mubr.f32.mxu0 %v1072_v0  ;;  %555 = vmatprep.mubr.f32.mxu1 %v1072_v0 }
  0x54   : > { %919 = vmatmul.mubr.msk.f32.gmra.mrb[12].mxu0 %vm262_vm0, %v228_v25  ;;  %935 = vmatmul.mubr.msk.f32.gmra.mrb[12].mxu1 %vm262_vm0, %v244_v26 }
  0x55   : > { %465 = vmatprep.mubr.f32.mxu0 %v1072_v0  ;;  %561 = vmatprep.mubr.f32.mxu1 %v1072_v0 }
  0x58   : > { %920 = vmatmul.mubr.msk.f32.gmra.mrb[14].mxu0 %vm262_vm0, %v229_v27  ;;  %936 = vmatmul.mubr.msk.f32.gmra.mrb[14].mxu1 %vm262_vm0, %v245_v28 }
  0x59   : > { %471 = vmatprep.mubr.f32.mxu0 %v1072_v0  ;;  %567 = vmatprep.mubr.f32.mxu1 %v1072_v0 }
  0x5c   : > { %921 = vmatmul.mubr.msk.f32.gmra.mrb[16].mxu0 %vm262_vm0, %v230_v29  ;;  %937 = vmatmul.mubr.msk.f32.gmra.mrb[16].mxu1 %vm262_vm0, %v246_v30 }
  0x5d   : > { %477 = vmatprep.mubr.f32.mxu0 %v1072_v0  ;;  %573 = vmatprep.mubr.f32.mxu1 %v1072_v0 }
  0x60   : > { %922 = vmatmul.mubr.msk.f32.gmra.mrb[18].mxu0 %vm262_vm0, %v231_v31  ;;  %938 = vmatmul.mubr.msk.f32.gmra.mrb[18].mxu1 %vm262_vm0, %v247_v32 }
  0x61   : > { %483 = vmatprep.mubr.f32.mxu0 %v1072_v0  ;;  %579 = vmatprep.mubr.f32.mxu1 %v1072_v0 }
  0x64   : > { %923 = vmatmul.mubr.msk.f32.gmra.mrb[20].mxu0 %vm262_vm0, %v232_v33  ;;  %939 = vmatmul.mubr.msk.f32.gmra.mrb[20].mxu1 %vm262_vm0, %v248_v34 }
  0x65   : > { %489 = vmatprep.mubr.f32.mxu0 %v1072_v0  ;;  %585 = vmatprep.mubr.f32.mxu1 %v1072_v0 }
  0x68   : > { %924 = vmatmul.mubr.msk.f32.gmra.mrb[22].mxu0 %vm262_vm0, %v233_v35  ;;  %940 = vmatmul.mubr.msk.f32.gmra.mrb[22].mxu1 %vm262_vm0, %v249_v36 }
  0x69   : > { %495 = vmatprep.mubr.f32.mxu0 %v1072_v0  ;;  %591 = vmatprep.mubr.f32.mxu1 %v1072_v0 }
  0x6c   : > { %925 = vmatmul.mubr.msk.f32.gmra.mrb[24].mxu0 %vm262_vm0, %v234_v37  ;;  %941 = vmatmul.mubr.msk.f32.gmra.mrb[24].mxu1 %vm262_vm0, %v250_v38 }
  0x6d   : > { %501 = vmatprep.mubr.f32.mxu0 %v1072_v0  ;;  %597 = vmatprep.mubr.f32.mxu1 %v1072_v0 }
  0x70   : > { %926 = vmatmul.mubr.msk.f32.gmra.mrb[26].mxu0 %vm262_vm0, %v235_v39  ;;  %942 = vmatmul.mubr.msk.f32.gmra.mrb[26].mxu1 %vm262_vm0, %v251_v40 }
  0x71   : > { %507 = vmatprep.mubr.f32.mxu0 %v1072_v0  ;;  %603 = vmatprep.mubr.f32.mxu1 %v1072_v0 }
  0x74   : > { %927 = vmatmul.mubr.msk.f32.gmra.mrb[28].mxu0 %vm262_vm0, %v236_v41  ;;  %943 = vmatmul.mubr.msk.f32.gmra.mrb[28].mxu1 %vm262_vm0, %v252_v42 }
  0x75   : > { %513 = vmatprep.mubr.f32.mxu0 %v1072_v0  ;;  %609 = vmatprep.mubr.f32.mxu1 %v1072_v0 }
  0x78   : > { %928 = vmatmul.mubr.msk.f32.gmra.mrb[30].mxu0 %vm262_vm0, %v237_v43  ;;  %944 = vmatmul.mubr.msk.f32.gmra.mrb[30].mxu1 %vm262_vm0, %v253_v44 }
 0x10f   : > { %v425_v54 = vpop.f32.mrb[0].mxu0  ;;  %v521_v55 = vpop.f32.mrb[0].mxu1 }
 0x110   : > { %v628_v57 = vmul.f32 %v1317_v51, %v425_v54  ;;  %v660_v58 = vmul.f32 %v1317_v51, %v521_v55  ;;  %v427_v59 = vpop.f32.mrb[1].mxu0  ;;  %v523_v60 = vpop.f32.mrb[1].mxu1 }
 0x111   : > { %v629_v61 = vmul.f32 %v1319_v52, %v427_v59  ;;  %v661_v62 = vmul.f32 %v1319_v52, %v523_v60 }
 0x112   : > { %v704_v63 = vadd.f32 %v1321_v53, %v628_v57  ;;  %v736_v0 = vadd.f32 %v1321_v53, %v660_v58 }
 0x113   : > { %v705_v1 = vadd.f32 %v1323_v56, %v629_v61  ;;  %v737_v2 = vadd.f32 %v1323_v56, %v661_v62  ;;  %v431_v3 = vpop.f32.mrb[2].mxu0  ;;  %v527_v4 = vpop.f32.mrb[2].mxu1 }
 0x114   : > { %768 = vst [vmem:[%s1330_s7] sm:$0xff] %v704_v63  ;;  %800 = vst [vmem:[%s1330_s7 + $0x100] sm:$0xff] %v736_v0  ;;  %v630_v5 = vmul.f32 %v1317_v51, %v431_v3  ;;  %v662_v6 = vmul.f32 %v1317_v51, %v527_v4  ;;  %v433_v7 = vpop.f32.mrb[3].mxu0  ;;  %v529_v8 = vpop.f32.mrb[3].mxu1 }
 0x115   : > { %769 = vst.msk [vmem:[%s1330_s7 + $0x8] sm:$0xff] %vm262_vm0, %v705_v1  ;;  %801 = vst.msk [vmem:[%s1330_s7 + $0x108] sm:$0xff] %vm262_vm0, %v737_v2  ;;  %v631_v9 = vmul.f32 %v1319_v52, %v433_v7  ;;  %v663_v10 = vmul.f32 %v1319_v52, %v529_v8 }
 0x116   : > { %v706_v11 = vadd.f32 %v1321_v53, %v630_v5  ;;  %v738_v12 = vadd.f32 %v1321_v53, %v662_v6 }
 0x117   : > { %v707_v13 = vadd.f32 %v1323_v56, %v631_v9  ;;  %v739_v14 = vadd.f32 %v1323_v56, %v663_v10  ;;  %v437_v15 = vpop.f32.mrb[4].mxu0  ;;  %v533_v16 = vpop.f32.mrb[4].mxu1 }
 0x118   : > { %770 = vst [vmem:[%s1330_s7 + $0x10] sm:$0xff] %v706_v11  ;;  %802 = vst [vmem:[%s1330_s7 + $0x110] sm:$0xff] %v738_v12  ;;  %v632_v17 = vmul.f32 %v1317_v51, %v437_v15  ;;  %v664_v18 = vmul.f32 %v1317_v51, %v533_v16  ;;  %v439_v19 = vpop.f32.mrb[5].mxu0  ;;  %v535_v20 = vpop.f32.mrb[5].mxu1 }
 0x119   : > { %771 = vst.msk [vmem:[%s1330_s7 + $0x18] sm:$0xff] %vm262_vm0, %v707_v13  ;;  %803 = vst.msk [vmem:[%s1330_s7 + $0x118] sm:$0xff] %vm262_vm0, %v739_v14  ;;  %v633_v21 = vmul.f32 %v1319_v52, %v439_v19  ;;  %v665_v22 = vmul.f32 %v1319_v52, %v535_v20 }
 0x11a   : > { %v708_v23 = vadd.f32 %v1321_v53, %v632_v17  ;;  %v740_v24 = vadd.f32 %v1321_v53, %v664_v18 }
 0x11b   : > { %v709_v25 = vadd.f32 %v1323_v56, %v633_v21  ;;  %v741_v26 = vadd.f32 %v1323_v56, %v665_v22  ;;  %v443_v27 = vpop.f32.mrb[6].mxu0  ;;  %v539_v28 = vpop.f32.mrb[6].mxu1 }
 0x11c   : > { %772 = vst [vmem:[%s1330_s7 + $0x20] sm:$0xff] %v708_v23  ;;  %804 = vst [vmem:[%s1330_s7 + $0x120] sm:$0xff] %v740_v24  ;;  %v634_v29 = vmul.f32 %v1317_v51, %v443_v27  ;;  %v666_v30 = vmul.f32 %v1317_v51, %v539_v28  ;;  %v445_v31 = vpop.f32.mrb[7].mxu0  ;;  %v541_v32 = vpop.f32.mrb[7].mxu1 }
 0x11d   : > { %773 = vst.msk [vmem:[%s1330_s7 + $0x28] sm:$0xff] %vm262_vm0, %v709_v25  ;;  %805 = vst.msk [vmem:[%s1330_s7 + $0x128] sm:$0xff] %vm262_vm0, %v741_v26  ;;  %v635_v33 = vmul.f32 %v1319_v52, %v445_v31  ;;  %v667_v34 = vmul.f32 %v1319_v52, %v541_v32 }
 0x11e   : > { %v710_v35 = vadd.f32 %v1321_v53, %v634_v29  ;;  %v742_v36 = vadd.f32 %v1321_v53, %v666_v30 }
 0x11f   : > { %v711_v37 = vadd.f32 %v1323_v56, %v635_v33  ;;  %v743_v38 = vadd.f32 %v1323_v56, %v667_v34  ;;  %v449_v39 = vpop.f32.mrb[8].mxu0  ;;  %v545_v40 = vpop.f32.mrb[8].mxu1 }
 0x120   : > { %774 = vst [vmem:[%s1330_s7 + $0x30] sm:$0xff] %v710_v35  ;;  %806 = vst [vmem:[%s1330_s7 + $0x130] sm:$0xff] %v742_v36  ;;  %v636_v41 = vmul.f32 %v1317_v51, %v449_v39  ;;  %v668_v42 = vmul.f32 %v1317_v51, %v545_v40  ;;  %v451_v43 = vpop.f32.mrb[9].mxu0  ;;  %v547_v44 = vpop.f32.mrb[9].mxu1 }
 0x121   : > { %775 = vst.msk [vmem:[%s1330_s7 + $0x38] sm:$0xff] %vm262_vm0, %v711_v37  ;;  %807 = vst.msk [vmem:[%s1330_s7 + $0x138] sm:$0xff] %vm262_vm0, %v743_v38  ;;  %v637_v45 = vmul.f32 %v1319_v52, %v451_v43  ;;  %v669_v46 = vmul.f32 %v1319_v52, %v547_v44 }
 0x122   : > { %v712_v47 = vadd.f32 %v1321_v53, %v636_v41  ;;  %v744_v48 = vadd.f32 %v1321_v53, %v668_v42 }
 0x123   : > { %v713_v49 = vadd.f32 %v1323_v56, %v637_v45  ;;  %v745_v50 = vadd.f32 %v1323_v56, %v669_v46  ;;  %v455_v54 = vpop.f32.mrb[10].mxu0  ;;  %v551_v55 = vpop.f32.mrb[10].mxu1 }
 0x124   : > { %776 = vst [vmem:[%s1330_s7 + $0x40] sm:$0xff] %v712_v47  ;;  %808 = vst [vmem:[%s1330_s7 + $0x140] sm:$0xff] %v744_v48  ;;  %v638_v57 = vmul.f32 %v1317_v51, %v455_v54  ;;  %v670_v58 = vmul.f32 %v1317_v51, %v551_v55  ;;  %v457_v59 = vpop.f32.mrb[11].mxu0  ;;  %v553_v60 = vpop.f32.mrb[11].mxu1 }
 0x125   : > { %777 = vst.msk [vmem:[%s1330_s7 + $0x48] sm:$0xff] %vm262_vm0, %v713_v49  ;;  %809 = vst.msk [vmem:[%s1330_s7 + $0x148] sm:$0xff] %vm262_vm0, %v745_v50  ;;  %v639_v61 = vmul.f32 %v1319_v52, %v457_v59  ;;  %v671_v62 = vmul.f32 %v1319_v52, %v553_v60 }
 0x126   : > { %v714_v63 = vadd.f32 %v1321_v53, %v638_v57  ;;  %v746_v0 = vadd.f32 %v1321_v53, %v670_v58 }
 0x127   : > { %v715_v1 = vadd.f32 %v1323_v56, %v639_v61  ;;  %v747_v2 = vadd.f32 %v1323_v56, %v671_v62  ;;  %v461_v3 = vpop.f32.mrb[12].mxu0  ;;  %v557_v4 = vpop.f32.mrb[12].mxu1 }
 0x128   : > { %778 = vst [vmem:[%s1330_s7 + $0x50] sm:$0xff] %v714_v63  ;;  %810 = vst [vmem:[%s1330_s7 + $0x150] sm:$0xff] %v746_v0  ;;  %v640_v5 = vmul.f32 %v1317_v51, %v461_v3  ;;  %v672_v6 = vmul.f32 %v1317_v51, %v557_v4  ;;  %v463_v7 = vpop.f32.mrb[13].mxu0  ;;  %v559_v8 = vpop.f32.mrb[13].mxu1 }
 0x129   : > { %779 = vst.msk [vmem:[%s1330_s7 + $0x58] sm:$0xff] %vm262_vm0, %v715_v1  ;;  %811 = vst.msk [vmem:[%s1330_s7 + $0x158] sm:$0xff] %vm262_vm0, %v747_v2  ;;  %v641_v9 = vmul.f32 %v1319_v52, %v463_v7  ;;  %v673_v10 = vmul.f32 %v1319_v52, %v559_v8 }
 0x12a   : > { %v716_v11 = vadd.f32 %v1321_v53, %v640_v5  ;;  %v748_v12 = vadd.f32 %v1321_v53, %v672_v6 }
 0x12b   : > { %v717_v13 = vadd.f32 %v1323_v56, %v641_v9  ;;  %v749_v14 = vadd.f32 %v1323_v56, %v673_v10  ;;  %v467_v15 = vpop.f32.mrb[14].mxu0  ;;  %v563_v16 = vpop.f32.mrb[14].mxu1 }
 0x12c   : > { %780 = vst [vmem:[%s1330_s7 + $0x60] sm:$0xff] %v716_v11  ;;  %812 = vst [vmem:[%s1330_s7 + $0x160] sm:$0xff] %v748_v12  ;;  %v642_v17 = vmul.f32 %v1317_v51, %v467_v15  ;;  %v674_v18 = vmul.f32 %v1317_v51, %v563_v16  ;;  %v469_v19 = vpop.f32.mrb[15].mxu0  ;;  %v565_v20 = vpop.f32.mrb[15].mxu1 }
 0x12d   : > { %781 = vst.msk [vmem:[%s1330_s7 + $0x68] sm:$0xff] %vm262_vm0, %v717_v13  ;;  %813 = vst.msk [vmem:[%s1330_s7 + $0x168] sm:$0xff] %vm262_vm0, %v749_v14  ;;  %v643_v21 = vmul.f32 %v1319_v52, %v469_v19  ;;  %v675_v22 = vmul.f32 %v1319_v52, %v565_v20 }
 0x12e   : > { %v718_v23 = vadd.f32 %v1321_v53, %v642_v17  ;;  %v750_v24 = vadd.f32 %v1321_v53, %v674_v18 }
 0x12f   : > { %v719_v25 = vadd.f32 %v1323_v56, %v643_v21  ;;  %v751_v26 = vadd.f32 %v1323_v56, %v675_v22  ;;  %v473_v27 = vpop.f32.mrb[16].mxu0  ;;  %v569_v28 = vpop.f32.mrb[16].mxu1 }
 0x130   : > { %782 = vst [vmem:[%s1330_s7 + $0x70] sm:$0xff] %v718_v23  ;;  %814 = vst [vmem:[%s1330_s7 + $0x170] sm:$0xff] %v750_v24  ;;  %v644_v29 = vmul.f32 %v1317_v51, %v473_v27  ;;  %v676_v30 = vmul.f32 %v1317_v51, %v569_v28  ;;  %v475_v31 = vpop.f32.mrb[17].mxu0  ;;  %v571_v32 = vpop.f32.mrb[17].mxu1 }
 0x131   : > { %783 = vst.msk [vmem:[%s1330_s7 + $0x78] sm:$0xff] %vm262_vm0, %v719_v25  ;;  %815 = vst.msk [vmem:[%s1330_s7 + $0x178] sm:$0xff] %vm262_vm0, %v751_v26  ;;  %v645_v33 = vmul.f32 %v1319_v52, %v475_v31  ;;  %v677_v34 = vmul.f32 %v1319_v52, %v571_v32 }
 0x132   : > { %v720_v35 = vadd.f32 %v1321_v53, %v644_v29  ;;  %v752_v36 = vadd.f32 %v1321_v53, %v676_v30 }
 0x133   : > { %v721_v37 = vadd.f32 %v1323_v56, %v645_v33  ;;  %v753_v38 = vadd.f32 %v1323_v56, %v677_v34  ;;  %v479_v39 = vpop.f32.mrb[18].mxu0  ;;  %v575_v40 = vpop.f32.mrb[18].mxu1 }
 0x134   : > { %784 = vst [vmem:[%s1330_s7 + $0x80] sm:$0xff] %v720_v35  ;;  %816 = vst [vmem:[%s1330_s7 + $0x180] sm:$0xff] %v752_v36  ;;  %v646_v41 = vmul.f32 %v1317_v51, %v479_v39  ;;  %v678_v42 = vmul.f32 %v1317_v51, %v575_v40  ;;  %v481_v43 = vpop.f32.mrb[19].mxu0  ;;  %v577_v44 = vpop.f32.mrb[19].mxu1 }
 0x135   : > { %785 = vst.msk [vmem:[%s1330_s7 + $0x88] sm:$0xff] %vm262_vm0, %v721_v37  ;;  %817 = vst.msk [vmem:[%s1330_s7 + $0x188] sm:$0xff] %vm262_vm0, %v753_v38  ;;  %v647_v45 = vmul.f32 %v1319_v52, %v481_v43  ;;  %v679_v46 = vmul.f32 %v1319_v52, %v577_v44 }
 0x136   : > { %v722_v47 = vadd.f32 %v1321_v53, %v646_v41  ;;  %v754_v48 = vadd.f32 %v1321_v53, %v678_v42 }
 0x137   : > { %v723_v49 = vadd.f32 %v1323_v56, %v647_v45  ;;  %v755_v50 = vadd.f32 %v1323_v56, %v679_v46  ;;  %v485_v54 = vpop.f32.mrb[20].mxu0  ;;  %v581_v55 = vpop.f32.mrb[20].mxu1 }
 0x138   : > { %786 = vst [vmem:[%s1330_s7 + $0x90] sm:$0xff] %v722_v47  ;;  %818 = vst [vmem:[%s1330_s7 + $0x190] sm:$0xff] %v754_v48  ;;  %v648_v57 = vmul.f32 %v1317_v51, %v485_v54  ;;  %v680_v58 = vmul.f32 %v1317_v51, %v581_v55  ;;  %v487_v59 = vpop.f32.mrb[21].mxu0  ;;  %v583_v60 = vpop.f32.mrb[21].mxu1 }
 0x139   : > { %787 = vst.msk [vmem:[%s1330_s7 + $0x98] sm:$0xff] %vm262_vm0, %v723_v49  ;;  %819 = vst.msk [vmem:[%s1330_s7 + $0x198] sm:$0xff] %vm262_vm0, %v755_v50  ;;  %v649_v61 = vmul.f32 %v1319_v52, %v487_v59  ;;  %v681_v62 = vmul.f32 %v1319_v52, %v583_v60 }
 0x13a   : > { %v724_v63 = vadd.f32 %v1321_v53, %v648_v57  ;;  %v756_v0 = vadd.f32 %v1321_v53, %v680_v58 }
 0x13b   : > { %v725_v1 = vadd.f32 %v1323_v56, %v649_v61  ;;  %v757_v2 = vadd.f32 %v1323_v56, %v681_v62  ;;  %v491_v3 = vpop.f32.mrb[22].mxu0  ;;  %v587_v4 = vpop.f32.mrb[22].mxu1 }
 0x13c   : > { %788 = vst [vmem:[%s1330_s7 + $0xa0] sm:$0xff] %v724_v63  ;;  %820 = vst [vmem:[%s1330_s7 + $0x1a0] sm:$0xff] %v756_v0  ;;  %v650_v5 = vmul.f32 %v1317_v51, %v491_v3  ;;  %v682_v6 = vmul.f32 %v1317_v51, %v587_v4  ;;  %v493_v7 = vpop.f32.mrb[23].mxu0  ;;  %v589_v8 = vpop.f32.mrb[23].mxu1 }
 0x13d   : > { %789 = vst.msk [vmem:[%s1330_s7 + $0xa8] sm:$0xff] %vm262_vm0, %v725_v1  ;;  %821 = vst.msk [vmem:[%s1330_s7 + $0x1a8] sm:$0xff] %vm262_vm0, %v757_v2  ;;  %v651_v9 = vmul.f32 %v1319_v52, %v493_v7  ;;  %v683_v10 = vmul.f32 %v1319_v52, %v589_v8 }
 0x13e   : > { %v726_v11 = vadd.f32 %v1321_v53, %v650_v5  ;;  %v758_v12 = vadd.f32 %v1321_v53, %v682_v6 }
 0x13f   : > { %v727_v13 = vadd.f32 %v1323_v56, %v651_v9  ;;  %v759_v14 = vadd.f32 %v1323_v56, %v683_v10  ;;  %v497_v15 = vpop.f32.mrb[24].mxu0  ;;  %v593_v16 = vpop.f32.mrb[24].mxu1 }
 0x140   : > { %790 = vst [vmem:[%s1330_s7 + $0xb0] sm:$0xff] %v726_v11  ;;  %822 = vst [vmem:[%s1330_s7 + $0x1b0] sm:$0xff] %v758_v12  ;;  %v652_v17 = vmul.f32 %v1317_v51, %v497_v15  ;;  %v684_v18 = vmul.f32 %v1317_v51, %v593_v16  ;;  %v499_v19 = vpop.f32.mrb[25].mxu0  ;;  %v595_v20 = vpop.f32.mrb[25].mxu1 }
 0x141   : > { %791 = vst.msk [vmem:[%s1330_s7 + $0xb8] sm:$0xff] %vm262_vm0, %v727_v13  ;;  %823 = vst.msk [vmem:[%s1330_s7 + $0x1b8] sm:$0xff] %vm262_vm0, %v759_v14  ;;  %v653_v21 = vmul.f32 %v1319_v52, %v499_v19  ;;  %v685_v22 = vmul.f32 %v1319_v52, %v595_v20 }
 0x142   : > { %v728_v23 = vadd.f32 %v1321_v53, %v652_v17  ;;  %v760_v24 = vadd.f32 %v1321_v53, %v684_v18 }
 0x143   : > { %v729_v25 = vadd.f32 %v1323_v56, %v653_v21  ;;  %v761_v26 = vadd.f32 %v1323_v56, %v685_v22  ;;  %v503_v27 = vpop.f32.mrb[26].mxu0  ;;  %v599_v28 = vpop.f32.mrb[26].mxu1 }
 0x144   : > { %792 = vst [vmem:[%s1330_s7 + $0xc0] sm:$0xff] %v728_v23  ;;  %824 = vst [vmem:[%s1330_s7 + $0x1c0] sm:$0xff] %v760_v24  ;;  %v654_v29 = vmul.f32 %v1317_v51, %v503_v27  ;;  %v686_v30 = vmul.f32 %v1317_v51, %v599_v28  ;;  %v505_v31 = vpop.f32.mrb[27].mxu0  ;;  %v601_v32 = vpop.f32.mrb[27].mxu1 }
 0x145   : > { %793 = vst.msk [vmem:[%s1330_s7 + $0xc8] sm:$0xff] %vm262_vm0, %v729_v25  ;;  %825 = vst.msk [vmem:[%s1330_s7 + $0x1c8] sm:$0xff] %vm262_vm0, %v761_v26  ;;  %v655_v33 = vmul.f32 %v1319_v52, %v505_v31  ;;  %v687_v34 = vmul.f32 %v1319_v52, %v601_v32 }
 0x146   : > { %v730_v35 = vadd.f32 %v1321_v53, %v654_v29  ;;  %v762_v36 = vadd.f32 %v1321_v53, %v686_v30 }
 0x147   : > { %v731_v37 = vadd.f32 %v1323_v56, %v655_v33  ;;  %v763_v38 = vadd.f32 %v1323_v56, %v687_v34  ;;  %v509_v39 = vpop.f32.mrb[28].mxu0  ;;  %v605_v40 = vpop.f32.mrb[28].mxu1 }
 0x148   : > { %794 = vst [vmem:[%s1330_s7 + $0xd0] sm:$0xff] %v730_v35  ;;  %826 = vst [vmem:[%s1330_s7 + $0x1d0] sm:$0xff] %v762_v36  ;;  %v656_v41 = vmul.f32 %v1317_v51, %v509_v39  ;;  %v688_v42 = vmul.f32 %v1317_v51, %v605_v40  ;;  %v511_v43 = vpop.f32.mrb[29].mxu0  ;;  %v607_v44 = vpop.f32.mrb[29].mxu1 }
 0x149   : > { %795 = vst.msk [vmem:[%s1330_s7 + $0xd8] sm:$0xff] %vm262_vm0, %v731_v37  ;;  %827 = vst.msk [vmem:[%s1330_s7 + $0x1d8] sm:$0xff] %vm262_vm0, %v763_v38  ;;  %v657_v45 = vmul.f32 %v1319_v52, %v511_v43  ;;  %v689_v46 = vmul.f32 %v1319_v52, %v607_v44 }
 0x14a   : > { %v732_v47 = vadd.f32 %v1321_v53, %v656_v41  ;;  %v764_v48 = vadd.f32 %v1321_v53, %v688_v42 }
 0x14b   : > { %v733_v49 = vadd.f32 %v1323_v56, %v657_v45  ;;  %v765_v50 = vadd.f32 %v1323_v56, %v689_v46  ;;  %v515_v54 = vpop.f32.mrb[30].mxu0  ;;  %v611_v55 = vpop.f32.mrb[30].mxu1 }
 0x14c   : > { %796 = vst [vmem:[%s1330_s7 + $0xe0] sm:$0xff] %v732_v47  ;;  %828 = vst [vmem:[%s1330_s7 + $0x1e0] sm:$0xff] %v764_v48  ;;  %v658_v57 = vmul.f32 %v1317_v51, %v515_v54  ;;  %v690_v58 = vmul.f32 %v1317_v51, %v611_v55  ;;  %v517_v59 = vpop.f32.mrb[31].mxu0  ;;  %v613_v60 = vpop.f32.mrb[31].mxu1 }
 0x14d   : > { %797 = vst.msk [vmem:[%s1330_s7 + $0xe8] sm:$0xff] %vm262_vm0, %v733_v49  ;;  %829 = vst.msk [vmem:[%s1330_s7 + $0x1e8] sm:$0xff] %vm262_vm0, %v765_v50  ;;  %v659_v61 = vmul.f32 %v1319_v52, %v517_v59  ;;  %v691_v62 = vmul.f32 %v1319_v52, %v613_v60 }
 0x14e   : > { %v734_v63 = vadd.f32 %v1321_v53, %v658_v57  ;;  %v766_v0 = vadd.f32 %v1321_v53, %v690_v58 }
 0x14f   : > { %v735_v1 = vadd.f32 %v1323_v56, %v659_v61  ;;  %v767_v2 = vadd.f32 %v1323_v56, %v691_v62 }
 0x150   : > { %798 = vst [vmem:[%s1330_s7 + $0xf0] sm:$0xff] %v734_v63  ;;  %830 = vst [vmem:[%s1330_s7 + $0x1f0] sm:$0xff] %v766_v0 }
 0x151   : > { %799 = vst.msk [vmem:[%s1330_s7 + $0xf8] sm:$0xff] %vm262_vm0, %v735_v1  ;;  %831 = vst.msk [vmem:[%s1330_s7 + $0x1f8] sm:$0xff] %vm262_vm0, %v767_v2 }
 0x152 PF: > { %p14_p8 = scmp.ge.s32.totalorder %s1118_s20, 4   ;;  %s1575_s15 = smov %s1059_s16 }
 0x153   : > { %s1576_s16 = smov %s1063_s17  ;;  %s1577_s17 = smov %s1128_s23 }
 0x154   : > { %s1578_s18 = smov %s1118_s20  ;;  %16 = sbr.rel (!%p14_p8) target bundleno = 3 (0x3), region = 76 }
 0x15b   :  { %856 = vsyncpa [#allocation3], 1 }
 0x15c   :  { %858 = vsyncpa [#allocation3 + $0x1], 1 }

// kernel: rfb_m_forward.6
= control target key start
LH: loop header
LB: loop body
LE: loop exit
PB: predicated region body
PF: predicated region fallthrough
CT: control target
= control target key end

     0   :  { %s1762_s15 = smov 0   ;;  %s2550_s0 = inlined_call_operand.vmem [shape: f32[512,672], index: 0, kind: input, shape index: {}]   ;;  %s2551_s1 = inlined_call_operand.vmem [shape: f32[672,96], index: 1, kind: input, shape index: {}]   ;;  %s2552_s2 = inlined_call_operand.vmem [shape: f32[1,96], index: 2, kind: input, shape index: {}]   ;;  %s2553_s3 = inlined_call_operand.vmem [shape: f32[1,96], index: 3, kind: input, shape index: {}]   ;;  %s2554_s4 = inlined_call_operand.vmem [shape: f32[512,96], index: 4, kind: output, shape index: {}]  }
   0x1 LB: > { %s1419_s16 = sadd.s32 4294967295, %s1734_s15   ;;  %p1423_p0 = scmp.ge.s32.totalorder %s1734_s15, 1  ;;  %s1734_s15 = sphi %s1762_s15, %s14_s15  }
   0x2   : > { %p164_p1 = scmp.lt.s32.totalorder %s1734_s15, 3 }
   0x4   : > { %p165_p2 = pnand %p1423_p0, %p164_p1 }
   0x5   : > { %v396_v0 = vld [vmem:[%s2551_s1] sm:$0xff] (!%p165_p2)  ;;  %v397_v1 = vld [vmem:[%s2551_s1 + $0x8] sm:$0xff] (!%p165_p2)  ;;  %v1736_v3 = vmov (!%p165_p2), 0.0|0.0   ;;  %v398_v6 = vld [vmem:[%s2551_s1 + $0x10] sm:$0xff] (!%p165_p2)  ;;  %s1424_s7 = sshll.u32 (!%p165_p2), %s1419_s16, 5  ;;  %vm480_vm0 = vcmask (!%p165_p2), 261120  }
   0x6   : > { %168 = sbr.rel (%p165_p2) target bundleno = 479 (0x1df), region = 36  ;;  %v428_v2 = vld [vmem:[%s2551_s1 + $0x100] sm:$0xff] (!%p165_p2)  ;;  %1464 = vmatprep.subr.bf16.mxu1 (!%p165_p2), %v1736_v3  ;;  %1512 = vmatprep.subr.bf16.mxu0 (!%p165_p2), %v1736_v3  ;;  %v1465_v4 = vpack.c.bf16 (!%p165_p2), %v397_v1, %v396_v0  ;;  %v429_v5 = vld [vmem:[%s2551_s1 + $0x108] sm:$0xff] (!%p165_p2)  ;;  %v399_v7 = vld [vmem:[%s2551_s1 + $0x18] sm:$0xff] (!%p165_p2)  ;;  %p192_p3 = scmp.lt.s32.totalorder (!%p165_p2), %s1424_s7, 63  ;;  %vm1330_vm1 = vcmask (!%p165_p2), 785408  }
   0x7   : > { %v1790_v8 = vpack.c.bf16 (!%p165_p2), %v429_v5, %v428_v2  ;;  %v430_v9 = vld [vmem:[%s2551_s1 + $0x110] sm:$0xff] (!%p165_p2)  ;;  %v431_v10 = vld [vmem:[%s2551_s1 + $0x118] sm:$0xff] (!%p165_p2)  ;;  %v1468_v11 = vpack.c.bf16 (!%p165_p2), %v399_v7, %v398_v6  ;;  %v400_v13 = vld [vmem:[%s2551_s1 + $0x20] sm:$0xff] (!%p165_p2) }
   0x8   : > { %1466 = vmatpush1.bf16.msra.mxu1 (!%p165_p2), %v1465_v4  ;;  %v1800_v12 = vpack.c.bf16 (!%p165_p2), %v431_v10, %v430_v9  ;;  %v401_v14 = vld [vmem:[%s2551_s1 + $0x28] sm:$0xff] (!%p165_p2)  ;;  %v432_v15 = vld [vmem:[%s2551_s1 + $0x120] sm:$0xff] (!%p165_p2)  ;;  %v402_v19 = vld [vmem:[%s2551_s1 + $0x30] sm:$0xff] (!%p165_p2) }
   0x9   : > { %1514 = vmatpush1.bf16.msra.mxu0 (!%p165_p2), %v1790_v8  ;;  %1467 = vmatprep.subr.bf16.mxu1 (!%p165_p2), %v1736_v3  ;;  %v433_v16 = vld [vmem:[%s2551_s1 + $0x128] sm:$0xff] (!%p165_p2)  ;;  %v1471_v17 = vpack.c.bf16 (!%p165_p2), %v401_v14, %v400_v13  ;;  %v403_v20 = vld [vmem:[%s2551_s1 + $0x38] sm:$0xff] (!%p165_p2)  ;;  %v434_v21 = vld [vmem:[%s2551_s1 + $0x130] sm:$0xff] (!%p165_p2) }
   0xa   : > { %1515 = vmatprep.subr.bf16.mxu0 (!%p165_p2), %v1736_v3  ;;  %v1817_v18 = vpack.c.bf16 (!%p165_p2), %v433_v16, %v432_v15  ;;  %v435_v22 = vld [vmem:[%s2551_s1 + $0x138] sm:$0xff] (!%p165_p2)  ;;  %v1474_v23 = vpack.c.bf16 (!%p165_p2), %v403_v20, %v402_v19  ;;  %v404_v25 = vld [vmem:[%s2551_s1 + $0x40] sm:$0xff] (!%p165_p2)  ;;  %v405_v26 = vld [vmem:[%s2551_s1 + $0x48] sm:$0xff] (!%p165_p2) }
   0xb   : > { %v1836_v24 = vpack.c.bf16 (!%p165_p2), %v435_v22, %v434_v21  ;;  %v436_v27 = vld [vmem:[%s2551_s1 + $0x140] sm:$0xff] (!%p165_p2)  ;;  %v437_v28 = vld [vmem:[%s2551_s1 + $0x148] sm:$0xff] (!%p165_p2)  ;;  %v1477_v29 = vpack.c.bf16 (!%p165_p2), %v405_v26, %v404_v25  ;;  %v406_v31 = vld [vmem:[%s2551_s1 + $0x50] sm:$0xff] (!%p165_p2) }
   0xc   : > { %1469 = vmatpush1.bf16.msra.mxu1 (!%p165_p2), %v1468_v11  ;;  %v1854_v30 = vpack.c.bf16 (!%p165_p2), %v437_v28, %v436_v27  ;;  %v407_v32 = vld [vmem:[%s2551_s1 + $0x58] sm:$0xff] (!%p165_p2)  ;;  %v438_v33 = vld [vmem:[%s2551_s1 + $0x150] sm:$0xff] (!%p165_p2)  ;;  %v408_v37 = vld [vmem:[%s2551_s1 + $0x60] sm:$0xff] (!%p165_p2) }
   0xd   : > { %1517 = vmatpush1.bf16.msra.mxu0 %v1800_v12  ;;  %1470 = vmatprep.subr.bf16.mxu1 %v1736_v3  ;;  %s2556_s7 = smov (!%p192_p3, %s1424_s7), 63  ;;  %v439_v34 = vld [vmem:[%s2551_s1 + $0x158] sm:$0xff]  ;;  %v1480_v35 = vpack.c.bf16 %v407_v32, %v406_v31  ;;  %v409_v38 = vld [vmem:[%s2551_s1 + $0x68] sm:$0xff]  ;;  %v440_v39 = vld [vmem:[%s2551_s1 + $0x160] sm:$0xff] }
   0xe   : > { %1518 = vmatprep.subr.bf16.mxu0 %v1736_v3  ;;  %s1718_s8 = smul.u32 48, %s2556_s7  ;;  %v1876_v36 = vpack.c.bf16 %v439_v34, %v438_v33  ;;  %v441_v40 = vld [vmem:[%s2551_s1 + $0x168] sm:$0xff]  ;;  %v1483_v43 = vpack.c.bf16 %v409_v38, %v408_v37  ;;  %v410_v45 = vld [vmem:[%s2551_s1 + $0x70] sm:$0xff]  ;;  %v411_v46 = vld [vmem:[%s2551_s1 + $0x78] sm:$0xff]  ;;  %s1427_s27 = sshll.u32 %s2556_s7, 3 }
   0xf   : > { %v1895_v44 = vpack.c.bf16 %v441_v40, %v440_v39  ;;  %v442_v47 = vld [vmem:[%s2551_s1 + $0x170] sm:$0xff]  ;;  %v443_v48 = vld [vmem:[%s2551_s1 + $0x178] sm:$0xff]  ;;  %v1486_v49 = vpack.c.bf16 %v411_v46, %v410_v45  ;;  %v412_v51 = vld [vmem:[%s2551_s1 + $0x80] sm:$0xff]  ;;  %s2409_s6 = scalar_lea.vmem %s2554_s4, %s1427_s27 }
  0x10   : > { %1472 = vmatpush1.bf16.msra.mxu1 %v1471_v17  ;;  %s1872_s20 = scalar_lea.vmem %s2550_s0, %s1718_s8  ;;  %v1912_v50 = vpack.c.bf16 %v443_v48, %v442_v47  ;;  %v413_v52 = vld [vmem:[%s2551_s1 + $0x88] sm:$0xff]  ;;  %v444_v53 = vld [vmem:[%s2551_s1 + $0x180] sm:$0xff]  ;;  %v414_v57 = vld [vmem:[%s2551_s1 + $0x90] sm:$0xff] }
  0x11   : > { %1520 = vmatpush1.bf16.msra.mxu0 %v1817_v18  ;;  %1473 = vmatprep.subr.bf16.mxu1 %v1736_v3  ;;  %v205_v41 = vld [vmem:[%s1872_s20 + $0x8] sm:$0xff]  ;;  %v207_v42 = vld [vmem:[%s1872_s20 + $0x18] sm:$0xff]  ;;  %v1489_v55 = vpack.c.bf16 %v413_v52, %v412_v51  ;;  %v446_v59 = vld [vmem:[%s2551_s1 + $0x190] sm:$0xff] }
  0x12   : > { %1521 = vmatprep.subr.bf16.mxu0 %v1736_v3  ;;  %641 = vmatprep.mubr.f32.mxu1 %v205_v41  ;;  %v445_v54 = vld [vmem:[%s2551_s1 + $0x188] sm:$0xff]  ;;  %v415_v58 = vld [vmem:[%s2551_s1 + $0x98] sm:$0xff]  ;;  %v416_v63 = vld [vmem:[%s2551_s1 + $0xa0] sm:$0xff] }
  0x13   : > { %866 = vmatprep.mubr.f32.mxu0 %v207_v42  ;;  %v1929_v56 = vpack.c.bf16 %v445_v54, %v444_v53  ;;  %v447_v60 = vld [vmem:[%s2551_s1 + $0x198] sm:$0xff]  ;;  %v1492_v61 = vpack.c.bf16 %v415_v58, %v414_v57  ;;  %v417_v0 = vld [vmem:[%s2551_s1 + $0xa8] sm:$0xff]  ;;  %v448_v1 = vld [vmem:[%s2551_s1 + $0x1a0] sm:$0xff] }
  0x14   : > { %1475 = vmatpush1.bf16.msra.mxu1 %v1474_v23  ;;  %v1946_v62 = vpack.c.bf16 %v447_v60, %v446_v59  ;;  %v449_v2 = vld [vmem:[%s2551_s1 + $0x1a8] sm:$0xff]  ;;  %v1495_v4 = vpack.c.bf16 %v417_v0, %v416_v63  ;;  %v418_v6 = vld [vmem:[%s2551_s1 + $0xb0] sm:$0xff]  ;;  %v419_v7 = vld [vmem:[%s2551_s1 + $0xb8] sm:$0xff] }
  0x15   : > { %1523 = vmatpush1.bf16.msra.mxu0 %v1836_v24  ;;  %1476 = vmatprep.subr.bf16.mxu1 %v1736_v3  ;;  %v1963_v5 = vpack.c.bf16 %v449_v2, %v448_v1  ;;  %v450_v9 = vld [vmem:[%s2551_s1 + $0x1b0] sm:$0xff]  ;;  %v451_v10 = vld [vmem:[%s2551_s1 + $0x1b8] sm:$0xff]  ;;  %v1498_v11 = vpack.c.bf16 %v419_v7, %v418_v6  ;;  %v420_v14 = vld [vmem:[%s2551_s1 + $0xc0] sm:$0xff] }
  0x16   : > { %1524 = vmatprep.subr.bf16.mxu0 %v1736_v3  ;;  %v1980_v13 = vpack.c.bf16 %v451_v10, %v450_v9  ;;  %v421_v15 = vld [vmem:[%s2551_s1 + $0xc8] sm:$0xff]  ;;  %v452_v16 = vld [vmem:[%s2551_s1 + $0x1c0] sm:$0xff]  ;;  %v422_v21 = vld [vmem:[%s2551_s1 + $0xd0] sm:$0xff] }
  0x17   : > { %v453_v17 = vld [vmem:[%s2551_s1 + $0x1c8] sm:$0xff]  ;;  %v1501_v19 = vpack.c.bf16 %v421_v15, %v420_v14  ;;  %v423_v22 = vld [vmem:[%s2551_s1 + $0xd8] sm:$0xff]  ;;  %v454_v23 = vld [vmem:[%s2551_s1 + $0x1d0] sm:$0xff] }
  0x18   : > { %1478 = vmatpush1.bf16.msra.mxu1 %v1477_v29  ;;  %v1997_v20 = vpack.c.bf16 %v453_v17, %v452_v16  ;;  %v455_v25 = vld [vmem:[%s2551_s1 + $0x1d8] sm:$0xff]  ;;  %v1504_v26 = vpack.c.bf16 %v423_v22, %v422_v21  ;;  %v424_v28 = vld [vmem:[%s2551_s1 + $0xe0] sm:$0xff]  ;;  %v425_v29 = vld [vmem:[%s2551_s1 + $0xe8] sm:$0xff] }
  0x19   : > { %1526 = vmatpush1.bf16.msra.mxu0 %v1854_v30  ;;  %1479 = vmatprep.subr.bf16.mxu1 %v1736_v3  ;;  %v2014_v27 = vpack.c.bf16 %v455_v25, %v454_v23  ;;  %v456_v31 = vld [vmem:[%s2551_s1 + $0x1e0] sm:$0xff]  ;;  %v457_v32 = vld [vmem:[%s2551_s1 + $0x1e8] sm:$0xff]  ;;  %v1507_v33 = vpack.c.bf16 %v425_v29, %v424_v28  ;;  %v427_v37 = vld [vmem:[%s2551_s1 + $0xf8] sm:$0xff] }
  0x1a   : > { %1527 = vmatprep.subr.bf16.mxu0 %v1736_v3  ;;  %v2031_v34 = vpack.c.bf16 %v457_v32, %v456_v31  ;;  %v458_v38 = vld [vmem:[%s2551_s1 + $0x1f0] sm:$0xff]  ;;  %v459_v39 = vld [vmem:[%s2551_s1 + $0x1f8] sm:$0xff]  ;;  %v460_v42 = vld [vmem:[%s2551_s1 + $0x200] sm:$0xff] }
  0x1b   : > { %v2048_v41 = vpack.c.bf16 %v459_v39, %v458_v38  ;;  %v204_v45 = vld [vmem:[%s1872_s20] sm:$0xff]  ;;  %v206_v46 = vld [vmem:[%s1872_s20 + $0x10] sm:$0xff]  ;;  %v211_v48 = vld [vmem:[%s1872_s20 + $0x38] sm:$0xff] }
  0x1c   : > { %1481 = vmatpush1.bf16.msra.mxu1 %v1480_v35  ;;  %v426_v35 = vld [vmem:[%s2551_s1 + $0xf0] sm:$0xff]  ;;  %v463_v51 = vld [vmem:[%s2551_s1 + $0x218] sm:$0xff]  ;;  %v213_v52 = vld [vmem:[%s1872_s20 + $0x48] sm:$0xff] }
  0x1d   : > { %1529 = vmatpush1.bf16.msra.mxu0 %v1876_v36  ;;  %1482 = vmatprep.subr.bf16.mxu1 %v1736_v3  ;;  %v1510_v40 = vpack.c.bf16 %v427_v37, %v426_v35  ;;  %v210_v53 = vld [vmem:[%s1872_s20 + $0x30] sm:$0xff]  ;;  %v212_v54 = vld [vmem:[%s1872_s20 + $0x40] sm:$0xff]  ;;  %v219_v58 = vld [vmem:[%s1872_s20 + $0x78] sm:$0xff] }
  0x1e   : > { %1530 = vmatprep.subr.bf16.mxu0 %v1736_v3  ;;  %v464_v59 = vld [vmem:[%s2551_s1 + $0x220] sm:$0xff]  ;;  %v223_v63 = vld [vmem:[%s1872_s20 + $0x98] sm:$0xff]  ;;  %v225_v1 = vld [vmem:[%s1872_s20 + $0xa8] sm:$0xff] }
  0x1f   : > { %v216_v60 = vld [vmem:[%s1872_s20 + $0x60] sm:$0xff]  ;;  %v466_v2 = vld [vmem:[%s2551_s1 + $0x230] sm:$0xff]  ;;  %v229_v7 = vld [vmem:[%s1872_s20 + $0xc8] sm:$0xff] }
  0x20   : > { %1484 = vmatpush1.bf16.msra.mxu1 %v1483_v43  ;;  %v461_v43 = vld [vmem:[%s2551_s1 + $0x208] sm:$0xff]  ;;  %v222_v6 = vld [vmem:[%s1872_s20 + $0x90] sm:$0xff]  ;;  %v231_v10 = vld [vmem:[%s1872_s20 + $0xd8] sm:$0xff] }
  0x21   : > { %1532 = vmatpush1.bf16.msra.mxu0 %v1895_v44  ;;  %1485 = vmatprep.subr.bf16.mxu1 %v1736_v3  ;;  %v1561_v47 = vpack.c.bf16 %v461_v43, %v460_v42  ;;  %v469_v14 = vld [vmem:[%s2551_s1 + $0x248] sm:$0xff]  ;;  %v228_v15 = vld [vmem:[%s1872_s20 + $0xc0] sm:$0xff]  ;;  %v235_v16 = vld [vmem:[%s1872_s20 + $0xf8] sm:$0xff] }
  0x22   : > { %1533 = vmatprep.subr.bf16.mxu0 %v1736_v3  ;;  %v470_v21 = vld [vmem:[%s2551_s1 + $0x250] sm:$0xff]  ;;  %v471_v22 = vld [vmem:[%s2551_s1 + $0x258] sm:$0xff]  ;;  %v241_v25 = vld [vmem:[%s1872_s20 + $0x128] sm:$0xff] }
  0x23   : > { %v234_v23 = vld [vmem:[%s1872_s20 + $0xf0] sm:$0xff]  ;;  %v243_v28 = vld [vmem:[%s1872_s20 + $0x138] sm:$0xff]  ;;  %v472_v29 = vld [vmem:[%s2551_s1 + $0x260] sm:$0xff] }
  0x24   : > { %1487 = vmatpush1.bf16.msra.mxu1 %v1486_v49  ;;  %v462_v49 = vld [vmem:[%s2551_s1 + $0x210] sm:$0xff]  ;;  %v473_v31 = vld [vmem:[%s2551_s1 + $0x268] sm:$0xff]  ;;  %v240_v32 = vld [vmem:[%s1872_s20 + $0x120] sm:$0xff] }
  0x25   : > { %1535 = vmatpush1.bf16.msra.mxu0 %v1912_v50  ;;  %1488 = vmatprep.subr.bf16.mxu1 %v1736_v3  ;;  %v1564_v57 = vpack.c.bf16 %v463_v51, %v462_v49  ;;  %v1579_v35 = vpack.c.bf16 %v473_v31, %v472_v29  ;;  %v249_v37 = vld [vmem:[%s1872_s20 + $0x168] sm:$0xff]  ;;  %v474_v38 = vld [vmem:[%s2551_s1 + $0x270] sm:$0xff]  ;;  %v475_v39 = vld [vmem:[%s2551_s1 + $0x278] sm:$0xff] }
  0x26   : > { %1536 = vmatprep.subr.bf16.mxu0 %v1736_v3  ;;  %v248_v42 = vld [vmem:[%s1872_s20 + $0x160] sm:$0xff]  ;;  %v1582_v43 = vpack.c.bf16 %v475_v39, %v474_v38  ;;  %v254_v49 = vld [vmem:[%s1872_s20 + $0x190] sm:$0xff]  ;;  %v239_v38 = vld [vmem:[%s1872_s20 + $0x118] sm:$0xff] }
  0x27   : > { %v318_v29 = vld [vmem:[%s1872_s20 + $0x390] sm:$0xff] }
  0x28   : > { %1490 = vmatpush1.bf16.msra.mxu1 %v1489_v55  ;;  %v217_v55 = vld [vmem:[%s1872_s20 + $0x68] sm:$0xff]  ;;  %v226_v31 = vld [vmem:[%s1872_s20 + $0xb0] sm:$0xff] }
  0x29   : > { %1538 = vmatpush1.bf16.msra.mxu0 %v1929_v56  ;;  %1491 = vmatprep.subr.bf16.mxu1 %v1736_v3  ;;  %v330_v39 = vld [vmem:[%s1872_s20 + $0x3f0] sm:$0xff] }
  0x2a   : > { %1539 = vmatprep.subr.bf16.mxu0 %v1736_v3 }
  0x2c   : > { %1493 = vmatpush1.bf16.msra.mxu1 %v1492_v61  ;;  %v218_v61 = vld [vmem:[%s1872_s20 + $0x70] sm:$0xff] }
  0x2d   : > { %1541 = vmatpush1.bf16.msra.mxu0 %v1946_v62  ;;  %1494 = vmatprep.subr.bf16.mxu1 %v1736_v3 }
  0x2e   : > { %1542 = vmatprep.subr.bf16.mxu0 %v1736_v3 }
  0x30   : > { %1496 = vmatpush1.bf16.msra.mxu1 %v1495_v4  ;;  %v467_v4 = vld [vmem:[%s2551_s1 + $0x238] sm:$0xff] }
  0x31   : > { %1544 = vmatpush1.bf16.msra.mxu0 %v1963_v5  ;;  %1497 = vmatprep.subr.bf16.mxu1 %v1736_v3  ;;  %v1570_v9 = vpack.c.bf16 %v467_v4, %v466_v2  ;;  %v279_v2 = vld [vmem:[%s1872_s20 + $0x258] sm:$0xff]  ;;  %v278_v4 = vld [vmem:[%s1872_s20 + $0x250] sm:$0xff] }
  0x32   : > { %1545 = vmatprep.subr.bf16.mxu0 %v1736_v3 }
  0x34   : > { %1499 = vmatpush1.bf16.msra.mxu1 %v1498_v11  ;;  %v468_v11 = vld [vmem:[%s2551_s1 + $0x240] sm:$0xff] }
  0x35   : > { %1547 = vmatpush1.bf16.msra.mxu0 %v1980_v13  ;;  %1500 = vmatprep.subr.bf16.mxu1 %v1736_v3  ;;  %v1573_v17 = vpack.c.bf16 %v469_v14, %v468_v11  ;;  %v290_v11 = vld [vmem:[%s1872_s20 + $0x2b0] sm:$0xff]  ;;  %v295_v14 = vld [vmem:[%s1872_s20 + $0x2d8] sm:$0xff] }
  0x36   : > { %1548 = vmatprep.subr.bf16.mxu0 %v1736_v3 }
  0x38   : > { %1502 = vmatpush1.bf16.msra.mxu1 %v1501_v19  ;;  %v237_v19 = vld [vmem:[%s1872_s20 + $0x108] sm:$0xff] }
  0x39   : > { %1550 = vmatpush1.bf16.msra.mxu0 %v1997_v20  ;;  %1503 = vmatprep.subr.bf16.mxu1 %v1736_v3 }
  0x3a   : > { %1551 = vmatprep.subr.bf16.mxu0 %v1736_v3 }
  0x3c   : > { %1505 = vmatpush1.bf16.msra.mxu1 %v1504_v26  ;;  %v1576_v26 = vpack.c.bf16 %v471_v22, %v470_v21  ;;  %v307_v21 = vld [vmem:[%s1872_s20 + $0x338] sm:$0xff] }
  0x3d   : > { %1553 = vmatpush1.bf16.msra.mxu0 %v2014_v27  ;;  %1506 = vmatprep.subr.bf16.mxu1 %v1736_v3  ;;  %v215_v22 = vld [vmem:[%s1872_s20 + $0x58] sm:$0xff] }
  0x3e   : > { %1554 = vmatprep.subr.bf16.mxu0 %v1736_v3 }
  0x40   : > { %1508 = vmatpush1.bf16.msra.mxu1 %v1507_v33  ;;  %v242_v33 = vld [vmem:[%s1872_s20 + $0x130] sm:$0xff] }
  0x41   : > { %1556 = vmatpush1.bf16.msra.mxu0 %v2031_v34  ;;  %1509 = vmatprep.subr.bf16.mxu1 %v1736_v3 }
  0x42   : > { %1557 = vmatprep.subr.bf16.mxu0 %v1736_v3 }
  0x44   : > { %1511 = vmatpush1.bf16.msra.mxu1 %v1510_v40  ;;  %v246_v40 = vld [vmem:[%s1872_s20 + $0x150] sm:$0xff] }
  0x45   : > { %1559 = vmatpush1.bf16.msra.mxu0 %v2048_v41  ;;  %1590 = vmatprep.subr.bf16.mxu1 %v1736_v3 }
  0x46   : > { %1560 = vmatprep.subr.bf16.mxu0 %v1736_v3 }
  0x47   : > { %642 = vmatmul.mubr.f32.vlgmr.msra.gmra.mrb[0].mxu1 %v204_v45  ;;  %v255_v45 = vld [vmem:[%s1872_s20 + $0x198] sm:$0xff] }
  0x48   : > { %867 = vmatmul.mubr.f32.vlgmr.msra.gmra.mrb[0].mxu0 %v206_v46  ;;  %1606 = vmatpush1.bf16.msra.mxu1 %v1790_v8  ;;  %v465_v8 = vld [vmem:[%s2551_s1 + $0x228] sm:$0xff]  ;;  %v476_v46 = vld [vmem:[%s2551_s1 + $0x280] sm:$0xff] }
  0x49   : > { %1562 = vmatpush1.bf16.msra.mxu0 %v1561_v47  ;;  %646 = vmatprep.mubr.f32.mxu1 %v211_v48  ;;  %v1567_v0 = vpack.c.bf16 %v465_v8, %v464_v59  ;;  %v477_v47 = vld [vmem:[%s2551_s1 + $0x288] sm:$0xff]  ;;  %v252_v48 = vld [vmem:[%s1872_s20 + $0x180] sm:$0xff]  ;;  %v267_v59 = vld [vmem:[%s1872_s20 + $0x1f8] sm:$0xff] }
  0x4a   : > { %871 = vmatprep.mubr.f32.mxu0 %v213_v52  ;;  %1563 = vmatprep.subr.bf16.mxu0 %v1736_v3  ;;  %v1585_v51 = vpack.c.bf16 %v477_v47, %v476_v46  ;;  %v261_v52 = vld [vmem:[%s1872_s20 + $0x1c8] sm:$0xff]  ;;  %v264_v8 = vld [vmem:[%s1872_s20 + $0x1e0] sm:$0xff]  ;;  %v343_v46 = vld [vmem:[%s1872_s20 + $0x458] sm:$0xff] }
  0x4b   : > { %647 = vmatmul.mubr.f32.gmra.mrb[2].mxu1 %v210_v53  ;;  %1591 = vmatprep.subr.bf16.mxu1 %v1736_v3  ;;  %v478_v53 = vld [vmem:[%s2551_s1 + $0x290] sm:$0xff]  ;;  %v251_v47 = vld [vmem:[%s1872_s20 + $0x178] sm:$0xff] }
  0x4c   : > { %872 = vmatmul.mubr.f32.gmra.mrb[2].mxu0 %v212_v54  ;;  %651 = vmatprep.mubr.f32.mxu1 %v217_v55  ;;  %v479_v54 = vld [vmem:[%s2551_s1 + $0x298] sm:$0xff]  ;;  %v258_v55 = vld [vmem:[%s1872_s20 + $0x1b0] sm:$0xff] }
  0x4d   : > { %876 = vmatprep.mubr.f32.mxu0 %v219_v58  ;;  %1565 = vmatpush1.bf16.msra.mxu0 %v1564_v57  ;;  %v260_v57 = vld [vmem:[%s1872_s20 + $0x1c0] sm:$0xff]  ;;  %v1588_v58 = vpack.c.bf16 %v479_v54, %v478_v53  ;;  %v355_v54 = vld [vmem:[%s1872_s20 + $0x4b8] sm:$0xff] }
  0x4e   : > { %1607 = vmatpush1.bf16.msra.mxu1 %v1800_v12  ;;  %1566 = vmatprep.subr.bf16.mxu0 %v1736_v3  ;;  %v224_v12 = vld [vmem:[%s1872_s20 + $0xa0] sm:$0xff] }
  0x4f   : > { %652 = vmatmul.mubr.f32.gmra.mrb[4].mxu1 %v216_v60  ;;  %1592 = vmatprep.subr.bf16.mxu1 %v1736_v3  ;;  %v266_v60 = vld [vmem:[%s1872_s20 + $0x1f0] sm:$0xff]  ;;  %v256_v53 = vld [vmem:[%s1872_s20 + $0x1a0] sm:$0xff] }
  0x50   : > { %877 = vmatmul.mubr.f32.gmra.mrb[4].mxu0 %v218_v61  ;;  %656 = vmatprep.mubr.f32.mxu1 %v223_v63  ;;  %v271_v61 = vld [vmem:[%s1872_s20 + $0x218] sm:$0xff]  ;;  %v273_v63 = vld [vmem:[%s1872_s20 + $0x228] sm:$0xff] }
  0x51   : > { %881 = vmatprep.mubr.f32.mxu0 %v225_v1  ;;  %1568 = vmatpush1.bf16.msra.mxu0 %v1567_v0  ;;  %v272_v0 = vld [vmem:[%s1872_s20 + $0x220] sm:$0xff]  ;;  %v277_v1 = vld [vmem:[%s1872_s20 + $0x248] sm:$0xff] }
  0x52   : > { %1608 = vmatpush1.bf16.msra.mxu1 %v1817_v18  ;;  %1569 = vmatprep.subr.bf16.mxu0 %v1736_v3  ;;  %v230_v18 = vld [vmem:[%s1872_s20 + $0xd0] sm:$0xff] }
  0x53   : > { %657 = vmatmul.mubr.f32.gmra.mrb[6].mxu1 %v222_v6  ;;  %1593 = vmatprep.subr.bf16.mxu1 %v1736_v3  ;;  %v283_v6 = vld [vmem:[%s1872_s20 + $0x278] sm:$0xff] }
  0x54   : > { %882 = vmatmul.mubr.f32.gmra.mrb[6].mxu0 %v224_v12  ;;  %661 = vmatprep.mubr.f32.mxu1 %v229_v7  ;;  %v285_v12 = vld [vmem:[%s1872_s20 + $0x288] sm:$0xff]  ;;  %v284_v7 = vld [vmem:[%s1872_s20 + $0x280] sm:$0xff] }
  0x55   : > { %886 = vmatprep.mubr.f32.mxu0 %v231_v10  ;;  %1571 = vmatpush1.bf16.msra.mxu0 %v1570_v9  ;;  %v289_v9 = vld [vmem:[%s1872_s20 + $0x2a8] sm:$0xff]  ;;  %v291_v10 = vld [vmem:[%s1872_s20 + $0x2b8] sm:$0xff] }
  0x56   : > { %1609 = vmatpush1.bf16.msra.mxu1 %v1836_v24  ;;  %1572 = vmatprep.subr.bf16.mxu0 %v1736_v3  ;;  %v236_v24 = vld [vmem:[%s1872_s20 + $0x100] sm:$0xff] }
  0x57   : > { %662 = vmatmul.mubr.f32.gmra.mrb[8].mxu1 %v228_v15  ;;  %1594 = vmatprep.subr.bf16.mxu1 %v1736_v3  ;;  %v297_v15 = vld [vmem:[%s1872_s20 + $0x2e8] sm:$0xff] }
  0x58   : > { %887 = vmatmul.mubr.f32.gmra.mrb[8].mxu0 %v230_v18  ;;  %666 = vmatprep.mubr.f32.mxu1 %v235_v16  ;;  %v296_v18 = vld [vmem:[%s1872_s20 + $0x2e0] sm:$0xff]  ;;  %v301_v16 = vld [vmem:[%s1872_s20 + $0x308] sm:$0xff] }
  0x59   : > { %891 = vmatprep.mubr.f32.mxu0 %v237_v19  ;;  %1574 = vmatpush1.bf16.msra.mxu0 %v1573_v17  ;;  %v209_v17 = vld [vmem:[%s1872_s20 + $0x28] sm:$0xff]  ;;  %v208_v19 = vld [vmem:[%s1872_s20 + $0x20] sm:$0xff] }
  0x5a   : > { %1575 = vmatprep.subr.bf16.mxu0 %v1736_v3  ;;  %1610 = vmatpush1.bf16.msra.mxu1 %v1854_v30  ;;  %v247_v30 = vld [vmem:[%s1872_s20 + $0x158] sm:$0xff] }
  0x5b   : > { %667 = vmatmul.mubr.f32.gmra.mrb[10].mxu1 %v234_v23  ;;  %1595 = vmatprep.subr.bf16.mxu1 %v1736_v3  ;;  %v313_v23 = vld [vmem:[%s1872_s20 + $0x368] sm:$0xff] }
  0x5c   : > { %892 = vmatmul.mubr.f32.gmra.mrb[10].mxu0 %v236_v24  ;;  %671 = vmatprep.mubr.f32.mxu1 %v241_v25  ;;  %v221_v24 = vld [vmem:[%s1872_s20 + $0x88] sm:$0xff]  ;;  %v312_v25 = vld [vmem:[%s1872_s20 + $0x360] sm:$0xff] }
  0x5d   : > { %896 = vmatprep.mubr.f32.mxu0 %v243_v28  ;;  %1577 = vmatpush1.bf16.msra.mxu0 %v1576_v26  ;;  %v319_v26 = vld [vmem:[%s1872_s20 + $0x398] sm:$0xff] }
  0x5e   : > { %1578 = vmatprep.subr.bf16.mxu0 %v1736_v3  ;;  %1611 = vmatpush1.bf16.msra.mxu1 %v1876_v36  ;;  %v253_v36 = vld [vmem:[%s1872_s20 + $0x188] sm:$0xff]  ;;  %v227_v28 = vld [vmem:[%s1872_s20 + $0xb8] sm:$0xff] }
  0x5f   : > { %672 = vmatmul.mubr.f32.gmra.mrb[12].mxu1 %v240_v32  ;;  %1596 = vmatprep.subr.bf16.mxu1 %v1736_v3  ;;  %v325_v32 = vld [vmem:[%s1872_s20 + $0x3c8] sm:$0xff] }
  0x60   : > { %897 = vmatmul.mubr.f32.gmra.mrb[12].mxu0 %v242_v33  ;;  %676 = vmatprep.mubr.f32.mxu1 %v247_v30  ;;  %v233_v33 = vld [vmem:[%s1872_s20 + $0xe8] sm:$0xff]  ;;  %v324_v30 = vld [vmem:[%s1872_s20 + $0x3c0] sm:$0xff] }
  0x61   : > { %901 = vmatprep.mubr.f32.mxu0 %v249_v37  ;;  %1580 = vmatpush1.bf16.msra.mxu0 %v1579_v35  ;;  %v232_v35 = vld [vmem:[%s1872_s20 + $0xe0] sm:$0xff]  ;;  %v331_v37 = vld [vmem:[%s1872_s20 + $0x3f8] sm:$0xff] }
  0x62   : > { %1581 = vmatprep.subr.bf16.mxu0 %v1736_v3  ;;  %1612 = vmatpush1.bf16.msra.mxu1 %v1895_v44  ;;  %v259_v44 = vld [vmem:[%s1872_s20 + $0x1b8] sm:$0xff] }
  0x63   : > { %677 = vmatmul.mubr.f32.gmra.mrb[14].mxu1 %v246_v40  ;;  %1597 = vmatprep.subr.bf16.mxu1 %v1736_v3  ;;  %v238_v40 = vld [vmem:[%s1872_s20 + $0x110] sm:$0xff] }
  0x64   : > { %902 = vmatmul.mubr.f32.gmra.mrb[14].mxu0 %v248_v42  ;;  %681 = vmatprep.mubr.f32.mxu1 %v253_v36  ;;  %v337_v42 = vld [vmem:[%s1872_s20 + $0x428] sm:$0xff] }
  0x65   : > { %906 = vmatprep.mubr.f32.mxu0 %v255_v45  ;;  %1583 = vmatpush1.bf16.msra.mxu0 %v1582_v43  ;;  %v245_v36 = vld [vmem:[%s1872_s20 + $0x148] sm:$0xff]  ;;  %v336_v43 = vld [vmem:[%s1872_s20 + $0x420] sm:$0xff] }
  0x66   : > { %1584 = vmatprep.subr.bf16.mxu0 %v1736_v3  ;;  %1613 = vmatpush1.bf16.msra.mxu1 %v1912_v50  ;;  %v265_v50 = vld [vmem:[%s1872_s20 + $0x1e8] sm:$0xff]  ;;  %v244_v45 = vld [vmem:[%s1872_s20 + $0x140] sm:$0xff] }
  0x67   : > { %682 = vmatmul.mubr.f32.gmra.mrb[16].mxu1 %v252_v48  ;;  %1598 = vmatprep.subr.bf16.mxu1 %v1736_v3  ;;  %v342_v48 = vld [vmem:[%s1872_s20 + $0x450] sm:$0xff] }
  0x68   : > { %907 = vmatmul.mubr.f32.gmra.mrb[16].mxu0 %v254_v49  ;;  %686 = vmatprep.mubr.f32.mxu1 %v259_v44  ;;  %v250_v49 = vld [vmem:[%s1872_s20 + $0x170] sm:$0xff]  ;;  %v349_v44 = vld [vmem:[%s1872_s20 + $0x488] sm:$0xff] }
  0x69   : > { %911 = vmatprep.mubr.f32.mxu0 %v261_v52  ;;  %1586 = vmatpush1.bf16.msra.mxu0 %v1585_v51  ;;  %v257_v51 = vld [vmem:[%s1872_s20 + $0x1a8] sm:$0xff]  ;;  %v348_v52 = vld [vmem:[%s1872_s20 + $0x480] sm:$0xff] }
  0x6a   : > { %1587 = vmatprep.subr.bf16.mxu0 %v1736_v3  ;;  %1614 = vmatpush1.bf16.msra.mxu1 %v1929_v56  ;;  %v270_v56 = vld [vmem:[%s1872_s20 + $0x210] sm:$0xff] }
  0x6b   : > { %687 = vmatmul.mubr.f32.gmra.mrb[18].mxu1 %v258_v55  ;;  %1599 = vmatprep.subr.bf16.mxu1 %v1736_v3  ;;  %v263_v55 = vld [vmem:[%s1872_s20 + $0x1d8] sm:$0xff] }
  0x6c   : > { %912 = vmatmul.mubr.f32.gmra.mrb[18].mxu0 %v260_v57  ;;  %691 = vmatprep.mubr.f32.mxu1 %v265_v50  ;;  %v354_v57 = vld [vmem:[%s1872_s20 + $0x4b0] sm:$0xff] }
  0x6d   : > { %916 = vmatprep.mubr.f32.mxu0 %v267_v59  ;;  %1589 = vmatpush1.bf16.msra.mxu0 %v1588_v58  ;;  %v262_v50 = vld [vmem:[%s1872_s20 + $0x1d0] sm:$0xff]  ;;  %v361_v58 = vld [vmem:[%s1872_s20 + $0x4e8] sm:$0xff] }
  0x6e   : > { %1615 = vmatpush1.bf16.msra.mxu1 %v1946_v62  ;;  %v276_v62 = vld [vmem:[%s1872_s20 + $0x240] sm:$0xff]  ;;  %v269_v59 = vld [vmem:[%s1872_s20 + $0x208] sm:$0xff] }
  0x6f   : > { %692 = vmatmul.mubr.f32.gmra.mrb[20].mxu1 %v264_v8  ;;  %1600 = vmatprep.subr.bf16.mxu1 %v1736_v3  ;;  %v360_v8 = vld [vmem:[%s1872_s20 + $0x4e0] sm:$0xff] }
  0x70   : > { %917 = vmatmul.mubr.f32.gmra.mrb[20].mxu0 %v266_v60  ;;  %696 = vmatprep.mubr.f32.mxu1 %v271_v61  ;;  %v268_v60 = vld [vmem:[%s1872_s20 + $0x200] sm:$0xff]  ;;  %v367_v61 = vld [vmem:[%s1872_s20 + $0x518] sm:$0xff] }
  0x71   : > { %921 = vmatprep.mubr.f32.mxu0 %v273_v63  ;;  %v275_v63 = vld [vmem:[%s1872_s20 + $0x238] sm:$0xff] }
  0x72   : > { %1616 = vmatpush1.bf16.msra.mxu1 %v1963_v5  ;;  %v282_v5 = vld [vmem:[%s1872_s20 + $0x270] sm:$0xff] }
  0x73   : > { %697 = vmatmul.mubr.f32.gmra.mrb[22].mxu1 %v270_v56  ;;  %1601 = vmatprep.subr.bf16.mxu1 %v1736_v3  ;;  %v366_v56 = vld [vmem:[%s1872_s20 + $0x510] sm:$0xff] }
  0x74   : > { %922 = vmatmul.mubr.f32.gmra.mrb[22].mxu0 %v272_v0  ;;  %701 = vmatprep.mubr.f32.mxu1 %v277_v1  ;;  %v274_v0 = vld [vmem:[%s1872_s20 + $0x230] sm:$0xff]  ;;  %v373_v1 = vld [vmem:[%s1872_s20 + $0x548] sm:$0xff] }
  0x75   : > { %926 = vmatprep.mubr.f32.mxu0 %v279_v2  ;;  %v281_v2 = vld [vmem:[%s1872_s20 + $0x268] sm:$0xff] }
  0x76   : > { %1617 = vmatpush1.bf16.msra.mxu1 %v1980_v13  ;;  %v288_v13 = vld [vmem:[%s1872_s20 + $0x2a0] sm:$0xff] }
  0x77   : > { %702 = vmatmul.mubr.f32.gmra.mrb[24].mxu1 %v276_v62  ;;  %1602 = vmatprep.subr.bf16.mxu1 %v1736_v3  ;;  %v372_v62 = vld [vmem:[%s1872_s20 + $0x540] sm:$0xff] }
  0x78   : > { %927 = vmatmul.mubr.f32.gmra.mrb[24].mxu0 %v278_v4  ;;  %706 = vmatprep.mubr.f32.mxu1 %v283_v6  ;;  %v280_v4 = vld [vmem:[%s1872_s20 + $0x260] sm:$0xff]  ;;  %v379_v6 = vld [vmem:[%s1872_s20 + $0x578] sm:$0xff] }
  0x79   : > { %931 = vmatprep.mubr.f32.mxu0 %v285_v12  ;;  %v287_v12 = vld [vmem:[%s1872_s20 + $0x298] sm:$0xff] }
  0x7a   : > { %1618 = vmatpush1.bf16.msra.mxu1 %v1997_v20  ;;  %v294_v20 = vld [vmem:[%s1872_s20 + $0x2d0] sm:$0xff] }
  0x7b   : > { %707 = vmatmul.mubr.f32.gmra.mrb[26].mxu1 %v282_v5  ;;  %1603 = vmatprep.subr.bf16.mxu1 %v1736_v3  ;;  %v378_v5 = vld [vmem:[%s1872_s20 + $0x570] sm:$0xff] }
  0x7c   : > { %932 = vmatmul.mubr.f32.gmra.mrb[26].mxu0 %v284_v7  ;;  %711 = vmatprep.mubr.f32.mxu1 %v289_v9  ;;  %v286_v7 = vld [vmem:[%s1872_s20 + $0x290] sm:$0xff]  ;;  %v385_v9 = vld [vmem:[%s1872_s20 + $0x5a8] sm:$0xff] }
  0x7d   : > { %936 = vmatprep.mubr.f32.mxu0 %v291_v10  ;;  %v293_v10 = vld [vmem:[%s1872_s20 + $0x2c8] sm:$0xff] }
  0x7e   : > { %1619 = vmatpush1.bf16.msra.mxu1 %v2014_v27  ;;  %v300_v27 = vld [vmem:[%s1872_s20 + $0x300] sm:$0xff] }
  0x7f   : > { %712 = vmatmul.mubr.f32.gmra.mrb[28].mxu1 %v288_v13  ;;  %1604 = vmatprep.subr.bf16.mxu1 %v1736_v3  ;;  %v384_v13 = vld [vmem:[%s1872_s20 + $0x5a0] sm:$0xff] }
  0x80   : > { %937 = vmatmul.mubr.f32.gmra.mrb[28].mxu0 %v290_v11  ;;  %716 = vmatprep.mubr.f32.mxu1 %v295_v14  ;;  %v292_v11 = vld [vmem:[%s1872_s20 + $0x2c0] sm:$0xff]  ;;  %v391_v14 = vld [vmem:[%s1872_s20 + $0x5d8] sm:$0xff] }
  0x81   : > { %941 = vmatprep.mubr.f32.mxu0 %v297_v15  ;;  %v299_v15 = vld [vmem:[%s1872_s20 + $0x2f8] sm:$0xff] }
  0x82   : > { %1620 = vmatpush1.bf16.msra.mxu1 %v2031_v34  ;;  %v306_v34 = vld [vmem:[%s1872_s20 + $0x330] sm:$0xff] }
  0x83   : > { %717 = vmatmul.mubr.f32.gmra.mrb[30].mxu1 %v294_v20  ;;  %1605 = vmatprep.subr.bf16.mxu1 %v1736_v3  ;;  %v214_v3 = vld [vmem:[%s1872_s20 + $0x50] sm:$0xff] }
  0x84   : > { %942 = vmatmul.mubr.f32.gmra.mrb[30].mxu0 %v296_v18  ;;  %721 = vmatprep.mubr.f32.mxu1 %v301_v16  ;;  %v390_v20 = vld [vmem:[%s1872_s20 + $0x5d0] sm:$0xff]  ;;  %v303_v16 = vld [vmem:[%s1872_s20 + $0x318] sm:$0xff] }
  0x85   : > { %1428 = vmatprep.mubr.msk.f32.mxu0 %vm480_vm0, %v209_v17  ;;  %v298_v18 = vld [vmem:[%s1872_s20 + $0x2f0] sm:$0xff]  ;;  %v305_v17 = vld [vmem:[%s1872_s20 + $0x328] sm:$0xff] }
  0x86   : > { %1621 = vmatpush1.bf16.msra.mxu1 %v2048_v41  ;;  %v220_v41 = vld [vmem:[%s1872_s20 + $0x80] sm:$0xff] }
  0x87   : > { %722 = vmatmul.mubr.f32.gmra.mrb[32].mxu1 %v300_v27  ;;  %v302_v27 = vld [vmem:[%s1872_s20 + $0x310] sm:$0xff] }
  0x88   : > { %1092 = vmatmul.mubr.f32.vlgmr.msra.gmra.mrb[0].mxu0 %v208_v19  ;;  %726 = vmatprep.mubr.f32.mxu1 %v307_v21  ;;  %v304_v19 = vld [vmem:[%s1872_s20 + $0x320] sm:$0xff]  ;;  %v309_v21 = vld [vmem:[%s1872_s20 + $0x348] sm:$0xff] }
  0x89   : > { %1429 = vmatprep.mubr.msk.f32.mxu0 %vm480_vm0, %v215_v22  ;;  %v311_v22 = vld [vmem:[%s1872_s20 + $0x358] sm:$0xff] }
  0x8b   : > { %727 = vmatmul.mubr.f32.gmra.mrb[34].mxu1 %v306_v34  ;;  %v308_v34 = vld [vmem:[%s1872_s20 + $0x340] sm:$0xff] }
  0x8c   : > { %1097 = vmatmul.mubr.f32.gmra.mrb[2].mxu0 %v214_v3  ;;  %731 = vmatprep.mubr.f32.mxu1 %v313_v23  ;;  %v310_v3 = vld [vmem:[%s1872_s20 + $0x350] sm:$0xff]  ;;  %v315_v23 = vld [vmem:[%s1872_s20 + $0x378] sm:$0xff] }
  0x8d   : > { %1430 = vmatprep.mubr.msk.f32.mxu0 %vm480_vm0, %v221_v24  ;;  %v317_v24 = vld [vmem:[%s1872_s20 + $0x388] sm:$0xff] }
  0x8f   : > { %732 = vmatmul.mubr.f32.gmra.mrb[36].mxu1 %v312_v25  ;;  %v314_v25 = vld [vmem:[%s1872_s20 + $0x370] sm:$0xff] }
  0x90   : > { %1102 = vmatmul.mubr.f32.gmra.mrb[4].mxu0 %v220_v41  ;;  %736 = vmatprep.mubr.f32.mxu1 %v319_v26  ;;  %v316_v41 = vld [vmem:[%s1872_s20 + $0x380] sm:$0xff]  ;;  %v321_v26 = vld [vmem:[%s1872_s20 + $0x3a8] sm:$0xff] }
  0x91   : > { %1431 = vmatprep.mubr.msk.f32.mxu0 %vm480_vm0, %v227_v28  ;;  %v323_v28 = vld [vmem:[%s1872_s20 + $0x3b8] sm:$0xff] }
  0x93   : > { %737 = vmatmul.mubr.f32.gmra.mrb[38].mxu1 %v318_v29  ;;  %v320_v29 = vld [vmem:[%s1872_s20 + $0x3a0] sm:$0xff] }
  0x94   : > { %1107 = vmatmul.mubr.f32.gmra.mrb[6].mxu0 %v226_v31  ;;  %741 = vmatprep.mubr.f32.mxu1 %v325_v32  ;;  %v322_v31 = vld [vmem:[%s1872_s20 + $0x3b0] sm:$0xff]  ;;  %v327_v32 = vld [vmem:[%s1872_s20 + $0x3d8] sm:$0xff] }
  0x95   : > { %1432 = vmatprep.mubr.msk.f32.mxu0 %vm480_vm0, %v233_v33  ;;  %v329_v33 = vld [vmem:[%s1872_s20 + $0x3e8] sm:$0xff] }
  0x97   : > { %742 = vmatmul.mubr.f32.gmra.mrb[40].mxu1 %v324_v30  ;;  %v326_v30 = vld [vmem:[%s1872_s20 + $0x3d0] sm:$0xff] }
  0x98   : > { %1112 = vmatmul.mubr.f32.gmra.mrb[8].mxu0 %v232_v35  ;;  %746 = vmatprep.mubr.f32.mxu1 %v331_v37  ;;  %v328_v35 = vld [vmem:[%s1872_s20 + $0x3e0] sm:$0xff]  ;;  %v333_v37 = vld [vmem:[%s1872_s20 + $0x408] sm:$0xff] }
  0x99   : > { %1433 = vmatprep.mubr.msk.f32.mxu0 %vm480_vm0, %v239_v38  ;;  %v335_v38 = vld [vmem:[%s1872_s20 + $0x418] sm:$0xff] }
  0x9b   : > { %747 = vmatmul.mubr.f32.gmra.mrb[42].mxu1 %v330_v39  ;;  %v332_v39 = vld [vmem:[%s1872_s20 + $0x400] sm:$0xff] }
  0x9c   : > { %1117 = vmatmul.mubr.f32.gmra.mrb[10].mxu0 %v238_v40  ;;  %751 = vmatprep.mubr.f32.mxu1 %v337_v42  ;;  %v334_v40 = vld [vmem:[%s1872_s20 + $0x410] sm:$0xff]  ;;  %v339_v42 = vld [vmem:[%s1872_s20 + $0x438] sm:$0xff] }
  0x9d   : > { %1434 = vmatprep.mubr.msk.f32.mxu0 %vm480_vm0, %v245_v36  ;;  %v341_v36 = vld [vmem:[%s1872_s20 + $0x448] sm:$0xff] }
  0x9f   : > { %752 = vmatmul.mubr.f32.gmra.mrb[44].mxu1 %v336_v43  ;;  %v338_v43 = vld [vmem:[%s1872_s20 + $0x430] sm:$0xff] }
  0xa0   : > { %1122 = vmatmul.mubr.f32.gmra.mrb[12].mxu0 %v244_v45  ;;  %756 = vmatprep.mubr.f32.mxu1 %v343_v46  ;;  %v340_v45 = vld [vmem:[%s1872_s20 + $0x440] sm:$0xff]  ;;  %v345_v46 = vld [vmem:[%s1872_s20 + $0x468] sm:$0xff] }
  0xa1   : > { %1435 = vmatprep.mubr.msk.f32.mxu0 %vm480_vm0, %v251_v47  ;;  %v347_v47 = vld [vmem:[%s1872_s20 + $0x478] sm:$0xff] }
  0xa3   : > { %757 = vmatmul.mubr.f32.gmra.mrb[46].mxu1 %v342_v48  ;;  %v344_v48 = vld [vmem:[%s1872_s20 + $0x460] sm:$0xff] }
  0xa4   : > { %1127 = vmatmul.mubr.f32.gmra.mrb[14].mxu0 %v250_v49  ;;  %761 = vmatprep.mubr.f32.mxu1 %v349_v44  ;;  %v346_v49 = vld [vmem:[%s1872_s20 + $0x470] sm:$0xff]  ;;  %v351_v44 = vld [vmem:[%s1872_s20 + $0x498] sm:$0xff] }
  0xa5   : > { %1436 = vmatprep.mubr.msk.f32.mxu0 %vm480_vm0, %v257_v51  ;;  %v353_v51 = vld [vmem:[%s1872_s20 + $0x4a8] sm:$0xff] }
  0xa7   : > { %762 = vmatmul.mubr.f32.gmra.mrb[48].mxu1 %v348_v52  ;;  %v350_v52 = vld [vmem:[%s1872_s20 + $0x490] sm:$0xff] }
  0xa8   : > { %1132 = vmatmul.mubr.f32.gmra.mrb[16].mxu0 %v256_v53  ;;  %766 = vmatprep.mubr.f32.mxu1 %v355_v54  ;;  %v352_v53 = vld [vmem:[%s1872_s20 + $0x4a0] sm:$0xff]  ;;  %v357_v54 = vld [vmem:[%s1872_s20 + $0x4c8] sm:$0xff] }
  0xa9   : > { %1437 = vmatprep.mubr.msk.f32.mxu0 %vm480_vm0, %v263_v55  ;;  %v359_v55 = vld [vmem:[%s1872_s20 + $0x4d8] sm:$0xff] }
  0xab   : > { %767 = vmatmul.mubr.f32.gmra.mrb[50].mxu1 %v354_v57  ;;  %v356_v57 = vld [vmem:[%s1872_s20 + $0x4c0] sm:$0xff] }
  0xac   : > { %1137 = vmatmul.mubr.f32.gmra.mrb[18].mxu0 %v262_v50  ;;  %771 = vmatprep.mubr.f32.mxu1 %v361_v58  ;;  %v358_v50 = vld [vmem:[%s1872_s20 + $0x4d0] sm:$0xff]  ;;  %v363_v58 = vld [vmem:[%s1872_s20 + $0x4f8] sm:$0xff] }
  0xad   : > { %1438 = vmatprep.mubr.msk.f32.mxu0 %vm480_vm0, %v269_v59  ;;  %v365_v59 = vld [vmem:[%s1872_s20 + $0x508] sm:$0xff] }
  0xaf   : > { %772 = vmatmul.mubr.f32.gmra.mrb[52].mxu1 %v360_v8  ;;  %v362_v8 = vld [vmem:[%s1872_s20 + $0x4f0] sm:$0xff] }
  0xb0   : > { %1142 = vmatmul.mubr.f32.gmra.mrb[20].mxu0 %v268_v60  ;;  %776 = vmatprep.mubr.f32.mxu1 %v367_v61  ;;  %v364_v60 = vld [vmem:[%s1872_s20 + $0x500] sm:$0xff]  ;;  %v369_v61 = vld [vmem:[%s1872_s20 + $0x528] sm:$0xff] }
  0xb1   : > { %1439 = vmatprep.mubr.msk.f32.mxu0 %vm480_vm0, %v275_v63  ;;  %v371_v63 = vld [vmem:[%s1872_s20 + $0x538] sm:$0xff] }
  0xb3   : > { %777 = vmatmul.mubr.f32.gmra.mrb[54].mxu1 %v366_v56  ;;  %v368_v56 = vld [vmem:[%s1872_s20 + $0x520] sm:$0xff] }
  0xb4   : > { %1147 = vmatmul.mubr.f32.gmra.mrb[22].mxu0 %v274_v0  ;;  %781 = vmatprep.mubr.f32.mxu1 %v373_v1  ;;  %v370_v0 = vld [vmem:[%s1872_s20 + $0x530] sm:$0xff]  ;;  %v375_v1 = vld [vmem:[%s1872_s20 + $0x558] sm:$0xff] }
  0xb5   : > { %1440 = vmatprep.mubr.msk.f32.mxu0 %vm480_vm0, %v281_v2  ;;  %v377_v2 = vld [vmem:[%s1872_s20 + $0x568] sm:$0xff] }
  0xb7   : > { %782 = vmatmul.mubr.f32.gmra.mrb[56].mxu1 %v372_v62  ;;  %v374_v62 = vld [vmem:[%s1872_s20 + $0x550] sm:$0xff] }
  0xb8   : > { %1152 = vmatmul.mubr.f32.gmra.mrb[24].mxu0 %v280_v4  ;;  %786 = vmatprep.mubr.f32.mxu1 %v379_v6  ;;  %v376_v4 = vld [vmem:[%s1872_s20 + $0x560] sm:$0xff]  ;;  %v381_v6 = vld [vmem:[%s1872_s20 + $0x588] sm:$0xff] }
  0xb9   : > { %1441 = vmatprep.mubr.msk.f32.mxu0 %vm480_vm0, %v287_v12  ;;  %v383_v12 = vld [vmem:[%s1872_s20 + $0x598] sm:$0xff] }
  0xbb   : > { %787 = vmatmul.mubr.f32.gmra.mrb[58].mxu1 %v378_v5  ;;  %v380_v5 = vld [vmem:[%s1872_s20 + $0x580] sm:$0xff] }
  0xbc   : > { %1157 = vmatmul.mubr.f32.gmra.mrb[26].mxu0 %v286_v7  ;;  %791 = vmatprep.mubr.f32.mxu1 %v385_v9  ;;  %v382_v7 = vld [vmem:[%s1872_s20 + $0x590] sm:$0xff]  ;;  %v387_v9 = vld [vmem:[%s1872_s20 + $0x5b8] sm:$0xff] }
  0xbd   : > { %1442 = vmatprep.mubr.msk.f32.mxu0 %vm480_vm0, %v293_v10  ;;  %v389_v10 = vld [vmem:[%s1872_s20 + $0x5c8] sm:$0xff] }
  0xbf   : > { %792 = vmatmul.mubr.f32.gmra.mrb[60].mxu1 %v384_v13  ;;  %v386_v13 = vld [vmem:[%s1872_s20 + $0x5b0] sm:$0xff] }
  0xc0   : > { %1162 = vmatmul.mubr.f32.gmra.mrb[28].mxu0 %v292_v11  ;;  %796 = vmatprep.mubr.f32.mxu1 %v391_v14  ;;  %v388_v11 = vld [vmem:[%s1872_s20 + $0x5c0] sm:$0xff]  ;;  %v393_v14 = vld [vmem:[%s1872_s20 + $0x5e8] sm:$0xff] }
  0xc1   : > { %1443 = vmatprep.mubr.msk.f32.mxu0 %vm480_vm0, %v299_v15  ;;  %v395_v15 = vld [vmem:[%s1872_s20 + $0x5f8] sm:$0xff] }
  0xc3   : > { %797 = vmatmul.mubr.f32.gmra.mrb[62].mxu1 %v390_v20  ;;  %v392_v20 = vld [vmem:[%s1872_s20 + $0x5e0] sm:$0xff] }
  0xc4   : > { %1167 = vmatmul.mubr.f32.gmra.mrb[30].mxu0 %v298_v18  ;;  %946 = vmatprep.mubr.f32.mxu1 %v303_v16  ;;  %v394_v18 = vld [vmem:[%s1872_s20 + $0x5f0] sm:$0xff] }
  0xc5   : > { %1444 = vmatprep.mubr.msk.f32.mxu0 %vm480_vm0, %v305_v17 }
  0xc7   : > { %947 = vmatmul.mubr.f32.vlgmr.msra.gmra.mrb[32].mxu1 %v302_v27 }
  0xc8   : > { %1172 = vmatmul.mubr.f32.gmra.mrb[32].mxu0 %v304_v19  ;;  %951 = vmatprep.mubr.f32.mxu1 %v309_v21 }
  0xc9   : > { %1445 = vmatprep.mubr.msk.f32.mxu0 %vm480_vm0, %v311_v22 }
  0xcb   : > { %952 = vmatmul.mubr.f32.gmra.mrb[34].mxu1 %v308_v34 }
  0xcc   : > { %1177 = vmatmul.mubr.f32.gmra.mrb[34].mxu0 %v310_v3  ;;  %956 = vmatprep.mubr.f32.mxu1 %v315_v23 }
  0xcd   : > { %1446 = vmatprep.mubr.msk.f32.mxu0 %vm480_vm0, %v317_v24 }
  0xcf   : > { %957 = vmatmul.mubr.f32.gmra.mrb[36].mxu1 %v314_v25 }
  0xd0   : > { %1182 = vmatmul.mubr.f32.gmra.mrb[36].mxu0 %v316_v41  ;;  %961 = vmatprep.mubr.f32.mxu1 %v321_v26 }
  0xd1   : > { %1447 = vmatprep.mubr.msk.f32.mxu0 %vm480_vm0, %v323_v28 }
  0xd3   : > { %962 = vmatmul.mubr.f32.gmra.mrb[38].mxu1 %v320_v29 }
  0xd4   : > { %1187 = vmatmul.mubr.f32.gmra.mrb[38].mxu0 %v322_v31  ;;  %966 = vmatprep.mubr.f32.mxu1 %v327_v32 }
  0xd5   : > { %1448 = vmatprep.mubr.msk.f32.mxu0 %vm480_vm0, %v329_v33 }
  0xd7   : > { %967 = vmatmul.mubr.f32.gmra.mrb[40].mxu1 %v326_v30 }
  0xd8   : > { %1192 = vmatmul.mubr.f32.gmra.mrb[40].mxu0 %v328_v35  ;;  %971 = vmatprep.mubr.f32.mxu1 %v333_v37 }
  0xd9   : > { %1449 = vmatprep.mubr.msk.f32.mxu0 %vm480_vm0, %v335_v38 }
  0xdb   : > { %972 = vmatmul.mubr.f32.gmra.mrb[42].mxu1 %v332_v39 }
  0xdc   : > { %1197 = vmatmul.mubr.f32.gmra.mrb[42].mxu0 %v334_v40  ;;  %976 = vmatprep.mubr.f32.mxu1 %v339_v42 }
  0xdd   : > { %1450 = vmatprep.mubr.msk.f32.mxu0 %vm480_vm0, %v341_v36 }
  0xdf   : > { %977 = vmatmul.mubr.f32.gmra.mrb[44].mxu1 %v338_v43 }
  0xe0   : > { %1202 = vmatmul.mubr.f32.gmra.mrb[44].mxu0 %v340_v45  ;;  %981 = vmatprep.mubr.f32.mxu1 %v345_v46 }
  0xe1   : > { %1451 = vmatprep.mubr.msk.f32.mxu0 %vm480_vm0, %v347_v47 }
  0xe3   : > { %982 = vmatmul.mubr.f32.gmra.mrb[46].mxu1 %v344_v48 }
  0xe4   : > { %1207 = vmatmul.mubr.f32.gmra.mrb[46].mxu0 %v346_v49  ;;  %986 = vmatprep.mubr.f32.mxu1 %v351_v44 }
  0xe5   : > { %1452 = vmatprep.mubr.msk.f32.mxu0 %vm480_vm0, %v353_v51  ;;  %v2397_v51 = vld [vmem:[%s2552_s2] ss:$0 sm:$0xff] }
  0xe7   : > { %987 = vmatmul.mubr.f32.gmra.mrb[48].mxu1 %v350_v52 }
  0xe8   : > { %1212 = vmatmul.mubr.f32.gmra.mrb[48].mxu0 %v352_v53  ;;  %991 = vmatprep.mubr.f32.mxu1 %v357_v54  ;;  %v2403_v54 = vld [vmem:[%s2553_s3] ss:$0 sm:$0xff] }
  0xe9   : > { %1453 = vmatprep.mubr.msk.f32.mxu0 %vm480_vm0, %v359_v55 }
  0xeb   : > { %992 = vmatmul.mubr.f32.gmra.mrb[50].mxu1 %v356_v57 }
  0xec   : > { %1217 = vmatmul.mubr.f32.gmra.mrb[50].mxu0 %v358_v50  ;;  %996 = vmatprep.mubr.f32.mxu1 %v363_v58 }
  0xed   : > { %1454 = vmatprep.mubr.msk.f32.mxu0 %vm480_vm0, %v365_v59 }
  0xef   : > { %997 = vmatmul.mubr.f32.gmra.mrb[52].mxu1 %v362_v8 }
  0xf0   : > { %1222 = vmatmul.mubr.f32.gmra.mrb[52].mxu0 %v364_v60  ;;  %1001 = vmatprep.mubr.f32.mxu1 %v369_v61 }
  0xf1   : > { %1455 = vmatprep.mubr.msk.f32.mxu0 %vm480_vm0, %v371_v63 }
  0xf3   : > { %1002 = vmatmul.mubr.f32.gmra.mrb[54].mxu1 %v368_v56 }
  0xf4   : > { %1227 = vmatmul.mubr.f32.gmra.mrb[54].mxu0 %v370_v0  ;;  %1006 = vmatprep.mubr.f32.mxu1 %v375_v1 }
  0xf5   : > { %1456 = vmatprep.mubr.msk.f32.mxu0 %vm480_vm0, %v377_v2 }
  0xf7   : > { %1007 = vmatmul.mubr.f32.gmra.mrb[56].mxu1 %v374_v62 }
  0xf8   : > { %1232 = vmatmul.mubr.f32.gmra.mrb[56].mxu0 %v376_v4  ;;  %1011 = vmatprep.mubr.f32.mxu1 %v381_v6 }
  0xf9   : > { %1457 = vmatprep.mubr.msk.f32.mxu0 %vm480_vm0, %v383_v12 }
  0xfb   : > { %1012 = vmatmul.mubr.f32.gmra.mrb[58].mxu1 %v380_v5 }
  0xfc   : > { %1237 = vmatmul.mubr.f32.gmra.mrb[58].mxu0 %v382_v7  ;;  %1016 = vmatprep.mubr.f32.mxu1 %v387_v9 }
  0xfd   : > { %1458 = vmatprep.mubr.msk.f32.mxu0 %vm480_vm0, %v389_v10 }
  0xff   : > { %1017 = vmatmul.mubr.f32.gmra.mrb[60].mxu1 %v386_v13 }
 0x100   : > { %1242 = vmatmul.mubr.f32.gmra.mrb[60].mxu0 %v388_v11  ;;  %1021 = vmatprep.mubr.f32.mxu1 %v393_v14 }
 0x101   : > { %1459 = vmatprep.mubr.msk.f32.mxu0 %vm480_vm0, %v395_v15 }
 0x103   : > { %1022 = vmatmul.mubr.f32.gmra.mrb[62].mxu1 %v392_v20 }
 0x104   : > { %1247 = vmatmul.mubr.f32.gmra.mrb[62].mxu0 %v394_v18 }
 0x11a   : > { %v643_v16 = vpop.f32.mrb[0].mxu1 }
 0x11b   : > { %v645_v17 = vpop.f32.mrb[1].mxu1 }
 0x11e   : > { %v648_v27 = vpop.f32.mrb[2].mxu1 }
 0x11f   : > { %v650_v19 = vpop.f32.mrb[3].mxu1 }
 0x122   : > { %v653_v21 = vpop.f32.mrb[4].mxu1 }
 0x123   : > { %v655_v22 = vpop.f32.mrb[5].mxu1 }
 0x126   : > { %v658_v34 = vpop.f32.mrb[6].mxu1 }
 0x127   : > { %v660_v3 = vpop.f32.mrb[7].mxu1 }
 0x12a   : > { %v663_v23 = vpop.f32.mrb[8].mxu1 }
 0x12b   : > { %v665_v24 = vpop.f32.mrb[9].mxu1 }
 0x12e   : > { %v668_v25 = vpop.f32.mrb[10].mxu1 }
 0x12f   : > { %v670_v41 = vpop.f32.mrb[11].mxu1 }
 0x132   : > { %v673_v26 = vpop.f32.mrb[12].mxu1 }
 0x133   : > { %v675_v28 = vpop.f32.mrb[13].mxu1 }
 0x136   : > { %v2376_v29 = vpop.f32.mrb[14].mxu1 }
 0x137   : > { %v680_v31 = vpop.f32.mrb[15].mxu1 }
 0x13a   : > { %v2378_v32 = vpop.f32.mrb[16].mxu1 }
 0x13b   : > { %v685_v33 = vpop.f32.mrb[17].mxu1 }
 0x13e   : > { %v2380_v30 = vpop.f32.mrb[18].mxu1 }
 0x13f   : > { %v690_v35 = vpop.f32.mrb[19].mxu1 }
 0x142   : > { %v2382_v37 = vpop.f32.mrb[20].mxu1 }
 0x143   : > { %v695_v38 = vpop.f32.mrb[21].mxu1 }
 0x146   : > { %v2384_v39 = vpop.f32.mrb[22].mxu1 }
 0x147   : > { %v700_v40 = vpop.f32.mrb[23].mxu1 }
 0x14a   : > { %v2386_v42 = vpop.f32.mrb[24].mxu1 }
 0x14b   : > { %v705_v36 = vpop.f32.mrb[25].mxu1 }
 0x14e   : > { %v2388_v43 = vpop.f32.mrb[26].mxu1 }
 0x14f   : > { %v710_v45 = vpop.f32.mrb[27].mxu1 }
 0x152   : > { %v2390_v46 = vpop.f32.mrb[28].mxu1 }
 0x153   : > { %v715_v47 = vpop.f32.mrb[29].mxu1 }
 0x156   : > { %v2392_v48 = vpop.f32.mrb[30].mxu1 }
 0x157   : > { %v720_v49 = vpop.f32.mrb[31].mxu1 }
 0x15b   : > { %v1093_v44 = vpop.f32.mrb[0].mxu0 }
 0x15c   : > { %v1622_v52 = vadd.f32 %v1093_v44, %v643_v16  ;;  %v1095_v53 = vpop.f32.mrb[1].mxu0 }
 0x15e   : > { %v1259_v55 = vmul.f32 %v1622_v52, %v2397_v51 }
 0x15f   : > { %v1098_v57 = vpop.f32.mrb[2].mxu0 }
 0x160   : > { %v1298_v50 = vadd.f32 %v2403_v54, %v1259_v55  ;;  %v1623_v58 = vadd.f32 %v1098_v57, %v648_v27  ;;  %v1100_v59 = vpop.f32.mrb[3].mxu0 }
 0x162   : > { %1331 = vst.msk [vmem:[%s2409_s6] sm:$0xff] %vm1330_vm1, %v1298_v50  ;;  %v1260_v8 = vmul.f32 %v1623_v58, %v2397_v51 }
 0x163   : > { %v1103_v60 = vpop.f32.mrb[4].mxu0 }
 0x164   : > { %v1299_v61 = vadd.f32 %v2403_v54, %v1260_v8  ;;  %v1624_v63 = vadd.f32 %v1103_v60, %v653_v21  ;;  %v1105_v56 = vpop.f32.mrb[5].mxu0 }
 0x166   : > { %1332 = vst.msk [vmem:[%s2409_s6 + $0x8] sm:$0xff] %vm1330_vm1, %v1299_v61  ;;  %v1261_v0 = vmul.f32 %v1624_v63, %v2397_v51 }
 0x167   : > { %v1108_v1 = vpop.f32.mrb[6].mxu0 }
 0x168   : > { %v1300_v2 = vadd.f32 %v2403_v54, %v1261_v0  ;;  %v1625_v62 = vadd.f32 %v1108_v1, %v658_v34  ;;  %v1110_v4 = vpop.f32.mrb[7].mxu0 }
 0x16a   : > { %1333 = vst.msk [vmem:[%s2409_s6 + $0x10] sm:$0xff] %vm1330_vm1, %v1300_v2  ;;  %v1262_v6 = vmul.f32 %v1625_v62, %v2397_v51 }
 0x16b   : > { %v1113_v12 = vpop.f32.mrb[8].mxu0 }
 0x16c   : > { %v1301_v5 = vadd.f32 %v2403_v54, %v1262_v6  ;;  %v1626_v7 = vadd.f32 %v1113_v12, %v663_v23  ;;  %v1115_v9 = vpop.f32.mrb[9].mxu0 }
 0x16e   : > { %1334 = vst.msk [vmem:[%s2409_s6 + $0x18] sm:$0xff] %vm1330_vm1, %v1301_v5  ;;  %v1263_v10 = vmul.f32 %v1626_v7, %v2397_v51 }
 0x16f   : > { %v1118_v13 = vpop.f32.mrb[10].mxu0 }
 0x170   : > { %v1302_v11 = vadd.f32 %v2403_v54, %v1263_v10  ;;  %v1627_v14 = vadd.f32 %v1118_v13, %v668_v25  ;;  %v1120_v15 = vpop.f32.mrb[11].mxu0 }
 0x172   : > { %1335 = vst.msk [vmem:[%s2409_s6 + $0x20] sm:$0xff] %vm1330_vm1, %v1302_v11  ;;  %v1264_v20 = vmul.f32 %v1627_v14, %v2397_v51 }
 0x173   : > { %v1123_v18 = vpop.f32.mrb[12].mxu0 }
 0x174   : > { %v1303_v16 = vadd.f32 %v2403_v54, %v1264_v20  ;;  %v1628_v17 = vadd.f32 %v1123_v18, %v673_v26  ;;  %v1125_v27 = vpop.f32.mrb[13].mxu0 }
 0x176   : > { %1336 = vst.msk [vmem:[%s2409_s6 + $0x28] sm:$0xff] %vm1330_vm1, %v1303_v16  ;;  %v1265_v19 = vmul.f32 %v1628_v17, %v2397_v51 }
 0x177   : > { %v1128_v21 = vpop.f32.mrb[14].mxu0 }
 0x178   : > { %v1304_v22 = vadd.f32 %v2403_v54, %v1265_v19  ;;  %v1629_v34 = vadd.f32 %v1128_v21, %v2376_v29  ;;  %v1130_v3 = vpop.f32.mrb[15].mxu0 }
 0x17a   : > { %1337 = vst.msk [vmem:[%s2409_s6 + $0x30] sm:$0xff] %vm1330_vm1, %v1304_v22  ;;  %v1266_v23 = vmul.f32 %v1629_v34, %v2397_v51 }
 0x17b   : > { %v1133_v24 = vpop.f32.mrb[16].mxu0 }
 0x17c   : > { %v1305_v25 = vadd.f32 %v2403_v54, %v1266_v23  ;;  %v1630_v41 = vadd.f32 %v1133_v24, %v2378_v32  ;;  %v1135_v26 = vpop.f32.mrb[17].mxu0 }
 0x17e   : > { %1338 = vst.msk [vmem:[%s2409_s6 + $0x38] sm:$0xff] %vm1330_vm1, %v1305_v25  ;;  %v1267_v28 = vmul.f32 %v1630_v41, %v2397_v51 }
 0x17f   : > { %v1138_v31 = vpop.f32.mrb[18].mxu0 }
 0x180   : > { %v1306_v29 = vadd.f32 %v2403_v54, %v1267_v28  ;;  %v1631_v33 = vadd.f32 %v1138_v31, %v2380_v30  ;;  %v1140_v35 = vpop.f32.mrb[19].mxu0 }
 0x182   : > { %1339 = vst.msk [vmem:[%s2409_s6 + $0x40] sm:$0xff] %vm1330_vm1, %v1306_v29  ;;  %v1268_v38 = vmul.f32 %v1631_v33, %v2397_v51 }
 0x183   : > { %v1143_v40 = vpop.f32.mrb[20].mxu0 }
 0x184   : > { %v1307_v32 = vadd.f32 %v2403_v54, %v1268_v38  ;;  %v1632_v36 = vadd.f32 %v1143_v40, %v2382_v37  ;;  %v1145_v45 = vpop.f32.mrb[21].mxu0 }
 0x186   : > { %1340 = vst.msk [vmem:[%s2409_s6 + $0x48] sm:$0xff] %vm1330_vm1, %v1307_v32  ;;  %v1269_v47 = vmul.f32 %v1632_v36, %v2397_v51 }
 0x187   : > { %v1148_v49 = vpop.f32.mrb[22].mxu0 }
 0x188   : > { %v1308_v30 = vadd.f32 %v2403_v54, %v1269_v47  ;;  %v1633_v44 = vadd.f32 %v1148_v49, %v2384_v39  ;;  %v1150_v52 = vpop.f32.mrb[23].mxu0 }
 0x18a   : > { %1341 = vst.msk [vmem:[%s2409_s6 + $0x50] sm:$0xff] %vm1330_vm1, %v1308_v30  ;;  %v1270_v53 = vmul.f32 %v1633_v44, %v2397_v51 }
 0x18b   : > { %v1153_v55 = vpop.f32.mrb[24].mxu0 }
 0x18c   : > { %v1309_v37 = vadd.f32 %v2403_v54, %v1270_v53  ;;  %v1634_v57 = vadd.f32 %v1153_v55, %v2386_v42  ;;  %v1155_v50 = vpop.f32.mrb[25].mxu0 }
 0x18e   : > { %1342 = vst.msk [vmem:[%s2409_s6 + $0x58] sm:$0xff] %vm1330_vm1, %v1309_v37  ;;  %v1271_v58 = vmul.f32 %v1634_v57, %v2397_v51 }
 0x18f   : > { %v1158_v59 = vpop.f32.mrb[26].mxu0 }
 0x190   : > { %v1310_v39 = vadd.f32 %v2403_v54, %v1271_v58  ;;  %v1635_v8 = vadd.f32 %v1158_v59, %v2388_v43  ;;  %v1160_v60 = vpop.f32.mrb[27].mxu0 }
 0x192   : > { %1343 = vst.msk [vmem:[%s2409_s6 + $0x60] sm:$0xff] %vm1330_vm1, %v1310_v39  ;;  %v1272_v61 = vmul.f32 %v1635_v8, %v2397_v51 }
 0x193   : > { %v1163_v63 = vpop.f32.mrb[28].mxu0 }
 0x194   : > { %v1311_v56 = vadd.f32 %v2403_v54, %v1272_v61  ;;  %v1636_v42 = vadd.f32 %v1163_v63, %v2390_v46  ;;  %v1165_v0 = vpop.f32.mrb[29].mxu0 }
 0x196   : > { %1344 = vst.msk [vmem:[%s2409_s6 + $0x68] sm:$0xff] %vm1330_vm1, %v1311_v56  ;;  %v1273_v1 = vmul.f32 %v1636_v42, %v2397_v51 }
 0x197   : > { %v1168_v2 = vpop.f32.mrb[30].mxu0 }
 0x198   : > { %v1312_v62 = vadd.f32 %v2403_v54, %v1273_v1  ;;  %v1637_v43 = vadd.f32 %v1168_v2, %v2392_v48  ;;  %v1170_v4 = vpop.f32.mrb[31].mxu0 }
 0x19a   : > { %1345 = vst.msk [vmem:[%s2409_s6 + $0x70] sm:$0xff] %vm1330_vm1, %v1312_v62  ;;  %v1274_v6 = vmul.f32 %v1637_v43, %v2397_v51  ;;  %v948_v12 = vpop.f32.mrb[32].mxu1 }
 0x19b   : > { %v1173_v5 = vpop.f32.mrb[32].mxu0  ;;  %v950_v46 = vpop.f32.mrb[33].mxu1 }
 0x19c   : > { %v1313_v7 = vadd.f32 %v2403_v54, %v1274_v6  ;;  %v1638_v9 = vadd.f32 %v1173_v5, %v948_v12  ;;  %v1175_v10 = vpop.f32.mrb[33].mxu0 }
 0x19e   : > { %1346 = vst.msk [vmem:[%s2409_s6 + $0x78] sm:$0xff] %vm1330_vm1, %v1313_v7  ;;  %v1275_v13 = vmul.f32 %v1638_v9, %v2397_v51  ;;  %v953_v11 = vpop.f32.mrb[34].mxu1 }
 0x19f   : > { %v1178_v48 = vpop.f32.mrb[34].mxu0  ;;  %v955_v14 = vpop.f32.mrb[35].mxu1 }
 0x1a0   : > { %v1314_v15 = vadd.f32 %v2403_v54, %v1275_v13  ;;  %v1639_v20 = vadd.f32 %v1178_v48, %v953_v11  ;;  %v1180_v18 = vpop.f32.mrb[35].mxu0 }
 0x1a2   : > { %1347 = vst.msk [vmem:[%s2409_s6 + $0x80] sm:$0xff] %vm1330_vm1, %v1314_v15  ;;  %v1276_v16 = vmul.f32 %v1639_v20, %v2397_v51  ;;  %v958_v17 = vpop.f32.mrb[36].mxu1 }
 0x1a3   : > { %v1183_v27 = vpop.f32.mrb[36].mxu0  ;;  %v960_v19 = vpop.f32.mrb[37].mxu1 }
 0x1a4   : > { %v1315_v21 = vadd.f32 %v2403_v54, %v1276_v16  ;;  %v1640_v22 = vadd.f32 %v1183_v27, %v958_v17  ;;  %v1185_v34 = vpop.f32.mrb[37].mxu0 }
 0x1a6   : > { %1348 = vst.msk [vmem:[%s2409_s6 + $0x88] sm:$0xff] %vm1330_vm1, %v1315_v21  ;;  %v1277_v3 = vmul.f32 %v1640_v22, %v2397_v51  ;;  %v963_v23 = vpop.f32.mrb[38].mxu1 }
 0x1a7   : > { %v1188_v24 = vpop.f32.mrb[38].mxu0  ;;  %v965_v25 = vpop.f32.mrb[39].mxu1 }
 0x1a8   : > { %v1316_v41 = vadd.f32 %v2403_v54, %v1277_v3  ;;  %v1641_v26 = vadd.f32 %v1188_v24, %v963_v23  ;;  %v1190_v28 = vpop.f32.mrb[39].mxu0 }
 0x1aa   : > { %1349 = vst.msk [vmem:[%s2409_s6 + $0x90] sm:$0xff] %vm1330_vm1, %v1316_v41  ;;  %v1278_v31 = vmul.f32 %v1641_v26, %v2397_v51  ;;  %v968_v29 = vpop.f32.mrb[40].mxu1 }
 0x1ab   : > { %v1193_v33 = vpop.f32.mrb[40].mxu0  ;;  %v970_v35 = vpop.f32.mrb[41].mxu1 }
 0x1ac   : > { %v1317_v38 = vadd.f32 %v2403_v54, %v1278_v31  ;;  %v1642_v40 = vadd.f32 %v1193_v33, %v968_v29  ;;  %v1195_v32 = vpop.f32.mrb[41].mxu0 }
 0x1ae   : > { %1350 = vst.msk [vmem:[%s2409_s6 + $0x98] sm:$0xff] %vm1330_vm1, %v1317_v38  ;;  %v1279_v36 = vmul.f32 %v1642_v40, %v2397_v51  ;;  %v973_v45 = vpop.f32.mrb[42].mxu1 }
 0x1af   : > { %v1198_v47 = vpop.f32.mrb[42].mxu0  ;;  %v975_v49 = vpop.f32.mrb[43].mxu1 }
 0x1b0   : > { %v1318_v30 = vadd.f32 %v2403_v54, %v1279_v36  ;;  %v1643_v44 = vadd.f32 %v1198_v47, %v973_v45  ;;  %v1200_v52 = vpop.f32.mrb[43].mxu0 }
 0x1b2   : > { %1351 = vst.msk [vmem:[%s2409_s6 + $0xa0] sm:$0xff] %vm1330_vm1, %v1318_v30  ;;  %v1280_v53 = vmul.f32 %v1643_v44, %v2397_v51  ;;  %v978_v55 = vpop.f32.mrb[44].mxu1 }
 0x1b3   : > { %v1203_v37 = vpop.f32.mrb[44].mxu0  ;;  %v980_v57 = vpop.f32.mrb[45].mxu1 }
 0x1b4   : > { %v1319_v50 = vadd.f32 %v2403_v54, %v1280_v53  ;;  %v1644_v58 = vadd.f32 %v1203_v37, %v978_v55  ;;  %v1205_v59 = vpop.f32.mrb[45].mxu0 }
 0x1b6   : > { %1352 = vst.msk [vmem:[%s2409_s6 + $0xa8] sm:$0xff] %vm1330_vm1, %v1319_v50  ;;  %v1281_v39 = vmul.f32 %v1644_v58, %v2397_v51  ;;  %v983_v8 = vpop.f32.mrb[46].mxu1 }
 0x1b7   : > { %v1208_v60 = vpop.f32.mrb[46].mxu0  ;;  %v985_v61 = vpop.f32.mrb[47].mxu1 }
 0x1b8   : > { %v1320_v63 = vadd.f32 %v2403_v54, %v1281_v39  ;;  %v1645_v56 = vadd.f32 %v1208_v60, %v983_v8  ;;  %v1210_v42 = vpop.f32.mrb[47].mxu0 }
 0x1ba   : > { %1353 = vst.msk [vmem:[%s2409_s6 + $0xb0] sm:$0xff] %vm1330_vm1, %v1320_v63  ;;  %v1282_v0 = vmul.f32 %v1645_v56, %v2397_v51  ;;  %v988_v1 = vpop.f32.mrb[48].mxu1 }
 0x1bb   : > { %v1213_v2 = vpop.f32.mrb[48].mxu0  ;;  %v990_v62 = vpop.f32.mrb[49].mxu1 }
 0x1bc   : > { %v1321_v43 = vadd.f32 %v2403_v54, %v1282_v0  ;;  %v1646_v4 = vadd.f32 %v1213_v2, %v988_v1  ;;  %v1215_v6 = vpop.f32.mrb[49].mxu0 }
 0x1be   : > { %1354 = vst.msk [vmem:[%s2409_s6 + $0xb8] sm:$0xff] %vm1330_vm1, %v1321_v43  ;;  %v1283_v12 = vmul.f32 %v1646_v4, %v2397_v51  ;;  %v993_v5 = vpop.f32.mrb[50].mxu1 }
 0x1bf   : > { %v1218_v46 = vpop.f32.mrb[50].mxu0  ;;  %v995_v7 = vpop.f32.mrb[51].mxu1 }
 0x1c0   : > { %v1322_v9 = vadd.f32 %v2403_v54, %v1283_v12  ;;  %v1647_v10 = vadd.f32 %v1218_v46, %v993_v5  ;;  %v1220_v13 = vpop.f32.mrb[51].mxu0 }
 0x1c2   : > { %1355 = vst.msk [vmem:[%s2409_s6 + $0xc0] sm:$0xff] %vm1330_vm1, %v1322_v9  ;;  %v1284_v11 = vmul.f32 %v1647_v10, %v2397_v51  ;;  %v998_v48 = vpop.f32.mrb[52].mxu1 }
 0x1c3   : > { %v1223_v14 = vpop.f32.mrb[52].mxu0  ;;  %v1000_v15 = vpop.f32.mrb[53].mxu1 }
 0x1c4   : > { %v1323_v20 = vadd.f32 %v2403_v54, %v1284_v11  ;;  %v1648_v18 = vadd.f32 %v1223_v14, %v998_v48  ;;  %v1225_v16 = vpop.f32.mrb[53].mxu0 }
 0x1c6   : > { %1356 = vst.msk [vmem:[%s2409_s6 + $0xc8] sm:$0xff] %vm1330_vm1, %v1323_v20  ;;  %v1285_v17 = vmul.f32 %v1648_v18, %v2397_v51  ;;  %v1003_v27 = vpop.f32.mrb[54].mxu1 }
 0x1c7   : > { %v1228_v19 = vpop.f32.mrb[54].mxu0  ;;  %v1005_v21 = vpop.f32.mrb[55].mxu1 }
 0x1c8   : > { %v1324_v22 = vadd.f32 %v2403_v54, %v1285_v17  ;;  %v1649_v34 = vadd.f32 %v1228_v19, %v1003_v27  ;;  %v1230_v3 = vpop.f32.mrb[55].mxu0 }
 0x1ca   : > { %1357 = vst.msk [vmem:[%s2409_s6 + $0xd0] sm:$0xff] %vm1330_vm1, %v1324_v22  ;;  %v1286_v23 = vmul.f32 %v1649_v34, %v2397_v51  ;;  %v1008_v24 = vpop.f32.mrb[56].mxu1 }
 0x1cb   : > { %v1233_v25 = vpop.f32.mrb[56].mxu0  ;;  %v1010_v41 = vpop.f32.mrb[57].mxu1 }
 0x1cc   : > { %v1325_v26 = vadd.f32 %v2403_v54, %v1286_v23  ;;  %v1650_v28 = vadd.f32 %v1233_v25, %v1008_v24  ;;  %v1235_v31 = vpop.f32.mrb[57].mxu0 }
 0x1ce   : > { %1358 = vst.msk [vmem:[%s2409_s6 + $0xd8] sm:$0xff] %vm1330_vm1, %v1325_v26  ;;  %v1287_v29 = vmul.f32 %v1650_v28, %v2397_v51  ;;  %v1013_v33 = vpop.f32.mrb[58].mxu1 }
 0x1cf   : > { %v1238_v35 = vpop.f32.mrb[58].mxu0  ;;  %v1015_v38 = vpop.f32.mrb[59].mxu1 }
 0x1d0   : > { %v1326_v40 = vadd.f32 %v2403_v54, %v1287_v29  ;;  %v1651_v32 = vadd.f32 %v1238_v35, %v1013_v33  ;;  %v1240_v36 = vpop.f32.mrb[59].mxu0 }
 0x1d2   : > { %1359 = vst.msk [vmem:[%s2409_s6 + $0xe0] sm:$0xff] %vm1330_vm1, %v1326_v40  ;;  %v1288_v45 = vmul.f32 %v1651_v32, %v2397_v51  ;;  %v1018_v47 = vpop.f32.mrb[60].mxu1 }
 0x1d3   : > { %v1243_v49 = vpop.f32.mrb[60].mxu0  ;;  %v1020_v30 = vpop.f32.mrb[61].mxu1 }
 0x1d4   : > { %v1327_v44 = vadd.f32 %v2403_v54, %v1288_v45  ;;  %v1652_v52 = vadd.f32 %v1243_v49, %v1018_v47  ;;  %v1245_v53 = vpop.f32.mrb[61].mxu0 }
 0x1d6   : > { %1360 = vst.msk [vmem:[%s2409_s6 + $0xe8] sm:$0xff] %vm1330_vm1, %v1327_v44  ;;  %v1289_v55 = vmul.f32 %v1652_v52, %v2397_v51  ;;  %v1023_v37 = vpop.f32.mrb[62].mxu1 }
 0x1d7   : > { %v1248_v57 = vpop.f32.mrb[62].mxu0  ;;  %v1025_v50 = vpop.f32.mrb[63].mxu1 }
 0x1d8   : > { %v1328_v58 = vadd.f32 %v2403_v54, %v1289_v55  ;;  %v1653_v59 = vadd.f32 %v1248_v57, %v1023_v37  ;;  %v1250_v39 = vpop.f32.mrb[63].mxu0 }
 0x1da   : > { %1361 = vst.msk [vmem:[%s2409_s6 + $0xf0] sm:$0xff] %vm1330_vm1, %v1328_v58  ;;  %v1290_v8 = vmul.f32 %v1653_v59, %v2397_v51 }
 0x1dc   : > { %v1329_v60 = vadd.f32 %v2403_v54, %v1290_v8 }
 0x1de   : > { %1362 = vst.msk [vmem:[%s2409_s6 + $0xf8] sm:$0xff] %vm1330_vm1, %v1329_v60 }
 0x1df PF: > { %s14_s15 = sadd.s32 1, %s1734_s15  }
 0x1e0   : > { %p11_p4 = scmp.ge.s32.totalorder %s14_s15, 4  }
 0x1e2   :  { %13 = sbr.rel (!%p11_p4) target bundleno = 1 (0x1), region = 66 }

// kernel: rfb_m_forward.8
= control target key start
LH: loop header
LB: loop body
LE: loop exit
PB: predicated region body
PF: predicated region fallthrough
CT: control target
= control target key end

     0   :  { %s3977_s24 = smov 0   ;;  %s5643_s0 = inlined_call_operand.vmem [shape: f32[512,32], index: 0, kind: input, shape index: {}]   ;;  %s5644_s1 = inlined_call_operand.vmem [shape: f32[512,288], index: 1, kind: input, shape index: {}]   ;;  %s5645_s2 = inlined_call_operand.vmem [shape: f32[512,288], index: 2, kind: input, shape index: {}]   ;;  %s5646_s3 = inlined_call_operand.vmem [shape: f32[512,288], index: 3, kind: input, shape index: {}]   ;;  %s5647_s4 = inlined_call_operand.vmem [shape: f32[3,288,32], index: 4, kind: input, shape index: {}]   ;;  %s5648_s5 = inlined_call_operand.vmem [shape: f32[1,96], index: 5, kind: input, shape index: {}]   ;;  %s5649_s6 = inlined_call_operand.vmem [shape: f32[1,96], index: 6, kind: input, shape index: {}]   ;;  %s5650_s7 = inlined_call_operand.vmem [shape: f32[512,128], index: 7, kind: output, shape index: {}]  }
   0x1 LB: > { %s3275_s25 = sadd.s32 4294967295, %s3931_s24   ;;  %p3279_p0 = scmp.ge.s32.totalorder %s3931_s24, 1  ;;  %s3931_s24 = sphi %s3977_s24, %s17_s24  }
   0x2   : > { %p274_p1 = scmp.lt.s32.totalorder %s3931_s24, 3 }
   0x4   : > { %p275_p2 = pnand %p3279_p0, %p274_p1 }
   0x5   : > { %v518_v0 = vld [vmem:[%s5647_s4] sm:$0xff] (!%p275_p2)  ;;  %v519_v1 = vld [vmem:[%s5647_s4 + $0x8] sm:$0xff] (!%p275_p2)  ;;  %s3280_s9 = sshll.u32 (!%p275_p2), %s3275_s25, 5  ;;  %v3933_v3 = vmov (!%p275_p2), 0.0|0.0   ;;  %v520_v6 = vld [vmem:[%s5647_s4 + $0x10] sm:$0xff] (!%p275_p2)  ;;  %vm389_vm0 = vcmask (!%p275_p2), 261120  }
   0x6   : > { %278 = sbr.rel (%p275_p2) target bundleno = 669 (0x29d), region = 48  ;;  %v550_v2 = vld [vmem:[%s5647_s4 + $0x100] sm:$0xff] (!%p275_p2)  ;;  %3742 = vmatprep.subr.bf16.mxu0 (!%p275_p2), %v3933_v3  ;;  %v3743_v4 = vpack.c.bf16 (!%p275_p2), %v519_v1, %v518_v0  ;;  %v551_v5 = vld [vmem:[%s5647_s4 + $0x108] sm:$0xff] (!%p275_p2)  ;;  %v521_v7 = vld [vmem:[%s5647_s4 + $0x18] sm:$0xff] (!%p275_p2)  ;;  %p325_p3 = scmp.lt.s32.totalorder (!%p275_p2), %s3280_s9, 63  ;;  %vm1306_vm1 = vcmask (!%p275_p2), 523520  }
   0x7   : > { %v3790_v8 = vpack.c.bf16 (!%p275_p2), %v551_v5, %v550_v2  ;;  %v552_v9 = vld [vmem:[%s5647_s4 + $0x110] sm:$0xff] (!%p275_p2)  ;;  %v553_v10 = vld [vmem:[%s5647_s4 + $0x118] sm:$0xff] (!%p275_p2)  ;;  %v3746_v11 = vpack.c.bf16 (!%p275_p2), %v521_v7, %v520_v6  ;;  %v522_v13 = vld [vmem:[%s5647_s4 + $0x20] sm:$0xff] (!%p275_p2)  ;;  %s3934_s17 = smov (!%p275_p2), 96   ;;  %s3935_s18 = smov (!%p275_p2), 64   ;;  %vm2228_vm2 = vcmask (!%p275_p2), 785920  }
   0x8   : > { %3744 = vmatpush1.bf16.msra.mxu0 (!%p275_p2), %v3743_v4  ;;  %v3794_v12 = vpack.c.bf16 (!%p275_p2), %v553_v10, %v552_v9  ;;  %v523_v14 = vld [vmem:[%s5647_s4 + $0x28] sm:$0xff] (!%p275_p2)  ;;  %v3324_v15 = vld [vmem:[%s5647_s4 + $0x120] sm:$0xff] (!%p275_p2)  ;;  %v524_v19 = vld [vmem:[%s5647_s4 + $0x30] sm:$0xff] (!%p275_p2)  ;;  %vm3150_vm3 = vcmask (!%p275_p2), 1048320  }
   0x9   : > { %3791 = vmatprep.subr.bf16.mxu1 (!%p275_p2), %v3790_v8  ;;  %3745 = vmatprep.subr.bf16.mxu0 (!%p275_p2), %v3933_v3  ;;  %v3325_v16 = vld [vmem:[%s5647_s4 + $0x128] sm:$0xff] (!%p275_p2)  ;;  %v3749_v17 = vpack.c.bf16 (!%p275_p2), %v523_v14, %v522_v13  ;;  %v525_v20 = vld [vmem:[%s5647_s4 + $0x38] sm:$0xff] (!%p275_p2)  ;;  %v3326_v24 = vld [vmem:[%s5647_s4 + $0x130] sm:$0xff] (!%p275_p2) }
   0xa   : > { %3793 = vmatpush3.bf16.msra.mxu1 (!%p275_p2), %v3790_v8  ;;  %v3799_v22 = vpack.c.bf16 (!%p275_p2), %v3325_v16, %v3324_v15  ;;  %v3327_v25 = vld [vmem:[%s5647_s4 + $0x138] sm:$0xff] (!%p275_p2)  ;;  %v3752_v26 = vpack.c.bf16 (!%p275_p2), %v525_v20, %v524_v19  ;;  %v526_v27 = vld [vmem:[%s5647_s4 + $0x40] sm:$0xff] (!%p275_p2)  ;;  %v527_v28 = vld [vmem:[%s5647_s4 + $0x48] sm:$0xff] (!%p275_p2) }
   0xb   : > { %3795 = vmatprep.subr.bf16.mxu1 (!%p275_p2), %v3794_v12  ;;  %v3802_v30 = vpack.c.bf16 (!%p275_p2), %v3327_v25, %v3326_v24  ;;  %v3328_v32 = vld [vmem:[%s5647_s4 + $0x140] sm:$0xff] (!%p275_p2)  ;;  %v3329_v33 = vld [vmem:[%s5647_s4 + $0x148] sm:$0xff] (!%p275_p2)  ;;  %v3755_v34 = vpack.c.bf16 (!%p275_p2), %v527_v28, %v526_v27  ;;  %v528_v35 = vld [vmem:[%s5647_s4 + $0x50] sm:$0xff] (!%p275_p2) }
   0xc   : > { %3747 = vmatpush1.bf16.msra.mxu0 (!%p275_p2), %v3746_v11  ;;  %v529_v36 = vld [vmem:[%s5647_s4 + $0x58] sm:$0xff] (!%p275_p2)  ;;  %v3805_v38 = vpack.c.bf16 (!%p275_p2), %v3329_v33, %v3328_v32  ;;  %v3330_v40 = vld [vmem:[%s5647_s4 + $0x150] sm:$0xff] (!%p275_p2)  ;;  %v530_v43 = vld [vmem:[%s5647_s4 + $0x60] sm:$0xff] (!%p275_p2) }
   0xd   : > { %s5652_s9 = smov (!%p325_p3, %s3280_s9), 63  ;;  %3748 = vmatprep.subr.bf16.mxu0 %v3933_v3  ;;  %v3331_v41 = vld [vmem:[%s5647_s4 + $0x158] sm:$0xff]  ;;  %v3758_v42 = vpack.c.bf16 %v529_v36, %v528_v35  ;;  %v531_v44 = vld [vmem:[%s5647_s4 + $0x68] sm:$0xff]  ;;  %v3332_v48 = vld [vmem:[%s5647_s4 + $0x160] sm:$0xff] }
   0xe   : > { %s4020_s25 = smul.u32 24, %s5652_s9  ;;  %3797 = vmatpush3.bf16.msra.mxu1 %v3794_v12  ;;  %v3808_v46 = vpack.c.bf16 %v3331_v41, %v3330_v40  ;;  %v3333_v49 = vld [vmem:[%s5647_s4 + $0x168] sm:$0xff]  ;;  %v3761_v50 = vpack.c.bf16 %v531_v44, %v530_v43  ;;  %v532_v51 = vld [vmem:[%s5647_s4 + $0x70] sm:$0xff]  ;;  %v533_v52 = vld [vmem:[%s5647_s4 + $0x78] sm:$0xff] }
   0xf   : > { %3798 = vmatprep.subr.bf16.mxu1 %v3933_v3  ;;  %v3811_v54 = vpack.c.bf16 %v3333_v49, %v3332_v48  ;;  %v3334_v56 = vld [vmem:[%s5647_s4 + $0x170] sm:$0xff]  ;;  %v3335_v57 = vld [vmem:[%s5647_s4 + $0x178] sm:$0xff]  ;;  %v3764_v58 = vpack.c.bf16 %v533_v52, %v532_v51  ;;  %v534_v59 = vld [vmem:[%s5647_s4 + $0x80] sm:$0xff] }
  0x10   : > { %s4032_s10 = scalar_lea.vmem %s5644_s1, %s4020_s25  ;;  %3750 = vmatpush1.bf16.msra.mxu0 %v3749_v17  ;;  %v535_v60 = vld [vmem:[%s5647_s4 + $0x88] sm:$0xff]  ;;  %v3814_v62 = vpack.c.bf16 %v3335_v57, %v3334_v56  ;;  %v3336_v0 = vld [vmem:[%s5647_s4 + $0x180] sm:$0xff]  ;;  %v536_v5 = vld [vmem:[%s5647_s4 + $0x90] sm:$0xff]  ;;  %s4311_s19 = scalar_lea.vmem %s5645_s2, %s4020_s25 }
  0x11   : > { %v424_v18 = vld [vmem:[%s4032_s10 + $0x10] sm:$0xff]  ;;  %v427_v21 = vld [vmem:[%s4032_s10 + $0x28] sm:$0xff]  ;;  %v430_v23 = vld [vmem:[%s4032_s10 + $0x40] sm:$0xff]  ;;  %3751 = vmatprep.subr.bf16.mxu0 %v3933_v3  ;;  %v3767_v4 = vpack.c.bf16 %v535_v60, %v534_v59  ;;  %s4597_s29 = scalar_lea.vmem %s5646_s3, %s4020_s25  ;;  %s3281_s25 = sshll.u32 %s5652_s9, 3 }
  0x12   : > { %3582 = vmatprep.mubr.msk.f32.mxu1 %vm389_vm0, %v424_v18  ;;  %v433_v29 = vld [vmem:[%s4032_s10 + $0x58] sm:$0xff]  ;;  %v436_v31 = vld [vmem:[%s4032_s10 + $0x70] sm:$0xff]  ;;  %v439_v37 = vld [vmem:[%s4032_s10 + $0x88] sm:$0xff]  ;;  %s4762_s8 = scalar_lea.vmem %s5643_s0, %s3281_s25  ;;  %s4769_s13 = scalar_lea.vmem %s5650_s7, %s3281_s25 }
  0x13   : > { %3583 = vmatmul.mubr.msk.f32.vlgmr.msra.gmra.mrb[0].mxu1 %vm389_vm0, %v427_v21  ;;  %v442_v39 = vld [vmem:[%s4032_s10 + $0xa0] sm:$0xff]  ;;  %v445_v45 = vld [vmem:[%s4032_s10 + $0xb8] sm:$0xff]  ;;  %v448_v47 = vld [vmem:[%s4032_s10 + $0xd0] sm:$0xff]  ;;  %s3936_s9 = smov 32  }
  0x14   : > { %3800 = vmatpush1.bf16.msra.mxu1 %v3799_v22  ;;  %3585 = vmatprep.mubr.msk.f32.mxu1 %vm389_vm0, %v430_v23  ;;  %v451_v53 = vld [vmem:[%s4032_s10 + $0xe8] sm:$0xff]  ;;  %v454_v55 = vld [vmem:[%s4032_s10 + $0x100] sm:$0xff]  ;;  %v457_v61 = vld [vmem:[%s4032_s10 + $0x118] sm:$0xff] }
  0x15   : > { %3801 = vmatprep.subr.bf16.mxu1 %v3933_v3  ;;  %3753 = vmatpush1.bf16.msra.mxu0 %v3752_v26  ;;  %v460_v63 = vld [vmem:[%s4032_s10 + $0x130] sm:$0xff]  ;;  %v3337_v1 = vld [vmem:[%s5647_s4 + $0x188] sm:$0xff]  ;;  %v537_v6 = vld [vmem:[%s5647_s4 + $0x98] sm:$0xff] }
  0x16   : > { %3754 = vmatprep.subr.bf16.mxu0 %v3933_v3  ;;  %v423_v2 = vld [vmem:[%s4032_s10 + $0x8] sm:$0xff]  ;;  %v3817_v8 = vpack.c.bf16 %v3337_v1, %v3336_v0  ;;  %v466_v9 = vld [vmem:[%s4032_s10 + $0x160] sm:$0xff]  ;;  %v3338_v10 = vld [vmem:[%s5647_s4 + $0x190] sm:$0xff]  ;;  %v3770_v12 = vpack.c.bf16 %v537_v6, %v536_v5 }
  0x17   : > { %3586 = vmatmul.mubr.msk.f32.gmra.mrb[2].mxu1 %vm389_vm0, %v433_v29  ;;  %714 = vmatprep.mubr.f32.mxu0 %v423_v2  ;;  %v463_v7 = vld [vmem:[%s4032_s10 + $0x148] sm:$0xff]  ;;  %v3339_v11 = vld [vmem:[%s5647_s4 + $0x198] sm:$0xff]  ;;  %v538_v13 = vld [vmem:[%s5647_s4 + $0xa0] sm:$0xff] }
  0x18   : > { %3803 = vmatpush1.bf16.msra.mxu1 %v3802_v30  ;;  %3588 = vmatprep.mubr.msk.f32.mxu1 %vm389_vm0, %v436_v31  ;;  %v539_v14 = vld [vmem:[%s5647_s4 + $0xa8] sm:$0xff]  ;;  %v469_v15 = vld [vmem:[%s4032_s10 + $0x178] sm:$0xff]  ;;  %v3820_v16 = vpack.c.bf16 %v3339_v11, %v3338_v10  ;;  %v472_v17 = vld [vmem:[%s4032_s10 + $0x190] sm:$0xff] }
  0x19   : > { %3804 = vmatprep.subr.bf16.mxu1 %v3933_v3  ;;  %3756 = vmatpush1.bf16.msra.mxu0 %v3755_v34  ;;  %v3340_v18 = vld [vmem:[%s5647_s4 + $0x1a0] sm:$0xff]  ;;  %v3341_v19 = vld [vmem:[%s5647_s4 + $0x1a8] sm:$0xff]  ;;  %v3773_v20 = vpack.c.bf16 %v539_v14, %v538_v13  ;;  %v540_v21 = vld [vmem:[%s5647_s4 + $0xb0] sm:$0xff] }
  0x1a   : > { %3757 = vmatprep.subr.bf16.mxu0 %v3933_v3  ;;  %v541_v22 = vld [vmem:[%s5647_s4 + $0xb8] sm:$0xff]  ;;  %v475_v23 = vld [vmem:[%s4032_s10 + $0x1a8] sm:$0xff]  ;;  %v3823_v24 = vpack.c.bf16 %v3341_v19, %v3340_v18  ;;  %v478_v25 = vld [vmem:[%s4032_s10 + $0x1c0] sm:$0xff] }
  0x1b   : > { %3589 = vmatmul.mubr.msk.f32.gmra.mrb[4].mxu1 %vm389_vm0, %v439_v37  ;;  %v3342_v26 = vld [vmem:[%s5647_s4 + $0x1b0] sm:$0xff]  ;;  %v3343_v27 = vld [vmem:[%s5647_s4 + $0x1b8] sm:$0xff]  ;;  %v3776_v28 = vpack.c.bf16 %v541_v22, %v540_v21  ;;  %v542_v29 = vld [vmem:[%s5647_s4 + $0xc0] sm:$0xff] }
  0x1c   : > { %3806 = vmatpush1.bf16.msra.mxu1 %v3805_v38  ;;  %3591 = vmatprep.mubr.msk.f32.mxu1 %vm389_vm0, %v442_v39  ;;  %v543_v30 = vld [vmem:[%s5647_s4 + $0xc8] sm:$0xff]  ;;  %v481_v31 = vld [vmem:[%s4032_s10 + $0x1d8] sm:$0xff]  ;;  %v3826_v32 = vpack.c.bf16 %v3343_v27, %v3342_v26  ;;  %v484_v33 = vld [vmem:[%s4032_s10 + $0x1f0] sm:$0xff] }
  0x1d   : > { %3807 = vmatprep.subr.bf16.mxu1 %v3933_v3  ;;  %3759 = vmatpush1.bf16.msra.mxu0 %v3758_v42  ;;  %v3344_v34 = vld [vmem:[%s5647_s4 + $0x1c0] sm:$0xff]  ;;  %v3345_v35 = vld [vmem:[%s5647_s4 + $0x1c8] sm:$0xff]  ;;  %v3779_v36 = vpack.c.bf16 %v543_v30, %v542_v29  ;;  %v544_v37 = vld [vmem:[%s5647_s4 + $0xd0] sm:$0xff] }
  0x1e   : > { %3760 = vmatprep.subr.bf16.mxu0 %v3933_v3  ;;  %v545_v38 = vld [vmem:[%s5647_s4 + $0xd8] sm:$0xff]  ;;  %v487_v39 = vld [vmem:[%s4032_s10 + $0x208] sm:$0xff]  ;;  %v3829_v40 = vpack.c.bf16 %v3345_v35, %v3344_v34  ;;  %v490_v41 = vld [vmem:[%s4032_s10 + $0x220] sm:$0xff] }
  0x1f   : > { %3592 = vmatmul.mubr.msk.f32.gmra.mrb[6].mxu1 %vm389_vm0, %v445_v45  ;;  %v3346_v42 = vld [vmem:[%s5647_s4 + $0x1d0] sm:$0xff]  ;;  %v3347_v43 = vld [vmem:[%s5647_s4 + $0x1d8] sm:$0xff]  ;;  %v3782_v44 = vpack.c.bf16 %v545_v38, %v544_v37  ;;  %v546_v45 = vld [vmem:[%s5647_s4 + $0xe0] sm:$0xff] }
  0x20   : > { %3809 = vmatpush1.bf16.msra.mxu1 %v3808_v46  ;;  %3594 = vmatprep.mubr.msk.f32.mxu1 %vm389_vm0, %v448_v47  ;;  %v547_v46 = vld [vmem:[%s5647_s4 + $0xe8] sm:$0xff]  ;;  %v493_v47 = vld [vmem:[%s4032_s10 + $0x238] sm:$0xff]  ;;  %v3832_v48 = vpack.c.bf16 %v3347_v43, %v3346_v42  ;;  %v496_v49 = vld [vmem:[%s4032_s10 + $0x250] sm:$0xff] }
  0x21   : > { %3810 = vmatprep.subr.bf16.mxu1 %v3933_v3  ;;  %3762 = vmatpush1.bf16.msra.mxu0 %v3761_v50  ;;  %v3348_v50 = vld [vmem:[%s5647_s4 + $0x1e0] sm:$0xff]  ;;  %v3349_v51 = vld [vmem:[%s5647_s4 + $0x1e8] sm:$0xff]  ;;  %v3785_v52 = vpack.c.bf16 %v547_v46, %v546_v45  ;;  %v3350_v60 = vld [vmem:[%s5647_s4 + $0x1f0] sm:$0xff] }
  0x22   : > { %3763 = vmatprep.subr.bf16.mxu0 %v3933_v3  ;;  %v3835_v56 = vpack.c.bf16 %v3349_v51, %v3348_v50  ;;  %v3356_v57 = vld [vmem:[%s5647_s4 + $0x220] sm:$0xff]  ;;  %v505_v0 = vld [vmem:[%s4032_s10 + $0x298] sm:$0xff]  ;;  %v508_v2 = vld [vmem:[%s4032_s10 + $0x2b0] sm:$0xff] }
  0x23   : > { %3595 = vmatmul.mubr.msk.f32.gmra.mrb[8].mxu1 %vm389_vm0, %v451_v53  ;;  %v548_v53 = vld [vmem:[%s5647_s4 + $0xf0] sm:$0xff]  ;;  %v502_v59 = vld [vmem:[%s4032_s10 + $0x280] sm:$0xff]  ;;  %v3353_v5 = vld [vmem:[%s5647_s4 + $0x208] sm:$0xff] }
  0x24   : > { %3812 = vmatpush1.bf16.msra.mxu1 %v3811_v54  ;;  %3597 = vmatprep.mubr.msk.f32.mxu1 %vm389_vm0, %v454_v55  ;;  %v549_v54 = vld [vmem:[%s5647_s4 + $0xf8] sm:$0xff]  ;;  %v499_v55 = vld [vmem:[%s4032_s10 + $0x268] sm:$0xff]  ;;  %v422_v6 = vld [vmem:[%s4032_s10] sm:$0xff] }
  0x25   : > { %3813 = vmatprep.subr.bf16.mxu1 %v3933_v3  ;;  %3765 = vmatpush1.bf16.msra.mxu0 %v3764_v58  ;;  %v3357_v58 = vld [vmem:[%s5647_s4 + $0x228] sm:$0xff]  ;;  %v514_v13 = vld [vmem:[%s4032_s10 + $0x2e0] sm:$0xff]  ;;  %v3354_v14 = vld [vmem:[%s5647_s4 + $0x210] sm:$0xff] }
  0x26   : > { %3766 = vmatprep.subr.bf16.mxu0 %v3933_v3  ;;  %v511_v11 = vld [vmem:[%s4032_s10 + $0x2c8] sm:$0xff]  ;;  %v517_v18 = vld [vmem:[%s4032_s10 + $0x2f8] sm:$0xff]  ;;  %v3394_v21 = vld [vmem:[%s5647_s4 + $0x240] sm:$0xff] }
  0x27   : > { %3598 = vmatmul.mubr.msk.f32.gmra.mrb[10].mxu1 %vm389_vm0, %v457_v61  ;;  %v3351_v61 = vld [vmem:[%s5647_s4 + $0x1f8] sm:$0xff]  ;;  %v3395_v22 = vld [vmem:[%s5647_s4 + $0x248] sm:$0xff]  ;;  %v1343_v27 = vld [vmem:[%s4311_s19 + $0x20] sm:$0xff] }
  0x28   : > { %3815 = vmatpush1.bf16.msra.mxu1 %v3814_v62  ;;  %3600 = vmatprep.mubr.msk.f32.mxu1 %vm389_vm0, %v460_v63  ;;  %v3788_v62 = vpack.c.bf16 %v549_v54, %v548_v53  ;;  %v3846_v63 = vpack.c.bf16 %v3357_v58, %v3356_v57  ;;  %v3838_v1 = vpack.c.bf16 %v3351_v61, %v3350_v60  ;;  %v3397_v29 = vld [vmem:[%s5647_s4 + $0x258] sm:$0xff]  ;;  %v431_v30 = vld [vmem:[%s4032_s10 + $0x48] sm:$0xff]  ;;  %v3398_v35 = vld [vmem:[%s5647_s4 + $0x260] sm:$0xff] }
  0x29   : > { %3816 = vmatprep.subr.bf16.mxu1 %v3933_v3  ;;  %3768 = vmatpush1.bf16.msra.mxu0 %v3767_v4  ;;  %v3352_v4 = vld [vmem:[%s5647_s4 + $0x200] sm:$0xff]  ;;  %v3855_v26 = vpack.c.bf16 %v3395_v22, %v3394_v21  ;;  %v1346_v34 = vld [vmem:[%s4311_s19 + $0x38] sm:$0xff]  ;;  %v3400_v42 = vld [vmem:[%s5647_s4 + $0x270] sm:$0xff] }
  0x2a   : > { %3769 = vmatprep.subr.bf16.mxu0 %v3933_v3  ;;  %v434_v37 = vld [vmem:[%s4032_s10 + $0x60] sm:$0xff]  ;;  %v3401_v43 = vld [vmem:[%s5647_s4 + $0x278] sm:$0xff]  ;;  %v1348_v46 = vld [vmem:[%s4311_s19 + $0x48] sm:$0xff] }
  0x2b   : > { %3601 = vmatmul.mubr.msk.f32.gmra.mrb[12].mxu1 %vm389_vm0, %v463_v7  ;;  %v3358_v7 = vld [vmem:[%s5647_s4 + $0x230] sm:$0xff]  ;;  %v438_v38 = vld [vmem:[%s4032_s10 + $0x80] sm:$0xff]  ;;  %v441_v45 = vld [vmem:[%s4032_s10 + $0x98] sm:$0xff] }
  0x2c   : > { %3818 = vmatpush1.bf16.msra.mxu1 %v3817_v8  ;;  %3603 = vmatprep.mubr.msk.f32.mxu1 %vm389_vm0, %v466_v9  ;;  %v3359_v8 = vld [vmem:[%s5647_s4 + $0x238] sm:$0xff]  ;;  %v426_v9 = vld [vmem:[%s4032_s10 + $0x20] sm:$0xff]  ;;  %v3403_v50 = vld [vmem:[%s5647_s4 + $0x288] sm:$0xff] }
  0x2d   : > { %3819 = vmatprep.subr.bf16.mxu1 %v3933_v3  ;;  %3771 = vmatpush1.bf16.msra.mxu0 %v3770_v12  ;;  %v3850_v10 = vpack.c.bf16 %v3359_v8, %v3358_v7  ;;  %v3841_v12 = vpack.c.bf16 %v3353_v5, %v3352_v4  ;;  %v440_v51 = vld [vmem:[%s4032_s10 + $0x90] sm:$0xff]  ;;  %v1351_v53 = vld [vmem:[%s4311_s19 + $0x60] sm:$0xff]  ;;  %v3405_v57 = vld [vmem:[%s5647_s4 + $0x298] sm:$0xff] }
  0x2e   : > { %3772 = vmatprep.subr.bf16.mxu0 %v3933_v3  ;;  %v1355_v54 = vld [vmem:[%s4311_s19 + $0x80] sm:$0xff]  ;;  %v443_v60 = vld [vmem:[%s4032_s10 + $0xa8] sm:$0xff]  ;;  %v1357_v7 = vld [vmem:[%s4311_s19 + $0x90] sm:$0xff] }
  0x2f   : > { %3604 = vmatmul.mubr.msk.f32.gmra.mrb[14].mxu1 %vm389_vm0, %v469_v15  ;;  %v3355_v15 = vld [vmem:[%s5647_s4 + $0x218] sm:$0xff]  ;;  %v3426_v58 = vld [vmem:[%s5647_s4 + $0x340] sm:$0xff]  ;;  %v3407_v4 = vld [vmem:[%s5647_s4 + $0x2a8] sm:$0xff] }
  0x30   : > { %3821 = vmatpush1.bf16.msra.mxu1 %v3820_v16  ;;  %3606 = vmatprep.mubr.msk.f32.mxu1 %vm389_vm0, %v472_v17  ;;  %v425_v16 = vld [vmem:[%s4032_s10 + $0x18] sm:$0xff]  ;;  %v3844_v19 = vpack.c.bf16 %v3355_v15, %v3354_v14  ;;  %v446_v5 = vld [vmem:[%s4032_s10 + $0xc0] sm:$0xff]  ;;  %v1360_v14 = vld [vmem:[%s4311_s19 + $0xa8] sm:$0xff] }
  0x31   : > { %3822 = vmatprep.subr.bf16.mxu1 %v3933_v3  ;;  %3774 = vmatpush1.bf16.msra.mxu0 %v3773_v20  ;;  %v429_v17 = vld [vmem:[%s4032_s10 + $0x38] sm:$0xff]  ;;  %v1340_v20 = vld [vmem:[%s4311_s19 + $0x8] sm:$0xff]  ;;  %v1363_v21 = vld [vmem:[%s4311_s19 + $0xc0] sm:$0xff] }
  0x32   : > { %3775 = vmatprep.subr.bf16.mxu0 %v3933_v3 }
  0x33   : > { %3607 = vmatmul.mubr.msk.f32.gmra.mrb[16].mxu1 %vm389_vm0, %v475_v23  ;;  %v428_v23 = vld [vmem:[%s4032_s10 + $0x30] sm:$0xff] }
  0x34   : > { %3824 = vmatpush1.bf16.msra.mxu1 %v3823_v24  ;;  %3609 = vmatprep.mubr.msk.f32.mxu1 %vm389_vm0, %v478_v25  ;;  %v432_v24 = vld [vmem:[%s4032_s10 + $0x50] sm:$0xff]  ;;  %v1339_v25 = vld [vmem:[%s4311_s19] sm:$0xff] }
  0x35   : > { %3825 = vmatprep.subr.bf16.mxu1 %v3933_v3  ;;  %3777 = vmatpush1.bf16.msra.mxu0 %v3776_v28  ;;  %v3396_v28 = vld [vmem:[%s5647_s4 + $0x250] sm:$0xff] }
  0x36   : > { %3778 = vmatprep.subr.bf16.mxu0 %v3933_v3 }
  0x37   : > { %3610 = vmatmul.mubr.msk.f32.gmra.mrb[18].mxu1 %vm389_vm0, %v481_v31  ;;  %v435_v31 = vld [vmem:[%s4032_s10 + $0x68] sm:$0xff] }
  0x38   : > { %3827 = vmatpush1.bf16.msra.mxu1 %v3826_v32  ;;  %3612 = vmatprep.mubr.msk.f32.mxu1 %vm389_vm0, %v484_v33  ;;  %v1342_v32 = vld [vmem:[%s4311_s19 + $0x18] sm:$0xff]  ;;  %v3858_v33 = vpack.c.bf16 %v3397_v29, %v3396_v28 }
  0x39   : > { %3828 = vmatprep.subr.bf16.mxu1 %v3933_v3  ;;  %3780 = vmatpush1.bf16.msra.mxu0 %v3779_v36  ;;  %v3399_v36 = vld [vmem:[%s5647_s4 + $0x268] sm:$0xff]  ;;  %v1366_v28 = vld [vmem:[%s4311_s19 + $0xd8] sm:$0xff] }
  0x3a   : > { %3781 = vmatprep.subr.bf16.mxu0 %v3933_v3 }
  0x3b   : > { %3613 = vmatmul.mubr.msk.f32.gmra.mrb[20].mxu1 %vm389_vm0, %v487_v39  ;;  %v1345_v39 = vld [vmem:[%s4311_s19 + $0x30] sm:$0xff] }
  0x3c   : > { %3830 = vmatpush1.bf16.msra.mxu1 %v3829_v40  ;;  %3615 = vmatprep.mubr.msk.f32.mxu1 %vm389_vm0, %v490_v41  ;;  %v3861_v40 = vpack.c.bf16 %v3399_v36, %v3398_v35  ;;  %v1349_v41 = vld [vmem:[%s4311_s19 + $0x50] sm:$0xff] }
  0x3d   : > { %3831 = vmatprep.subr.bf16.mxu1 %v3933_v3  ;;  %3783 = vmatpush1.bf16.msra.mxu0 %v3782_v44  ;;  %v437_v44 = vld [vmem:[%s4032_s10 + $0x78] sm:$0xff]  ;;  %v1369_v35 = vld [vmem:[%s4311_s19 + $0xf0] sm:$0xff] }
  0x3e   : > { %3784 = vmatprep.subr.bf16.mxu0 %v3933_v3 }
  0x3f   : > { %3616 = vmatmul.mubr.msk.f32.gmra.mrb[22].mxu1 %vm389_vm0, %v493_v47  ;;  %v3864_v47 = vpack.c.bf16 %v3401_v43, %v3400_v42  ;;  %v1372_v42 = vld [vmem:[%s4311_s19 + $0x108] sm:$0xff] }
  0x40   : > { %3833 = vmatpush1.bf16.msra.mxu1 %v3832_v48  ;;  %3618 = vmatprep.mubr.msk.f32.mxu1 %vm389_vm0, %v496_v49  ;;  %v1352_v48 = vld [vmem:[%s4311_s19 + $0x68] sm:$0xff]  ;;  %v3402_v49 = vld [vmem:[%s5647_s4 + $0x280] sm:$0xff] }
  0x41   : > { %3834 = vmatprep.subr.bf16.mxu1 %v3933_v3  ;;  %3786 = vmatpush1.bf16.msra.mxu0 %v3785_v52  ;;  %v444_v52 = vld [vmem:[%s4032_s10 + $0xb0] sm:$0xff] }
  0x42   : > { %3787 = vmatprep.subr.bf16.mxu0 %v3933_v3 }
  0x43   : > { %3619 = vmatmul.mubr.msk.f32.gmra.mrb[24].mxu1 %vm389_vm0, %v499_v55  ;;  %v3867_v55 = vpack.c.bf16 %v3403_v50, %v3402_v49  ;;  %v1375_v49 = vld [vmem:[%s4311_s19 + $0x120] sm:$0xff] }
  0x44   : > { %3836 = vmatpush1.bf16.msra.mxu1 %v3835_v56  ;;  %3621 = vmatprep.mubr.msk.f32.mxu1 %vm389_vm0, %v502_v59  ;;  %v3404_v56 = vld [vmem:[%s5647_s4 + $0x290] sm:$0xff]  ;;  %v3427_v59 = vld [vmem:[%s5647_s4 + $0x348] sm:$0xff] }
  0x45   : > { %3837 = vmatprep.subr.bf16.mxu1 %v3933_v3  ;;  %3789 = vmatpush1.bf16.msra.mxu0 %v3788_v62  ;;  %v4388_v61 = vpack.c.bf16 %v3427_v59, %v3426_v58  ;;  %v447_v62 = vld [vmem:[%s4032_s10 + $0xc8] sm:$0xff]  ;;  %v1382_v58 = vld [vmem:[%s4311_s19 + $0x158] sm:$0xff]  ;;  %v3422_v59 = vld [vmem:[%s5647_s4 + $0x320] sm:$0xff] }
  0x46   : > { %3847 = vmatprep.subr.bf16.mxu0 %v3846_v63 }
  0x47   : > { %3622 = vmatmul.mubr.msk.f32.gmra.mrb[26].mxu1 %vm389_vm0, %v505_v0  ;;  %v3870_v0 = vpack.c.bf16 %v3405_v57, %v3404_v56  ;;  %v1378_v56 = vld [vmem:[%s4311_s19 + $0x138] sm:$0xff] }
  0x48   : > { %3839 = vmatpush1.bf16.msra.mxu1 %v3838_v1  ;;  %3624 = vmatprep.mubr.msk.f32.mxu1 %vm389_vm0, %v508_v2  ;;  %v1358_v1 = vld [vmem:[%s4311_s19 + $0x98] sm:$0xff]  ;;  %v3406_v2 = vld [vmem:[%s5647_s4 + $0x2a0] sm:$0xff] }
  0x49   : > { %715 = vmatmul.mubr.f32.vlgmr.msra.gmra.mrb[0].mxu0 %v422_v6  ;;  %3840 = vmatprep.subr.bf16.mxu1 %v3933_v3  ;;  %v450_v6 = vld [vmem:[%s4032_s10 + $0xe0] sm:$0xff]  ;;  %v3873_v8 = vpack.c.bf16 %v3407_v4, %v3406_v2  ;;  %v1385_v2 = vld [vmem:[%s4311_s19 + $0x170] sm:$0xff] }
  0x4a   : > { %719 = vmatprep.mubr.f32.mxu0 %v426_v9  ;;  %3849 = vmatpush3.bf16.msra.mxu0 %v3846_v63  ;;  %v1354_v63 = vld [vmem:[%s4311_s19 + $0x78] sm:$0xff]  ;;  %v1361_v9 = vld [vmem:[%s4311_s19 + $0xb0] sm:$0xff] }
  0x4b   : > { %3625 = vmatmul.mubr.msk.f32.gmra.mrb[28].mxu1 %vm389_vm0, %v511_v11  ;;  %3851 = vmatprep.subr.bf16.mxu0 %v3850_v10  ;;  %v3409_v11 = vld [vmem:[%s5647_s4 + $0x2b8] sm:$0xff]  ;;  %v3424_v4 = vld [vmem:[%s5647_s4 + $0x330] sm:$0xff] }
  0x4c   : > { %3842 = vmatpush1.bf16.msra.mxu1 %v3841_v12  ;;  %3627 = vmatprep.mubr.msk.f32.mxu1 %vm389_vm0, %v514_v13  ;;  %v449_v12 = vld [vmem:[%s4032_s10 + $0xd8] sm:$0xff] }
  0x4d   : > { %720 = vmatmul.mubr.f32.gmra.mrb[2].mxu0 %v425_v16  ;;  %3843 = vmatprep.subr.bf16.mxu1 %v3933_v3  ;;  %v453_v13 = vld [vmem:[%s4032_s10 + $0xf8] sm:$0xff]  ;;  %v1364_v16 = vld [vmem:[%s4311_s19 + $0xc8] sm:$0xff] }
  0x4e   : > { %724 = vmatprep.mubr.f32.mxu0 %v429_v17  ;;  %3853 = vmatpush3.bf16.msra.mxu0 %v3850_v10  ;;  %v3408_v10 = vld [vmem:[%s5647_s4 + $0x2b0] sm:$0xff]  ;;  %v3410_v17 = vld [vmem:[%s5647_s4 + $0x2c0] sm:$0xff] }
  0x4f   : > { %3628 = vmatmul.mubr.msk.f32.gmra.mrb[30].mxu1 %vm389_vm0, %v517_v18  ;;  %3903 = vmatprep.subr.bf16.mxu0 %v4388_v61  ;;  %v3876_v15 = vpack.c.bf16 %v3409_v11, %v3408_v10  ;;  %v3411_v18 = vld [vmem:[%s5647_s4 + $0x2c8] sm:$0xff]  ;;  %v476_v11 = vld [vmem:[%s4032_s10 + $0x1b0] sm:$0xff] }
  0x50   : > { %3845 = vmatpush1.bf16.msra.mxu1 %v3844_v19  ;;  %1632 = vmatprep.mubr.f32.mxu1 %v1340_v20  ;;  %v452_v19 = vld [vmem:[%s4032_s10 + $0xf0] sm:$0xff]  ;;  %v3879_v22 = vpack.c.bf16 %v3411_v18, %v3410_v17  ;;  %v1388_v10 = vld [vmem:[%s4311_s19 + $0x188] sm:$0xff]  ;;  %v1394_v17 = vld [vmem:[%s4311_s19 + $0x1b8] sm:$0xff] }
  0x51   : > { %725 = vmatmul.mubr.f32.gmra.mrb[4].mxu0 %v428_v23  ;;  %3854 = vmatprep.subr.bf16.mxu1 %v3933_v3  ;;  %v456_v20 = vld [vmem:[%s4032_s10 + $0x110] sm:$0xff]  ;;  %v1367_v23 = vld [vmem:[%s4311_s19 + $0xe0] sm:$0xff] }
  0x52   : > { %729 = vmatprep.mubr.f32.mxu0 %v432_v24  ;;  %v3412_v24 = vld [vmem:[%s5647_s4 + $0x2d0] sm:$0xff]  ;;  %v482_v18 = vld [vmem:[%s4032_s10 + $0x1e0] sm:$0xff] }
  0x53   : > { %1633 = vmatmul.mubr.f32.vlgmr.msra.gmra.mrb[32].mxu1 %v1339_v25  ;;  %v3413_v25 = vld [vmem:[%s5647_s4 + $0x2d8] sm:$0xff] }
  0x54   : > { %3856 = vmatpush1.bf16.msra.mxu1 %v3855_v26  ;;  %1637 = vmatprep.mubr.f32.mxu1 %v1343_v27  ;;  %v455_v26 = vld [vmem:[%s4032_s10 + $0x108] sm:$0xff]  ;;  %v3882_v29 = vpack.c.bf16 %v3413_v25, %v3412_v24  ;;  %v4522_v24 = vld [vmem:[%s5648_s5] ss:$0 sm:$0xff] }
  0x55   : > { %730 = vmatmul.mubr.f32.gmra.mrb[6].mxu0 %v431_v30  ;;  %3857 = vmatprep.subr.bf16.mxu1 %v3933_v3  ;;  %v459_v27 = vld [vmem:[%s4032_s10 + $0x128] sm:$0xff]  ;;  %v1370_v30 = vld [vmem:[%s4311_s19 + $0xf8] sm:$0xff] }
  0x56   : > { %734 = vmatprep.mubr.f32.mxu0 %v435_v31  ;;  %v3414_v31 = vld [vmem:[%s5647_s4 + $0x2e0] sm:$0xff]  ;;  %v1396_v25 = vld [vmem:[%s4311_s19 + $0x1c8] sm:$0xff]  ;;  %2024 = vrot.lane.b32.xlu0 %v4522_v24, %s3934_s17 }
  0x57   : > { %1638 = vmatmul.mubr.f32.gmra.mrb[34].mxu1 %v1342_v32  ;;  %v3415_v32 = vld [vmem:[%s5647_s4 + $0x2e8] sm:$0xff] }
  0x58   : > { %1642 = vmatprep.mubr.f32.mxu1 %v1346_v34  ;;  %3859 = vmatpush1.bf16.msra.mxu1 %v3858_v33  ;;  %v458_v33 = vld [vmem:[%s4032_s10 + $0x120] sm:$0xff]  ;;  %v3885_v36 = vpack.c.bf16 %v3415_v32, %v3414_v31  ;;  %v491_v32 = vld [vmem:[%s4032_s10 + $0x228] sm:$0xff] }
  0x59   : > { %735 = vmatmul.mubr.f32.gmra.mrb[8].mxu0 %v434_v37  ;;  %3860 = vmatprep.subr.bf16.mxu1 %v3933_v3  ;;  %v462_v34 = vld [vmem:[%s4032_s10 + $0x140] sm:$0xff]  ;;  %v1373_v37 = vld [vmem:[%s4311_s19 + $0x110] sm:$0xff] }
  0x5a   : > { %739 = vmatprep.mubr.f32.mxu0 %v438_v38  ;;  %v3416_v38 = vld [vmem:[%s5647_s4 + $0x2f0] sm:$0xff]  ;;  %2946 = vrot.lane.b32.xlu0 %v4522_v24, %s3935_s18  ;;  %v4537_v31 = vld [vmem:[%s5649_s6] ss:$0 sm:$0xff] }
  0x5b   : > { %1643 = vmatmul.mubr.f32.gmra.mrb[36].mxu1 %v1345_v39  ;;  %v3417_v39 = vld [vmem:[%s5647_s4 + $0x2f8] sm:$0xff]  ;;  %2065 = vrot.lane.b32.xlu1 %v4537_v31, %s3934_s17 }
  0x5c   : > { %1647 = vmatprep.mubr.f32.mxu1 %v1349_v41  ;;  %3862 = vmatpush1.bf16.msra.mxu1 %v3861_v40  ;;  %v461_v40 = vld [vmem:[%s4032_s10 + $0x138] sm:$0xff]  ;;  %v3888_v43 = vpack.c.bf16 %v3417_v39, %v3416_v38  ;;  %v1405_v38 = vld [vmem:[%s4311_s19 + $0x210] sm:$0xff] }
  0x5d   : > { %740 = vmatmul.mubr.f32.gmra.mrb[10].mxu0 %v437_v44  ;;  %3863 = vmatprep.subr.bf16.mxu1 %v3933_v3  ;;  %v465_v41 = vld [vmem:[%s4032_s10 + $0x158] sm:$0xff]  ;;  %v1376_v44 = vld [vmem:[%s4311_s19 + $0x128] sm:$0xff]  ;;  %v1409_v39 = vld [vmem:[%s4311_s19 + $0x230] sm:$0xff] }
  0x5e   : > { %744 = vmatprep.mubr.f32.mxu0 %v441_v45  ;;  %v3418_v45 = vld [vmem:[%s5647_s4 + $0x300] sm:$0xff] }
  0x5f   : > { %1648 = vmatmul.mubr.f32.gmra.mrb[38].mxu1 %v1348_v46  ;;  %v3419_v46 = vld [vmem:[%s5647_s4 + $0x308] sm:$0xff]  ;;  %2987 = vrot.lane.b32.xlu1 %v4537_v31, %s3935_s18 }
  0x60   : > { %1652 = vmatprep.mubr.f32.mxu1 %v1352_v48  ;;  %3865 = vmatpush1.bf16.msra.mxu1 %v3864_v47  ;;  %v464_v47 = vld [vmem:[%s4032_s10 + $0x150] sm:$0xff]  ;;  %v3891_v50 = vpack.c.bf16 %v3419_v46, %v3418_v45  ;;  %v1411_v46 = vld [vmem:[%s4311_s19 + $0x240] sm:$0xff] }
  0x61   : > { %745 = vmatmul.mubr.f32.gmra.mrb[12].mxu0 %v440_v51  ;;  %3866 = vmatprep.subr.bf16.mxu1 %v3933_v3  ;;  %v468_v48 = vld [vmem:[%s4032_s10 + $0x170] sm:$0xff]  ;;  %v1379_v51 = vld [vmem:[%s4311_s19 + $0x140] sm:$0xff] }
  0x62   : > { %749 = vmatprep.mubr.f32.mxu0 %v444_v52  ;;  %v3420_v52 = vld [vmem:[%s5647_s4 + $0x310] sm:$0xff] }
  0x63   : > { %1653 = vmatmul.mubr.f32.gmra.mrb[40].mxu1 %v1351_v53  ;;  %v3421_v53 = vld [vmem:[%s5647_s4 + $0x318] sm:$0xff]  ;;  %v504_v45 = vld [vmem:[%s4032_s10 + $0x290] sm:$0xff] }
  0x64   : > { %1657 = vmatprep.mubr.f32.mxu1 %v1355_v54  ;;  %3868 = vmatpush1.bf16.msra.mxu1 %v3867_v55  ;;  %v467_v54 = vld [vmem:[%s4032_s10 + $0x168] sm:$0xff]  ;;  %v3894_v57 = vpack.c.bf16 %v3421_v53, %v3420_v52  ;;  %v506_v52 = vld [vmem:[%s4032_s10 + $0x2a0] sm:$0xff] }
  0x65   : > { %750 = vmatmul.mubr.f32.gmra.mrb[14].mxu0 %v443_v60  ;;  %3869 = vmatprep.subr.bf16.mxu1 %v3933_v3  ;;  %v471_v55 = vld [vmem:[%s4032_s10 + $0x188] sm:$0xff]  ;;  %v510_v53 = vld [vmem:[%s4032_s10 + $0x2c0] sm:$0xff] }
  0x66   : > { %754 = vmatprep.mubr.f32.mxu0 %v447_v62  ;;  %v3423_v60 = vld [vmem:[%s5647_s4 + $0x328] sm:$0xff]  ;;  %v470_v62 = vld [vmem:[%s4032_s10 + $0x180] sm:$0xff] }
  0x67   : > { %1658 = vmatmul.mubr.f32.gmra.mrb[42].mxu1 %v1354_v63  ;;  %v474_v63 = vld [vmem:[%s4032_s10 + $0x1a0] sm:$0xff] }
  0x68   : > { %1662 = vmatprep.mubr.f32.mxu1 %v1358_v1  ;;  %3871 = vmatpush1.bf16.msra.mxu1 %v3870_v0  ;;  %v1381_v0 = vld [vmem:[%s4311_s19 + $0x150] sm:$0xff]  ;;  %v3897_v1 = vpack.c.bf16 %v3423_v60, %v3422_v59  ;;  %v1424_v59 = vld [vmem:[%s4311_s19 + $0x2a8] sm:$0xff] }
  0x69   : > { %755 = vmatmul.mubr.f32.gmra.mrb[16].mxu0 %v446_v5  ;;  %3872 = vmatprep.subr.bf16.mxu1 %v3933_v3  ;;  %v3425_v5 = vld [vmem:[%s5647_s4 + $0x338] sm:$0xff]  ;;  %v512_v60 = vld [vmem:[%s4032_s10 + $0x2d0] sm:$0xff] }
  0x6a   : > { %759 = vmatprep.mubr.f32.mxu0 %v450_v6  ;;  %v473_v6 = vld [vmem:[%s4032_s10 + $0x198] sm:$0xff] }
  0x6b   : > { %1663 = vmatmul.mubr.f32.gmra.mrb[44].mxu1 %v1357_v7  ;;  %v477_v7 = vld [vmem:[%s4032_s10 + $0x1b8] sm:$0xff] }
  0x6c   : > { %1667 = vmatprep.mubr.f32.mxu1 %v1361_v9  ;;  %3874 = vmatpush1.bf16.msra.mxu1 %v3873_v8  ;;  %v1384_v8 = vld [vmem:[%s4311_s19 + $0x168] sm:$0xff]  ;;  %v3900_v9 = vpack.c.bf16 %v3425_v5, %v3424_v4  ;;  %v1426_v4 = vld [vmem:[%s4311_s19 + $0x2b8] sm:$0xff]  ;;  %v3428_v5 = vld [vmem:[%s5647_s4 + $0x350] sm:$0xff] }
  0x6d   : > { %760 = vmatmul.mubr.f32.gmra.mrb[18].mxu0 %v449_v12  ;;  %3875 = vmatprep.subr.bf16.mxu1 %v3933_v3  ;;  %v480_v12 = vld [vmem:[%s4032_s10 + $0x1d0] sm:$0xff] }
  0x6e   : > { %764 = vmatprep.mubr.f32.mxu0 %v453_v13  ;;  %v1387_v13 = vld [vmem:[%s4311_s19 + $0x180] sm:$0xff] }
  0x6f   : > { %1668 = vmatmul.mubr.f32.gmra.mrb[46].mxu1 %v1360_v14  ;;  %v1391_v14 = vld [vmem:[%s4311_s19 + $0x1a0] sm:$0xff] }
  0x70   : > { %1672 = vmatprep.mubr.f32.mxu1 %v1364_v16  ;;  %3877 = vmatpush1.bf16.msra.mxu1 %v3876_v15  ;;  %v479_v15 = vld [vmem:[%s4032_s10 + $0x1c8] sm:$0xff] }
  0x71   : > { %765 = vmatmul.mubr.f32.gmra.mrb[20].mxu0 %v452_v19  ;;  %3878 = vmatprep.subr.bf16.mxu1 %v3933_v3  ;;  %v483_v16 = vld [vmem:[%s4032_s10 + $0x1e8] sm:$0xff]  ;;  %v486_v19 = vld [vmem:[%s4032_s10 + $0x200] sm:$0xff] }
  0x72   : > { %769 = vmatprep.mubr.f32.mxu0 %v456_v20  ;;  %v1393_v20 = vld [vmem:[%s4311_s19 + $0x1b0] sm:$0xff] }
  0x73   : > { %1673 = vmatmul.mubr.f32.gmra.mrb[48].mxu1 %v1363_v21  ;;  %v1397_v21 = vld [vmem:[%s4311_s19 + $0x1d0] sm:$0xff] }
  0x74   : > { %1677 = vmatprep.mubr.f32.mxu1 %v1367_v23  ;;  %3880 = vmatpush1.bf16.msra.mxu1 %v3879_v22  ;;  %v485_v22 = vld [vmem:[%s4032_s10 + $0x1f8] sm:$0xff] }
  0x75   : > { %770 = vmatmul.mubr.f32.gmra.mrb[22].mxu0 %v455_v26  ;;  %3881 = vmatprep.subr.bf16.mxu1 %v3933_v3  ;;  %v489_v23 = vld [vmem:[%s4032_s10 + $0x218] sm:$0xff]  ;;  %v1400_v26 = vld [vmem:[%s4311_s19 + $0x1e8] sm:$0xff] }
  0x76   : > { %774 = vmatprep.mubr.f32.mxu0 %v459_v27  ;;  %v488_v27 = vld [vmem:[%s4032_s10 + $0x210] sm:$0xff] }
  0x77   : > { %1678 = vmatmul.mubr.f32.gmra.mrb[50].mxu1 %v1366_v28  ;;  %v492_v28 = vld [vmem:[%s4032_s10 + $0x230] sm:$0xff] }
  0x78   : > { %1682 = vmatprep.mubr.f32.mxu1 %v1370_v30  ;;  %3883 = vmatpush1.bf16.msra.mxu1 %v3882_v29  ;;  %v1399_v29 = vld [vmem:[%s4311_s19 + $0x1e0] sm:$0xff] }
  0x79   : > { %775 = vmatmul.mubr.f32.gmra.mrb[24].mxu0 %v458_v33  ;;  %3884 = vmatprep.subr.bf16.mxu1 %v3933_v3  ;;  %v1403_v30 = vld [vmem:[%s4311_s19 + $0x200] sm:$0xff]  ;;  %v495_v33 = vld [vmem:[%s4032_s10 + $0x248] sm:$0xff] }
  0x7a   : > { %779 = vmatprep.mubr.f32.mxu0 %v462_v34  ;;  %v1402_v34 = vld [vmem:[%s4311_s19 + $0x1f8] sm:$0xff] }
  0x7b   : > { %1683 = vmatmul.mubr.f32.gmra.mrb[52].mxu1 %v1369_v35  ;;  %v1406_v35 = vld [vmem:[%s4311_s19 + $0x218] sm:$0xff] }
  0x7c   : > { %1687 = vmatprep.mubr.f32.mxu1 %v1373_v37  ;;  %3886 = vmatpush1.bf16.msra.mxu1 %v3885_v36  ;;  %v494_v36 = vld [vmem:[%s4032_s10 + $0x240] sm:$0xff] }
  0x7d   : > { %780 = vmatmul.mubr.f32.gmra.mrb[26].mxu0 %v461_v40  ;;  %3887 = vmatprep.subr.bf16.mxu1 %v3933_v3  ;;  %v498_v37 = vld [vmem:[%s4032_s10 + $0x260] sm:$0xff]  ;;  %v497_v40 = vld [vmem:[%s4032_s10 + $0x258] sm:$0xff] }
  0x7e   : > { %784 = vmatprep.mubr.f32.mxu0 %v465_v41  ;;  %v501_v41 = vld [vmem:[%s4032_s10 + $0x278] sm:$0xff] }
  0x7f   : > { %1688 = vmatmul.mubr.f32.gmra.mrb[54].mxu1 %v1372_v42  ;;  %v1408_v42 = vld [vmem:[%s4311_s19 + $0x228] sm:$0xff] }
  0x80   : > { %1692 = vmatprep.mubr.f32.mxu1 %v1376_v44  ;;  %3889 = vmatpush1.bf16.msra.mxu1 %v3888_v43  ;;  %v1412_v43 = vld [vmem:[%s4311_s19 + $0x248] sm:$0xff]  ;;  %v500_v44 = vld [vmem:[%s4032_s10 + $0x270] sm:$0xff] }
  0x81   : > { %785 = vmatmul.mubr.f32.gmra.mrb[28].mxu0 %v464_v47  ;;  %3890 = vmatprep.subr.bf16.mxu1 %v3933_v3  ;;  %v1415_v47 = vld [vmem:[%s4311_s19 + $0x260] sm:$0xff] }
  0x82   : > { %789 = vmatprep.mubr.f32.mxu0 %v468_v48  ;;  %v503_v48 = vld [vmem:[%s4032_s10 + $0x288] sm:$0xff] }
  0x83   : > { %1693 = vmatmul.mubr.f32.gmra.mrb[56].mxu1 %v1375_v49  ;;  %v507_v49 = vld [vmem:[%s4032_s10 + $0x2a8] sm:$0xff] }
  0x84   : > { %1697 = vmatprep.mubr.f32.mxu1 %v1379_v51  ;;  %3892 = vmatpush1.bf16.msra.mxu1 %v3891_v50  ;;  %v1414_v50 = vld [vmem:[%s4311_s19 + $0x258] sm:$0xff] }
  0x85   : > { %790 = vmatmul.mubr.f32.gmra.mrb[30].mxu0 %v467_v54  ;;  %3893 = vmatprep.subr.bf16.mxu1 %v3933_v3  ;;  %v1418_v51 = vld [vmem:[%s4311_s19 + $0x278] sm:$0xff]  ;;  %v1417_v54 = vld [vmem:[%s4311_s19 + $0x270] sm:$0xff] }
  0x86   : > { %794 = vmatprep.mubr.f32.mxu0 %v471_v55  ;;  %v1421_v55 = vld [vmem:[%s4311_s19 + $0x290] sm:$0xff] }
  0x87   : > { %1698 = vmatmul.mubr.f32.gmra.mrb[58].mxu1 %v1378_v56  ;;  %v509_v56 = vld [vmem:[%s4032_s10 + $0x2b8] sm:$0xff] }
  0x88   : > { %1702 = vmatprep.mubr.f32.mxu1 %v1382_v58  ;;  %3895 = vmatpush1.bf16.msra.mxu1 %v3894_v57  ;;  %v513_v57 = vld [vmem:[%s4032_s10 + $0x2d8] sm:$0xff]  ;;  %v1420_v58 = vld [vmem:[%s4311_s19 + $0x288] sm:$0xff] }
  0x89   : > { %795 = vmatmul.mubr.f32.gmra.mrb[32].mxu0 %v470_v62  ;;  %3896 = vmatprep.subr.bf16.mxu1 %v3933_v3  ;;  %v516_v62 = vld [vmem:[%s4032_s10 + $0x2f0] sm:$0xff] }
  0x8a   : > { %799 = vmatprep.mubr.f32.mxu0 %v474_v63  ;;  %v1423_v63 = vld [vmem:[%s4311_s19 + $0x2a0] sm:$0xff] }
  0x8b   : > { %1703 = vmatmul.mubr.f32.gmra.mrb[60].mxu1 %v1381_v0  ;;  %v1427_v0 = vld [vmem:[%s4311_s19 + $0x2c0] sm:$0xff] }
  0x8c   : > { %1707 = vmatprep.mubr.f32.mxu1 %v1385_v2  ;;  %3898 = vmatpush1.bf16.msra.mxu1 %v3897_v1  ;;  %v515_v1 = vld [vmem:[%s4032_s10 + $0x2e8] sm:$0xff]  ;;  %v1341_v2 = vld [vmem:[%s4311_s19 + $0x10] sm:$0xff] }
  0x8d   : > { %800 = vmatmul.mubr.f32.gmra.mrb[34].mxu0 %v473_v6  ;;  %3899 = vmatprep.subr.bf16.mxu1 %v3933_v3  ;;  %v1390_v3 = vld [vmem:[%s4311_s19 + $0x198] sm:$0xff] }
  0x8e   : > { %804 = vmatprep.mubr.f32.mxu0 %v477_v7  ;;  %v3429_v6 = vld [vmem:[%s5647_s4 + $0x358] sm:$0xff] }
  0x8f   : > { %1708 = vmatmul.mubr.f32.gmra.mrb[62].mxu1 %v1384_v8  ;;  %v1430_v7 = vld [vmem:[%s4311_s19 + $0x2d8] sm:$0xff]  ;;  %v1344_v8 = vld [vmem:[%s4311_s19 + $0x28] sm:$0xff] }
  0x90   : > { %1712 = vmatprep.mubr.f32.mxu1 %v1388_v10  ;;  %3901 = vmatpush1.bf16.msra.mxu1 %v3900_v9  ;;  %v1347_v9 = vld [vmem:[%s4311_s19 + $0x40] sm:$0xff]  ;;  %v3906_v10 = vpack.c.bf16 %v3429_v6, %v3428_v5 }
  0x91   : > { %805 = vmatmul.mubr.f32.gmra.mrb[36].mxu0 %v476_v11  ;;  %v1429_v11 = vld [vmem:[%s4311_s19 + $0x2d0] sm:$0xff]  ;;  %v1419_v6 = vld [vmem:[%s4311_s19 + $0x280] sm:$0xff] }
  0x92   : > { %809 = vmatprep.mubr.f32.mxu0 %v480_v12  ;;  %v1433_v12 = vld [vmem:[%s4311_s19 + $0x2f0] sm:$0xff] }
  0x93   : > { %1713 = vmatmul.mubr.f32.gmra.mrb[64].mxu1 %v1387_v13  ;;  %v1350_v13 = vld [vmem:[%s4311_s19 + $0x58] sm:$0xff] }
  0x94   : > { %1717 = vmatprep.mubr.f32.mxu1 %v1391_v14  ;;  %v1353_v14 = vld [vmem:[%s4311_s19 + $0x70] sm:$0xff] }
  0x95   : > { %810 = vmatmul.mubr.f32.gmra.mrb[38].mxu0 %v479_v15  ;;  %v1432_v15 = vld [vmem:[%s4311_s19 + $0x2e8] sm:$0xff] }
  0x96   : > { %814 = vmatprep.mubr.f32.mxu0 %v483_v16  ;;  %v2262_v16 = vld [vmem:[%s4597_s29 + $0x8] sm:$0xff] }
  0x97   : > { %1718 = vmatmul.mubr.f32.gmra.mrb[66].mxu1 %v1390_v3  ;;  %v1356_v3 = vld [vmem:[%s4311_s19 + $0x88] sm:$0xff] }
  0x98   : > { %1722 = vmatprep.mubr.f32.mxu1 %v1394_v17  ;;  %v2261_v17 = vld [vmem:[%s4597_s29] sm:$0xff] }
  0x99   : > { %815 = vmatmul.mubr.f32.gmra.mrb[40].mxu0 %v482_v18  ;;  %v2265_v18 = vld [vmem:[%s4597_s29 + $0x20] sm:$0xff] }
  0x9a   : > { %819 = vmatprep.mubr.f32.mxu0 %v486_v19  ;;  %v1362_v19 = vld [vmem:[%s4311_s19 + $0xb8] sm:$0xff] }
  0x9b   : > { %1723 = vmatmul.mubr.f32.gmra.mrb[68].mxu1 %v1393_v20  ;;  %v1365_v20 = vld [vmem:[%s4311_s19 + $0xd0] sm:$0xff] }
  0x9c   : > { %1727 = vmatprep.mubr.f32.mxu1 %v1397_v21  ;;  %v2264_v21 = vld [vmem:[%s4597_s29 + $0x18] sm:$0xff] }
  0x9d   : > { %820 = vmatmul.mubr.f32.gmra.mrb[42].mxu0 %v485_v22  ;;  %v2268_v22 = vld [vmem:[%s4597_s29 + $0x38] sm:$0xff] }
  0x9e   : > { %824 = vmatprep.mubr.f32.mxu0 %v489_v23  ;;  %v1368_v23 = vld [vmem:[%s4311_s19 + $0xe8] sm:$0xff] }
  0x9f   : > { %1728 = vmatmul.mubr.f32.gmra.mrb[70].mxu1 %v1396_v25  ;;  %v1371_v25 = vld [vmem:[%s4311_s19 + $0x100] sm:$0xff] }
  0xa0   : > { %1732 = vmatprep.mubr.f32.mxu1 %v1400_v26  ;;  %v2267_v26 = vld [vmem:[%s4597_s29 + $0x30] sm:$0xff] }
  0xa1   : > { %825 = vmatmul.mubr.f32.gmra.mrb[44].mxu0 %v488_v27  ;;  %v2271_v27 = vld [vmem:[%s4597_s29 + $0x50] sm:$0xff] }
  0xa2   : > { %829 = vmatprep.mubr.f32.mxu0 %v492_v28  ;;  %v1374_v28 = vld [vmem:[%s4311_s19 + $0x118] sm:$0xff] }
  0xa3   : > { %1733 = vmatmul.mubr.f32.gmra.mrb[72].mxu1 %v1399_v29  ;;  %v1377_v29 = vld [vmem:[%s4311_s19 + $0x130] sm:$0xff] }
  0xa4   : > { %1737 = vmatprep.mubr.f32.mxu1 %v1403_v30  ;;  %v2270_v30 = vld [vmem:[%s4597_s29 + $0x48] sm:$0xff] }
  0xa5   : > { %830 = vmatmul.mubr.f32.gmra.mrb[46].mxu0 %v491_v32  ;;  %v2274_v32 = vld [vmem:[%s4597_s29 + $0x68] sm:$0xff] }
  0xa6   : > { %834 = vmatprep.mubr.f32.mxu0 %v495_v33  ;;  %v1380_v33 = vld [vmem:[%s4311_s19 + $0x148] sm:$0xff] }
  0xa7   : > { %1738 = vmatmul.mubr.f32.gmra.mrb[74].mxu1 %v1402_v34  ;;  %v1383_v34 = vld [vmem:[%s4311_s19 + $0x160] sm:$0xff] }
  0xa8   : > { %1742 = vmatprep.mubr.f32.mxu1 %v1406_v35  ;;  %v2273_v35 = vld [vmem:[%s4597_s29 + $0x60] sm:$0xff] }
  0xa9   : > { %835 = vmatmul.mubr.f32.gmra.mrb[48].mxu0 %v494_v36  ;;  %v2277_v36 = vld [vmem:[%s4597_s29 + $0x80] sm:$0xff] }
  0xaa   : > { %839 = vmatprep.mubr.f32.mxu0 %v498_v37  ;;  %v1386_v37 = vld [vmem:[%s4311_s19 + $0x178] sm:$0xff] }
  0xab   : > { %1743 = vmatmul.mubr.f32.gmra.mrb[76].mxu1 %v1405_v38  ;;  %v1389_v38 = vld [vmem:[%s4311_s19 + $0x190] sm:$0xff] }
  0xac   : > { %1747 = vmatprep.mubr.f32.mxu1 %v1409_v39  ;;  %v2276_v39 = vld [vmem:[%s4597_s29 + $0x78] sm:$0xff] }
  0xad   : > { %840 = vmatmul.mubr.f32.gmra.mrb[50].mxu0 %v497_v40  ;;  %v2280_v40 = vld [vmem:[%s4597_s29 + $0x98] sm:$0xff] }
  0xae   : > { %844 = vmatprep.mubr.f32.mxu0 %v501_v41 }
  0xaf   : > { %1748 = vmatmul.mubr.f32.gmra.mrb[78].mxu1 %v1408_v42  ;;  %v1392_v42 = vld [vmem:[%s4311_s19 + $0x1a8] sm:$0xff] }
  0xb0   : > { %1752 = vmatprep.mubr.f32.mxu1 %v1412_v43 }
  0xb1   : > { %845 = vmatmul.mubr.f32.gmra.mrb[52].mxu0 %v500_v44  ;;  %v1395_v44 = vld [vmem:[%s4311_s19 + $0x1c0] sm:$0xff] }
  0xb2   : > { %849 = vmatprep.mubr.f32.mxu0 %v504_v45  ;;  %v2279_v45 = vld [vmem:[%s4597_s29 + $0x90] sm:$0xff] }
  0xb3   : > { %1753 = vmatmul.mubr.f32.gmra.mrb[80].mxu1 %v1411_v46  ;;  %v2283_v46 = vld [vmem:[%s4597_s29 + $0xb0] sm:$0xff] }
  0xb4   : > { %1757 = vmatprep.mubr.f32.mxu1 %v1415_v47 }
  0xb5   : > { %850 = vmatmul.mubr.f32.gmra.mrb[54].mxu0 %v503_v48  ;;  %v1398_v48 = vld [vmem:[%s4311_s19 + $0x1d8] sm:$0xff] }
  0xb6   : > { %854 = vmatprep.mubr.f32.mxu0 %v507_v49 }
  0xb7   : > { %1758 = vmatmul.mubr.f32.gmra.mrb[82].mxu1 %v1414_v50  ;;  %v1401_v50 = vld [vmem:[%s4311_s19 + $0x1f0] sm:$0xff] }
  0xb8   : > { %1762 = vmatprep.mubr.f32.mxu1 %v1418_v51  ;;  %v2282_v51 = vld [vmem:[%s4597_s29 + $0xa8] sm:$0xff] }
  0xb9   : > { %855 = vmatmul.mubr.f32.gmra.mrb[56].mxu0 %v506_v52  ;;  %v2286_v52 = vld [vmem:[%s4597_s29 + $0xc8] sm:$0xff] }
  0xba   : > { %859 = vmatprep.mubr.f32.mxu0 %v510_v53 }
  0xbb   : > { %1763 = vmatmul.mubr.f32.gmra.mrb[84].mxu1 %v1417_v54  ;;  %v1404_v54 = vld [vmem:[%s4311_s19 + $0x208] sm:$0xff] }
  0xbc   : > { %1767 = vmatprep.mubr.f32.mxu1 %v1421_v55 }
  0xbd   : > { %860 = vmatmul.mubr.f32.gmra.mrb[58].mxu0 %v509_v56  ;;  %v1407_v56 = vld [vmem:[%s4311_s19 + $0x220] sm:$0xff] }
  0xbe   : > { %864 = vmatprep.mubr.f32.mxu0 %v513_v57  ;;  %v2285_v57 = vld [vmem:[%s4597_s29 + $0xc0] sm:$0xff] }
  0xbf   : > { %1768 = vmatmul.mubr.f32.gmra.mrb[86].mxu1 %v1420_v58  ;;  %v2289_v58 = vld [vmem:[%s4597_s29 + $0xe0] sm:$0xff] }
  0xc0   : > { %1772 = vmatprep.mubr.f32.mxu1 %v1424_v59 }
  0xc1   : > { %865 = vmatmul.mubr.f32.gmra.mrb[60].mxu0 %v512_v60  ;;  %v1410_v60 = vld [vmem:[%s4311_s19 + $0x238] sm:$0xff] }
  0xc2   : > { %869 = vmatprep.mubr.f32.mxu0 %v516_v62 }
  0xc3   : > { %1773 = vmatmul.mubr.f32.gmra.mrb[88].mxu1 %v1423_v63  ;;  %v1413_v63 = vld [vmem:[%s4311_s19 + $0x250] sm:$0xff] }
  0xc4   : > { %1777 = vmatprep.mubr.f32.mxu1 %v1427_v0  ;;  %v2288_v0 = vld [vmem:[%s4597_s29 + $0xd8] sm:$0xff] }
  0xc5   : > { %870 = vmatmul.mubr.f32.gmra.mrb[62].mxu0 %v515_v1  ;;  %v2292_v1 = vld [vmem:[%s4597_s29 + $0xf8] sm:$0xff] }
  0xc6   : > { %3638 = vmatprep.mubr.msk.f32.mxu0 %vm389_vm0, %v1341_v2 }
  0xc7   : > { %1778 = vmatmul.mubr.f32.gmra.mrb[90].mxu1 %v1426_v4  ;;  %v1416_v4 = vld [vmem:[%s4311_s19 + $0x268] sm:$0xff] }
  0xc8   : > { %1782 = vmatprep.mubr.f32.mxu1 %v1430_v7  ;;  %v2291_v7 = vld [vmem:[%s4597_s29 + $0xf0] sm:$0xff] }
  0xc9   : > { %3639 = vmatmul.mubr.msk.f32.vlgmr.msra.gmra.mrb[64].mxu0 %vm389_vm0, %v1344_v8  ;;  %v2295_v8 = vld [vmem:[%s4597_s29 + $0x110] sm:$0xff] }
  0xca   : > { %3641 = vmatprep.mubr.msk.f32.mxu0 %vm389_vm0, %v1347_v9  ;;  %3905 = vmatpush3.bf16.msra.mxu0 %v4388_v61  ;;  %v1359_v61 = vld [vmem:[%s4311_s19 + $0xa0] sm:$0xff] }
  0xcb   : > { %1783 = vmatmul.mubr.f32.gmra.mrb[92].mxu1 %v1429_v11  ;;  %3907 = vmatprep.subr.bf16.mxu0 %v3906_v10 }
  0xcc   : > { %1787 = vmatprep.mubr.f32.mxu1 %v1433_v12  ;;  %v1425_v12 = vld [vmem:[%s4311_s19 + $0x2b0] sm:$0xff] }
  0xcd   : > { %3642 = vmatmul.mubr.msk.f32.gmra.mrb[66].mxu0 %vm389_vm0, %v1350_v13  ;;  %v2294_v13 = vld [vmem:[%s4597_s29 + $0x108] sm:$0xff] }
  0xce   : > { %3644 = vmatprep.mubr.msk.f32.mxu0 %vm389_vm0, %v1353_v14  ;;  %3909 = vmatpush3.bf16.msra.mxu0 %v3906_v10  ;;  %v1422_v10 = vld [vmem:[%s4311_s19 + $0x298] sm:$0xff]  ;;  %v2298_v14 = vld [vmem:[%s4597_s29 + $0x128] sm:$0xff] }
  0xcf   : > { %1788 = vmatmul.mubr.f32.gmra.mrb[94].mxu1 %v1432_v15 }
  0xd0   : > { %2554 = vmatprep.mubr.f32.mxu1 %v2262_v16  ;;  %v1428_v16 = vld [vmem:[%s4311_s19 + $0x2c8] sm:$0xff] }
  0xd1   : > { %3645 = vmatmul.mubr.msk.f32.gmra.mrb[68].mxu0 %vm389_vm0, %v1356_v3 }
  0xd2   : > { %3647 = vmatprep.mubr.msk.f32.mxu0 %vm389_vm0, %v1359_v61  ;;  %v1431_v61 = vld [vmem:[%s4311_s19 + $0x2e0] sm:$0xff] }
  0xd3   : > { %2555 = vmatmul.mubr.f32.vlgmr.msra.gmra.mrb[96].mxu1 %v2261_v17  ;;  %v2297_v17 = vld [vmem:[%s4597_s29 + $0x120] sm:$0xff] }
  0xd4   : > { %2559 = vmatprep.mubr.f32.mxu1 %v2265_v18  ;;  %v2301_v18 = vld [vmem:[%s4597_s29 + $0x140] sm:$0xff] }
  0xd5   : > { %3648 = vmatmul.mubr.msk.f32.gmra.mrb[70].mxu0 %vm389_vm0, %v1362_v19 }
  0xd6   : > { %3650 = vmatprep.mubr.msk.f32.mxu0 %vm389_vm0, %v1365_v20  ;;  %v1434_v20 = vld [vmem:[%s4311_s19 + $0x2f8] sm:$0xff] }
  0xd7   : > { %2560 = vmatmul.mubr.f32.gmra.mrb[98].mxu1 %v2264_v21 }
  0xd8   : > { %2564 = vmatprep.mubr.f32.mxu1 %v2268_v22  ;;  %v2263_v22 = vld [vmem:[%s4597_s29 + $0x10] sm:$0xff] }
  0xd9   : > { %3651 = vmatmul.mubr.msk.f32.gmra.mrb[72].mxu0 %vm389_vm0, %v1368_v23  ;;  %v2300_v23 = vld [vmem:[%s4597_s29 + $0x138] sm:$0xff] }
  0xda   : > { %3653 = vmatprep.mubr.msk.f32.mxu0 %vm389_vm0, %v1371_v25  ;;  %v2304_v25 = vld [vmem:[%s4597_s29 + $0x158] sm:$0xff] }
  0xdb   : > { %2565 = vmatmul.mubr.f32.gmra.mrb[100].mxu1 %v2267_v26 }
  0xdc   : > { %2569 = vmatprep.mubr.f32.mxu1 %v2271_v27  ;;  %v2266_v27 = vld [vmem:[%s4597_s29 + $0x28] sm:$0xff] }
  0xdd   : > { %3654 = vmatmul.mubr.msk.f32.gmra.mrb[74].mxu0 %vm389_vm0, %v1374_v28 }
  0xde   : > { %3656 = vmatprep.mubr.msk.f32.mxu0 %vm389_vm0, %v1377_v29  ;;  %v2269_v29 = vld [vmem:[%s4597_s29 + $0x40] sm:$0xff] }
  0xdf   : > { %2570 = vmatmul.mubr.f32.gmra.mrb[102].mxu1 %v2270_v30  ;;  %v2303_v30 = vld [vmem:[%s4597_s29 + $0x150] sm:$0xff] }
  0xe0   : > { %2574 = vmatprep.mubr.f32.mxu1 %v2274_v32  ;;  %v2307_v32 = vld [vmem:[%s4597_s29 + $0x170] sm:$0xff] }
  0xe1   : > { %3657 = vmatmul.mubr.msk.f32.gmra.mrb[76].mxu0 %vm389_vm0, %v1380_v33 }
  0xe2   : > { %3659 = vmatprep.mubr.msk.f32.mxu0 %vm389_vm0, %v1383_v34  ;;  %v2272_v34 = vld [vmem:[%s4597_s29 + $0x58] sm:$0xff] }
  0xe3   : > { %2575 = vmatmul.mubr.f32.gmra.mrb[104].mxu1 %v2273_v35 }
  0xe4   : > { %2579 = vmatprep.mubr.f32.mxu1 %v2277_v36  ;;  %v2275_v36 = vld [vmem:[%s4597_s29 + $0x70] sm:$0xff] }
  0xe5   : > { %3660 = vmatmul.mubr.msk.f32.gmra.mrb[78].mxu0 %vm389_vm0, %v1386_v37  ;;  %v2306_v37 = vld [vmem:[%s4597_s29 + $0x168] sm:$0xff] }
  0xe6   : > { %v4640_v41 = vpop.f32.mrb[0].mxu1  ;;  %3662 = vmatprep.mubr.msk.f32.mxu0 %vm389_vm0, %v1389_v38  ;;  %v2310_v38 = vld [vmem:[%s4597_s29 + $0x188] sm:$0xff] }
  0xe7   : > { %v4644_v43 = vpop.f32.mrb[1].mxu1  ;;  %2580 = vmatmul.mubr.f32.gmra.mrb[106].mxu1 %v2276_v39 }
  0xe8   : > { %2584 = vmatprep.mubr.f32.mxu1 %v2280_v40  ;;  %v2278_v40 = vld [vmem:[%s4597_s29 + $0x88] sm:$0xff] }
  0xe9   : > { %3663 = vmatmul.mubr.msk.f32.gmra.mrb[80].mxu0 %vm389_vm0, %v1392_v42 }
  0xea   : > { %v4650_v47 = vpop.f32.mrb[2].mxu1  ;;  %3665 = vmatprep.mubr.msk.f32.mxu0 %vm389_vm0, %v1395_v44  ;;  %v2281_v44 = vld [vmem:[%s4597_s29 + $0xa0] sm:$0xff] }
  0xeb   : > { %v4654_v49 = vpop.f32.mrb[3].mxu1  ;;  %2585 = vmatmul.mubr.f32.gmra.mrb[108].mxu1 %v2279_v45  ;;  %v2309_v45 = vld [vmem:[%s4597_s29 + $0x180] sm:$0xff] }
  0xec   : > { %2589 = vmatprep.mubr.f32.mxu1 %v2283_v46  ;;  %v2313_v46 = vld [vmem:[%s4597_s29 + $0x1a0] sm:$0xff] }
  0xed   : > { %3666 = vmatmul.mubr.msk.f32.gmra.mrb[82].mxu0 %vm389_vm0, %v1398_v48 }
  0xee   : > { %v4660_v53 = vpop.f32.mrb[4].mxu1  ;;  %3668 = vmatprep.mubr.msk.f32.mxu0 %vm389_vm0, %v1401_v50  ;;  %v2284_v50 = vld [vmem:[%s4597_s29 + $0xb8] sm:$0xff] }
  0xef   : > { %v4664_v55 = vpop.f32.mrb[5].mxu1  ;;  %2590 = vmatmul.mubr.f32.gmra.mrb[110].mxu1 %v2282_v51 }
  0xf0   : > { %2594 = vmatprep.mubr.f32.mxu1 %v2286_v52  ;;  %v2287_v52 = vld [vmem:[%s4597_s29 + $0xd0] sm:$0xff] }
  0xf1   : > { %3669 = vmatmul.mubr.msk.f32.gmra.mrb[84].mxu0 %vm389_vm0, %v1404_v54  ;;  %v2312_v54 = vld [vmem:[%s4597_s29 + $0x198] sm:$0xff] }
  0xf2   : > { %v4670_v59 = vpop.f32.mrb[6].mxu1  ;;  %3671 = vmatprep.mubr.msk.f32.mxu0 %vm389_vm0, %v1407_v56  ;;  %v2316_v56 = vld [vmem:[%s4597_s29 + $0x1b8] sm:$0xff] }
  0xf3   : > { %v4674_v62 = vpop.f32.mrb[7].mxu1  ;;  %2595 = vmatmul.mubr.f32.gmra.mrb[112].mxu1 %v2285_v57  ;;  %v357_v57 = vld [vmem:[%s4762_s8] sm:$0xff] }
  0xf4   : > { %2599 = vmatprep.mubr.f32.mxu1 %v2289_v58  ;;  %390 = vst.msk [vmem:[%s4769_s13] sm:$0xff] %vm389_vm0, %v357_v57  ;;  %v2328_v57 = vld [vmem:[%s4597_s29 + $0x218] sm:$0xff] }
  0xf5   : > { %3672 = vmatmul.mubr.msk.f32.gmra.mrb[86].mxu0 %vm389_vm0, %v1410_v60  ;;  %v2290_v60 = vld [vmem:[%s4597_s29 + $0xe8] sm:$0xff] }
  0xf6   : > { %v4680_v2 = vpop.f32.mrb[8].mxu1  ;;  %3674 = vmatprep.mubr.msk.f32.mxu0 %vm389_vm0, %v1413_v63 }
  0xf7   : > { %v4684_v5 = vpop.f32.mrb[9].mxu1  ;;  %2600 = vmatmul.mubr.f32.gmra.mrb[114].mxu1 %v2288_v0  ;;  %v2293_v0 = vld [vmem:[%s4597_s29 + $0x100] sm:$0xff] }
  0xf8   : > { %2604 = vmatprep.mubr.f32.mxu1 %v2292_v1  ;;  %v2315_v1 = vld [vmem:[%s4597_s29 + $0x1b0] sm:$0xff] }
  0xf9   : > { %3675 = vmatmul.mubr.msk.f32.gmra.mrb[88].mxu0 %vm389_vm0, %v1416_v4  ;;  %v2319_v4 = vld [vmem:[%s4597_s29 + $0x1d0] sm:$0xff] }
  0xfa   : > { %v4690_v9 = vpop.f32.mrb[10].mxu1  ;;  %3677 = vmatprep.mubr.msk.f32.mxu0 %vm389_vm0, %v1419_v6  ;;  %v358_v6 = vld [vmem:[%s4762_s8 + $0x8] sm:$0xff] }
  0xfb   : > { %v4694_v11 = vpop.f32.mrb[11].mxu1  ;;  %2605 = vmatmul.mubr.f32.gmra.mrb[116].mxu1 %v2291_v7  ;;  %391 = vst.msk [vmem:[%s4769_s13 + $0x8] sm:$0xff] %vm389_vm0, %v358_v6  ;;  %v2317_v6 = vld [vmem:[%s4597_s29 + $0x1c0] sm:$0xff] }
  0xfc   : > { %2609 = vmatprep.mubr.f32.mxu1 %v2295_v8  ;;  %v2296_v8 = vld [vmem:[%s4597_s29 + $0x118] sm:$0xff] }
  0xfd   : > { %3678 = vmatmul.mubr.msk.f32.gmra.mrb[90].mxu0 %vm389_vm0, %v1422_v10 }
  0xfe   : > { %v4700_v15 = vpop.f32.mrb[12].mxu1  ;;  %3680 = vmatprep.mubr.msk.f32.mxu0 %vm389_vm0, %v1425_v12  ;;  %v2299_v12 = vld [vmem:[%s4597_s29 + $0x130] sm:$0xff] }
  0xff   : > { %v4704_v3 = vpop.f32.mrb[13].mxu1  ;;  %2610 = vmatmul.mubr.f32.gmra.mrb[118].mxu1 %v2294_v13 }
 0x100   : > { %2614 = vmatprep.mubr.f32.mxu1 %v2298_v14  ;;  %v2318_v14 = vld [vmem:[%s4597_s29 + $0x1c8] sm:$0xff] }
 0x101   : > { %3681 = vmatmul.mubr.msk.f32.gmra.mrb[92].mxu0 %vm389_vm0, %v1428_v16 }
 0x102   : > { %v4710_v19 = vpop.f32.mrb[14].mxu1  ;;  %3683 = vmatprep.mubr.msk.f32.mxu0 %vm389_vm0, %v1431_v61 }
 0x103   : > { %v4714_v21 = vpop.f32.mrb[15].mxu1  ;;  %2615 = vmatmul.mubr.f32.gmra.mrb[120].mxu1 %v2297_v17  ;;  %v2322_v17 = vld [vmem:[%s4597_s29 + $0x1e8] sm:$0xff] }
 0x104   : > { %2619 = vmatprep.mubr.f32.mxu1 %v2301_v18  ;;  %v359_v18 = vld [vmem:[%s4762_s8 + $0x10] sm:$0xff] }
 0x105   : > { %3684 = vmatmul.mubr.msk.f32.gmra.mrb[94].mxu0 %vm389_vm0, %v1434_v20  ;;  %392 = vst.msk [vmem:[%s4769_s13 + $0x10] sm:$0xff] %vm389_vm0, %v359_v18 }
 0x106   : > { %v4720_v26 = vpop.f32.mrb[16].mxu1  ;;  %3694 = vmatprep.mubr.msk.f32.mxu0 %vm389_vm0, %v2263_v22  ;;  %v2302_v22 = vld [vmem:[%s4597_s29 + $0x148] sm:$0xff] }
 0x107   : > { %v4724_v28 = vpop.f32.mrb[17].mxu1  ;;  %2620 = vmatmul.mubr.f32.gmra.mrb[122].mxu1 %v2300_v23 }
 0x108   : > { %2624 = vmatprep.mubr.f32.mxu1 %v2304_v25 }
 0x109   : > { %3695 = vmatmul.mubr.msk.f32.vlgmr.msra.gmra.mrb[96].mxu0 %vm389_vm0, %v2266_v27 }
 0x10a   : > { %v4730_v33 = vpop.f32.mrb[18].mxu1  ;;  %3697 = vmatprep.mubr.msk.f32.mxu0 %vm389_vm0, %v2269_v29  ;;  %v2321_v29 = vld [vmem:[%s4597_s29 + $0x1e0] sm:$0xff] }
 0x10b   : > { %v4734_v35 = vpop.f32.mrb[19].mxu1  ;;  %2625 = vmatmul.mubr.f32.gmra.mrb[124].mxu1 %v2303_v30 }
 0x10c   : > { %2629 = vmatprep.mubr.f32.mxu1 %v2307_v32 }
 0x10d   : > { %3698 = vmatmul.mubr.msk.f32.gmra.mrb[98].mxu0 %vm389_vm0, %v2272_v34 }
 0x10e   : > { %v4740_v39 = vpop.f32.mrb[20].mxu1  ;;  %3700 = vmatprep.mubr.msk.f32.mxu0 %vm389_vm0, %v2275_v36  ;;  %v2325_v36 = vld [vmem:[%s4597_s29 + $0x200] sm:$0xff] }
 0x10f   : > { %v4744_v42 = vpop.f32.mrb[21].mxu1  ;;  %2630 = vmatmul.mubr.f32.gmra.mrb[126].mxu1 %v2306_v37  ;;  %v360_v37 = vld [vmem:[%s4762_s8 + $0x18] sm:$0xff] }
 0x110   : > { %2634 = vmatprep.mubr.f32.mxu1 %v2310_v38  ;;  %393 = vst.msk [vmem:[%s4769_s13 + $0x18] sm:$0xff] %vm389_vm0, %v360_v37  ;;  %v363_v37 = vld [vmem:[%s4762_s8 + $0x30] sm:$0xff] }
 0x111   : > { %3701 = vmatmul.mubr.msk.f32.gmra.mrb[100].mxu0 %vm389_vm0, %v2278_v40  ;;  %v2308_v40 = vld [vmem:[%s4597_s29 + $0x178] sm:$0xff]  ;;  %396 = vst.msk [vmem:[%s4769_s13 + $0x30] sm:$0xff] %vm389_vm0, %v363_v37  ;;  %v2343_v37 = vld [vmem:[%s4597_s29 + $0x290] sm:$0xff] }
 0x112   : > { %v4750_v48 = vpop.f32.mrb[22].mxu1  ;;  %3703 = vmatprep.mubr.msk.f32.mxu0 %vm389_vm0, %v2281_v44 }
 0x113   : > { %v4754_v51 = vpop.f32.mrb[23].mxu1  ;;  %2635 = vmatmul.mubr.f32.gmra.mrb[128].mxu1 %v2309_v45  ;;  %v2311_v45 = vld [vmem:[%s4597_s29 + $0x190] sm:$0xff] }
 0x114   : > { %2639 = vmatprep.mubr.f32.mxu1 %v2313_v46 }
 0x115   : > { %3704 = vmatmul.mubr.msk.f32.gmra.mrb[102].mxu0 %vm389_vm0, %v2284_v50  ;;  %v2324_v50 = vld [vmem:[%s4597_s29 + $0x1f8] sm:$0xff] }
 0x116   : > { %v4772_v58 = vpop.f32.mrb[24].mxu1  ;;  %3706 = vmatprep.mubr.msk.f32.mxu0 %vm389_vm0, %v2287_v52 }
 0x117   : > { %v4778_v63 = vpop.f32.mrb[25].mxu1  ;;  %2640 = vmatmul.mubr.f32.gmra.mrb[130].mxu1 %v2312_v54 }
 0x118   : > { %2644 = vmatprep.mubr.f32.mxu1 %v2316_v56 }
 0x119   : > { %3707 = vmatmul.mubr.msk.f32.gmra.mrb[104].mxu0 %vm389_vm0, %v2290_v60  ;;  %v361_v60 = vld [vmem:[%s4762_s8 + $0x20] sm:$0xff] }
 0x11a   : > { %v4785_v7 = vpop.f32.mrb[26].mxu1  ;;  %3709 = vmatprep.mubr.msk.f32.mxu0 %vm389_vm0, %v2293_v0  ;;  %394 = vst.msk [vmem:[%s4769_s13 + $0x20] sm:$0xff] %vm389_vm0, %v361_v60  ;;  %v2337_v60 = vld [vmem:[%s4597_s29 + $0x260] sm:$0xff] }
 0x11b   : > { %v4791_v10 = vpop.f32.mrb[27].mxu1  ;;  %2645 = vmatmul.mubr.f32.gmra.mrb[132].mxu1 %v2315_v1  ;;  %v2314_v1 = vld [vmem:[%s4597_s29 + $0x1a8] sm:$0xff] }
 0x11c   : > { %v716_v13 = vpop.f32.mrb[0].mxu0  ;;  %2649 = vmatprep.mubr.f32.mxu1 %v2319_v4 }
 0x11d   : > { %v942_v16 = vadd.f32 %v4644_v43, %v716_v13  ;;  %3710 = vmatmul.mubr.msk.f32.gmra.mrb[106].mxu0 %vm389_vm0, %v2296_v8  ;;  %v718_v61 = vpop.f32.mrb[1].mxu0  ;;  %v2305_v43 = vld [vmem:[%s4597_s29 + $0x160] sm:$0xff] }
 0x11e   : > { %v4799_v20 = vpop.f32.mrb[28].mxu1  ;;  %3712 = vmatprep.mubr.msk.f32.mxu0 %vm389_vm0, %v2299_v12  ;;  %v2327_v12 = vld [vmem:[%s4597_s29 + $0x210] sm:$0xff] }
 0x11f   : > { %v1107_v23 = vmul.f32 %v4522_v24, %v942_v16  ;;  %v4806_v25 = vpop.f32.mrb[29].mxu1  ;;  %2650 = vmatmul.mubr.f32.gmra.mrb[134].mxu1 %v2318_v14  ;;  %v2331_v61 = vld [vmem:[%s4597_s29 + $0x230] sm:$0xff] }
 0x120   : > { %v721_v27 = vpop.f32.mrb[2].mxu0  ;;  %2654 = vmatprep.mubr.f32.mxu1 %v2322_v17  ;;  %v362_v17 = vld [vmem:[%s4762_s8 + $0x28] sm:$0xff] }
 0x121   : > { %v947_v30 = vadd.f32 %v4640_v41, %v721_v27  ;;  %3713 = vmatmul.mubr.msk.f32.gmra.mrb[108].mxu0 %vm389_vm0, %v2302_v22  ;;  %v1146_v32 = vadd.f32 %v4537_v31, %v1107_v23  ;;  %v723_v34 = vpop.f32.mrb[3].mxu0  ;;  %v2320_v22 = vld [vmem:[%s4597_s29 + $0x1d8] sm:$0xff]  ;;  %395 = vst.msk [vmem:[%s4769_s13 + $0x28] sm:$0xff] %vm389_vm0, %v362_v17 }
 0x122   : > { %v4815_v38 = vpop.f32.mrb[30].mxu1  ;;  %3715 = vmatprep.mubr.msk.f32.mxu0 %vm389_vm0, %v2305_v43  ;;  %v2323_v43 = vld [vmem:[%s4597_s29 + $0x1f0] sm:$0xff]  ;;  %v2340_v17 = vld [vmem:[%s4597_s29 + $0x278] sm:$0xff] }
 0x123   : > { %v1108_v44 = vmul.f32 %v4522_v24, %v947_v30  ;;  %v4822_v41 = vpop.f32.mrb[31].mxu1  ;;  %2655 = vmatmul.mubr.f32.gmra.mrb[136].mxu1 %v2321_v29  ;;  %1210 = vrot.lane.b32.xlu0 %v1146_v32, %s3936_s9  ;;  %v2330_v29 = vld [vmem:[%s4597_s29 + $0x228] sm:$0xff] }
 0x124   : > { %v726_v46 = vpop.f32.mrb[4].mxu0  ;;  %2659 = vmatprep.mubr.f32.mxu1 %v2325_v36  ;;  %v2334_v36 = vld [vmem:[%s4597_s29 + $0x248] sm:$0xff] }
 0x125   : > { %v952_v52 = vadd.f32 %v4654_v49, %v726_v46  ;;  %3716 = vmatmul.mubr.msk.f32.gmra.mrb[110].mxu0 %vm389_vm0, %v2308_v40  ;;  %v1147_v54 = vadd.f32 %v4537_v31, %v1108_v44  ;;  %v728_v56 = vpop.f32.mrb[5].mxu0  ;;  %v2326_v44 = vld [vmem:[%s4597_s29 + $0x208] sm:$0xff]  ;;  %v2329_v46 = vld [vmem:[%s4597_s29 + $0x220] sm:$0xff] }
 0x126   : > { %v4832_v0 = vpop.f32.mrb[32].mxu1  ;;  %3718 = vmatprep.mubr.msk.f32.mxu0 %vm389_vm0, %v2311_v45 }
 0x127   : > { %v1109_v4 = vmul.f32 %v4522_v24, %v952_v52  ;;  %v1636_v49 = vpop.f32.mrb[33].mxu1  ;;  %2660 = vmatmul.mubr.f32.gmra.mrb[138].mxu1 %v2324_v50  ;;  %1212 = vrot.lane.b32.xlu0 %v1147_v54, %s3936_s9  ;;  %v2333_v52 = vld [vmem:[%s4597_s29 + $0x240] sm:$0xff] }
 0x128   : > { %v731_v8 = vpop.f32.mrb[6].mxu0  ;;  %2664 = vmatprep.mubr.f32.mxu1 %v2328_v57  ;;  %v2332_v49 = vld [vmem:[%s4597_s29 + $0x238] sm:$0xff] }
 0x129   : > { %v957_v13 = vadd.f32 %v4650_v47, %v731_v8  ;;  %3719 = vmatmul.mubr.msk.f32.gmra.mrb[112].mxu0 %vm389_vm0, %v2314_v1  ;;  %v1148_v14 = vadd.f32 %v4537_v31, %v1109_v4  ;;  %v733_v16 = vpop.f32.mrb[7].mxu0  ;;  %v364_v1 = vld [vmem:[%s4762_s8 + $0x38] sm:$0xff]  ;;  %v2335_v8 = vld [vmem:[%s4597_s29 + $0x250] sm:$0xff] }
 0x12a   : > { %v4847_v18 = vpop.f32.mrb[34].mxu1  ;;  %3721 = vmatprep.mubr.msk.f32.mxu0 %vm389_vm0, %v2317_v6  ;;  %397 = vst.msk [vmem:[%s4769_s13 + $0x38] sm:$0xff] %vm389_vm0, %v364_v1  ;;  %v2346_v1 = vld [vmem:[%s4597_s29 + $0x2a8] sm:$0xff] }
 0x12b   : > { %v1110_v23 = vmul.f32 %v4522_v24, %v957_v13  ;;  %v1641_v47 = vpop.f32.mrb[35].mxu1  ;;  %2665 = vmatmul.mubr.f32.gmra.mrb[140].mxu1 %v2327_v12  ;;  %1214 = vrot.lane.b32.xlu1 %v1148_v14, %s3936_s9  ;;  %v2336_v13 = vld [vmem:[%s4597_s29 + $0x258] sm:$0xff] }
 0x12c   : > { %v736_v27 = vpop.f32.mrb[8].mxu0  ;;  %2669 = vmatprep.mubr.f32.mxu1 %v2331_v61  ;;  %v2338_v47 = vld [vmem:[%s4597_s29 + $0x268] sm:$0xff] }
 0x12d   : > { %v962_v30 = vadd.f32 %v4664_v55, %v736_v27  ;;  %3722 = vmatmul.mubr.msk.f32.gmra.mrb[114].mxu0 %vm389_vm0, %v2320_v22  ;;  %v1149_v32 = vadd.f32 %v4537_v31, %v1110_v23  ;;  %v738_v34 = vpop.f32.mrb[9].mxu0  ;;  %v365_v22 = vld [vmem:[%s4762_s8 + $0x40] sm:$0xff] }
 0x12e   : > { %v4862_v40 = vpop.f32.mrb[36].mxu1  ;;  %3724 = vmatprep.mubr.msk.f32.mxu0 %vm389_vm0, %v2323_v43  ;;  %398 = vst.msk [vmem:[%s4769_s13 + $0x40] sm:$0xff] %vm389_vm0, %v365_v22  ;;  %v2341_v27 = vld [vmem:[%s4597_s29 + $0x280] sm:$0xff] }
 0x12f   : > { %v1111_v45 = vmul.f32 %v4522_v24, %v962_v30  ;;  %v1646_v55 = vpop.f32.mrb[37].mxu1  ;;  %2670 = vmatmul.mubr.f32.gmra.mrb[142].mxu1 %v2330_v29  ;;  %1216 = vrot.lane.b32.xlu1 %v1149_v32, %s3936_s9  ;;  %v2339_v30 = vld [vmem:[%s4597_s29 + $0x270] sm:$0xff]  ;;  %v2349_v22 = vld [vmem:[%s4597_s29 + $0x2c0] sm:$0xff] }
 0x130   : > { %v741_v50 = vpop.f32.mrb[10].mxu0  ;;  %2674 = vmatprep.mubr.f32.mxu1 %v2334_v36  ;;  %v2344_v55 = vld [vmem:[%s4597_s29 + $0x298] sm:$0xff] }
 0x131   : > { %v967_v54 = vadd.f32 %v4660_v53, %v741_v50  ;;  %3725 = vmatmul.mubr.msk.f32.gmra.mrb[116].mxu0 %vm389_vm0, %v2326_v44  ;;  %v1150_v56 = vadd.f32 %v4537_v31, %v1111_v45  ;;  %v743_v57 = vpop.f32.mrb[11].mxu0  ;;  %v366_v44 = vld [vmem:[%s4762_s8 + $0x48] sm:$0xff]  ;;  %v2347_v50 = vld [vmem:[%s4597_s29 + $0x2b0] sm:$0xff] }
 0x132   : > { %v4877_v4 = vpop.f32.mrb[38].mxu1  ;;  %3727 = vmatprep.mubr.msk.f32.mxu0 %vm389_vm0, %v2329_v46  ;;  %399 = vst.msk [vmem:[%s4769_s13 + $0x48] sm:$0xff] %vm389_vm0, %v366_v44  ;;  %v369_v44 = vld [vmem:[%s4762_s8 + $0x60] sm:$0xff] }
 0x133   : > { %v1112_v6 = vmul.f32 %v4522_v24, %v967_v54  ;;  %v1651_v53 = vpop.f32.mrb[39].mxu1  ;;  %2675 = vmatmul.mubr.f32.gmra.mrb[144].mxu1 %v2333_v52  ;;  %1218 = vrot.lane.b32.xlu0 %v1150_v56, %s3936_s9  ;;  %v2342_v54 = vld [vmem:[%s4597_s29 + $0x288] sm:$0xff]  ;;  %402 = vst.msk [vmem:[%s4769_s13 + $0x60] sm:$0xff] %vm389_vm0, %v369_v44 }
 0x134   : > { %v746_v12 = vpop.f32.mrb[12].mxu0  ;;  %2679 = vmatprep.mubr.f32.mxu1 %v2337_v60  ;;  %v2350_v53 = vld [vmem:[%s4597_s29 + $0x2c8] sm:$0xff] }
 0x135   : > { %v972_v14 = vadd.f32 %v4674_v62, %v746_v12  ;;  %3728 = vmatmul.mubr.msk.f32.gmra.mrb[118].mxu0 %vm389_vm0, %v2332_v49  ;;  %v1151_v16 = vadd.f32 %v4537_v31, %v1112_v6  ;;  %v748_v61 = vpop.f32.mrb[13].mxu0  ;;  %v367_v49 = vld [vmem:[%s4762_s8 + $0x50] sm:$0xff]  ;;  %v2353_v12 = vld [vmem:[%s4597_s29 + $0x2e0] sm:$0xff] }
 0x136   : > { %v4892_v23 = vpop.f32.mrb[40].mxu1  ;;  %3730 = vmatprep.mubr.msk.f32.mxu0 %vm389_vm0, %v2335_v8  ;;  %400 = vst.msk [vmem:[%s4769_s13 + $0x50] sm:$0xff] %vm389_vm0, %v367_v49 }
 0x137   : > { %v1113_v43 = vmul.f32 %v4522_v24, %v972_v14  ;;  %v1656_v62 = vpop.f32.mrb[41].mxu1  ;;  %2680 = vmatmul.mubr.f32.gmra.mrb[146].mxu1 %v2336_v13  ;;  %1220 = vrot.lane.b32.xlu1 %v1151_v16, %s3936_s9  ;;  %v2345_v14 = vld [vmem:[%s4597_s29 + $0x2a0] sm:$0xff] }
 0x138   : > { %v751_v29 = vpop.f32.mrb[14].mxu0  ;;  %2684 = vmatprep.mubr.f32.mxu1 %v2340_v17  ;;  %v2356_v62 = vld [vmem:[%s4597_s29 + $0x2f8] sm:$0xff] }
 0x139   : > { %v977_v32 = vadd.f32 %v4670_v59, %v751_v29  ;;  %3731 = vmatmul.mubr.msk.f32.gmra.mrb[120].mxu0 %vm389_vm0, %v2338_v47  ;;  %v1152_v34 = vadd.f32 %v4537_v31, %v1113_v43  ;;  %v753_v36 = vpop.f32.mrb[15].mxu0  ;;  %v368_v47 = vld [vmem:[%s4762_s8 + $0x58] sm:$0xff] }
 0x13a   : > { %v4907_v45 = vpop.f32.mrb[42].mxu1  ;;  %3733 = vmatprep.mubr.msk.f32.mxu0 %vm389_vm0, %v2341_v27  ;;  %401 = vst.msk [vmem:[%s4769_s13 + $0x58] sm:$0xff] %vm389_vm0, %v368_v47 }
 0x13b   : > { %v1114_v46 = vmul.f32 %v4522_v24, %v977_v32  ;;  %v1661_v59 = vpop.f32.mrb[43].mxu1  ;;  %2685 = vmatmul.mubr.f32.gmra.mrb[148].mxu1 %v2339_v30  ;;  %1222 = vrot.lane.b32.xlu0 %v1152_v34, %s3936_s9  ;;  %v2348_v30 = vld [vmem:[%s4597_s29 + $0x2b8] sm:$0xff] }
 0x13c   : > { %v756_v52 = vpop.f32.mrb[16].mxu0  ;;  %2689 = vmatprep.mubr.f32.mxu1 %v2343_v37  ;;  %v2352_v37 = vld [vmem:[%s4597_s29 + $0x2d8] sm:$0xff] }
 0x13d   : > { %v982_v56 = vadd.f32 %v4684_v5, %v756_v52  ;;  %3734 = vmatmul.mubr.msk.f32.gmra.mrb[122].mxu0 %vm389_vm0, %v2344_v55  ;;  %v1153_v57 = vadd.f32 %v4537_v31, %v1114_v46  ;;  %v758_v60 = vpop.f32.mrb[17].mxu0 }
 0x13e   : > { %v4922_v6 = vpop.f32.mrb[44].mxu1  ;;  %3736 = vmatprep.mubr.msk.f32.mxu0 %vm389_vm0, %v2347_v50  ;;  %v2351_v50 = vld [vmem:[%s4597_s29 + $0x2d0] sm:$0xff]  ;;  %v370_v60 = vld [vmem:[%s4762_s8 + $0x68] sm:$0xff] }
 0x13f   : > { %v1115_v8 = vmul.f32 %v4522_v24, %v982_v56  ;;  %v1666_v5 = vpop.f32.mrb[45].mxu1  ;;  %2690 = vmatmul.mubr.f32.gmra.mrb[150].mxu1 %v2342_v54  ;;  %1224 = vrot.lane.b32.xlu1 %v1153_v57, %s3936_s9  ;;  %v2355_v57 = vld [vmem:[%s4597_s29 + $0x2f0] sm:$0xff]  ;;  %403 = vst.msk [vmem:[%s4769_s13 + $0x68] sm:$0xff] %vm389_vm0, %v370_v60 }
 0x140   : > { %v761_v13 = vpop.f32.mrb[18].mxu0  ;;  %2694 = vmatprep.mubr.f32.mxu1 %v2346_v1 }
 0x141   : > { %v987_v16 = vadd.f32 %v4680_v2, %v761_v13  ;;  %3737 = vmatmul.mubr.msk.f32.gmra.mrb[124].mxu0 %vm389_vm0, %v2350_v53  ;;  %v1154_v61 = vadd.f32 %v4537_v31, %v1115_v8  ;;  %v763_v17 = vpop.f32.mrb[19].mxu0 }
 0x142   : > { %v4937_v43 = vpop.f32.mrb[46].mxu1  ;;  %3739 = vmatprep.mubr.msk.f32.mxu0 %vm389_vm0, %v2353_v12 }
 0x143   : > { %v1116_v2 = vmul.f32 %v4522_v24, %v987_v16  ;;  %v1671_v27 = vpop.f32.mrb[47].mxu1  ;;  %2695 = vmatmul.mubr.f32.gmra.mrb[152].mxu1 %v2345_v14  ;;  %1226 = vrot.lane.b32.xlu0 %v1154_v61, %s3936_s9  ;;  %v371_v14 = vld [vmem:[%s4762_s8 + $0x70] sm:$0xff] }
 0x144   : > { %v766_v29 = vpop.f32.mrb[20].mxu0  ;;  %2699 = vmatprep.mubr.f32.mxu1 %v2349_v22  ;;  %404 = vst.msk [vmem:[%s4769_s13 + $0x70] sm:$0xff] %vm389_vm0, %v371_v14 }
 0x145   : > { %v992_v32 = vadd.f32 %v4694_v11, %v766_v29  ;;  %v1155_v34 = vadd.f32 %v4537_v31, %v1116_v2  ;;  %v768_v36 = vpop.f32.mrb[21].mxu0  ;;  %3740 = vmatmul.mubr.msk.f32.gmra.mrb[126].mxu0 %vm389_vm0, %v2356_v62  ;;  %v372_v2 = vld [vmem:[%s4762_s8 + $0x78] sm:$0xff] }
 0x146   : > { %v4951_v55 = vpop.f32.mrb[48].mxu1  ;;  %405 = vst.msk [vmem:[%s4769_s13 + $0x78] sm:$0xff] %vm389_vm0, %v372_v2 }
 0x147   : > { %v1117_v46 = vmul.f32 %v4522_v24, %v992_v32  ;;  %v1676_v59 = vpop.f32.mrb[49].mxu1  ;;  %2700 = vmatmul.mubr.f32.gmra.mrb[154].mxu1 %v2348_v30  ;;  %1228 = vrot.lane.b32.xlu1 %v1155_v34, %s3936_s9 }
 0x148   : > { %v771_v11 = vpop.f32.mrb[22].mxu0  ;;  %2704 = vmatprep.mubr.f32.mxu1 %v2352_v37  ;;  %v373_v37 = vld [vmem:[%s4762_s8 + $0x80] sm:$0xff] }
 0x149   : > { %v997_v52 = vadd.f32 %v4690_v9, %v771_v11  ;;  %v1156_v54 = vadd.f32 %v4537_v31, %v1117_v46  ;;  %v773_v56 = vpop.f32.mrb[23].mxu0  ;;  %v2354_v9 = vld [vmem:[%s4597_s29 + $0x2e8] sm:$0xff]  ;;  %406 = vst.msk [vmem:[%s4769_s13 + $0x80] sm:$0xff] %vm389_vm0, %v373_v37 }
 0x14a   : > { %v4962_v1 = vpop.f32.mrb[50].mxu1 }
 0x14b   : > { %v1118_v49 = vmul.f32 %v4522_v24, %v997_v52  ;;  %v1681_v53 = vpop.f32.mrb[51].mxu1  ;;  %2705 = vmatmul.mubr.f32.gmra.mrb[156].mxu1 %v2351_v50  ;;  %1230 = vrot.lane.b32.xlu0 %v1156_v54, %s3936_s9  ;;  %v4979_v24 = vld [vmem:[%s5648_s5] ss:$0 sm:$0xff]  ;;  %v374_v54 = vld [vmem:[%s4762_s8 + $0x88] sm:$0xff] }
 0x14c   : > { %v776_v8 = vpop.f32.mrb[24].mxu0  ;;  %2709 = vmatprep.mubr.f32.mxu1 %v2355_v57  ;;  %407 = vst.msk [vmem:[%s4769_s13 + $0x88] sm:$0xff] %vm389_vm0, %v374_v54 }
 0x14d   : > { %v1002_v5 = vadd.f32 %v4704_v3, %v776_v8  ;;  %v1157_v12 = vadd.f32 %v4537_v31, %v1118_v49  ;;  %v778_v13 = vpop.f32.mrb[25].mxu0 }
 0x14e   : > { %v4972_v16 = vpop.f32.mrb[52].mxu1 }
 0x14f   : > { %v1119_v61 = vmul.f32 %v4979_v24, %v1002_v5  ;;  %v1686_v17 = vpop.f32.mrb[53].mxu1  ;;  %2710 = vmatmul.mubr.f32.gmra.mrb[158].mxu1 %v2354_v9  ;;  %1232 = vrot.lane.b32.xlu1 %v1157_v12, %s3936_s9  ;;  %v375_v9 = vld [vmem:[%s4762_s8 + $0x90] sm:$0xff] }
 0x150   : > { %v781_v3 = vpop.f32.mrb[26].mxu0  ;;  %408 = vst.msk [vmem:[%s4769_s13 + $0x90] sm:$0xff] %vm389_vm0, %v375_v9 }
 0x151   : > { %v1007_v22 = vadd.f32 %v4700_v15, %v781_v3  ;;  %v1158_v47 = vadd.f32 %v4537_v31, %v1119_v61  ;;  %v783_v62 = vpop.f32.mrb[27].mxu0  ;;  %v4996_v31 = vld [vmem:[%s5649_s6] ss:$0 sm:$0xff]  ;;  %v376_v3 = vld [vmem:[%s4762_s8 + $0x98] sm:$0xff] }
 0x152   : > { %v4986_v27 = vpop.f32.mrb[54].mxu1  ;;  %409 = vst.msk [vmem:[%s4769_s13 + $0x98] sm:$0xff] %vm389_vm0, %v376_v3 }
 0x153   : > { %v1120_v29 = vmul.f32 %v4979_v24, %v1007_v22  ;;  %v1691_v30 = vpop.f32.mrb[55].mxu1  ;;  %1234 = vrot.lane.b32.xlu0 %v1158_v47, %s3936_s9 }
 0x154   : > { %v786_v32 = vpop.f32.mrb[28].mxu0 }
 0x155   : > { %v1012_v34 = vadd.f32 %v4714_v21, %v786_v32  ;;  %v1159_v15 = vadd.f32 %v4996_v31, %v1120_v29  ;;  %v788_v36 = vpop.f32.mrb[29].mxu0  ;;  %v377_v32 = vld [vmem:[%s4762_s8 + $0xa0] sm:$0xff] }
 0x156   : > { %v5000_v44 = vpop.f32.mrb[56].mxu1  ;;  %410 = vst.msk [vmem:[%s4769_s13 + $0xa0] sm:$0xff] %vm389_vm0, %v377_v32 }
 0x157   : > { %v1121_v46 = vmul.f32 %v4979_v24, %v1012_v34  ;;  %v1696_v59 = vpop.f32.mrb[57].mxu1  ;;  %1236 = vrot.lane.b32.xlu1 %v1159_v15, %s3936_s9 }
 0x158   : > { %v791_v21 = vpop.f32.mrb[30].mxu0 }
 0x159   : > { %v1017_v11 = vadd.f32 %v4710_v19, %v791_v21  ;;  %v1160_v50 = vadd.f32 %v4996_v31, %v1121_v46  ;;  %v793_v52 = vpop.f32.mrb[31].mxu0  ;;  %v378_v21 = vld [vmem:[%s4762_s8 + $0xa8] sm:$0xff] }
 0x15a   : > { %v5009_v56 = vpop.f32.mrb[58].mxu1  ;;  %411 = vst.msk [vmem:[%s4769_s13 + $0xa8] sm:$0xff] %vm389_vm0, %v378_v21 }
 0x15b   : > { %v1122_v57 = vmul.f32 %v4979_v24, %v1017_v11  ;;  %v1701_v60 = vpop.f32.mrb[59].mxu1  ;;  %1238 = vrot.lane.b32.xlu0 %v1160_v50, %s3936_s9 }
 0x15c   : > { %v796_v49 = vpop.f32.mrb[32].mxu0 }
 0x15d   : > { %v1022_v53 = vadd.f32 %v4724_v28, %v796_v49  ;;  %v1161_v19 = vadd.f32 %v4996_v31, %v1122_v57  ;;  %v798_v8 = vpop.f32.mrb[33].mxu0  ;;  %v379_v49 = vld [vmem:[%s4762_s8 + $0xb0] sm:$0xff] }
 0x15e   : > { %v5018_v5 = vpop.f32.mrb[60].mxu1  ;;  %412 = vst.msk [vmem:[%s4769_s13 + $0xb0] sm:$0xff] %vm389_vm0, %v379_v49 }
 0x15f   : > { %v1123_v12 = vmul.f32 %v4979_v24, %v1022_v53  ;;  %v1706_v13 = vpop.f32.mrb[61].mxu1  ;;  %1240 = vrot.lane.b32.xlu1 %v1161_v19, %s3936_s9 }
 0x160   : > { %v801_v14 = vpop.f32.mrb[34].mxu0 }
 0x161   : > { %v1027_v61 = vadd.f32 %v4720_v26, %v801_v14  ;;  %v1162_v28 = vadd.f32 %v4996_v31, %v1123_v12  ;;  %v803_v17 = vpop.f32.mrb[35].mxu0  ;;  %v380_v14 = vld [vmem:[%s4762_s8 + $0xb8] sm:$0xff] }
 0x162   : > { %v5027_v22 = vpop.f32.mrb[62].mxu1  ;;  %413 = vst.msk [vmem:[%s4769_s13 + $0xb8] sm:$0xff] %vm389_vm0, %v380_v14 }
 0x163   : > { %v1124_v47 = vmul.f32 %v4979_v24, %v1027_v61  ;;  %v1711_v62 = vpop.f32.mrb[63].mxu1  ;;  %1242 = vrot.lane.b32.xlu0 %v1162_v28, %s3936_s9 }
 0x164   : > { %v806_v2 = vpop.f32.mrb[36].mxu0 }
 0x165   : > { %v1032_v29 = vadd.f32 %v4734_v35, %v806_v2  ;;  %v1163_v26 = vadd.f32 %v4996_v31, %v1124_v47  ;;  %v808_v30 = vpop.f32.mrb[37].mxu0  ;;  %v381_v2 = vld [vmem:[%s4762_s8 + $0xc0] sm:$0xff] }
 0x166   : > { %v5036_v34 = vpop.f32.mrb[64].mxu1  ;;  %414 = vst.msk [vmem:[%s4769_s13 + $0xc0] sm:$0xff] %vm389_vm0, %v381_v2 }
 0x167   : > { %v1125_v15 = vmul.f32 %v4979_v24, %v1032_v29  ;;  %v1716_v36 = vpop.f32.mrb[65].mxu1  ;;  %1244 = vrot.lane.b32.xlu1 %v1163_v26, %s3936_s9 }
 0x168   : > { %v811_v37 = vpop.f32.mrb[38].mxu0 }
 0x169   : > { %v1037_v46 = vadd.f32 %v4730_v33, %v811_v37  ;;  %v1164_v35 = vadd.f32 %v4996_v31, %v1125_v15  ;;  %v813_v59 = vpop.f32.mrb[39].mxu0  ;;  %v382_v37 = vld [vmem:[%s4762_s8 + $0xc8] sm:$0xff] }
 0x16a   : > { %v5045_v11 = vpop.f32.mrb[66].mxu1  ;;  %415 = vst.msk [vmem:[%s4769_s13 + $0xc8] sm:$0xff] %vm389_vm0, %v382_v37 }
 0x16b   : > { %v1126_v50 = vmul.f32 %v4979_v24, %v1037_v46  ;;  %v1721_v52 = vpop.f32.mrb[67].mxu1  ;;  %1246 = vrot.lane.b32.xlu0 %v1164_v35, %s3936_s9 }
 0x16c   : > { %v816_v54 = vpop.f32.mrb[40].mxu0 }
 0x16d   : > { %v1042_v57 = vadd.f32 %v4744_v42, %v816_v54  ;;  %v1165_v33 = vadd.f32 %v4996_v31, %v1126_v50  ;;  %v818_v60 = vpop.f32.mrb[41].mxu0  ;;  %v383_v54 = vld [vmem:[%s4762_s8 + $0xd0] sm:$0xff] }
 0x16e   : > { %v5054_v53 = vpop.f32.mrb[68].mxu1  ;;  %416 = vst.msk [vmem:[%s4769_s13 + $0xd0] sm:$0xff] %vm389_vm0, %v383_v54 }
 0x16f   : > { %v1127_v19 = vmul.f32 %v4979_v24, %v1042_v57  ;;  %v1726_v8 = vpop.f32.mrb[69].mxu1  ;;  %1248 = vrot.lane.b32.xlu1 %v1165_v33, %s3936_s9 }
 0x170   : > { %v821_v9 = vpop.f32.mrb[42].mxu0 }
 0x171   : > { %v1047_v12 = vadd.f32 %v4740_v39, %v821_v9  ;;  %v1166_v42 = vadd.f32 %v4996_v31, %v1127_v19  ;;  %v823_v13 = vpop.f32.mrb[43].mxu0  ;;  %v384_v9 = vld [vmem:[%s4762_s8 + $0xd8] sm:$0xff] }
 0x172   : > { %v5063_v61 = vpop.f32.mrb[70].mxu1  ;;  %417 = vst.msk [vmem:[%s4769_s13 + $0xd8] sm:$0xff] %vm389_vm0, %v384_v9 }
 0x173   : > { %v1128_v28 = vmul.f32 %v4979_v24, %v1047_v12  ;;  %v1731_v17 = vpop.f32.mrb[71].mxu1  ;;  %1250 = vrot.lane.b32.xlu0 %v1166_v42, %s3936_s9 }
 0x174   : > { %v826_v3 = vpop.f32.mrb[44].mxu0 }
 0x175   : > { %v1052_v47 = vadd.f32 %v4754_v51, %v826_v3  ;;  %v1167_v39 = vadd.f32 %v4996_v31, %v1128_v28  ;;  %v828_v62 = vpop.f32.mrb[45].mxu0  ;;  %v385_v3 = vld [vmem:[%s4762_s8 + $0xe0] sm:$0xff] }
 0x176   : > { %v5072_v29 = vpop.f32.mrb[72].mxu1  ;;  %418 = vst.msk [vmem:[%s4769_s13 + $0xe0] sm:$0xff] %vm389_vm0, %v385_v3 }
 0x177   : > { %v1129_v26 = vmul.f32 %v4979_v24, %v1052_v47  ;;  %v1736_v30 = vpop.f32.mrb[73].mxu1  ;;  %1252 = vrot.lane.b32.xlu1 %v1167_v39, %s3936_s9 }
 0x178   : > { %v831_v32 = vpop.f32.mrb[46].mxu0 }
 0x179   : > { %v1057_v15 = vadd.f32 %v4750_v48, %v831_v32  ;;  %v1168_v51 = vadd.f32 %v4996_v31, %v1129_v26  ;;  %v833_v36 = vpop.f32.mrb[47].mxu0  ;;  %v5116_v32 = vpop.permute.xlu0 %2024 }
 0x17a   : > { %v5081_v46 = vpop.f32.mrb[74].mxu1 }
 0x17b   : > { %v1130_v35 = vmul.f32 %v4979_v24, %v1057_v15  ;;  %v1741_v59 = vpop.f32.mrb[75].mxu1  ;;  %1254 = vrot.lane.b32.xlu0 %v1168_v51, %s3936_s9  ;;  %v386_v15 = vld [vmem:[%s4762_s8 + $0xe8] sm:$0xff] }
 0x17c   : > { %v836_v21 = vpop.f32.mrb[48].mxu0  ;;  %419 = vst.msk [vmem:[%s4769_s13 + $0xe8] sm:$0xff] %vm389_vm0, %v386_v15 }
 0x17d   : > { %v1062_v50 = vadd.f32 %v4778_v63, %v836_v21  ;;  %v1169_v48 = vadd.f32 %v4996_v31, %v1130_v35  ;;  %v838_v52 = vpop.f32.mrb[49].mxu0 }
 0x17e   : > { %v5090_v57 = vpop.f32.mrb[76].mxu1 }
 0x17f   : > { %v1131_v33 = vmul.f32 %v4979_v24, %v1062_v50  ;;  %v1746_v60 = vpop.f32.mrb[77].mxu1  ;;  %1256 = vrot.lane.b32.xlu1 %v1169_v48, %s3936_s9  ;;  %v387_v50 = vld [vmem:[%s4762_s8 + $0xf0] sm:$0xff] }
 0x180   : > { %v841_v49 = vpop.f32.mrb[50].mxu0  ;;  %420 = vst.msk [vmem:[%s4769_s13 + $0xf0] sm:$0xff] %vm389_vm0, %v387_v50 }
 0x181   : > { %v1067_v19 = vadd.f32 %v4772_v58, %v841_v49  ;;  %v1170_v63 = vadd.f32 %v4996_v31, %v1131_v33  ;;  %v843_v8 = vpop.f32.mrb[51].mxu0  ;;  %v5134_v33 = vpop.permute.xlu0 %2946 }
 0x182   : > { %v5099_v12 = vpop.f32.mrb[78].mxu1  ;;  %v388_v8 = vld [vmem:[%s4762_s8 + $0xf8] sm:$0xff] }
 0x183   : > { %v1132_v42 = vmul.f32 %v4979_v24, %v1067_v19  ;;  %v1751_v13 = vpop.f32.mrb[79].mxu1  ;;  %1258 = vrot.lane.b32.xlu0 %v1170_v63, %s3936_s9  ;;  %v5138_v63 = vpop.permute.xlu1 %2065  ;;  %421 = vst.msk [vmem:[%s4769_s13 + $0xf8] sm:$0xff] %vm389_vm0, %v388_v8 }
 0x184   : > { %v846_v14 = vpop.f32.mrb[52].mxu0 }
 0x185   : > { %v1072_v28 = vadd.f32 %v4791_v10, %v846_v14  ;;  %v1171_v58 = vadd.f32 %v4996_v31, %v1132_v42  ;;  %v848_v17 = vpop.f32.mrb[53].mxu0 }
 0x186   : > { %v5108_v47 = vpop.f32.mrb[80].mxu1 }
 0x187   : > { %v1133_v39 = vmul.f32 %v4979_v24, %v1072_v28  ;;  %v1756_v62 = vpop.f32.mrb[81].mxu1  ;;  %1260 = vrot.lane.b32.xlu1 %v1171_v58, %s3936_s9 }
 0x188   : > { %v851_v2 = vpop.f32.mrb[54].mxu0 }
 0x189   : > { %v1077_v26 = vadd.f32 %v4785_v7, %v851_v2  ;;  %v1172_v10 = vadd.f32 %v4996_v31, %v1133_v39  ;;  %v853_v30 = vpop.f32.mrb[55].mxu0  ;;  %v5155_v2 = vpop.permute.xlu1 %2987 }
 0x18a   : > { %v5119_v51 = vpop.f32.mrb[82].mxu1 }
 0x18b   : > { %v1134_v36 = vmul.f32 %v4979_v24, %v1077_v26  ;;  %v1761_v37 = vpop.f32.mrb[83].mxu1  ;;  %1262 = vrot.lane.b32.xlu0 %v1172_v10, %s3936_s9 }
 0x18c   : > { %v856_v35 = vpop.f32.mrb[56].mxu0 }
 0x18d   : > { %v1082_v7 = vadd.f32 %v4806_v25, %v856_v35  ;;  %v1173_v59 = vadd.f32 %v4996_v31, %v1134_v36  ;;  %v858_v21 = vpop.f32.mrb[57].mxu0 }
 0x18e   : > { %v5128_v48 = vpop.f32.mrb[84].mxu1 }
 0x18f   : > { %v1135_v52 = vmul.f32 %v4979_v24, %v1082_v7  ;;  %v1766_v54 = vpop.f32.mrb[85].mxu1  ;;  %1264 = vrot.lane.b32.xlu1 %v1173_v59, %s3936_s9 }
 0x190   : > { %v861_v60 = vpop.f32.mrb[58].mxu0 }
 0x191   : > { %v1087_v49 = vadd.f32 %v4799_v20, %v861_v60  ;;  %v1174_v25 = vadd.f32 %v4996_v31, %v1135_v52  ;;  %v863_v19 = vpop.f32.mrb[59].mxu0 }
 0x192   : > { %v5141_v9 = vpop.f32.mrb[86].mxu1 }
 0x193   : > { %v1136_v42 = vmul.f32 %v4979_v24, %v1087_v49  ;;  %v1771_v13 = vpop.f32.mrb[87].mxu1  ;;  %1266 = vrot.lane.b32.xlu0 %v1174_v25, %s3936_s9 }
 0x194   : > { %v866_v14 = vpop.f32.mrb[60].mxu0 }
 0x195   : > { %v1092_v20 = vadd.f32 %v4822_v41, %v866_v14  ;;  %v1211_v28 = vpop.permute.xlu0 %1210  ;;  %v1175_v58 = vadd.f32 %v4996_v31, %v1136_v42  ;;  %v868_v17 = vpop.f32.mrb[61].mxu0 }
 0x196   : > { %v5149_v3 = vpop.f32.mrb[88].mxu1  ;;  %1307 = vst.msk [vmem:[%s4769_s13] sm:$0xff] %vm1306_vm1, %v1211_v28 }
 0x197   : > { %v1137_v39 = vmul.f32 %v4979_v24, %v1092_v20  ;;  %v1776_v62 = vpop.f32.mrb[89].mxu1  ;;  %1268 = vrot.lane.b32.xlu1 %v1175_v58, %s3936_s9 }
 0x198   : > { %v871_v26 = vpop.f32.mrb[62].mxu0 }
 0x199   : > { %v1097_v41 = vadd.f32 %v4815_v38, %v871_v26  ;;  %v1213_v10 = vpop.permute.xlu0 %1212  ;;  %v1176_v30 = vadd.f32 %v4996_v31, %v1137_v39  ;;  %v873_v15 = vpop.f32.mrb[63].mxu0 }
 0x19a   : > { %v5159_v36 = vpop.f32.mrb[90].mxu1  ;;  %1308 = vst.msk [vmem:[%s4769_s13 + $0x8] sm:$0xff] %vm1306_vm1, %v1213_v10 }
 0x19b   : > { %v1138_v37 = vmul.f32 %v4979_v24, %v1097_v41  ;;  %v1781_v35 = vpop.f32.mrb[91].mxu1  ;;  %1270 = vrot.lane.b32.xlu0 %v1176_v30, %s3936_s9 }
 0x19c   : > { %v3640_v7 = vpop.f32.mrb[64].mxu0 }
 0x19d   : > { %v1865_v59 = vadd.f32 %v3640_v7, %v4847_v18  ;;  %v1215_v21 = vpop.permute.xlu1 %1214  ;;  %v1859_v50 = vpop.f32.mrb[65].mxu0  ;;  %v1177_v38 = vadd.f32 %v4996_v31, %v1138_v37 }
 0x19e   : > { %v5167_v52 = vpop.f32.mrb[92].mxu1  ;;  %1309 = vst.msk [vmem:[%s4769_s13 + $0x10] sm:$0xff] %vm1306_vm1, %v1215_v21  ;;  %v1860_v54 = vadd.f32 %v1859_v50, %v4832_v0 }
 0x19f   : > { %v2028_v60 = vmul.f32 %v5116_v32, %v1865_v59  ;;  %v1786_v24 = vpop.f32.mrb[93].mxu1  ;;  %1272 = vrot.lane.b32.xlu1 %v1177_v38, %s3936_s9 }
 0x1a0   : > { %v2027_v49 = vmul.f32 %v5116_v32, %v1860_v54  ;;  %v3643_v25 = vpop.f32.mrb[66].mxu0 }
 0x1a1   : > { %v1875_v18 = vadd.f32 %v3643_v25, %v4877_v4  ;;  %v1217_v19 = vpop.permute.xlu1 %1216  ;;  %v1869_v8 = vpop.f32.mrb[67].mxu0  ;;  %v2069_v31 = vadd.f32 %v5138_v63, %v2028_v60 }
 0x1a2   : > { %v5177_v42 = vpop.f32.mrb[94].mxu1  ;;  %1310 = vst.msk [vmem:[%s4769_s13 + $0x18] sm:$0xff] %vm1306_vm1, %v1217_v19  ;;  %v1870_v0 = vadd.f32 %v1869_v8, %v4862_v40  ;;  %v2068_v13 = vadd.f32 %v5138_v63, %v2027_v49 }
 0x1a3   : > { %v2030_v14 = vmul.f32 %v5116_v32, %v1875_v18  ;;  %v1791_v20 = vpop.f32.mrb[95].mxu1  ;;  %2134 = vrot.lane.b32.xlu1 %v2069_v31, %s3935_s18 }
 0x1a4   : > { %v2029_v4 = vmul.f32 %v5116_v32, %v1870_v0  ;;  %v3646_v28 = vpop.f32.mrb[68].mxu0  ;;  %2132 = vrot.lane.b32.xlu0 %v2068_v13, %s3935_s18 }
 0x1a5   : > { %v1885_v58 = vadd.f32 %v3646_v28, %v4907_v45  ;;  %v1219_v17 = vpop.permute.xlu0 %1218  ;;  %v1879_v39 = vpop.f32.mrb[69].mxu0  ;;  %v2071_v62 = vadd.f32 %v5138_v63, %v2030_v14 }
 0x1a6   : > { %v5189_v40 = vpop.f32.mrb[96].mxu1  ;;  %1311 = vst.msk [vmem:[%s4769_s13 + $0x20] sm:$0xff] %vm1306_vm1, %v1219_v17  ;;  %v1880_v26 = vadd.f32 %v1879_v39, %v4892_v23  ;;  %v2070_v41 = vadd.f32 %v5138_v63, %v2029_v4 }
 0x1a7   : > { %v2032_v10 = vmul.f32 %v5116_v32, %v1885_v58  ;;  %v2558_v30 = vpop.f32.mrb[97].mxu1  ;;  %2138 = vrot.lane.b32.xlu1 %v2071_v62, %s3935_s18 }
 0x1a8   : > { %v2031_v45 = vmul.f32 %v5116_v32, %v1880_v26  ;;  %v3649_v15 = vpop.f32.mrb[70].mxu0  ;;  %2136 = vrot.lane.b32.xlu0 %v2070_v41, %s3935_s18 }
 0x1a9   : > { %v1895_v37 = vadd.f32 %v3649_v15, %v4937_v43  ;;  %v1221_v35 = vpop.permute.xlu1 %1220  ;;  %v1889_v7 = vpop.f32.mrb[71].mxu0  ;;  %v2073_v59 = vadd.f32 %v5138_v63, %v2032_v10 }
 0x1aa   : > { %v5201_v23 = vpop.f32.mrb[98].mxu1  ;;  %1312 = vst.msk [vmem:[%s4769_s13 + $0x28] sm:$0xff] %vm1306_vm1, %v1221_v35  ;;  %v1890_v21 = vadd.f32 %v1889_v7, %v4922_v6  ;;  %v2072_v50 = vadd.f32 %v5138_v63, %v2031_v45 }
 0x1ab   : > { %v2034_v38 = vmul.f32 %v5116_v32, %v1895_v37  ;;  %v2563_v54 = vpop.f32.mrb[99].mxu1  ;;  %2142 = vrot.lane.b32.xlu1 %v2073_v59, %s3935_s18 }
 0x1ac   : > { %v2033_v43 = vmul.f32 %v5116_v32, %v1890_v21  ;;  %v3652_v60 = vpop.f32.mrb[72].mxu0  ;;  %2140 = vrot.lane.b32.xlu0 %v2072_v50, %s3935_s18 }
 0x1ad   : > { %v1905_v24 = vadd.f32 %v3652_v60, %v4962_v1  ;;  %v1223_v49 = vpop.permute.xlu0 %1222  ;;  %v1899_v25 = vpop.f32.mrb[73].mxu0  ;;  %v2075_v18 = vadd.f32 %v5138_v63, %v2034_v38 }
 0x1ae   : > { %v5213_v6 = vpop.f32.mrb[100].mxu1  ;;  %1313 = vst.msk [vmem:[%s4769_s13 + $0x30] sm:$0xff] %vm1306_vm1, %v1223_v49  ;;  %v1900_v19 = vadd.f32 %v1899_v25, %v4951_v55  ;;  %v2074_v8 = vadd.f32 %v5138_v63, %v2033_v43 }
 0x1af   : > { %v2036_v31 = vmul.f32 %v5116_v32, %v1905_v24  ;;  %v2568_v0 = vpop.f32.mrb[101].mxu1  ;;  %2146 = vrot.lane.b32.xlu1 %v2075_v18, %s3935_s18 }
 0x1b0   : > { %v2035_v1 = vmul.f32 %v5116_v32, %v1900_v19  ;;  %v3655_v13 = vpop.f32.mrb[74].mxu0  ;;  %2144 = vrot.lane.b32.xlu0 %v2074_v8, %s3935_s18 }
 0x1b1   : > { %v1915_v14 = vadd.f32 %v3655_v13, %v4986_v27  ;;  %v1225_v20 = vpop.permute.xlu1 %1224  ;;  %v1909_v4 = vpop.f32.mrb[75].mxu0  ;;  %v2077_v28 = vadd.f32 %v5138_v63, %v2036_v31 }
 0x1b2   : > { %v5225_v55 = vpop.f32.mrb[102].mxu1  ;;  %1314 = vst.msk [vmem:[%s4769_s13 + $0x38] sm:$0xff] %vm1306_vm1, %v1225_v20  ;;  %v1910_v58 = vadd.f32 %v1909_v4, %v4972_v16  ;;  %v2076_v17 = vadd.f32 %v5138_v63, %v2035_v1 }
 0x1b3   : > { %v2038_v39 = vmul.f32 %v5116_v32, %v1915_v14  ;;  %v2573_v62 = vpop.f32.mrb[103].mxu1  ;;  %2150 = vrot.lane.b32.xlu1 %v2077_v28, %s3935_s18 }
 0x1b4   : > { %v2037_v27 = vmul.f32 %v5116_v32, %v1910_v58  ;;  %v3658_v26 = vpop.f32.mrb[76].mxu0  ;;  %2148 = vrot.lane.b32.xlu0 %v2076_v17, %s3935_s18 }
 0x1b5   : > { %v1925_v41 = vadd.f32 %v3658_v26, %v5009_v56  ;;  %v1227_v10 = vpop.permute.xlu0 %1226  ;;  %v1919_v30 = vpop.f32.mrb[77].mxu0  ;;  %v2079_v45 = vadd.f32 %v5138_v63, %v2038_v39 }
 0x1b6   : > { %v5237_v16 = vpop.f32.mrb[104].mxu1  ;;  %1315 = vst.msk [vmem:[%s4769_s13 + $0x40] sm:$0xff] %vm1306_vm1, %v1227_v10  ;;  %v1920_v15 = vadd.f32 %v1919_v30, %v5000_v44  ;;  %v2078_v37 = vadd.f32 %v5138_v63, %v2037_v27 }
 0x1b7   : > { %v2040_v35 = vmul.f32 %v5116_v32, %v1925_v41  ;;  %v2578_v7 = vpop.f32.mrb[105].mxu1  ;;  %2154 = vrot.lane.b32.xlu1 %v2079_v45, %s3935_s18 }
 0x1b8   : > { %v2039_v56 = vmul.f32 %v5116_v32, %v1920_v15  ;;  %v3661_v59 = vpop.f32.mrb[78].mxu0  ;;  %2152 = vrot.lane.b32.xlu0 %v2078_v37, %s3935_s18 }
 0x1b9   : > { %v1935_v21 = vadd.f32 %v3661_v59, %v5027_v22  ;;  %v1229_v50 = vpop.permute.xlu1 %1228  ;;  %v1929_v38 = vpop.f32.mrb[79].mxu0  ;;  %v2081_v54 = vadd.f32 %v5138_v63, %v2040_v35 }
 0x1ba   : > { %v5249_v44 = vpop.f32.mrb[106].mxu1  ;;  %1316 = vst.msk [vmem:[%s4769_s13 + $0x48] sm:$0xff] %vm1306_vm1, %v1229_v50  ;;  %v1930_v43 = vadd.f32 %v1929_v38, %v5018_v5  ;;  %v2080_v60 = vadd.f32 %v5138_v63, %v2039_v56 }
 0x1bb   : > { %v2042_v24 = vmul.f32 %v5116_v32, %v1935_v21  ;;  %v2583_v49 = vpop.f32.mrb[107].mxu1  ;;  %2158 = vrot.lane.b32.xlu1 %v2081_v54, %s3935_s18 }
 0x1bc   : > { %v2041_v22 = vmul.f32 %v5116_v32, %v1930_v43  ;;  %v3664_v25 = vpop.f32.mrb[80].mxu0  ;;  %2156 = vrot.lane.b32.xlu0 %v2080_v60, %s3935_s18 }
 0x1bd   : > { %v1945_v18 = vadd.f32 %v3664_v25, %v5045_v11  ;;  %v1231_v19 = vpop.permute.xlu0 %1230  ;;  %v1939_v8 = vpop.f32.mrb[81].mxu0  ;;  %v2083_v31 = vadd.f32 %v5138_v63, %v2042_v24 }
 0x1be   : > { %v5261_v5 = vpop.f32.mrb[108].mxu1  ;;  %1317 = vst.msk [vmem:[%s4769_s13 + $0x50] sm:$0xff] %vm1306_vm1, %v1231_v19  ;;  %v1940_v0 = vadd.f32 %v1939_v8, %v5036_v34  ;;  %v2082_v1 = vadd.f32 %v5138_v63, %v2041_v22 }
 0x1bf   : > { %v2044_v13 = vmul.f32 %v5116_v32, %v1945_v18  ;;  %v2588_v14 = vpop.f32.mrb[109].mxu1  ;;  %2162 = vrot.lane.b32.xlu1 %v2083_v31, %s3935_s18 }
 0x1c0   : > { %v2043_v11 = vmul.f32 %v5116_v32, %v1940_v0  ;;  %v3667_v20 = vpop.f32.mrb[82].mxu0  ;;  %2160 = vrot.lane.b32.xlu0 %v2082_v1, %s3935_s18 }
 0x1c1   : > { %v1955_v4 = vadd.f32 %v3667_v20, %v5063_v61  ;;  %v1233_v28 = vpop.permute.xlu1 %1232  ;;  %v1949_v58 = vpop.f32.mrb[83].mxu0  ;;  %v2085_v17 = vadd.f32 %v5138_v63, %v2044_v13 }
 0x1c2   : > { %v5273_v34 = vpop.f32.mrb[110].mxu1  ;;  %1318 = vst.msk [vmem:[%s4769_s13 + $0x58] sm:$0xff] %vm1306_vm1, %v1233_v28  ;;  %v1950_v39 = vadd.f32 %v1949_v58, %v5054_v53  ;;  %v2084_v62 = vadd.f32 %v5138_v63, %v2043_v11 }
 0x1c3   : > { %v2046_v27 = vmul.f32 %v5116_v32, %v1955_v4  ;;  %v2593_v26 = vpop.f32.mrb[111].mxu1  ;;  %2166 = vrot.lane.b32.xlu1 %v2085_v17, %s3935_s18 }
 0x1c4   : > { %v2045_v61 = vmul.f32 %v5116_v32, %v1950_v39  ;;  %v3670_v41 = vpop.f32.mrb[84].mxu0  ;;  %2164 = vrot.lane.b32.xlu0 %v2084_v62, %s3935_s18 }
 0x1c5   : > { %v1965_v10 = vadd.f32 %v3670_v41, %v5081_v46  ;;  %v1235_v30 = vpop.permute.xlu0 %1234  ;;  %v1959_v45 = vpop.f32.mrb[85].mxu0  ;;  %v2087_v15 = vadd.f32 %v5138_v63, %v2046_v27 }
 0x1c6   : > { %v5285_v53 = vpop.f32.mrb[112].mxu1  ;;  %1319 = vst.msk [vmem:[%s4769_s13 + $0x60] sm:$0xff] %vm1306_vm1, %v1235_v30  ;;  %v1960_v37 = vadd.f32 %v1959_v45, %v5072_v29  ;;  %v2086_v35 = vadd.f32 %v5138_v63, %v2045_v61 }
 0x1c7   : > { %v2048_v7 = vmul.f32 %v5116_v32, %v1965_v10  ;;  %v2598_v56 = vpop.f32.mrb[113].mxu1  ;;  %2170 = vrot.lane.b32.xlu1 %v2087_v15, %s3935_s18 }
 0x1c8   : > { %v2047_v46 = vmul.f32 %v5116_v32, %v1960_v37  ;;  %v3673_v59 = vpop.f32.mrb[86].mxu0  ;;  %2168 = vrot.lane.b32.xlu0 %v2086_v35, %s3935_s18 }
 0x1c9   : > { %v1975_v21 = vadd.f32 %v3673_v59, %v5099_v12  ;;  %v1237_v50 = vpop.permute.xlu1 %1236  ;;  %v1969_v38 = vpop.f32.mrb[87].mxu0  ;;  %v2089_v54 = vadd.f32 %v5138_v63, %v2048_v7 }
 0x1ca   : > { %v5297_v29 = vpop.f32.mrb[114].mxu1  ;;  %1320 = vst.msk [vmem:[%s4769_s13 + $0x68] sm:$0xff] %vm1306_vm1, %v1237_v50  ;;  %v1970_v43 = vadd.f32 %v1969_v38, %v5090_v57  ;;  %v2088_v60 = vadd.f32 %v5138_v63, %v2047_v46 }
 0x1cb   : > { %v2050_v24 = vmul.f32 %v5116_v32, %v1975_v21  ;;  %v2603_v49 = vpop.f32.mrb[115].mxu1  ;;  %2174 = vrot.lane.b32.xlu1 %v2089_v54, %s3935_s18 }
 0x1cc   : > { %v2049_v12 = vmul.f32 %v5116_v32, %v1970_v43  ;;  %v3676_v22 = vpop.f32.mrb[88].mxu0  ;;  %2172 = vrot.lane.b32.xlu0 %v2088_v60, %s3935_s18 }
 0x1cd   : > { %v1985_v25 = vadd.f32 %v3676_v22, %v5119_v51  ;;  %v1239_v18 = vpop.permute.xlu0 %1238  ;;  %v1979_v19 = vpop.f32.mrb[89].mxu0  ;;  %v2091_v8 = vadd.f32 %v5138_v63, %v2050_v24 }
 0x1ce   : > { %v5309_v57 = vpop.f32.mrb[116].mxu1  ;;  %1321 = vst.msk [vmem:[%s4769_s13 + $0x70] sm:$0xff] %vm1306_vm1, %v1239_v18  ;;  %v1980_v31 = vadd.f32 %v1979_v19, %v5108_v47  ;;  %v2090_v0 = vadd.f32 %v5138_v63, %v2049_v12 }
 0x1cf   : > { %v2052_v1 = vmul.f32 %v5116_v32, %v1985_v25  ;;  %v2608_v13 = vpop.f32.mrb[117].mxu1  ;;  %2178 = vrot.lane.b32.xlu1 %v2091_v8, %s3935_s18 }
 0x1d0   : > { %v2051_v51 = vmul.f32 %v5116_v32, %v1980_v31  ;;  %v3679_v14 = vpop.f32.mrb[90].mxu0  ;;  %2176 = vrot.lane.b32.xlu0 %v2090_v0, %s3935_s18 }
 0x1d1   : > { %v1995_v11 = vadd.f32 %v3679_v14, %v5141_v9  ;;  %v1241_v20 = vpop.permute.xlu1 %1240  ;;  %v1989_v4 = vpop.f32.mrb[91].mxu0  ;;  %v2093_v28 = vadd.f32 %v5138_v63, %v2052_v1 }
 0x1d2   : > { %v5321_v47 = vpop.f32.mrb[118].mxu1  ;;  %1322 = vst.msk [vmem:[%s4769_s13 + $0x78] sm:$0xff] %vm1306_vm1, %v1241_v20  ;;  %v1990_v58 = vadd.f32 %v1989_v4, %v5128_v48  ;;  %v2092_v17 = vadd.f32 %v5138_v63, %v2051_v51 }
 0x1d3   : > { %v2054_v39 = vmul.f32 %v5116_v32, %v1995_v11  ;;  %v2613_v62 = vpop.f32.mrb[119].mxu1  ;;  %2182 = vrot.lane.b32.xlu1 %v2093_v28, %s3935_s18 }
 0x1d4   : > { %v2053_v9 = vmul.f32 %v5116_v32, %v1990_v58  ;;  %v3682_v27 = vpop.f32.mrb[92].mxu0  ;;  %2180 = vrot.lane.b32.xlu0 %v2092_v17, %s3935_s18 }
 0x1d5   : > { %v2005_v26 = vadd.f32 %v3682_v27, %v5159_v36  ;;  %v1243_v61 = vpop.permute.xlu0 %1242  ;;  %v1999_v41 = vpop.f32.mrb[93].mxu0  ;;  %v2095_v10 = vadd.f32 %v5138_v63, %v2054_v39 }
 0x1d6   : > { %v5333_v48 = vpop.f32.mrb[120].mxu1  ;;  %1323 = vst.msk [vmem:[%s4769_s13 + $0x80] sm:$0xff] %vm1306_vm1, %v1243_v61  ;;  %v2000_v30 = vadd.f32 %v1999_v41, %v5149_v3  ;;  %v2094_v45 = vadd.f32 %v5138_v63, %v2053_v9 }
 0x1d7   : > { %v2056_v15 = vmul.f32 %v5116_v32, %v2005_v26  ;;  %v2618_v37 = vpop.f32.mrb[121].mxu1  ;;  %2186 = vrot.lane.b32.xlu1 %v2095_v10, %s3935_s18 }
 0x1d8   : > { %v2055_v36 = vmul.f32 %v5116_v32, %v2000_v30  ;;  %v3685_v35 = vpop.f32.mrb[94].mxu0  ;;  %2184 = vrot.lane.b32.xlu0 %v2094_v45, %s3935_s18 }
 0x1d9   : > { %v2015_v7 = vadd.f32 %v3685_v35, %v5177_v42  ;;  %v1245_v56 = vpop.permute.xlu1 %1244  ;;  %v2009_v46 = vpop.f32.mrb[95].mxu0  ;;  %v2097_v59 = vadd.f32 %v5138_v63, %v2056_v15 }
 0x1da   : > { %v5345_v3 = vpop.f32.mrb[122].mxu1  ;;  %1324 = vst.msk [vmem:[%s4769_s13 + $0x88] sm:$0xff] %vm1306_vm1, %v1245_v56  ;;  %v2010_v21 = vadd.f32 %v2009_v46, %v5167_v52  ;;  %v2096_v50 = vadd.f32 %v5138_v63, %v2055_v36 }
 0x1db   : > { %v2058_v38 = vmul.f32 %v5116_v32, %v2015_v7  ;;  %v2623_v54 = vpop.f32.mrb[123].mxu1  ;;  %2190 = vrot.lane.b32.xlu1 %v2097_v59, %s3935_s18 }
 0x1dc   : > { %v2057_v42 = vmul.f32 %v5116_v32, %v2010_v21  ;;  %v3696_v43 = vpop.f32.mrb[96].mxu0  ;;  %2188 = vrot.lane.b32.xlu0 %v2096_v50, %s3935_s18 }
 0x1dd   : > { %v2787_v60 = vadd.f32 %v3696_v43, %v5201_v23  ;;  %v1247_v24 = vpop.permute.xlu0 %1246  ;;  %v2781_v49 = vpop.f32.mrb[97].mxu0  ;;  %v2099_v12 = vadd.f32 %v5138_v63, %v2058_v38 }
 0x1de   : > { %v5357_v52 = vpop.f32.mrb[124].mxu1  ;;  %1325 = vst.msk [vmem:[%s4769_s13 + $0x90] sm:$0xff] %vm1306_vm1, %v1247_v24  ;;  %v2782_v22 = vadd.f32 %v2781_v49, %v5189_v40  ;;  %v2098_v25 = vadd.f32 %v5138_v63, %v2057_v42 }
 0x1df   : > { %v2950_v32 = vmul.f32 %v5134_v33, %v2787_v60  ;;  %v2628_v18 = vpop.f32.mrb[125].mxu1  ;;  %2194 = vrot.lane.b32.xlu1 %v2099_v12, %s3935_s18 }
 0x1e0   : > { %v2949_v23 = vmul.f32 %v5134_v33, %v2782_v22  ;;  %v3699_v19 = vpop.f32.mrb[98].mxu0  ;;  %2192 = vrot.lane.b32.xlu0 %v2098_v25, %s3935_s18 }
 0x1e1   : > { %v2797_v8 = vadd.f32 %v3699_v19, %v5225_v55  ;;  %v1249_v31 = vpop.permute.xlu1 %1248  ;;  %v2791_v0 = vpop.f32.mrb[99].mxu0  ;;  %v2991_v1 = vadd.f32 %v5155_v2, %v2950_v32 }
 0x1e2   : > { %v5369_v40 = vpop.f32.mrb[126].mxu1  ;;  %1326 = vst.msk [vmem:[%s4769_s13 + $0x98] sm:$0xff] %vm1306_vm1, %v1249_v31  ;;  %v2792_v63 = vadd.f32 %v2791_v0, %v5213_v6  ;;  %v2990_v13 = vadd.f32 %v5155_v2, %v2949_v23 }
 0x1e3   : > { %v2952_v51 = vmul.f32 %v5134_v33, %v2797_v8  ;;  %v2633_v14 = vpop.f32.mrb[127].mxu1  ;;  %3056 = vrot.lane.b32.xlu1 %v2991_v1, %s3934_s17 }
 0x1e4   : > { %v2951_v55 = vmul.f32 %v5134_v33, %v2792_v63  ;;  %v3702_v11 = vpop.f32.mrb[100].mxu0  ;;  %3054 = vrot.lane.b32.xlu0 %v2990_v13, %s3934_s17 }
 0x1e5   : > { %v2807_v20 = vadd.f32 %v3702_v11, %v5249_v44  ;;  %v1251_v4 = vpop.permute.xlu0 %1250  ;;  %v2801_v28 = vpop.f32.mrb[101].mxu0  ;;  %v2993_v58 = vadd.f32 %v5155_v2, %v2952_v51 }
 0x1e6   : > { %v5381_v6 = vpop.f32.mrb[128].mxu1  ;;  %1327 = vst.msk [vmem:[%s4769_s13 + $0xa0] sm:$0xff] %vm1306_vm1, %v1251_v4  ;;  %v2802_v17 = vadd.f32 %v2801_v28, %v5237_v16  ;;  %v2992_v39 = vadd.f32 %v5155_v2, %v2951_v55 }
 0x1e7   : > { %v2954_v62 = vmul.f32 %v5134_v33, %v2807_v20  ;;  %v2638_v9 = vpop.f32.mrb[129].mxu1  ;;  %3060 = vrot.lane.b32.xlu1 %v2993_v58, %s3934_s17 }
 0x1e8   : > { %v2953_v44 = vmul.f32 %v5134_v33, %v2802_v17  ;;  %v3705_v27 = vpop.f32.mrb[102].mxu0  ;;  %3058 = vrot.lane.b32.xlu0 %v2992_v39, %s3934_s17 }
 0x1e9   : > { %v2817_v26 = vadd.f32 %v3705_v27, %v5273_v34  ;;  %v1253_v61 = vpop.permute.xlu1 %1252  ;;  %v2811_v41 = vpop.f32.mrb[103].mxu0  ;;  %v2995_v10 = vadd.f32 %v5155_v2, %v2954_v62 }
 0x1ea   : > { %v5393_v16 = vpop.f32.mrb[130].mxu1  ;;  %1328 = vst.msk [vmem:[%s4769_s13 + $0xa8] sm:$0xff] %vm1306_vm1, %v1253_v61  ;;  %v2812_v30 = vadd.f32 %v2811_v41, %v5261_v5  ;;  %v2994_v45 = vadd.f32 %v5155_v2, %v2953_v44 }
 0x1eb   : > { %v2956_v15 = vmul.f32 %v5134_v33, %v2817_v26  ;;  %v2643_v37 = vpop.f32.mrb[131].mxu1  ;;  %3064 = vrot.lane.b32.xlu1 %v2995_v10, %s3934_s17 }
 0x1ec   : > { %v2955_v34 = vmul.f32 %v5134_v33, %v2812_v30  ;;  %v3708_v36 = vpop.f32.mrb[104].mxu0  ;;  %3062 = vrot.lane.b32.xlu0 %v2994_v45, %s3934_s17 }
 0x1ed   : > { %v2827_v35 = vadd.f32 %v3708_v36, %v5297_v29  ;;  %v1255_v7 = vpop.permute.xlu0 %1254  ;;  %v2821_v56 = vpop.f32.mrb[105].mxu0  ;;  %v2997_v46 = vadd.f32 %v5155_v2, %v2956_v15 }
 0x1ee   : > { %v5405_v5 = vpop.f32.mrb[132].mxu1  ;;  %1329 = vst.msk [vmem:[%s4769_s13 + $0xb0] sm:$0xff] %vm1306_vm1, %v1255_v7  ;;  %v2822_v59 = vadd.f32 %v2821_v56, %v5285_v53  ;;  %v2996_v21 = vadd.f32 %v5155_v2, %v2955_v34 }
 0x1ef   : > { %v2958_v50 = vmul.f32 %v5134_v33, %v2827_v35  ;;  %v2648_v38 = vpop.f32.mrb[133].mxu1  ;;  %3068 = vrot.lane.b32.xlu1 %v2997_v46, %s3934_s17 }
 0x1f0   : > { %v2957_v29 = vmul.f32 %v5134_v33, %v2822_v59  ;;  %v3711_v54 = vpop.f32.mrb[106].mxu0  ;;  %3066 = vrot.lane.b32.xlu0 %v2996_v21, %s3934_s17 }
 0x1f1   : > { %v2837_v42 = vadd.f32 %v3711_v54, %v5321_v47  ;;  %v1257_v43 = vpop.permute.xlu1 %1256  ;;  %v2831_v60 = vpop.f32.mrb[107].mxu0  ;;  %v2999_v24 = vadd.f32 %v5155_v2, %v2958_v50 }
 0x1f2   : > { %v2651_v53 = vpop.f32.mrb[134].mxu1  ;;  %1330 = vst.msk [vmem:[%s4769_s13 + $0xb8] sm:$0xff] %vm1306_vm1, %v1257_v43  ;;  %v2832_v49 = vadd.f32 %v2831_v60, %v5309_v57  ;;  %v2998_v12 = vadd.f32 %v5155_v2, %v2957_v29 }
 0x1f3   : > { %v2960_v22 = vmul.f32 %v5134_v33, %v2837_v42  ;;  %v2653_v25 = vpop.f32.mrb[135].mxu1  ;;  %3072 = vrot.lane.b32.xlu1 %v2999_v24, %s3934_s17 }
 0x1f4   : > { %v2959_v32 = vmul.f32 %v5134_v33, %v2832_v49  ;;  %v3714_v47 = vpop.f32.mrb[108].mxu0  ;;  %3070 = vrot.lane.b32.xlu0 %v2998_v12, %s3934_s17 }
 0x1f5   : > { %v2847_v18 = vadd.f32 %v3714_v47, %v5345_v3  ;;  %v1259_v23 = vpop.permute.xlu0 %1258  ;;  %v2841_v19 = vpop.f32.mrb[109].mxu0  ;;  %v3001_v8 = vadd.f32 %v5155_v2, %v2960_v22 }
 0x1f6   : > { %v2656_v57 = vpop.f32.mrb[136].mxu1  ;;  %1331 = vst.msk [vmem:[%s4769_s13 + $0xc0] sm:$0xff] %vm1306_vm1, %v1259_v23  ;;  %v2842_v31 = vadd.f32 %v2841_v19, %v5333_v48  ;;  %v3000_v0 = vadd.f32 %v5155_v2, %v2959_v32 }
 0x1f7   : > { %v2962_v1 = vmul.f32 %v5134_v33, %v2847_v18  ;;  %v2658_v63 = vpop.f32.mrb[137].mxu1  ;;  %3076 = vrot.lane.b32.xlu1 %v3001_v8, %s3934_s17 }
 0x1f8   : > { %v2961_v13 = vmul.f32 %v5134_v33, %v2842_v31  ;;  %v3717_v3 = vpop.f32.mrb[110].mxu0  ;;  %3074 = vrot.lane.b32.xlu0 %v3000_v0, %s3934_s17 }
 0x1f9   : > { %v2857_v51 = vadd.f32 %v3717_v3, %v5369_v40  ;;  %v1261_v14 = vpop.permute.xlu1 %1260  ;;  %v2851_v55 = vpop.f32.mrb[111].mxu0  ;;  %v3003_v11 = vadd.f32 %v5155_v2, %v2962_v1 }
 0x1fa   : > { %v2661_v48 = vpop.f32.mrb[138].mxu1  ;;  %1332 = vst.msk [vmem:[%s4769_s13 + $0xc8] sm:$0xff] %vm1306_vm1, %v1261_v14  ;;  %v2852_v20 = vadd.f32 %v2851_v55, %v5357_v52  ;;  %v3002_v4 = vadd.f32 %v5155_v2, %v2961_v13 }
 0x1fb   : > { %v2964_v28 = vmul.f32 %v5134_v33, %v2857_v51  ;;  %v2663_v58 = vpop.f32.mrb[139].mxu1  ;;  %3080 = vrot.lane.b32.xlu1 %v3003_v11, %s3934_s17 }
 0x1fc   : > { %v2963_v17 = vmul.f32 %v5134_v33, %v2852_v20  ;;  %v3720_v40 = vpop.f32.mrb[112].mxu0  ;;  %3078 = vrot.lane.b32.xlu0 %v3002_v4, %s3934_s17 }
 0x1fd   : > { %v2867_v39 = vadd.f32 %v3720_v40, %v5393_v16  ;;  %v1263_v62 = vpop.permute.xlu0 %1262  ;;  %v2861_v9 = vpop.f32.mrb[113].mxu0  ;;  %v3005_v44 = vadd.f32 %v5155_v2, %v2964_v28 }
 0x1fe   : > { %v2666_v52 = vpop.f32.mrb[140].mxu1  ;;  %1333 = vst.msk [vmem:[%s4769_s13 + $0xd0] sm:$0xff] %vm1306_vm1, %v1263_v62  ;;  %v2862_v27 = vadd.f32 %v2861_v9, %v5381_v6  ;;  %v3004_v26 = vadd.f32 %v5155_v2, %v2963_v17 }
 0x1ff   : > { %v2966_v61 = vmul.f32 %v5134_v33, %v2867_v39  ;;  %v2668_v41 = vpop.f32.mrb[141].mxu1  ;;  %3084 = vrot.lane.b32.xlu1 %v3005_v44, %s3934_s17 }
 0x200   : > { %v2965_v10 = vmul.f32 %v5134_v33, %v2862_v27  ;;  %v3723_v16 = vpop.f32.mrb[114].mxu0  ;;  %3082 = vrot.lane.b32.xlu0 %v3004_v26, %s3934_s17 }
 0x201   : > { %v2877_v30 = vadd.f32 %v3723_v16, %v2651_v53  ;;  %v1265_v45 = vpop.permute.xlu1 %1264  ;;  %v2871_v15 = vpop.f32.mrb[115].mxu0  ;;  %v3007_v37 = vadd.f32 %v5155_v2, %v2966_v61 }
 0x202   : > { %v2671_v34 = vpop.f32.mrb[142].mxu1  ;;  %1334 = vst.msk [vmem:[%s4769_s13 + $0xd8] sm:$0xff] %vm1306_vm1, %v1265_v45  ;;  %v2872_v6 = vadd.f32 %v2871_v15, %v5405_v5  ;;  %v3006_v36 = vadd.f32 %v5155_v2, %v2965_v10 }
 0x203   : > { %v2968_v35 = vmul.f32 %v5134_v33, %v2877_v30  ;;  %v2673_v7 = vpop.f32.mrb[143].mxu1  ;;  %3088 = vrot.lane.b32.xlu1 %v3007_v37, %s3934_s17 }
 0x204   : > { %v2967_v56 = vmul.f32 %v5134_v33, %v2872_v6  ;;  %v3726_v46 = vpop.f32.mrb[116].mxu0  ;;  %3086 = vrot.lane.b32.xlu0 %v3006_v36, %s3934_s17 }
 0x205   : > { %v2887_v59 = vadd.f32 %v3726_v46, %v2661_v48  ;;  %v1267_v21 = vpop.permute.xlu0 %1266  ;;  %v2881_v50 = vpop.f32.mrb[117].mxu0  ;;  %v3009_v38 = vadd.f32 %v5155_v2, %v2968_v35 }
 0x206   : > { %v2676_v29 = vpop.f32.mrb[144].mxu1  ;;  %1335 = vst.msk [vmem:[%s4769_s13 + $0xe0] sm:$0xff] %vm1306_vm1, %v1267_v21  ;;  %v2882_v5 = vadd.f32 %v2881_v50, %v2656_v57  ;;  %v3008_v54 = vadd.f32 %v5155_v2, %v2967_v56 }
 0x207   : > { %v2970_v42 = vmul.f32 %v5134_v33, %v2887_v59  ;;  %v2678_v43 = vpop.f32.mrb[145].mxu1  ;;  %3092 = vrot.lane.b32.xlu1 %v3009_v38, %s3934_s17 }
 0x208   : > { %v2969_v60 = vmul.f32 %v5134_v33, %v2882_v5  ;;  %v3729_v24 = vpop.f32.mrb[118].mxu0  ;;  %3090 = vrot.lane.b32.xlu0 %v3008_v54, %s3934_s17 }
 0x209   : > { %v2897_v53 = vadd.f32 %v3729_v24, %v2671_v34  ;;  %v1269_v49 = vpop.permute.xlu1 %1268  ;;  %v2891_v12 = vpop.f32.mrb[119].mxu0  ;;  %v3011_v22 = vadd.f32 %v5155_v2, %v2970_v42 }
 0x20a   : > { %v2681_v25 = vpop.f32.mrb[146].mxu1  ;;  %1336 = vst.msk [vmem:[%s4769_s13 + $0xe8] sm:$0xff] %vm1306_vm1, %v1269_v49  ;;  %v2892_v32 = vadd.f32 %v2891_v12, %v2666_v52  ;;  %v3010_v47 = vadd.f32 %v5155_v2, %v2969_v60 }
 0x20b   : > { %v2972_v18 = vmul.f32 %v5134_v33, %v2897_v53  ;;  %v2683_v23 = vpop.f32.mrb[147].mxu1  ;;  %3096 = vrot.lane.b32.xlu1 %v3011_v22, %s3934_s17 }
 0x20c   : > { %v2971_v19 = vmul.f32 %v5134_v33, %v2892_v32  ;;  %v3732_v8 = vpop.f32.mrb[120].mxu0  ;;  %3094 = vrot.lane.b32.xlu0 %v3010_v47, %s3934_s17 }
 0x20d   : > { %v2907_v57 = vadd.f32 %v3732_v8, %v2681_v25  ;;  %v1271_v31 = vpop.permute.xlu0 %1270  ;;  %v2901_v0 = vpop.f32.mrb[121].mxu0  ;;  %v3013_v1 = vadd.f32 %v5155_v2, %v2972_v18 }
 0x20e   : > { %v2686_v63 = vpop.f32.mrb[148].mxu1  ;;  %1337 = vst.msk [vmem:[%s4769_s13 + $0xf0] sm:$0xff] %vm1306_vm1, %v1271_v31  ;;  %v2902_v13 = vadd.f32 %v2901_v0, %v2676_v29  ;;  %v3012_v3 = vadd.f32 %v5155_v2, %v2971_v19 }
 0x20f   : > { %v2974_v51 = vmul.f32 %v5134_v33, %v2907_v57  ;;  %v2688_v14 = vpop.f32.mrb[149].mxu1  ;;  %3100 = vrot.lane.b32.xlu1 %v3013_v1, %s3934_s17 }
 0x210   : > { %v2973_v55 = vmul.f32 %v5134_v33, %v2902_v13  ;;  %v3735_v11 = vpop.f32.mrb[122].mxu0  ;;  %3098 = vrot.lane.b32.xlu0 %v3012_v3, %s3934_s17 }
 0x211   : > { %v1273_v48 = vpop.permute.xlu1 %1272  ;;  %v2911_v20 = vpop.f32.mrb[123].mxu0  ;;  %v3015_v4 = vadd.f32 %v5155_v2, %v2974_v51 }
 0x212   : > { %v2691_v28 = vpop.f32.mrb[150].mxu1  ;;  %1338 = vst.msk [vmem:[%s4769_s13 + $0xf8] sm:$0xff] %vm1306_vm1, %v1273_v48  ;;  %v2912_v58 = vadd.f32 %v2911_v20, %v2686_v63  ;;  %v3014_v17 = vadd.f32 %v5155_v2, %v2973_v55 }
 0x213   : > { %v2917_v40 = vadd.f32 %v3735_v11, %v2691_v28  ;;  %v2693_v39 = vpop.f32.mrb[151].mxu1  ;;  %3104 = vrot.lane.b32.xlu1 %v3015_v4, %s3934_s17 }
 0x214   : > { %v2975_v62 = vmul.f32 %v5134_v33, %v2912_v58  ;;  %v3738_v9 = vpop.f32.mrb[124].mxu0  ;;  %3102 = vrot.lane.b32.xlu0 %v3014_v17, %s3934_s17 }
 0x215   : > { %v2976_v44 = vmul.f32 %v5134_v33, %v2917_v40  ;;  %v2135_v52 = vpop.permute.xlu1 %2134  ;;  %v2921_v27 = vpop.f32.mrb[125].mxu0 }
 0x216   : > { %v2696_v26 = vpop.f32.mrb[152].mxu1  ;;  %2230 = vst.msk [vmem:[%s4769_s13 + $0x8] sm:$0xff] %vm2228_vm2, %v2135_v52  ;;  %v2133_v61 = vpop.permute.xlu0 %2132  ;;  %v3016_v41 = vadd.f32 %v5155_v2, %v2975_v62 }
 0x217   : > { %v2922_v10 = vadd.f32 %v2921_v27, %v2696_v26  ;;  %v2698_v16 = vpop.f32.mrb[153].mxu1  ;;  %2229 = vst.msk [vmem:[%s4769_s13] sm:$0xff] %vm2228_vm2, %v2133_v61  ;;  %v3017_v30 = vadd.f32 %v5155_v2, %v2976_v44 }
 0x218   : > { %3106 = vrot.lane.b32.xlu0 %v3016_v41, %s3934_s17  ;;  %v3741_v45 = vpop.f32.mrb[126].mxu0 }
 0x219   : > { %v2977_v15 = vmul.f32 %v5134_v33, %v2922_v10  ;;  %3108 = vrot.lane.b32.xlu1 %v3017_v30, %s3934_s17  ;;  %v2139_v37 = vpop.permute.xlu1 %2138  ;;  %v2931_v34 = vpop.f32.mrb[127].mxu0 }
 0x21a   : > { %v2701_v6 = vpop.f32.mrb[154].mxu1  ;;  %2232 = vst.msk [vmem:[%s4769_s13 + $0x18] sm:$0xff] %vm2228_vm2, %v2139_v37  ;;  %v2137_v36 = vpop.permute.xlu0 %2136 }
 0x21b   : > { %v2927_v35 = vadd.f32 %v3738_v9, %v2701_v6  ;;  %v2703_v7 = vpop.f32.mrb[155].mxu1  ;;  %2231 = vst.msk [vmem:[%s4769_s13 + $0x10] sm:$0xff] %vm2228_vm2, %v2137_v36  ;;  %v3018_v56 = vadd.f32 %v5155_v2, %v2977_v15 }
 0x21d   : > { %v2978_v46 = vmul.f32 %v5134_v33, %v2927_v35  ;;  %3110 = vrot.lane.b32.xlu0 %v3018_v56, %s3934_s17  ;;  %v2143_v59 = vpop.permute.xlu1 %2142 }
 0x21e   : > { %v2706_v21 = vpop.f32.mrb[156].mxu1  ;;  %2234 = vst.msk [vmem:[%s4769_s13 + $0x28] sm:$0xff] %vm2228_vm2, %v2143_v59  ;;  %v2141_v50 = vpop.permute.xlu0 %2140 }
 0x21f   : > { %v2932_v38 = vadd.f32 %v2931_v34, %v2706_v21  ;;  %v2708_v29 = vpop.f32.mrb[157].mxu1  ;;  %2233 = vst.msk [vmem:[%s4769_s13 + $0x20] sm:$0xff] %vm2228_vm2, %v2141_v50  ;;  %v3019_v5 = vadd.f32 %v5155_v2, %v2978_v46 }
 0x221   : > { %v2979_v54 = vmul.f32 %v5134_v33, %v2932_v38  ;;  %3112 = vrot.lane.b32.xlu1 %v3019_v5, %s3934_s17  ;;  %v2147_v42 = vpop.permute.xlu1 %2146 }
 0x222   : > { %v2711_v43 = vpop.f32.mrb[158].mxu1  ;;  %2236 = vst.msk [vmem:[%s4769_s13 + $0x38] sm:$0xff] %vm2228_vm2, %v2147_v42  ;;  %v2145_v60 = vpop.permute.xlu0 %2144 }
 0x223   : > { %v3020_v24 = vadd.f32 %v5155_v2, %v2979_v54  ;;  %v2937_v53 = vadd.f32 %v3741_v45, %v2711_v43  ;;  %v2713_v49 = vpop.f32.mrb[159].mxu1  ;;  %2235 = vst.msk [vmem:[%s4769_s13 + $0x30] sm:$0xff] %vm2228_vm2, %v2145_v60 }
 0x225   : > { %v2980_v12 = vmul.f32 %v5134_v33, %v2937_v53  ;;  %3114 = vrot.lane.b32.xlu0 %v3020_v24, %s3934_s17  ;;  %v2151_v22 = vpop.permute.xlu1 %2150 }
 0x226   : > { %2238 = vst.msk [vmem:[%s4769_s13 + $0x48] sm:$0xff] %vm2228_vm2, %v2151_v22  ;;  %v2149_v25 = vpop.permute.xlu0 %2148 }
 0x227   : > { %v3021_v32 = vadd.f32 %v5155_v2, %v2980_v12  ;;  %2237 = vst.msk [vmem:[%s4769_s13 + $0x40] sm:$0xff] %vm2228_vm2, %v2149_v25 }
 0x229   : > { %3116 = vrot.lane.b32.xlu1 %v3021_v32, %s3934_s17  ;;  %v2155_v47 = vpop.permute.xlu1 %2154 }
 0x22a   : > { %2240 = vst.msk [vmem:[%s4769_s13 + $0x58] sm:$0xff] %vm2228_vm2, %v2155_v47  ;;  %v2153_v33 = vpop.permute.xlu0 %2152 }
 0x22b   : > { %2239 = vst.msk [vmem:[%s4769_s13 + $0x50] sm:$0xff] %vm2228_vm2, %v2153_v33 }
 0x22d   : > { %v2159_v18 = vpop.permute.xlu1 %2158 }
 0x22e   : > { %2242 = vst.msk [vmem:[%s4769_s13 + $0x68] sm:$0xff] %vm2228_vm2, %v2159_v18  ;;  %v2157_v23 = vpop.permute.xlu0 %2156 }
 0x22f   : > { %2241 = vst.msk [vmem:[%s4769_s13 + $0x60] sm:$0xff] %vm2228_vm2, %v2157_v23 }
 0x231   : > { %v2163_v2 = vpop.permute.xlu1 %2162 }
 0x232   : > { %2244 = vst.msk [vmem:[%s4769_s13 + $0x78] sm:$0xff] %vm2228_vm2, %v2163_v2  ;;  %v2161_v19 = vpop.permute.xlu0 %2160 }
 0x233   : > { %2243 = vst.msk [vmem:[%s4769_s13 + $0x70] sm:$0xff] %vm2228_vm2, %v2161_v19 }
 0x235   : > { %v2167_v8 = vpop.permute.xlu1 %2166 }
 0x236   : > { %2246 = vst.msk [vmem:[%s4769_s13 + $0x88] sm:$0xff] %vm2228_vm2, %v2167_v8  ;;  %v2165_v57 = vpop.permute.xlu0 %2164 }
 0x237   : > { %2245 = vst.msk [vmem:[%s4769_s13 + $0x80] sm:$0xff] %vm2228_vm2, %v2165_v57 }
 0x239   : > { %v2171_v31 = vpop.permute.xlu1 %2170 }
 0x23a   : > { %2248 = vst.msk [vmem:[%s4769_s13 + $0x98] sm:$0xff] %vm2228_vm2, %v2171_v31  ;;  %v2169_v0 = vpop.permute.xlu0 %2168 }
 0x23b   : > { %2247 = vst.msk [vmem:[%s4769_s13 + $0x90] sm:$0xff] %vm2228_vm2, %v2169_v0 }
 0x23d   : > { %v2175_v1 = vpop.permute.xlu1 %2174 }
 0x23e   : > { %2250 = vst.msk [vmem:[%s4769_s13 + $0xa8] sm:$0xff] %vm2228_vm2, %v2175_v1  ;;  %v2173_v63 = vpop.permute.xlu0 %2172 }
 0x23f   : > { %2249 = vst.msk [vmem:[%s4769_s13 + $0xa0] sm:$0xff] %vm2228_vm2, %v2173_v63 }
 0x241   : > { %v2179_v13 = vpop.permute.xlu1 %2178 }
 0x242   : > { %2252 = vst.msk [vmem:[%s4769_s13 + $0xb8] sm:$0xff] %vm2228_vm2, %v2179_v13  ;;  %v2177_v3 = vpop.permute.xlu0 %2176 }
 0x243   : > { %2251 = vst.msk [vmem:[%s4769_s13 + $0xb0] sm:$0xff] %vm2228_vm2, %v2177_v3 }
 0x245   : > { %v2183_v51 = vpop.permute.xlu1 %2182 }
 0x246   : > { %2254 = vst.msk [vmem:[%s4769_s13 + $0xc8] sm:$0xff] %vm2228_vm2, %v2183_v51  ;;  %v2181_v14 = vpop.permute.xlu0 %2180 }
 0x247   : > { %2253 = vst.msk [vmem:[%s4769_s13 + $0xc0] sm:$0xff] %vm2228_vm2, %v2181_v14 }
 0x249   : > { %v2187_v55 = vpop.permute.xlu1 %2186 }
 0x24a   : > { %2256 = vst.msk [vmem:[%s4769_s13 + $0xd8] sm:$0xff] %vm2228_vm2, %v2187_v55  ;;  %v2185_v11 = vpop.permute.xlu0 %2184 }
 0x24b   : > { %2255 = vst.msk [vmem:[%s4769_s13 + $0xd0] sm:$0xff] %vm2228_vm2, %v2185_v11 }
 0x24d   : > { %v2191_v48 = vpop.permute.xlu1 %2190 }
 0x24e   : > { %2258 = vst.msk [vmem:[%s4769_s13 + $0xe8] sm:$0xff] %vm2228_vm2, %v2191_v48  ;;  %v2189_v20 = vpop.permute.xlu0 %2188 }
 0x24f   : > { %2257 = vst.msk [vmem:[%s4769_s13 + $0xe0] sm:$0xff] %vm2228_vm2, %v2189_v20 }
 0x251   : > { %v2195_v4 = vpop.permute.xlu1 %2194 }
 0x252   : > { %2260 = vst.msk [vmem:[%s4769_s13 + $0xf8] sm:$0xff] %vm2228_vm2, %v2195_v4  ;;  %v2193_v28 = vpop.permute.xlu0 %2192 }
 0x253   : > { %2259 = vst.msk [vmem:[%s4769_s13 + $0xf0] sm:$0xff] %vm2228_vm2, %v2193_v28 }
 0x255   : > { %v3057_v58 = vpop.permute.xlu1 %3056 }
 0x256   : > { %3152 = vst.msk [vmem:[%s4769_s13 + $0x8] sm:$0xff] %vm3150_vm3, %v3057_v58  ;;  %v3055_v17 = vpop.permute.xlu0 %3054 }
 0x257   : > { %3151 = vst.msk [vmem:[%s4769_s13] sm:$0xff] %vm3150_vm3, %v3055_v17 }
 0x259   : > { %v3061_v40 = vpop.permute.xlu1 %3060 }
 0x25a   : > { %3154 = vst.msk [vmem:[%s4769_s13 + $0x18] sm:$0xff] %vm3150_vm3, %v3061_v40  ;;  %v3059_v39 = vpop.permute.xlu0 %3058 }
 0x25b   : > { %3153 = vst.msk [vmem:[%s4769_s13 + $0x10] sm:$0xff] %vm3150_vm3, %v3059_v39 }
 0x25d   : > { %v3065_v62 = vpop.permute.xlu1 %3064 }
 0x25e   : > { %3156 = vst.msk [vmem:[%s4769_s13 + $0x28] sm:$0xff] %vm3150_vm3, %v3065_v62  ;;  %v3063_v9 = vpop.permute.xlu0 %3062 }
 0x25f   : > { %3155 = vst.msk [vmem:[%s4769_s13 + $0x20] sm:$0xff] %vm3150_vm3, %v3063_v9 }
 0x261   : > { %v3069_v44 = vpop.permute.xlu1 %3068 }
 0x262   : > { %3158 = vst.msk [vmem:[%s4769_s13 + $0x38] sm:$0xff] %vm3150_vm3, %v3069_v44  ;;  %v3067_v52 = vpop.permute.xlu0 %3066 }
 0x263   : > { %3157 = vst.msk [vmem:[%s4769_s13 + $0x30] sm:$0xff] %vm3150_vm3, %v3067_v52 }
 0x265   : > { %v3073_v27 = vpop.permute.xlu1 %3072 }
 0x266   : > { %3160 = vst.msk [vmem:[%s4769_s13 + $0x48] sm:$0xff] %vm3150_vm3, %v3073_v27  ;;  %v3071_v26 = vpop.permute.xlu0 %3070 }
 0x267   : > { %3159 = vst.msk [vmem:[%s4769_s13 + $0x40] sm:$0xff] %vm3150_vm3, %v3071_v26 }
 0x269   : > { %v3077_v61 = vpop.permute.xlu1 %3076 }
 0x26a   : > { %3162 = vst.msk [vmem:[%s4769_s13 + $0x58] sm:$0xff] %vm3150_vm3, %v3077_v61  ;;  %v3075_v41 = vpop.permute.xlu0 %3074 }
 0x26b   : > { %3161 = vst.msk [vmem:[%s4769_s13 + $0x50] sm:$0xff] %vm3150_vm3, %v3075_v41 }
 0x26d   : > { %v3081_v10 = vpop.permute.xlu1 %3080 }
 0x26e   : > { %3164 = vst.msk [vmem:[%s4769_s13 + $0x68] sm:$0xff] %vm3150_vm3, %v3081_v10  ;;  %v3079_v16 = vpop.permute.xlu0 %3078 }
 0x26f   : > { %3163 = vst.msk [vmem:[%s4769_s13 + $0x60] sm:$0xff] %vm3150_vm3, %v3079_v16 }
 0x271   : > { %v3085_v30 = vpop.permute.xlu1 %3084 }
 0x272   : > { %3166 = vst.msk [vmem:[%s4769_s13 + $0x78] sm:$0xff] %vm3150_vm3, %v3085_v30  ;;  %v3083_v45 = vpop.permute.xlu0 %3082 }
 0x273   : > { %3165 = vst.msk [vmem:[%s4769_s13 + $0x70] sm:$0xff] %vm3150_vm3, %v3083_v45 }
 0x275   : > { %v3089_v15 = vpop.permute.xlu1 %3088 }
 0x276   : > { %3168 = vst.msk [vmem:[%s4769_s13 + $0x88] sm:$0xff] %vm3150_vm3, %v3089_v15  ;;  %v3087_v37 = vpop.permute.xlu0 %3086 }
 0x277   : > { %3167 = vst.msk [vmem:[%s4769_s13 + $0x80] sm:$0xff] %vm3150_vm3, %v3087_v37 }
 0x279   : > { %v3093_v34 = vpop.permute.xlu1 %3092 }
 0x27a   : > { %3170 = vst.msk [vmem:[%s4769_s13 + $0x98] sm:$0xff] %vm3150_vm3, %v3093_v34  ;;  %v3091_v6 = vpop.permute.xlu0 %3090 }
 0x27b   : > { %3169 = vst.msk [vmem:[%s4769_s13 + $0x90] sm:$0xff] %vm3150_vm3, %v3091_v6 }
 0x27d   : > { %v3097_v36 = vpop.permute.xlu1 %3096 }
 0x27e   : > { %3172 = vst.msk [vmem:[%s4769_s13 + $0xa8] sm:$0xff] %vm3150_vm3, %v3097_v36  ;;  %v3095_v35 = vpop.permute.xlu0 %3094 }
 0x27f   : > { %3171 = vst.msk [vmem:[%s4769_s13 + $0xa0] sm:$0xff] %vm3150_vm3, %v3095_v35 }
 0x281   : > { %v3101_v7 = vpop.permute.xlu1 %3100 }
 0x282   : > { %3174 = vst.msk [vmem:[%s4769_s13 + $0xb8] sm:$0xff] %vm3150_vm3, %v3101_v7  ;;  %v3099_v56 = vpop.permute.xlu0 %3098 }
 0x283   : > { %3173 = vst.msk [vmem:[%s4769_s13 + $0xb0] sm:$0xff] %vm3150_vm3, %v3099_v56 }
 0x285   : > { %v3105_v46 = vpop.permute.xlu1 %3104 }
 0x286   : > { %3176 = vst.msk [vmem:[%s4769_s13 + $0xc8] sm:$0xff] %vm3150_vm3, %v3105_v46  ;;  %v3103_v59 = vpop.permute.xlu0 %3102 }
 0x287   : > { %3175 = vst.msk [vmem:[%s4769_s13 + $0xc0] sm:$0xff] %vm3150_vm3, %v3103_v59 }
 0x28a   : > { %v3107_v21 = vpop.permute.xlu0 %3106 }
 0x28b   : > { %v3109_v50 = vpop.permute.xlu1 %3108  ;;  %3177 = vst.msk [vmem:[%s4769_s13 + $0xd0] sm:$0xff] %vm3150_vm3, %v3107_v21 }
 0x28c   : > { %3178 = vst.msk [vmem:[%s4769_s13 + $0xd8] sm:$0xff] %vm3150_vm3, %v3109_v50 }
 0x28f   : > { %v3111_v38 = vpop.permute.xlu0 %3110 }
 0x290   : > { %3179 = vst.msk [vmem:[%s4769_s13 + $0xe0] sm:$0xff] %vm3150_vm3, %v3111_v38 }
 0x293   : > { %v3113_v29 = vpop.permute.xlu1 %3112 }
 0x294   : > { %3180 = vst.msk [vmem:[%s4769_s13 + $0xe8] sm:$0xff] %vm3150_vm3, %v3113_v29 }
 0x297   : > { %v3115_v5 = vpop.permute.xlu0 %3114 }
 0x298   : > { %3181 = vst.msk [vmem:[%s4769_s13 + $0xf0] sm:$0xff] %vm3150_vm3, %v3115_v5 }
 0x29b   : > { %v3117_v54 = vpop.permute.xlu1 %3116 }
 0x29c   : > { %3182 = vst.msk [vmem:[%s4769_s13 + $0xf8] sm:$0xff] %vm3150_vm3, %v3117_v54 }
 0x29d PF: > { %s17_s24 = sadd.s32 1, %s3931_s24  }
 0x29e   : > { %p14_p4 = scmp.ge.s32.totalorder %s17_s24, 4  }
 0x2a0   :  { %16 = sbr.rel (!%p14_p4) target bundleno = 1 (0x1), region = 89 }

// kernel: rfb_m_forward.9
= control target key start
LH: loop header
LB: loop body
LE: loop exit
PB: predicated region body
PF: predicated region fallthrough
CT: control target
= control target key end

     0   :  { %10 = vsyncpa [#allocation3], 0  ;;  %s4143_s0 = inlined_call_operand.vmem [shape: f32[512,1152], index: 0, kind: input, shape index: {}]   ;;  %s4144_s1 = inlined_call_operand.vmem [shape: f32[1152,32], index: 1, kind: input, shape index: {}]   ;;  %s4145_s2 = inlined_call_operand.vmem [shape: f32[1,32], index: 2, kind: input, shape index: {}]   ;;  %s4146_s3 = inlined_call_operand.vmem [shape: f32[1,32], index: 3, kind: input, shape index: {}]   ;;  %s4147_s4 = inlined_call_operand.vmem [shape: f32[512,32], index: 4, kind: input, shape index: {}]   ;;  %s4148_s5 = inlined_call_operand.hbm [shape: f32[512,32], index: 5, kind: output, shape index: {}]  }
   0x1   :  { %12 = vsyncpa [#allocation3 + $0x1], 0  ;;  %s2781_s18 = smov 0   ;;  %s2783_s19 = smov 0  }
   0x2   :  { %s2785_s20 = smov 0   ;;  %s2787_s21 = smov 0  }
   0x3 LB: > { %s2802_s22 = sadd.s32 4294967295, %s2745_s21   ;;  %s2103_s23 = sadd.s32 4294967294, %s2745_s21   ;;  %s2745_s21 = sphi %s2787_s21, %s4154_s21   ;;  %s2741_s20 = sphi %s2785_s20, %s4153_s20   ;;  %s2737_s19 = sphi %s2783_s19, %s4152_s19   ;;  %s2733_s18 = sphi %s2781_s18, %s4151_s18  }
   0x4   : > { %s2806_s24 = sadd.s32 1, %s2745_s21   ;;  %s140_s25 = sadd.s32 1, %s2741_s20 }
   0x5   : > { %s137_s26 = ssub.s32 %s2745_s21, %s2806_s24  ;;  %p150_p0 = scmp.ne.s32.totalorder %s2741_s20, %s2737_s19 }
   0x6   : > { %p138_p1 = scmp.eq.s32.totalorder %s137_s26, 0  ;;  %p151_p2 = scmp.eq.s32.totalorder %s2802_s22, 1 }
   0x7   : > { %p156_p3 = scmp.ne.s32.totalorder %s2737_s19, %s2733_s18  ;;  %p157_p4 = scmp.eq.s32.totalorder %s2103_s23, 1 }
   0x8   : > { %s2817_s27 = scalar_select %p138_p1, %s2741_s20, %s140_s25  }
   0x9   : > { %p2819_p5 = por %p151_p2, %p150_p0  ;;  %p2823_p6 = por %p157_p4, %p156_p3 }
   0xa   : > { %p2106_p7 = scmp.ge.s32.totalorder %s2745_s21, 1  ;;  %p203_p8 = scmp.lt.s32.totalorder %s2745_s21, 3 }
   0xc   : > { %p204_p9 = pnand %p2106_p7, %p203_p8 }
   0xd   : > { %v539_v0 = vld [vmem:[%s4144_s1] sm:$0xff] (!%p204_p9)  ;;  %v540_v1 = vld [vmem:[%s4144_s1 + $0x8] sm:$0xff] (!%p204_p9)  ;;  %v2747_v3 = vmov (!%p204_p9), 0.0|0.0   ;;  %v541_v6 = vld [vmem:[%s4144_s1 + $0x10] sm:$0xff] (!%p204_p9)  ;;  %s2108_s30 = sshll.u32 (!%p204_p9), %s2802_s22, 5  ;;  %vm1982_vm0 = vcmask (!%p204_p9), 261120  }
   0xe   : > { %207 = sbr.rel (%p204_p9) target bundleno = 603 (0x25b), region = 40  ;;  %v571_v2 = vld [vmem:[%s4144_s1 + $0x100] sm:$0xff] (!%p204_p9)  ;;  %2248 = vmatprep.subr.bf16.mxu1 (!%p204_p9), %v2747_v3  ;;  %2296 = vmatprep.subr.bf16.mxu0 (!%p204_p9), %v2747_v3  ;;  %v2249_v4 = vpack.c.bf16 (!%p204_p9), %v540_v1, %v539_v0  ;;  %v572_v5 = vld [vmem:[%s4144_s1 + $0x108] sm:$0xff] (!%p204_p9)  ;;  %v542_v7 = vld [vmem:[%s4144_s1 + $0x18] sm:$0xff] (!%p204_p9)  ;;  %p238_p10 = scmp.lt.s32.totalorder (!%p204_p9), %s2108_s30, 63 }
   0xf   : > { %v2297_v8 = vpack.c.bf16 (!%p204_p9), %v572_v5, %v571_v2  ;;  %v573_v9 = vld [vmem:[%s4144_s1 + $0x110] sm:$0xff] (!%p204_p9)  ;;  %v574_v10 = vld [vmem:[%s4144_s1 + $0x118] sm:$0xff] (!%p204_p9)  ;;  %v2252_v11 = vpack.c.bf16 (!%p204_p9), %v542_v7, %v541_v6  ;;  %v543_v13 = vld [vmem:[%s4144_s1 + $0x20] sm:$0xff] (!%p204_p9)  ;;  %s2119_s8 = sshll.u32 (!%p204_p9), %s2802_s22, 12  ;;  %s2748_s14 = smov (!%p204_p9), [#allocation2]  }
  0x10   : > { %2250 = vmatpush1.bf16.msra.mxu1 (!%p204_p9), %v2249_v4  ;;  %v2300_v12 = vpack.c.bf16 (!%p204_p9), %v574_v10, %v573_v9  ;;  %v544_v14 = vld [vmem:[%s4144_s1 + $0x28] sm:$0xff] (!%p204_p9)  ;;  %v575_v15 = vld [vmem:[%s4144_s1 + $0x120] sm:$0xff] (!%p204_p9)  ;;  %v545_v19 = vld [vmem:[%s4144_s1 + $0x30] sm:$0xff] (!%p204_p9)  ;;  %s4092_s13 = scalar_lea.hbm (!%p204_p9), %s4148_s5, %s2119_s8  ;;  %s2687_s16 = sshll.u32 (!%p204_p9), %s2748_s14, 4  ;;  %s2688_s16 = int_to_ptr.vmem [resolvable:$false] %s2687_s16 }
  0x11   : > { %2298 = vmatpush1.bf16.msra.mxu0 (!%p204_p9), %v2297_v8  ;;  %2251 = vmatprep.subr.bf16.mxu1 (!%p204_p9), %v2747_v3  ;;  %v576_v16 = vld [vmem:[%s4144_s1 + $0x128] sm:$0xff] (!%p204_p9)  ;;  %v2255_v17 = vpack.c.bf16 (!%p204_p9), %v544_v14, %v543_v13  ;;  %v546_v20 = vld [vmem:[%s4144_s1 + $0x38] sm:$0xff] (!%p204_p9)  ;;  %v577_v21 = vld [vmem:[%s4144_s1 + $0x130] sm:$0xff] (!%p204_p9)  ;;  %s2689_s17 = scalar_lea.vmem (!%p204_p9), %s2688_s16, 8192 }
  0x12   : > { %2299 = vmatprep.subr.bf16.mxu0 (!%p204_p9), %v2747_v3  ;;  %v2303_v18 = vpack.c.bf16 (!%p204_p9), %v576_v16, %v575_v15  ;;  %v578_v22 = vld [vmem:[%s4144_s1 + $0x138] sm:$0xff] (!%p204_p9)  ;;  %v2258_v23 = vpack.c.bf16 (!%p204_p9), %v546_v20, %v545_v19  ;;  %v547_v25 = vld [vmem:[%s4144_s1 + $0x40] sm:$0xff] (!%p204_p9)  ;;  %v548_v26 = vld [vmem:[%s4144_s1 + $0x48] sm:$0xff] (!%p204_p9) }
  0x13   : > { %v2306_v24 = vpack.c.bf16 (!%p204_p9), %v578_v22, %v577_v21  ;;  %v579_v27 = vld [vmem:[%s4144_s1 + $0x140] sm:$0xff] (!%p204_p9)  ;;  %v580_v28 = vld [vmem:[%s4144_s1 + $0x148] sm:$0xff] (!%p204_p9)  ;;  %v2261_v29 = vpack.c.bf16 (!%p204_p9), %v548_v26, %v547_v25  ;;  %v549_v31 = vld [vmem:[%s4144_s1 + $0x50] sm:$0xff] (!%p204_p9) }
  0x14   : > { %2253 = vmatpush1.bf16.msra.mxu1 (!%p204_p9), %v2252_v11  ;;  %v2309_v30 = vpack.c.bf16 (!%p204_p9), %v580_v28, %v579_v27  ;;  %v550_v32 = vld [vmem:[%s4144_s1 + $0x58] sm:$0xff] (!%p204_p9)  ;;  %v581_v33 = vld [vmem:[%s4144_s1 + $0x150] sm:$0xff] (!%p204_p9)  ;;  %v551_v37 = vld [vmem:[%s4144_s1 + $0x60] sm:$0xff] (!%p204_p9) }
  0x15   : > { %2301 = vmatpush1.bf16.msra.mxu0 %v2300_v12  ;;  %2254 = vmatprep.subr.bf16.mxu1 %v2747_v3  ;;  %s4156_s30 = smov (!%p238_p10, %s2108_s30), 63  ;;  %v582_v34 = vld [vmem:[%s4144_s1 + $0x158] sm:$0xff]  ;;  %v2264_v35 = vpack.c.bf16 %v550_v32, %v549_v31  ;;  %v552_v38 = vld [vmem:[%s4144_s1 + $0x68] sm:$0xff]  ;;  %v583_v39 = vld [vmem:[%s4144_s1 + $0x160] sm:$0xff] }
  0x16   : > { %2302 = vmatprep.subr.bf16.mxu0 %v2747_v3  ;;  %s2640_s15 = smul.u32 72, %s4156_s30  ;;  %v2312_v36 = vpack.c.bf16 %v582_v34, %v581_v33  ;;  %v584_v40 = vld [vmem:[%s4144_s1 + $0x168] sm:$0xff]  ;;  %v2267_v43 = vpack.c.bf16 %v552_v38, %v551_v37  ;;  %v553_v45 = vld [vmem:[%s4144_s1 + $0x70] sm:$0xff]  ;;  %v554_v46 = vld [vmem:[%s4144_s1 + $0x78] sm:$0xff] }
  0x17   : > { %v2315_v44 = vpack.c.bf16 %v584_v40, %v583_v39  ;;  %v585_v47 = vld [vmem:[%s4144_s1 + $0x170] sm:$0xff]  ;;  %v586_v48 = vld [vmem:[%s4144_s1 + $0x178] sm:$0xff]  ;;  %v2270_v49 = vpack.c.bf16 %v554_v46, %v553_v45  ;;  %v555_v51 = vld [vmem:[%s4144_s1 + $0x80] sm:$0xff] }
  0x18   : > { %2256 = vmatpush1.bf16.msra.mxu1 %v2255_v17  ;;  %s2918_s11 = scalar_lea.vmem %s4143_s0, %s2640_s15  ;;  %v2318_v50 = vpack.c.bf16 %v586_v48, %v585_v47  ;;  %v556_v52 = vld [vmem:[%s4144_s1 + $0x88] sm:$0xff]  ;;  %v587_v53 = vld [vmem:[%s4144_s1 + $0x180] sm:$0xff]  ;;  %v557_v57 = vld [vmem:[%s4144_s1 + $0x90] sm:$0xff] }
  0x19   : > { %2304 = vmatpush1.bf16.msra.mxu0 %v2303_v18  ;;  %2257 = vmatprep.subr.bf16.mxu1 %v2747_v3  ;;  %v252_v41 = vld [vmem:[%s2918_s11 + $0x8] sm:$0xff]  ;;  %v254_v42 = vld [vmem:[%s2918_s11 + $0x18] sm:$0xff]  ;;  %v2273_v55 = vpack.c.bf16 %v556_v52, %v555_v51  ;;  %v589_v59 = vld [vmem:[%s4144_s1 + $0x190] sm:$0xff] }
  0x1a   : > { %2305 = vmatprep.subr.bf16.mxu0 %v2747_v3  ;;  %747 = vmatprep.mubr.f32.mxu1 %v252_v41  ;;  %v588_v54 = vld [vmem:[%s4144_s1 + $0x188] sm:$0xff]  ;;  %v558_v58 = vld [vmem:[%s4144_s1 + $0x98] sm:$0xff]  ;;  %v559_v63 = vld [vmem:[%s4144_s1 + $0xa0] sm:$0xff] }
  0x1b   : > { %972 = vmatprep.mubr.f32.mxu0 %v254_v42  ;;  %v2321_v56 = vpack.c.bf16 %v588_v54, %v587_v53  ;;  %v590_v60 = vld [vmem:[%s4144_s1 + $0x198] sm:$0xff]  ;;  %v2276_v61 = vpack.c.bf16 %v558_v58, %v557_v57  ;;  %v560_v0 = vld [vmem:[%s4144_s1 + $0xa8] sm:$0xff]  ;;  %v591_v1 = vld [vmem:[%s4144_s1 + $0x1a0] sm:$0xff] }
  0x1c   : > { %2259 = vmatpush1.bf16.msra.mxu1 %v2258_v23  ;;  %v2324_v62 = vpack.c.bf16 %v590_v60, %v589_v59  ;;  %v592_v2 = vld [vmem:[%s4144_s1 + $0x1a8] sm:$0xff]  ;;  %v2279_v4 = vpack.c.bf16 %v560_v0, %v559_v63  ;;  %v561_v6 = vld [vmem:[%s4144_s1 + $0xb0] sm:$0xff]  ;;  %v562_v7 = vld [vmem:[%s4144_s1 + $0xb8] sm:$0xff] }
  0x1d   : > { %2307 = vmatpush1.bf16.msra.mxu0 %v2306_v24  ;;  %2260 = vmatprep.subr.bf16.mxu1 %v2747_v3  ;;  %v2327_v5 = vpack.c.bf16 %v592_v2, %v591_v1  ;;  %v593_v8 = vld [vmem:[%s4144_s1 + $0x1b0] sm:$0xff]  ;;  %v594_v9 = vld [vmem:[%s4144_s1 + $0x1b8] sm:$0xff]  ;;  %v2282_v10 = vpack.c.bf16 %v562_v7, %v561_v6  ;;  %v563_v12 = vld [vmem:[%s4144_s1 + $0xc0] sm:$0xff] }
  0x1e   : > { %2308 = vmatprep.subr.bf16.mxu0 %v2747_v3  ;;  %v2330_v11 = vpack.c.bf16 %v594_v9, %v593_v8  ;;  %v564_v13 = vld [vmem:[%s4144_s1 + $0xc8] sm:$0xff]  ;;  %v595_v14 = vld [vmem:[%s4144_s1 + $0x1c0] sm:$0xff]  ;;  %v565_v18 = vld [vmem:[%s4144_s1 + $0xd0] sm:$0xff] }
  0x1f   : > { %v596_v15 = vld [vmem:[%s4144_s1 + $0x1c8] sm:$0xff]  ;;  %v2285_v16 = vpack.c.bf16 %v564_v13, %v563_v12  ;;  %v566_v19 = vld [vmem:[%s4144_s1 + $0xd8] sm:$0xff]  ;;  %v597_v20 = vld [vmem:[%s4144_s1 + $0x1d0] sm:$0xff] }
  0x20   : > { %2262 = vmatpush1.bf16.msra.mxu1 %v2261_v29  ;;  %v2333_v17 = vpack.c.bf16 %v596_v15, %v595_v14  ;;  %v598_v21 = vld [vmem:[%s4144_s1 + $0x1d8] sm:$0xff]  ;;  %v2288_v22 = vpack.c.bf16 %v566_v19, %v565_v18  ;;  %v567_v24 = vld [vmem:[%s4144_s1 + $0xe0] sm:$0xff]  ;;  %v568_v25 = vld [vmem:[%s4144_s1 + $0xe8] sm:$0xff] }
  0x21   : > { %2310 = vmatpush1.bf16.msra.mxu0 %v2309_v30  ;;  %2263 = vmatprep.subr.bf16.mxu1 %v2747_v3  ;;  %v2336_v23 = vpack.c.bf16 %v598_v21, %v597_v20  ;;  %v599_v26 = vld [vmem:[%s4144_s1 + $0x1e0] sm:$0xff]  ;;  %v600_v27 = vld [vmem:[%s4144_s1 + $0x1e8] sm:$0xff]  ;;  %v2291_v28 = vpack.c.bf16 %v568_v25, %v567_v24  ;;  %v569_v30 = vld [vmem:[%s4144_s1 + $0xf0] sm:$0xff] }
  0x22   : > { %2311 = vmatprep.subr.bf16.mxu0 %v2747_v3  ;;  %v2339_v29 = vpack.c.bf16 %v600_v27, %v599_v26  ;;  %v570_v31 = vld [vmem:[%s4144_s1 + $0xf8] sm:$0xff]  ;;  %v601_v32 = vld [vmem:[%s4144_s1 + $0x1f0] sm:$0xff]  ;;  %v636_v37 = vld [vmem:[%s4144_s1 + $0x308] sm:$0xff] }
  0x23   : > { %v602_v33 = vld [vmem:[%s4144_s1 + $0x1f8] sm:$0xff]  ;;  %v2294_v34 = vpack.c.bf16 %v570_v31, %v569_v30  ;;  %v603_v38 = vld [vmem:[%s4144_s1 + $0x200] sm:$0xff]  ;;  %v604_v39 = vld [vmem:[%s4144_s1 + $0x208] sm:$0xff] }
  0x24   : > { %2265 = vmatpush1.bf16.msra.mxu1 %v2264_v35  ;;  %v2342_v35 = vpack.c.bf16 %v602_v33, %v601_v32  ;;  %v251_v40 = vld [vmem:[%s2918_s11] sm:$0xff]  ;;  %v253_v42 = vld [vmem:[%s2918_s11 + $0x10] sm:$0xff]  ;;  %v606_v46 = vld [vmem:[%s4144_s1 + $0x218] sm:$0xff] }
  0x25   : > { %2313 = vmatpush1.bf16.msra.mxu0 %v2312_v36  ;;  %2266 = vmatprep.subr.bf16.mxu1 %v2747_v3  ;;  %v635_v36 = vld [vmem:[%s4144_s1 + $0x300] sm:$0xff]  ;;  %v605_v45 = vld [vmem:[%s4144_s1 + $0x210] sm:$0xff]  ;;  %v262_v51 = vld [vmem:[%s2918_s11 + $0x58] sm:$0xff] }
  0x26   : > { %2314 = vmatprep.subr.bf16.mxu0 %v2747_v3  ;;  %v3077_v41 = vpack.c.bf16 %v636_v37, %v635_v36  ;;  %v263_v47 = vld [vmem:[%s2918_s11 + $0x60] sm:$0xff]  ;;  %v637_v48 = vld [vmem:[%s4144_s1 + $0x310] sm:$0xff]  ;;  %v270_v52 = vld [vmem:[%s2918_s11 + $0x98] sm:$0xff]  ;;  %v2348_v53 = vpack.c.bf16 %v606_v46, %v605_v45 }
  0x27   : > { %v272_v54 = vld [vmem:[%s2918_s11 + $0xa8] sm:$0xff]  ;;  %v639_v58 = vld [vmem:[%s4144_s1 + $0x320] sm:$0xff]  ;;  %v269_v60 = vld [vmem:[%s2918_s11 + $0x90] sm:$0xff] }
  0x28   : > { %2268 = vmatpush1.bf16.msra.mxu1 %v2267_v43  ;;  %v2345_v43 = vpack.c.bf16 %v604_v39, %v603_v38  ;;  %v608_v57 = vld [vmem:[%s4144_s1 + $0x228] sm:$0xff]  ;;  %v281_v0 = vld [vmem:[%s2918_s11 + $0xf0] sm:$0xff]  ;;  %v642_v6 = vld [vmem:[%s4144_s1 + $0x338] sm:$0xff] }
  0x29   : > { %2316 = vmatpush1.bf16.msra.mxu0 %v2315_v44  ;;  %2269 = vmatprep.subr.bf16.mxu1 %v2747_v3  ;;  %v261_v44 = vld [vmem:[%s2918_s11 + $0x50] sm:$0xff]  ;;  %v640_v59 = vld [vmem:[%s4144_s1 + $0x328] sm:$0xff]  ;;  %v278_v7 = vld [vmem:[%s2918_s11 + $0xd8] sm:$0xff] }
  0x2a   : > { %2317 = vmatprep.subr.bf16.mxu0 %v2747_v3  ;;  %v3123_v1 = vpack.c.bf16 %v640_v59, %v639_v58  ;;  %v609_v2 = vld [vmem:[%s4144_s1 + $0x230] sm:$0xff]  ;;  %v280_v8 = vld [vmem:[%s2918_s11 + $0xe8] sm:$0xff]  ;;  %v611_v13 = vld [vmem:[%s4144_s1 + $0x240] sm:$0xff] }
  0x2b   : > { %v288_v9 = vld [vmem:[%s2918_s11 + $0x128] sm:$0xff]  ;;  %v643_v15 = vld [vmem:[%s4144_s1 + $0x340] sm:$0xff]  ;;  %v289_v18 = vld [vmem:[%s2918_s11 + $0x130] sm:$0xff] }
  0x2c   : > { %2271 = vmatpush1.bf16.msra.mxu1 %v2270_v49  ;;  %v638_v49 = vld [vmem:[%s4144_s1 + $0x318] sm:$0xff]  ;;  %v612_v14 = vld [vmem:[%s4144_s1 + $0x248] sm:$0xff]  ;;  %v297_v19 = vld [vmem:[%s2918_s11 + $0x170] sm:$0xff] }
  0x2d   : > { %2319 = vmatpush1.bf16.msra.mxu0 %v2318_v50  ;;  %2272 = vmatprep.subr.bf16.mxu1 %v2747_v3  ;;  %v260_v50 = vld [vmem:[%s2918_s11 + $0x48] sm:$0xff]  ;;  %v2357_v20 = vpack.c.bf16 %v612_v14, %v611_v13  ;;  %v299_v21 = vld [vmem:[%s2918_s11 + $0x180] sm:$0xff]  ;;  %v614_v24 = vld [vmem:[%s4144_s1 + $0x258] sm:$0xff] }
  0x2e   : > { %2320 = vmatprep.subr.bf16.mxu0 %v2747_v3  ;;  %v645_v25 = vld [vmem:[%s4144_s1 + $0x350] sm:$0xff]  ;;  %v646_v26 = vld [vmem:[%s4144_s1 + $0x358] sm:$0xff]  ;;  %v296_v27 = vld [vmem:[%s2918_s11 + $0x168] sm:$0xff] }
  0x2f   : > { %v308_v31 = vld [vmem:[%s2918_s11 + $0x1c8] sm:$0xff]  ;;  %v3186_v32 = vpack.c.bf16 %v646_v26, %v645_v25  ;;  %v615_v33 = vld [vmem:[%s4144_s1 + $0x260] sm:$0xff]  ;;  %v305_v37 = vld [vmem:[%s2918_s11 + $0x1b0] sm:$0xff] }
  0x30   : > { %2274 = vmatpush1.bf16.msra.mxu1 %v2273_v55  ;;  %v3102_v55 = vpack.c.bf16 %v638_v49, %v637_v48  ;;  %v648_v36 = vld [vmem:[%s4144_s1 + $0x368] sm:$0xff]  ;;  %v307_v38 = vld [vmem:[%s2918_s11 + $0x1c0] sm:$0xff]  ;;  %v618_v45 = vld [vmem:[%s4144_s1 + $0x278] sm:$0xff] }
  0x31   : > { %2322 = vmatpush1.bf16.msra.mxu0 %v2321_v56  ;;  %2275 = vmatprep.subr.bf16.mxu1 %v2747_v3  ;;  %v607_v56 = vld [vmem:[%s4144_s1 + $0x220] sm:$0xff]  ;;  %v649_v46 = vld [vmem:[%s4144_s1 + $0x370] sm:$0xff]  ;;  %v314_v48 = vld [vmem:[%s2918_s11 + $0x1f8] sm:$0xff] }
  0x32   : > { %2323 = vmatprep.subr.bf16.mxu0 %v2747_v3  ;;  %v2351_v63 = vpack.c.bf16 %v608_v57, %v607_v56  ;;  %v315_v39 = vld [vmem:[%s2918_s11 + $0x200] sm:$0xff]  ;;  %v316_v49 = vld [vmem:[%s2918_s11 + $0x208] sm:$0xff]  ;;  %v625_v25 = vld [vmem:[%s4144_s1 + $0x2b0] sm:$0xff] }
  0x33   : > { %v620_v56 = vld [vmem:[%s4144_s1 + $0x288] sm:$0xff]  ;;  %v651_v57 = vld [vmem:[%s4144_s1 + $0x380] sm:$0xff]  ;;  %v626_v26 = vld [vmem:[%s4144_s1 + $0x2b8] sm:$0xff] }
  0x34   : > { %2277 = vmatpush1.bf16.msra.mxu1 %v2276_v61  ;;  %v271_v61 = vld [vmem:[%s2918_s11 + $0xa0] sm:$0xff]  ;;  %v652_v58 = vld [vmem:[%s4144_s1 + $0x388] sm:$0xff] }
  0x35   : > { %2325 = vmatpush1.bf16.msra.mxu0 %v2324_v62  ;;  %2278 = vmatprep.subr.bf16.mxu1 %v2747_v3  ;;  %v279_v62 = vld [vmem:[%s2918_s11 + $0xe0] sm:$0xff] }
  0x36   : > { %2326 = vmatprep.subr.bf16.mxu0 %v2747_v3  ;;  %v323_v59 = vld [vmem:[%s2918_s11 + $0x240] sm:$0xff] }
  0x37   : > { %v623_v14 = vld [vmem:[%s4144_s1 + $0x2a0] sm:$0xff] }
  0x38   : > { %2280 = vmatpush1.bf16.msra.mxu1 %v2279_v4  ;;  %v610_v4 = vld [vmem:[%s4144_s1 + $0x238] sm:$0xff] }
  0x39   : > { %2328 = vmatpush1.bf16.msra.mxu0 %v2327_v5  ;;  %2281 = vmatprep.subr.bf16.mxu1 %v2747_v3  ;;  %v641_v5 = vld [vmem:[%s4144_s1 + $0x330] sm:$0xff] }
  0x3a   : > { %2329 = vmatprep.subr.bf16.mxu0 %v2747_v3  ;;  %v3144_v12 = vpack.c.bf16 %v642_v6, %v641_v5  ;;  %v653_v5 = vld [vmem:[%s4144_s1 + $0x390] sm:$0xff]  ;;  %v654_v6 = vld [vmem:[%s4144_s1 + $0x398] sm:$0xff] }
  0x3b   : > { %v3270_v13 = vpack.c.bf16 %v654_v6, %v653_v5  ;;  %v387_v5 = vld [vmem:[%s2918_s11 + $0x440] sm:$0xff] }
  0x3c   : > { %2283 = vmatpush1.bf16.msra.mxu1 %v2282_v10  ;;  %v2354_v10 = vpack.c.bf16 %v610_v4, %v609_v2  ;;  %v621_v2 = vld [vmem:[%s4144_s1 + $0x290] sm:$0xff]  ;;  %v622_v4 = vld [vmem:[%s4144_s1 + $0x298] sm:$0xff] }
  0x3d   : > { %2331 = vmatpush1.bf16.msra.mxu0 %v2330_v11  ;;  %2284 = vmatprep.subr.bf16.mxu1 %v2747_v3  ;;  %v290_v11 = vld [vmem:[%s2918_s11 + $0x138] sm:$0xff] }
  0x3e   : > { %2332 = vmatprep.subr.bf16.mxu0 %v2747_v3 }
  0x40   : > { %2286 = vmatpush1.bf16.msra.mxu1 %v2285_v16  ;;  %v644_v16 = vld [vmem:[%s4144_s1 + $0x348] sm:$0xff] }
  0x41   : > { %2334 = vmatpush1.bf16.msra.mxu0 %v2333_v17  ;;  %2287 = vmatprep.subr.bf16.mxu1 %v2747_v3  ;;  %v287_v17 = vld [vmem:[%s2918_s11 + $0x120] sm:$0xff] }
  0x42   : > { %2335 = vmatprep.subr.bf16.mxu0 %v2747_v3 }
  0x44   : > { %2289 = vmatpush1.bf16.msra.mxu1 %v2288_v22  ;;  %v3165_v22 = vpack.c.bf16 %v644_v16, %v643_v15  ;;  %v624_v15 = vld [vmem:[%s4144_s1 + $0x2a8] sm:$0xff]  ;;  %v655_v16 = vld [vmem:[%s4144_s1 + $0x3a0] sm:$0xff] }
  0x45   : > { %2337 = vmatpush1.bf16.msra.mxu0 %v2336_v23  ;;  %2290 = vmatprep.subr.bf16.mxu1 %v2747_v3  ;;  %v613_v23 = vld [vmem:[%s4144_s1 + $0x250] sm:$0xff] }
  0x46   : > { %2338 = vmatprep.subr.bf16.mxu0 %v2747_v3  ;;  %v2360_v30 = vpack.c.bf16 %v614_v24, %v613_v23  ;;  %v353_v23 = vld [vmem:[%s2918_s11 + $0x330] sm:$0xff] }
  0x48   : > { %2292 = vmatpush1.bf16.msra.mxu1 %v2291_v28  ;;  %v298_v28 = vld [vmem:[%s2918_s11 + $0x178] sm:$0xff] }
  0x49   : > { %2340 = vmatpush1.bf16.msra.mxu0 %v2339_v29  ;;  %2293 = vmatprep.subr.bf16.mxu1 %v2747_v3  ;;  %v306_v29 = vld [vmem:[%s2918_s11 + $0x1b8] sm:$0xff] }
  0x4a   : > { %2341 = vmatprep.subr.bf16.mxu0 %v2747_v3 }
  0x4c   : > { %2295 = vmatpush1.bf16.msra.mxu1 %v2294_v34  ;;  %v616_v34 = vld [vmem:[%s4144_s1 + $0x268] sm:$0xff] }
  0x4d   : > { %2343 = vmatpush1.bf16.msra.mxu0 %v2342_v35  ;;  %2472 = vmatprep.subr.bf16.mxu1 %v2747_v3  ;;  %v647_v35 = vld [vmem:[%s4144_s1 + $0x360] sm:$0xff] }
  0x4e   : > { %2344 = vmatprep.subr.bf16.mxu0 %v2747_v3 }
  0x4f   : > { %748 = vmatmul.mubr.f32.vlgmr.msra.gmra.mrb[0].mxu1 %v251_v40  ;;  %v2363_v40 = vpack.c.bf16 %v616_v34, %v615_v33  ;;  %v2378_v33 = vpack.c.bf16 %v626_v26, %v625_v25  ;;  %v362_v34 = vld [vmem:[%s2918_s11 + $0x378] sm:$0xff]  ;;  %v395_v26 = vld [vmem:[%s2918_s11 + $0x480] sm:$0xff] }
  0x50   : > { %973 = vmatmul.mubr.f32.vlgmr.msra.gmra.mrb[0].mxu0 %v253_v42  ;;  %2488 = vmatpush1.bf16.msra.mxu1 %v3077_v41  ;;  %v317_v42 = vld [vmem:[%s2918_s11 + $0x210] sm:$0xff] }
  0x51   : > { %2346 = vmatpush1.bf16.msra.mxu0 %v2345_v43  ;;  %752 = vmatprep.mubr.f32.mxu1 %v261_v44  ;;  %v3207_v43 = vpack.c.bf16 %v648_v36, %v647_v35  ;;  %v617_v44 = vld [vmem:[%s4144_s1 + $0x270] sm:$0xff]  ;;  %v627_v36 = vld [vmem:[%s4144_s1 + $0x2c0] sm:$0xff] }
  0x52   : > { %977 = vmatprep.mubr.f32.mxu0 %v263_v47  ;;  %2347 = vmatprep.subr.bf16.mxu0 %v2747_v3  ;;  %v650_v47 = vld [vmem:[%s4144_s1 + $0x378] sm:$0xff] }
  0x53   : > { %753 = vmatmul.mubr.f32.gmra.mrb[2].mxu1 %v260_v50  ;;  %2473 = vmatprep.subr.bf16.mxu1 %v2747_v3  ;;  %v324_v50 = vld [vmem:[%s2918_s11 + $0x248] sm:$0xff] }
  0x54   : > { %978 = vmatmul.mubr.f32.gmra.mrb[2].mxu0 %v262_v51  ;;  %757 = vmatprep.mubr.f32.mxu1 %v270_v52  ;;  %v2366_v51 = vpack.c.bf16 %v618_v45, %v617_v44  ;;  %v326_v52 = vld [vmem:[%s2918_s11 + $0x258] sm:$0xff]  ;;  %v369_v44 = vld [vmem:[%s2918_s11 + $0x3b0] sm:$0xff] }
  0x55   : > { %982 = vmatprep.mubr.f32.mxu0 %v272_v54  ;;  %2349 = vmatpush1.bf16.msra.mxu0 %v2348_v53  ;;  %v3228_v53 = vpack.c.bf16 %v650_v47, %v649_v46  ;;  %v619_v54 = vld [vmem:[%s4144_s1 + $0x280] sm:$0xff] }
  0x56   : > { %2489 = vmatpush1.bf16.msra.mxu1 %v3102_v55  ;;  %2350 = vmatprep.subr.bf16.mxu0 %v2747_v3  ;;  %v371_v46 = vld [vmem:[%s2918_s11 + $0x3c0] sm:$0xff] }
  0x57   : > { %758 = vmatmul.mubr.f32.gmra.mrb[4].mxu1 %v269_v60  ;;  %2474 = vmatprep.subr.bf16.mxu1 %v2747_v3  ;;  %v325_v60 = vld [vmem:[%s2918_s11 + $0x250] sm:$0xff] }
  0x58   : > { %983 = vmatmul.mubr.f32.gmra.mrb[4].mxu0 %v271_v61  ;;  %762 = vmatprep.mubr.f32.mxu1 %v279_v62  ;;  %v333_v61 = vld [vmem:[%s2918_s11 + $0x290] sm:$0xff]  ;;  %v2369_v62 = vpack.c.bf16 %v620_v56, %v619_v54  ;;  %v370_v54 = vld [vmem:[%s2918_s11 + $0x3b8] sm:$0xff] }
  0x59   : > { %987 = vmatprep.mubr.f32.mxu0 %v281_v0  ;;  %2352 = vmatpush1.bf16.msra.mxu0 %v2351_v63  ;;  %v335_v63 = vld [vmem:[%s2918_s11 + $0x2a0] sm:$0xff]  ;;  %v3249_v0 = vpack.c.bf16 %v652_v58, %v651_v57  ;;  %v378_v56 = vld [vmem:[%s2918_s11 + $0x3f8] sm:$0xff]  ;;  %v380_v58 = vld [vmem:[%s2918_s11 + $0x408] sm:$0xff] }
  0x5a   : > { %2490 = vmatpush1.bf16.msra.mxu1 %v3123_v1  ;;  %2353 = vmatprep.subr.bf16.mxu0 %v2747_v3 }
  0x5b   : > { %763 = vmatmul.mubr.f32.gmra.mrb[6].mxu1 %v278_v7  ;;  %2475 = vmatprep.subr.bf16.mxu1 %v2747_v3  ;;  %v332_v7 = vld [vmem:[%s2918_s11 + $0x288] sm:$0xff] }
  0x5c   : > { %988 = vmatmul.mubr.f32.gmra.mrb[6].mxu0 %v280_v8  ;;  %767 = vmatprep.mubr.f32.mxu1 %v288_v9  ;;  %v334_v8 = vld [vmem:[%s2918_s11 + $0x298] sm:$0xff] }
  0x5d   : > { %992 = vmatprep.mubr.f32.mxu0 %v290_v11  ;;  %2355 = vmatpush1.bf16.msra.mxu0 %v2354_v10  ;;  %v342_v9 = vld [vmem:[%s2918_s11 + $0x2d8] sm:$0xff]  ;;  %v2372_v10 = vpack.c.bf16 %v622_v4, %v621_v2  ;;  %v344_v11 = vld [vmem:[%s2918_s11 + $0x2e8] sm:$0xff]  ;;  %v377_v2 = vld [vmem:[%s2918_s11 + $0x3f0] sm:$0xff] }
  0x5e   : > { %2491 = vmatpush1.bf16.msra.mxu1 %v3144_v12  ;;  %2356 = vmatprep.subr.bf16.mxu0 %v2747_v3  ;;  %v379_v4 = vld [vmem:[%s2918_s11 + $0x400] sm:$0xff] }
  0x5f   : > { %768 = vmatmul.mubr.f32.gmra.mrb[8].mxu1 %v287_v17  ;;  %2476 = vmatprep.subr.bf16.mxu1 %v2747_v3  ;;  %v656_v17 = vld [vmem:[%s4144_s1 + $0x3a8] sm:$0xff] }
  0x60   : > { %993 = vmatmul.mubr.f32.gmra.mrb[8].mxu0 %v289_v18  ;;  %772 = vmatprep.mubr.f32.mxu1 %v297_v19  ;;  %v341_v18 = vld [vmem:[%s2918_s11 + $0x2d0] sm:$0xff]  ;;  %v343_v19 = vld [vmem:[%s2918_s11 + $0x2e0] sm:$0xff]  ;;  %v3291_v24 = vpack.c.bf16 %v656_v17, %v655_v16  ;;  %v668_v17 = vld [vmem:[%s4144_s1 + $0x408] sm:$0xff] }
  0x61   : > { %997 = vmatprep.mubr.f32.mxu0 %v299_v21  ;;  %2358 = vmatpush1.bf16.msra.mxu0 %v2357_v20  ;;  %v351_v20 = vld [vmem:[%s2918_s11 + $0x320] sm:$0xff]  ;;  %v2375_v21 = vpack.c.bf16 %v624_v15, %v623_v14  ;;  %v666_v14 = vld [vmem:[%s4144_s1 + $0x3f8] sm:$0xff] }
  0x62   : > { %2492 = vmatpush1.bf16.msra.mxu1 %v3165_v22  ;;  %2359 = vmatprep.subr.bf16.mxu0 %v2747_v3  ;;  %v386_v15 = vld [vmem:[%s2918_s11 + $0x438] sm:$0xff]  ;;  %v667_v16 = vld [vmem:[%s4144_s1 + $0x400] sm:$0xff] }
  0x63   : > { %773 = vmatmul.mubr.f32.gmra.mrb[10].mxu1 %v296_v27  ;;  %2477 = vmatprep.subr.bf16.mxu1 %v2747_v3  ;;  %v657_v27 = vld [vmem:[%s4144_s1 + $0x3b0] sm:$0xff]  ;;  %v3405_v25 = vpack.c.bf16 %v668_v17, %v667_v16  ;;  %v487_v17 = vld [vmem:[%s2918_s11 + $0x760] sm:$0xff] }
  0x64   : > { %998 = vmatmul.mubr.f32.gmra.mrb[10].mxu0 %v298_v28  ;;  %777 = vmatprep.mubr.f32.mxu1 %v306_v29  ;;  %v658_v28 = vld [vmem:[%s4144_s1 + $0x3b8] sm:$0xff]  ;;  %v485_v16 = vld [vmem:[%s2918_s11 + $0x750] sm:$0xff] }
  0x65   : > { %1002 = vmatprep.mubr.f32.mxu0 %v308_v31  ;;  %2361 = vmatpush1.bf16.msra.mxu0 %v2360_v30  ;;  %v350_v29 = vld [vmem:[%s2918_s11 + $0x318] sm:$0xff]  ;;  %v352_v30 = vld [vmem:[%s2918_s11 + $0x328] sm:$0xff]  ;;  %v3312_v35 = vpack.c.bf16 %v658_v28, %v657_v27  ;;  %v397_v27 = vld [vmem:[%s2918_s11 + $0x490] sm:$0xff] }
  0x66   : > { %2493 = vmatpush1.bf16.msra.mxu1 %v3186_v32  ;;  %2362 = vmatprep.subr.bf16.mxu0 %v2747_v3  ;;  %v360_v31 = vld [vmem:[%s2918_s11 + $0x368] sm:$0xff]  ;;  %v405_v28 = vld [vmem:[%s2918_s11 + $0x4d0] sm:$0xff] }
  0x67   : > { %778 = vmatmul.mubr.f32.gmra.mrb[12].mxu1 %v305_v37  ;;  %2478 = vmatprep.subr.bf16.mxu1 %v2747_v3  ;;  %v628_v37 = vld [vmem:[%s4144_s1 + $0x2c8] sm:$0xff] }
  0x68   : > { %1003 = vmatmul.mubr.f32.gmra.mrb[12].mxu0 %v307_v38  ;;  %782 = vmatprep.mubr.f32.mxu1 %v315_v39  ;;  %v659_v38 = vld [vmem:[%s4144_s1 + $0x3c0] sm:$0xff]  ;;  %v660_v39 = vld [vmem:[%s4144_s1 + $0x3c8] sm:$0xff]  ;;  %v2381_v45 = vpack.c.bf16 %v628_v37, %v627_v36  ;;  %v413_v36 = vld [vmem:[%s2918_s11 + $0x510] sm:$0xff] }
  0x69   : > { %1007 = vmatprep.mubr.f32.mxu0 %v317_v42  ;;  %2364 = vmatpush1.bf16.msra.mxu0 %v2363_v40  ;;  %v359_v40 = vld [vmem:[%s2918_s11 + $0x360] sm:$0xff]  ;;  %v361_v42 = vld [vmem:[%s2918_s11 + $0x370] sm:$0xff]  ;;  %v3333_v47 = vpack.c.bf16 %v660_v39, %v659_v38 }
  0x6a   : > { %2494 = vmatpush1.bf16.msra.mxu1 %v3207_v43  ;;  %2365 = vmatprep.subr.bf16.mxu0 %v2747_v3  ;;  %v415_v37 = vld [vmem:[%s2918_s11 + $0x520] sm:$0xff]  ;;  %v425_v39 = vld [vmem:[%s2918_s11 + $0x570] sm:$0xff] }
  0x6b   : > { %783 = vmatmul.mubr.f32.gmra.mrb[14].mxu1 %v314_v48  ;;  %2479 = vmatprep.subr.bf16.mxu1 %v2747_v3  ;;  %v629_v48 = vld [vmem:[%s4144_s1 + $0x2d0] sm:$0xff]  ;;  %v423_v38 = vld [vmem:[%s2918_s11 + $0x560] sm:$0xff] }
  0x6c   : > { %1008 = vmatmul.mubr.f32.gmra.mrb[14].mxu0 %v316_v49  ;;  %787 = vmatprep.mubr.f32.mxu1 %v324_v50  ;;  %v630_v49 = vld [vmem:[%s4144_s1 + $0x2d8] sm:$0xff]  ;;  %v661_v50 = vld [vmem:[%s4144_s1 + $0x3d0] sm:$0xff] }
  0x6d   : > { %1012 = vmatprep.mubr.f32.mxu0 %v326_v52  ;;  %2367 = vmatpush1.bf16.msra.mxu0 %v2366_v51  ;;  %v662_v51 = vld [vmem:[%s4144_s1 + $0x3d8] sm:$0xff]  ;;  %v368_v52 = vld [vmem:[%s2918_s11 + $0x3a8] sm:$0xff]  ;;  %v2384_v57 = vpack.c.bf16 %v630_v49, %v629_v48  ;;  %v433_v48 = vld [vmem:[%s2918_s11 + $0x5b0] sm:$0xff] }
  0x6e   : > { %2495 = vmatpush1.bf16.msra.mxu1 %v3228_v53  ;;  %2368 = vmatprep.subr.bf16.mxu0 %v2747_v3  ;;  %v441_v49 = vld [vmem:[%s2918_s11 + $0x5f0] sm:$0xff] }
  0x6f   : > { %788 = vmatmul.mubr.f32.gmra.mrb[16].mxu1 %v323_v59  ;;  %2480 = vmatprep.subr.bf16.mxu1 %v2747_v3  ;;  %v3354_v59 = vpack.c.bf16 %v662_v51, %v661_v50  ;;  %v443_v50 = vld [vmem:[%s2918_s11 + $0x600] sm:$0xff]  ;;  %v440_v51 = vld [vmem:[%s2918_s11 + $0x5e8] sm:$0xff] }
  0x70   : > { %1013 = vmatmul.mubr.f32.gmra.mrb[16].mxu0 %v325_v60  ;;  %792 = vmatprep.mubr.f32.mxu1 %v333_v61  ;;  %v631_v60 = vld [vmem:[%s4144_s1 + $0x2e0] sm:$0xff]  ;;  %v632_v61 = vld [vmem:[%s4144_s1 + $0x2e8] sm:$0xff] }
  0x71   : > { %1017 = vmatprep.mubr.f32.mxu0 %v335_v63  ;;  %2370 = vmatpush1.bf16.msra.mxu0 %v2369_v62  ;;  %v663_v62 = vld [vmem:[%s4144_s1 + $0x3e0] sm:$0xff]  ;;  %v664_v63 = vld [vmem:[%s4144_s1 + $0x3e8] sm:$0xff]  ;;  %v2387_v6 = vpack.c.bf16 %v632_v61, %v631_v60  ;;  %v461_v61 = vld [vmem:[%s2918_s11 + $0x690] sm:$0xff] }
  0x72   : > { %2496 = vmatpush1.bf16.msra.mxu1 %v3249_v0  ;;  %2371 = vmatprep.subr.bf16.mxu0 %v2747_v3  ;;  %v459_v60 = vld [vmem:[%s2918_s11 + $0x680] sm:$0xff] }
  0x73   : > { %793 = vmatmul.mubr.f32.gmra.mrb[18].mxu1 %v332_v7  ;;  %2481 = vmatprep.subr.bf16.mxu1 %v2747_v3  ;;  %v389_v7 = vld [vmem:[%s2918_s11 + $0x450] sm:$0xff] }
  0x74   : > { %1018 = vmatmul.mubr.f32.gmra.mrb[18].mxu0 %v334_v8  ;;  %797 = vmatprep.mubr.f32.mxu1 %v342_v9  ;;  %v3375_v8 = vpack.c.bf16 %v664_v63, %v663_v62  ;;  %v633_v9 = vld [vmem:[%s4144_s1 + $0x2f0] sm:$0xff]  ;;  %v458_v62 = vld [vmem:[%s2918_s11 + $0x678] sm:$0xff]  ;;  %v460_v63 = vld [vmem:[%s2918_s11 + $0x688] sm:$0xff] }
  0x75   : > { %1022 = vmatprep.mubr.f32.mxu0 %v344_v11  ;;  %2373 = vmatpush1.bf16.msra.mxu0 %v2372_v10  ;;  %v634_v10 = vld [vmem:[%s4144_s1 + $0x2f8] sm:$0xff]  ;;  %v665_v11 = vld [vmem:[%s4144_s1 + $0x3f0] sm:$0xff] }
  0x76   : > { %2497 = vmatpush1.bf16.msra.mxu1 %v3270_v13  ;;  %2374 = vmatprep.subr.bf16.mxu0 %v2747_v3 }
  0x77   : > { %798 = vmatmul.mubr.f32.gmra.mrb[20].mxu1 %v341_v18  ;;  %2482 = vmatprep.subr.bf16.mxu1 %v2747_v3  ;;  %v388_v18 = vld [vmem:[%s2918_s11 + $0x448] sm:$0xff] }
  0x78   : > { %1023 = vmatmul.mubr.f32.gmra.mrb[20].mxu0 %v343_v19  ;;  %802 = vmatprep.mubr.f32.mxu1 %v351_v20  ;;  %v396_v19 = vld [vmem:[%s2918_s11 + $0x488] sm:$0xff]  ;;  %v2390_v20 = vpack.c.bf16 %v634_v10, %v633_v9  ;;  %v479_v9 = vld [vmem:[%s2918_s11 + $0x720] sm:$0xff] }
  0x79   : > { %1027 = vmatprep.mubr.f32.mxu0 %v353_v23  ;;  %2376 = vmatpush1.bf16.msra.mxu0 %v2375_v21  ;;  %v398_v21 = vld [vmem:[%s2918_s11 + $0x498] sm:$0xff]  ;;  %v3402_v23 = vpack.c.bf16 %v666_v14, %v665_v11  ;;  %v476_v10 = vld [vmem:[%s2918_s11 + $0x708] sm:$0xff] }
  0x7a   : > { %2498 = vmatpush1.bf16.msra.mxu1 %v3291_v24  ;;  %2377 = vmatprep.subr.bf16.mxu0 %v2747_v3  ;;  %v478_v11 = vld [vmem:[%s2918_s11 + $0x718] sm:$0xff] }
  0x7b   : > { %803 = vmatmul.mubr.f32.gmra.mrb[22].mxu1 %v350_v29  ;;  %2483 = vmatprep.subr.bf16.mxu1 %v2747_v3  ;;  %v407_v29 = vld [vmem:[%s2918_s11 + $0x4e0] sm:$0xff]  ;;  %v486_v14 = vld [vmem:[%s2918_s11 + $0x758] sm:$0xff] }
  0x7c   : > { %1028 = vmatmul.mubr.f32.gmra.mrb[22].mxu0 %v352_v30  ;;  %807 = vmatprep.mubr.f32.mxu1 %v360_v31  ;;  %v404_v30 = vld [vmem:[%s2918_s11 + $0x4c8] sm:$0xff]  ;;  %v406_v31 = vld [vmem:[%s2918_s11 + $0x4d8] sm:$0xff] }
  0x7d   : > { %1032 = vmatprep.mubr.f32.mxu0 %v362_v34  ;;  %2379 = vmatpush1.bf16.msra.mxu0 %v2378_v33  ;;  %v414_v33 = vld [vmem:[%s2918_s11 + $0x518] sm:$0xff]  ;;  %v416_v34 = vld [vmem:[%s2918_s11 + $0x528] sm:$0xff] }
  0x7e   : > { %2499 = vmatpush1.bf16.msra.mxu1 %v3312_v35  ;;  %2380 = vmatprep.subr.bf16.mxu0 %v2747_v3 }
  0x7f   : > { %808 = vmatmul.mubr.f32.gmra.mrb[24].mxu1 %v359_v40  ;;  %2484 = vmatprep.subr.bf16.mxu1 %v2747_v3  ;;  %v422_v40 = vld [vmem:[%s2918_s11 + $0x558] sm:$0xff] }
  0x80   : > { %1033 = vmatmul.mubr.f32.gmra.mrb[24].mxu0 %v361_v42  ;;  %812 = vmatprep.mubr.f32.mxu1 %v369_v44  ;;  %v424_v42 = vld [vmem:[%s2918_s11 + $0x568] sm:$0xff] }
  0x81   : > { %1037 = vmatprep.mubr.f32.mxu0 %v371_v46  ;;  %2382 = vmatpush1.bf16.msra.mxu0 %v2381_v45  ;;  %v432_v44 = vld [vmem:[%s2918_s11 + $0x5a8] sm:$0xff]  ;;  %v434_v45 = vld [vmem:[%s2918_s11 + $0x5b8] sm:$0xff]  ;;  %v431_v46 = vld [vmem:[%s2918_s11 + $0x5a0] sm:$0xff] }
  0x82   : > { %2500 = vmatpush1.bf16.msra.mxu1 %v3333_v47  ;;  %2383 = vmatprep.subr.bf16.mxu0 %v2747_v3 }
  0x83   : > { %813 = vmatmul.mubr.f32.gmra.mrb[26].mxu1 %v368_v52  ;;  %2485 = vmatprep.subr.bf16.mxu1 %v2747_v3  ;;  %v442_v52 = vld [vmem:[%s2918_s11 + $0x5f8] sm:$0xff] }
  0x84   : > { %1038 = vmatmul.mubr.f32.gmra.mrb[26].mxu0 %v370_v54  ;;  %817 = vmatprep.mubr.f32.mxu1 %v378_v56  ;;  %v450_v54 = vld [vmem:[%s2918_s11 + $0x638] sm:$0xff]  ;;  %v452_v56 = vld [vmem:[%s2918_s11 + $0x648] sm:$0xff] }
  0x85   : > { %1042 = vmatprep.mubr.f32.mxu0 %v380_v58  ;;  %2385 = vmatpush1.bf16.msra.mxu0 %v2384_v57  ;;  %v449_v57 = vld [vmem:[%s2918_s11 + $0x630] sm:$0xff]  ;;  %v451_v58 = vld [vmem:[%s2918_s11 + $0x640] sm:$0xff] }
  0x86   : > { %2501 = vmatpush1.bf16.msra.mxu1 %v3354_v59  ;;  %2386 = vmatprep.subr.bf16.mxu0 %v2747_v3 }
  0x87   : > { %818 = vmatmul.mubr.f32.gmra.mrb[28].mxu1 %v377_v2  ;;  %2486 = vmatprep.subr.bf16.mxu1 %v2747_v3  ;;  %v468_v2 = vld [vmem:[%s2918_s11 + $0x6c8] sm:$0xff] }
  0x88   : > { %1043 = vmatmul.mubr.f32.gmra.mrb[28].mxu0 %v379_v4  ;;  %822 = vmatprep.mubr.f32.mxu1 %v387_v5  ;;  %v470_v4 = vld [vmem:[%s2918_s11 + $0x6d8] sm:$0xff]  ;;  %v467_v5 = vld [vmem:[%s2918_s11 + $0x6c0] sm:$0xff] }
  0x89   : > { %1047 = vmatprep.mubr.f32.mxu0 %v389_v7  ;;  %2388 = vmatpush1.bf16.msra.mxu0 %v2387_v6  ;;  %v469_v6 = vld [vmem:[%s2918_s11 + $0x6d0] sm:$0xff] }
  0x8a   : > { %2502 = vmatpush1.bf16.msra.mxu1 %v3375_v8  ;;  %2389 = vmatprep.subr.bf16.mxu0 %v2747_v3  ;;  %v477_v7 = vld [vmem:[%s2918_s11 + $0x710] sm:$0xff] }
  0x8b   : > { %823 = vmatmul.mubr.f32.gmra.mrb[30].mxu1 %v386_v15  ;;  %2487 = vmatprep.subr.bf16.mxu1 %v2747_v3  ;;  %v488_v15 = vld [vmem:[%s2918_s11 + $0x768] sm:$0xff] }
  0x8c   : > { %1048 = vmatmul.mubr.f32.gmra.mrb[30].mxu0 %v388_v18  ;;  %827 = vmatprep.mubr.f32.mxu1 %v396_v19  ;;  %v495_v18 = vld [vmem:[%s2918_s11 + $0x7a0] sm:$0xff]  ;;  %v497_v19 = vld [vmem:[%s2918_s11 + $0x7b0] sm:$0xff] }
  0x8d   : > { %1052 = vmatprep.mubr.f32.mxu0 %v398_v21  ;;  %2391 = vmatpush1.bf16.msra.mxu0 %v2390_v20  ;;  %v494_v20 = vld [vmem:[%s2918_s11 + $0x798] sm:$0xff]  ;;  %v496_v21 = vld [vmem:[%s2918_s11 + $0x7a8] sm:$0xff] }
  0x8e   : > { %2503 = vmatpush1.bf16.msra.mxu1 %v3402_v23  ;;  %2392 = vmatprep.subr.bf16.mxu0 %v2747_v3 }
  0x8f   : > { %828 = vmatmul.mubr.f32.gmra.mrb[32].mxu1 %v395_v26  ;;  %2441 = vmatprep.subr.bf16.mxu1 %v3405_v25  ;;  %v504_v26 = vld [vmem:[%s2918_s11 + $0x7e8] sm:$0xff] }
  0x90   : > { %1053 = vmatmul.mubr.f32.gmra.mrb[32].mxu0 %v397_v27  ;;  %832 = vmatprep.mubr.f32.mxu1 %v405_v28  ;;  %v506_v27 = vld [vmem:[%s2918_s11 + $0x7f8] sm:$0xff]  ;;  %v503_v28 = vld [vmem:[%s2918_s11 + $0x7e0] sm:$0xff] }
  0x91   : > { %1057 = vmatprep.mubr.f32.mxu0 %v407_v29  ;;  %v505_v29 = vld [vmem:[%s2918_s11 + $0x7f0] sm:$0xff] }
  0x93   : > { %833 = vmatmul.mubr.f32.gmra.mrb[34].mxu1 %v404_v30  ;;  %v513_v30 = vld [vmem:[%s2918_s11 + $0x830] sm:$0xff] }
  0x94   : > { %1058 = vmatmul.mubr.f32.gmra.mrb[34].mxu0 %v406_v31  ;;  %837 = vmatprep.mubr.f32.mxu1 %v414_v33  ;;  %v515_v31 = vld [vmem:[%s2918_s11 + $0x840] sm:$0xff]  ;;  %v512_v33 = vld [vmem:[%s2918_s11 + $0x828] sm:$0xff] }
  0x95   : > { %1062 = vmatprep.mubr.f32.mxu0 %v416_v34  ;;  %v514_v34 = vld [vmem:[%s2918_s11 + $0x838] sm:$0xff] }
  0x97   : > { %838 = vmatmul.mubr.f32.gmra.mrb[36].mxu1 %v413_v36  ;;  %v522_v36 = vld [vmem:[%s2918_s11 + $0x878] sm:$0xff] }
  0x98   : > { %1063 = vmatmul.mubr.f32.gmra.mrb[36].mxu0 %v415_v37  ;;  %842 = vmatprep.mubr.f32.mxu1 %v423_v38  ;;  %v524_v37 = vld [vmem:[%s2918_s11 + $0x888] sm:$0xff]  ;;  %v521_v38 = vld [vmem:[%s2918_s11 + $0x870] sm:$0xff] }
  0x99   : > { %1067 = vmatprep.mubr.f32.mxu0 %v425_v39  ;;  %v523_v39 = vld [vmem:[%s2918_s11 + $0x880] sm:$0xff] }
  0x9b   : > { %843 = vmatmul.mubr.f32.gmra.mrb[38].mxu1 %v422_v40  ;;  %v531_v40 = vld [vmem:[%s2918_s11 + $0x8c0] sm:$0xff] }
  0x9c   : > { %1068 = vmatmul.mubr.f32.gmra.mrb[38].mxu0 %v424_v42  ;;  %847 = vmatprep.mubr.f32.mxu1 %v432_v44  ;;  %v533_v42 = vld [vmem:[%s2918_s11 + $0x8d0] sm:$0xff]  ;;  %v530_v44 = vld [vmem:[%s2918_s11 + $0x8b8] sm:$0xff] }
  0x9d   : > { %1072 = vmatprep.mubr.f32.mxu0 %v434_v45  ;;  %v532_v45 = vld [vmem:[%s2918_s11 + $0x8c8] sm:$0xff] }
  0x9f   : > { %848 = vmatmul.mubr.f32.gmra.mrb[40].mxu1 %v431_v46  ;;  %v330_v46 = vld [vmem:[%s2918_s11 + $0x278] sm:$0xff] }
  0xa0   : > { %1073 = vmatmul.mubr.f32.gmra.mrb[40].mxu0 %v433_v48  ;;  %852 = vmatprep.mubr.f32.mxu1 %v441_v49  ;;  %v256_v48 = vld [vmem:[%s2918_s11 + $0x28] sm:$0xff]  ;;  %v329_v49 = vld [vmem:[%s2918_s11 + $0x270] sm:$0xff] }
  0xa1   : > { %1077 = vmatprep.mubr.f32.mxu0 %v443_v50  ;;  %v669_v50 = vld [vmem:[%s4144_s1 + $0x410] sm:$0xff] }
  0xa3   : > { %853 = vmatmul.mubr.f32.gmra.mrb[42].mxu1 %v440_v51  ;;  %v670_v51 = vld [vmem:[%s4144_s1 + $0x418] sm:$0xff] }
  0xa4   : > { %1078 = vmatmul.mubr.f32.gmra.mrb[42].mxu0 %v442_v52  ;;  %857 = vmatprep.mubr.f32.mxu1 %v450_v54  ;;  %v255_v52 = vld [vmem:[%s2918_s11 + $0x20] sm:$0xff]  ;;  %v265_v54 = vld [vmem:[%s2918_s11 + $0x70] sm:$0xff] }
  0xa5   : > { %1082 = vmatprep.mubr.f32.mxu0 %v452_v56  ;;  %v339_v56 = vld [vmem:[%s2918_s11 + $0x2c0] sm:$0xff] }
  0xa7   : > { %858 = vmatmul.mubr.f32.gmra.mrb[44].mxu1 %v449_v57  ;;  %v2444_v57 = vpack.c.bf16 %v670_v51, %v669_v50  ;;  %v327_v50 = vld [vmem:[%s2918_s11 + $0x260] sm:$0xff] }
  0xa8   : > { %1083 = vmatmul.mubr.f32.gmra.mrb[44].mxu0 %v451_v58  ;;  %862 = vmatprep.mubr.f32.mxu1 %v459_v60  ;;  %v338_v58 = vld [vmem:[%s2918_s11 + $0x2b8] sm:$0xff]  ;;  %v671_v60 = vld [vmem:[%s4144_s1 + $0x420] sm:$0xff] }
  0xa9   : > { %1087 = vmatprep.mubr.f32.mxu0 %v461_v61  ;;  %v672_v61 = vld [vmem:[%s4144_s1 + $0x428] sm:$0xff]  ;;  %v411_v51 = vld [vmem:[%s2918_s11 + $0x500] sm:$0xff] }
  0xab   : > { %863 = vmatmul.mubr.f32.gmra.mrb[46].mxu1 %v458_v62  ;;  %v264_v62 = vld [vmem:[%s2918_s11 + $0x68] sm:$0xff] }
  0xac   : > { %1088 = vmatmul.mubr.f32.gmra.mrb[46].mxu0 %v460_v63  ;;  %867 = vmatprep.mubr.f32.mxu1 %v468_v2  ;;  %v348_v63 = vld [vmem:[%s2918_s11 + $0x308] sm:$0xff]  ;;  %v2448_v2 = vpack.c.bf16 %v672_v61, %v671_v60  ;;  %v429_v60 = vld [vmem:[%s2918_s11 + $0x590] sm:$0xff]  ;;  %v355_v61 = vld [vmem:[%s2918_s11 + $0x340] sm:$0xff] }
  0xad   : > { %1092 = vmatprep.mubr.f32.mxu0 %v470_v4  ;;  %v347_v4 = vld [vmem:[%s2918_s11 + $0x300] sm:$0xff] }
  0xaf   : > { %868 = vmatmul.mubr.f32.gmra.mrb[48].mxu1 %v467_v5  ;;  %v674_v5 = vld [vmem:[%s4144_s1 + $0x438] sm:$0xff] }
  0xb0   : > { %1093 = vmatmul.mubr.f32.gmra.mrb[48].mxu0 %v469_v6  ;;  %872 = vmatprep.mubr.f32.mxu1 %v477_v7  ;;  %v273_v6 = vld [vmem:[%s2918_s11 + $0xb0] sm:$0xff] }
  0xb1   : > { %1097 = vmatprep.mubr.f32.mxu0 %v479_v9  ;;  %v357_v7 = vld [vmem:[%s2918_s11 + $0x350] sm:$0xff]  ;;  %v283_v9 = vld [vmem:[%s2918_s11 + $0x100] sm:$0xff] }
  0xb3   : > { %873 = vmatmul.mubr.f32.gmra.mrb[50].mxu1 %v476_v10 }
  0xb4   : > { %1098 = vmatmul.mubr.f32.gmra.mrb[50].mxu0 %v478_v11  ;;  %877 = vmatprep.mubr.f32.mxu1 %v486_v14  ;;  %v356_v11 = vld [vmem:[%s2918_s11 + $0x348] sm:$0xff]  ;;  %v675_v14 = vld [vmem:[%s4144_s1 + $0x440] sm:$0xff] }
  0xb5   : > { %1102 = vmatprep.mubr.f32.mxu0 %v488_v15  ;;  %v282_v15 = vld [vmem:[%s2918_s11 + $0xf8] sm:$0xff] }
  0xb7   : > { %878 = vmatmul.mubr.f32.gmra.mrb[52].mxu1 %v485_v16  ;;  %v366_v16 = vld [vmem:[%s2918_s11 + $0x398] sm:$0xff] }
  0xb8   : > { %1103 = vmatmul.mubr.f32.gmra.mrb[52].mxu0 %v487_v17  ;;  %882 = vmatprep.mubr.f32.mxu1 %v495_v18  ;;  %v292_v17 = vld [vmem:[%s2918_s11 + $0x148] sm:$0xff] }
  0xb9   : > { %1107 = vmatprep.mubr.f32.mxu0 %v497_v19  ;;  %v365_v19 = vld [vmem:[%s2918_s11 + $0x390] sm:$0xff] }
  0xbb   : > { %883 = vmatmul.mubr.f32.gmra.mrb[54].mxu1 %v494_v20  ;;  %v677_v20 = vld [vmem:[%s4144_s1 + $0x450] sm:$0xff] }
  0xbc   : > { %1108 = vmatmul.mubr.f32.gmra.mrb[54].mxu0 %v496_v21  ;;  %887 = vmatprep.mubr.f32.mxu1 %v504_v26  ;;  %v291_v21 = vld [vmem:[%s2918_s11 + $0x140] sm:$0xff] }
  0xbd   : > { %1112 = vmatprep.mubr.f32.mxu0 %v506_v27  ;;  %v375_v26 = vld [vmem:[%s2918_s11 + $0x3e0] sm:$0xff]  ;;  %v301_v27 = vld [vmem:[%s2918_s11 + $0x190] sm:$0xff] }
  0xbf   : > { %888 = vmatmul.mubr.f32.gmra.mrb[56].mxu1 %v503_v28 }
  0xc0   : > { %1113 = vmatmul.mubr.f32.gmra.mrb[56].mxu0 %v505_v29  ;;  %892 = vmatprep.mubr.f32.mxu1 %v513_v30  ;;  %v374_v29 = vld [vmem:[%s2918_s11 + $0x3d8] sm:$0xff]  ;;  %v679_v30 = vld [vmem:[%s4144_s1 + $0x460] sm:$0xff] }
  0xc1   : > { %1117 = vmatprep.mubr.f32.mxu0 %v515_v31  ;;  %v300_v31 = vld [vmem:[%s2918_s11 + $0x188] sm:$0xff] }
  0xc3   : > { %893 = vmatmul.mubr.f32.gmra.mrb[58].mxu1 %v512_v33  ;;  %v384_v33 = vld [vmem:[%s2918_s11 + $0x428] sm:$0xff] }
  0xc4   : > { %1118 = vmatmul.mubr.f32.gmra.mrb[58].mxu0 %v514_v34  ;;  %897 = vmatprep.mubr.f32.mxu1 %v522_v36  ;;  %v310_v34 = vld [vmem:[%s2918_s11 + $0x1d8] sm:$0xff] }
  0xc5   : > { %1122 = vmatprep.mubr.f32.mxu0 %v524_v37  ;;  %v383_v37 = vld [vmem:[%s2918_s11 + $0x420] sm:$0xff] }
  0xc7   : > { %898 = vmatmul.mubr.f32.gmra.mrb[60].mxu1 %v521_v38  ;;  %v681_v38 = vld [vmem:[%s4144_s1 + $0x470] sm:$0xff] }
  0xc8   : > { %1123 = vmatmul.mubr.f32.gmra.mrb[60].mxu0 %v523_v39  ;;  %902 = vmatprep.mubr.f32.mxu1 %v531_v40  ;;  %v309_v39 = vld [vmem:[%s2918_s11 + $0x1d0] sm:$0xff] }
  0xc9   : > { %1127 = vmatprep.mubr.f32.mxu0 %v533_v42  ;;  %v393_v40 = vld [vmem:[%s2918_s11 + $0x470] sm:$0xff]  ;;  %v319_v42 = vld [vmem:[%s2918_s11 + $0x220] sm:$0xff] }
  0xcb   : > { %903 = vmatmul.mubr.f32.gmra.mrb[62].mxu1 %v530_v44 }
  0xcc   : > { %1128 = vmatmul.mubr.f32.gmra.mrb[62].mxu0 %v532_v45  ;;  %1462 = vmatprep.mubr.f32.mxu1 %v330_v46  ;;  %v392_v45 = vld [vmem:[%s2918_s11 + $0x468] sm:$0xff]  ;;  %v318_v46 = vld [vmem:[%s2918_s11 + $0x218] sm:$0xff] }
  0xcd   : > { %1197 = vmatprep.mubr.f32.mxu0 %v256_v48  ;;  %v402_v48 = vld [vmem:[%s2918_s11 + $0x4b8] sm:$0xff] }
  0xcf   : > { %1463 = vmatmul.mubr.f32.vlgmr.msra.gmra.mrb[64].mxu1 %v329_v49  ;;  %v401_v49 = vld [vmem:[%s2918_s11 + $0x4b0] sm:$0xff] }
  0xd0   : > { %1198 = vmatmul.mubr.f32.vlgmr.msra.gmra.mrb[0].mxu0 %v255_v52  ;;  %2443 = vmatpush3.bf16.msra.mxu1 %v3405_v25  ;;  %v274_v25 = vld [vmem:[%s2918_s11 + $0xb8] sm:$0xff]  ;;  %v337_v52 = vld [vmem:[%s2918_s11 + $0x2b0] sm:$0xff] }
  0xd1   : > { %2394 = vmatpush1.bf16.msra.mxu0 %v3077_v41  ;;  %1202 = vmatprep.mubr.f32.mxu0 %v265_v54  ;;  %v673_v41 = vld [vmem:[%s4144_s1 + $0x430] sm:$0xff]  ;;  %v336_v54 = vld [vmem:[%s2918_s11 + $0x2a8] sm:$0xff] }
  0xd2   : > { %1467 = vmatprep.mubr.f32.mxu1 %v339_v56  ;;  %2395 = vmatprep.subr.bf16.mxu0 %v2747_v3  ;;  %v2452_v10 = vpack.c.bf16 %v674_v5, %v673_v41  ;;  %v420_v56 = vld [vmem:[%s2918_s11 + $0x548] sm:$0xff]  ;;  %v373_v41 = vld [vmem:[%s2918_s11 + $0x3d0] sm:$0xff] }
  0xd3   : > { %1468 = vmatmul.mubr.f32.gmra.mrb[66].mxu1 %v338_v58  ;;  %2445 = vmatprep.subr.bf16.mxu1 %v2444_v57  ;;  %v345_v58 = vld [vmem:[%s2918_s11 + $0x2f0] sm:$0xff]  ;;  %v372_v5 = vld [vmem:[%s2918_s11 + $0x3c8] sm:$0xff] }
  0xd4   : > { %1203 = vmatmul.mubr.f32.gmra.mrb[2].mxu0 %v264_v62  ;;  %1472 = vmatprep.mubr.f32.mxu1 %v348_v63  ;;  %v354_v62 = vld [vmem:[%s2918_s11 + $0x338] sm:$0xff] }
  0xd5   : > { %1207 = vmatprep.mubr.f32.mxu0 %v274_v25  ;;  %2397 = vmatpush1.bf16.msra.mxu0 %v3102_v55  ;;  %v676_v55 = vld [vmem:[%s4144_s1 + $0x448] sm:$0xff]  ;;  %v438_v63 = vld [vmem:[%s2918_s11 + $0x5d8] sm:$0xff] }
  0xd6   : > { %2447 = vmatpush3.bf16.msra.mxu1 %v2444_v57  ;;  %2398 = vmatprep.subr.bf16.mxu0 %v2747_v3  ;;  %v2456_v18 = vpack.c.bf16 %v676_v55, %v675_v14  ;;  %v346_v57 = vld [vmem:[%s2918_s11 + $0x2f8] sm:$0xff]  ;;  %v364_v25 = vld [vmem:[%s2918_s11 + $0x388] sm:$0xff] }
  0xd7   : > { %1473 = vmatmul.mubr.f32.gmra.mrb[68].mxu1 %v347_v4  ;;  %2449 = vmatprep.subr.bf16.mxu1 %v2448_v2  ;;  %v447_v4 = vld [vmem:[%s2918_s11 + $0x620] sm:$0xff]  ;;  %v390_v14 = vld [vmem:[%s2918_s11 + $0x458] sm:$0xff] }
  0xd8   : > { %1208 = vmatmul.mubr.f32.gmra.mrb[4].mxu0 %v273_v6  ;;  %1477 = vmatprep.mubr.f32.mxu1 %v357_v7  ;;  %v456_v6 = vld [vmem:[%s2918_s11 + $0x668] sm:$0xff]  ;;  %v382_v7 = vld [vmem:[%s2918_s11 + $0x418] sm:$0xff] }
  0xd9   : > { %1212 = vmatprep.mubr.f32.mxu0 %v283_v9  ;;  %2400 = vmatpush1.bf16.msra.mxu0 %v3123_v1  ;;  %v678_v1 = vld [vmem:[%s4144_s1 + $0x458] sm:$0xff]  ;;  %v381_v9 = vld [vmem:[%s2918_s11 + $0x410] sm:$0xff] }
  0xda   : > { %2401 = vmatprep.subr.bf16.mxu0 %v2747_v3  ;;  %2451 = vmatpush3.bf16.msra.mxu1 %v2448_v2  ;;  %v2460_v28 = vpack.c.bf16 %v678_v1, %v677_v20  ;;  %v363_v2 = vld [vmem:[%s2918_s11 + $0x380] sm:$0xff]  ;;  %v474_v55 = vld [vmem:[%s2918_s11 + $0x6f8] sm:$0xff] }
  0xdb   : > { %1478 = vmatmul.mubr.f32.gmra.mrb[70].mxu1 %v356_v11  ;;  %2453 = vmatprep.subr.bf16.mxu1 %v2452_v10  ;;  %v391_v11 = vld [vmem:[%s2918_s11 + $0x460] sm:$0xff]  ;;  %v418_v20 = vld [vmem:[%s2918_s11 + $0x538] sm:$0xff] }
  0xdc   : > { %1213 = vmatmul.mubr.f32.gmra.mrb[6].mxu0 %v282_v15  ;;  %1482 = vmatprep.mubr.f32.mxu1 %v366_v16  ;;  %v400_v15 = vld [vmem:[%s2918_s11 + $0x4a8] sm:$0xff]  ;;  %v399_v16 = vld [vmem:[%s2918_s11 + $0x4a0] sm:$0xff] }
  0xdd   : > { %1217 = vmatprep.mubr.f32.mxu0 %v292_v17  ;;  %2403 = vmatpush1.bf16.msra.mxu0 %v3144_v12  ;;  %v680_v12 = vld [vmem:[%s4144_s1 + $0x468] sm:$0xff]  ;;  %v483_v17 = vld [vmem:[%s2918_s11 + $0x740] sm:$0xff] }
  0xde   : > { %2404 = vmatprep.subr.bf16.mxu0 %v2747_v3  ;;  %2455 = vmatpush3.bf16.msra.mxu1 %v2452_v10  ;;  %v2464_v36 = vpack.c.bf16 %v680_v12, %v679_v30  ;;  %v465_v10 = vld [vmem:[%s2918_s11 + $0x6b0] sm:$0xff]  ;;  %v491_v1 = vld [vmem:[%s2918_s11 + $0x780] sm:$0xff]  ;;  %v436_v30 = vld [vmem:[%s2918_s11 + $0x5c8] sm:$0xff] }
  0xdf   : > { %1483 = vmatmul.mubr.f32.gmra.mrb[72].mxu1 %v365_v19  ;;  %2457 = vmatprep.subr.bf16.mxu1 %v2456_v18  ;;  %v492_v19 = vld [vmem:[%s2918_s11 + $0x788] sm:$0xff]  ;;  %v509_v12 = vld [vmem:[%s2918_s11 + $0x810] sm:$0xff] }
  0xe0   : > { %1218 = vmatmul.mubr.f32.gmra.mrb[8].mxu0 %v291_v21  ;;  %1487 = vmatprep.mubr.f32.mxu1 %v375_v26  ;;  %v501_v21 = vld [vmem:[%s2918_s11 + $0x7d0] sm:$0xff]  ;;  %v427_v26 = vld [vmem:[%s2918_s11 + $0x580] sm:$0xff] }
  0xe1   : > { %1222 = vmatprep.mubr.f32.mxu0 %v301_v27  ;;  %2406 = vmatpush1.bf16.msra.mxu0 %v3165_v22  ;;  %v682_v22 = vld [vmem:[%s4144_s1 + $0x478] sm:$0xff]  ;;  %v500_v27 = vld [vmem:[%s2918_s11 + $0x7c8] sm:$0xff] }
  0xe2   : > { %2407 = vmatprep.subr.bf16.mxu0 %v2747_v3  ;;  %2459 = vmatpush3.bf16.msra.mxu1 %v2456_v18  ;;  %v2468_v44 = vpack.c.bf16 %v682_v22, %v681_v38  ;;  %v409_v18 = vld [vmem:[%s2918_s11 + $0x4f0] sm:$0xff]  ;;  %v528_v38 = vld [vmem:[%s2918_s11 + $0x8a8] sm:$0xff] }
  0xe3   : > { %1488 = vmatmul.mubr.f32.gmra.mrb[74].mxu1 %v374_v29  ;;  %2461 = vmatprep.subr.bf16.mxu1 %v2460_v28  ;;  %v510_v29 = vld [vmem:[%s2918_s11 + $0x818] sm:$0xff] }
  0xe4   : > { %1223 = vmatmul.mubr.f32.gmra.mrb[10].mxu0 %v300_v31  ;;  %1492 = vmatprep.mubr.f32.mxu1 %v384_v33  ;;  %v435_v31 = vld [vmem:[%s2918_s11 + $0x5c0] sm:$0xff] }
  0xe5   : > { %1227 = vmatprep.mubr.f32.mxu0 %v310_v34  ;;  %2409 = vmatpush1.bf16.msra.mxu0 %v3186_v32  ;;  %v328_v32 = vld [vmem:[%s2918_s11 + $0x268] sm:$0xff]  ;;  %v519_v33 = vld [vmem:[%s2918_s11 + $0x860] sm:$0xff]  ;;  %v445_v34 = vld [vmem:[%s2918_s11 + $0x610] sm:$0xff] }
  0xe6   : > { %2410 = vmatprep.subr.bf16.mxu0 %v2747_v3  ;;  %2463 = vmatpush3.bf16.msra.mxu1 %v2460_v28  ;;  %v426_v28 = vld [vmem:[%s2918_s11 + $0x578] sm:$0xff] }
  0xe7   : > { %1493 = vmatmul.mubr.f32.gmra.mrb[76].mxu1 %v383_v37  ;;  %2465 = vmatprep.subr.bf16.mxu1 %v2464_v36  ;;  %v444_v37 = vld [vmem:[%s2918_s11 + $0x608] sm:$0xff] }
  0xe8   : > { %1228 = vmatmul.mubr.f32.gmra.mrb[12].mxu0 %v309_v39  ;;  %1497 = vmatprep.mubr.f32.mxu1 %v393_v40  ;;  %v454_v39 = vld [vmem:[%s2918_s11 + $0x658] sm:$0xff] }
  0xe9   : > { %1232 = vmatprep.mubr.f32.mxu0 %v319_v42  ;;  %2412 = vmatpush1.bf16.msra.mxu0 %v3207_v43  ;;  %v410_v43 = vld [vmem:[%s2918_s11 + $0x4f8] sm:$0xff]  ;;  %v527_v42 = vld [vmem:[%s2918_s11 + $0x8a0] sm:$0xff] }
  0xea   : > { %2413 = vmatprep.subr.bf16.mxu0 %v2747_v3  ;;  %2467 = vmatpush3.bf16.msra.mxu1 %v2464_v36  ;;  %v518_v36 = vld [vmem:[%s2918_s11 + $0x858] sm:$0xff] }
  0xeb   : > { %1498 = vmatmul.mubr.f32.gmra.mrb[78].mxu1 %v392_v45  ;;  %2469 = vmatprep.subr.bf16.mxu1 %v2468_v44  ;;  %v537_v45 = vld [vmem:[%s2918_s11 + $0x8f0] sm:$0xff] }
  0xec   : > { %1233 = vmatmul.mubr.f32.gmra.mrb[14].mxu0 %v318_v46  ;;  %1502 = vmatprep.mubr.f32.mxu1 %v402_v48  ;;  %v463_v48 = vld [vmem:[%s2918_s11 + $0x6a0] sm:$0xff] }
  0xed   : > { %1237 = vmatprep.mubr.f32.mxu0 %v328_v32  ;;  %2415 = vmatpush1.bf16.msra.mxu0 %v3228_v53  ;;  %v419_v53 = vld [vmem:[%s2918_s11 + $0x540] sm:$0xff] }
  0xee   : > { %2416 = vmatprep.subr.bf16.mxu0 %v2747_v3  ;;  %2471 = vmatpush3.bf16.msra.mxu1 %v2468_v44  ;;  %v453_v44 = vld [vmem:[%s2918_s11 + $0x650] sm:$0xff] }
  0xef   : > { %1503 = vmatmul.mubr.f32.gmra.mrb[80].mxu1 %v401_v49  ;;  %v536_v49 = vld [vmem:[%s2918_s11 + $0x8e8] sm:$0xff] }
  0xf0   : > { %1238 = vmatmul.mubr.f32.gmra.mrb[16].mxu0 %v327_v50  ;;  %1507 = vmatprep.mubr.f32.mxu1 %v411_v51  ;;  %v462_v50 = vld [vmem:[%s2918_s11 + $0x698] sm:$0xff]  ;;  %v259_v51 = vld [vmem:[%s2918_s11 + $0x40] sm:$0xff] }
  0xf1   : > { %1242 = vmatprep.mubr.f32.mxu0 %v337_v52  ;;  %2418 = vmatpush1.bf16.msra.mxu0 %v3249_v0  ;;  %v428_v0 = vld [vmem:[%s2918_s11 + $0x588] sm:$0xff] }
  0xf2   : > { %2419 = vmatprep.subr.bf16.mxu0 %v2747_v3 }
  0xf3   : > { %1508 = vmatmul.mubr.f32.gmra.mrb[82].mxu1 %v410_v43  ;;  %v472_v43 = vld [vmem:[%s2918_s11 + $0x6e8] sm:$0xff] }
  0xf4   : > { %1243 = vmatmul.mubr.f32.gmra.mrb[18].mxu0 %v336_v54  ;;  %1512 = vmatprep.mubr.f32.mxu1 %v420_v56  ;;  %v268_v56 = vld [vmem:[%s2918_s11 + $0x88] sm:$0xff] }
  0xf5   : > { %1247 = vmatprep.mubr.f32.mxu0 %v346_v57  ;;  %2421 = vmatpush1.bf16.msra.mxu0 %v3270_v13  ;;  %v437_v13 = vld [vmem:[%s2918_s11 + $0x5d0] sm:$0xff]  ;;  %v471_v57 = vld [vmem:[%s2918_s11 + $0x6e0] sm:$0xff] }
  0xf6   : > { %2422 = vmatprep.subr.bf16.mxu0 %v2747_v3 }
  0xf7   : > { %1513 = vmatmul.mubr.f32.gmra.mrb[84].mxu1 %v419_v53  ;;  %v277_v53 = vld [vmem:[%s2918_s11 + $0xd0] sm:$0xff] }
  0xf8   : > { %1248 = vmatmul.mubr.f32.gmra.mrb[20].mxu0 %v345_v58  ;;  %1517 = vmatprep.mubr.f32.mxu1 %v429_v60  ;;  %v481_v60 = vld [vmem:[%s2918_s11 + $0x730] sm:$0xff] }
  0xf9   : > { %1252 = vmatprep.mubr.f32.mxu0 %v355_v61  ;;  %2424 = vmatpush1.bf16.msra.mxu0 %v3291_v24  ;;  %v446_v24 = vld [vmem:[%s2918_s11 + $0x618] sm:$0xff] }
  0xfa   : > { %2425 = vmatprep.subr.bf16.mxu0 %v2747_v3 }
  0xfb   : > { %1518 = vmatmul.mubr.f32.gmra.mrb[86].mxu1 %v428_v0  ;;  %v286_v0 = vld [vmem:[%s2918_s11 + $0x118] sm:$0xff] }
  0xfc   : > { %1253 = vmatmul.mubr.f32.gmra.mrb[22].mxu0 %v354_v62  ;;  %1522 = vmatprep.mubr.f32.mxu1 %v438_v63  ;;  %v480_v62 = vld [vmem:[%s2918_s11 + $0x728] sm:$0xff]  ;;  %v295_v63 = vld [vmem:[%s2918_s11 + $0x160] sm:$0xff] }
  0xfd   : > { %1257 = vmatprep.mubr.f32.mxu0 %v364_v25  ;;  %2427 = vmatpush1.bf16.msra.mxu0 %v3312_v35  ;;  %v455_v35 = vld [vmem:[%s2918_s11 + $0x660] sm:$0xff] }
  0xfe   : > { %2428 = vmatprep.subr.bf16.mxu0 %v2747_v3 }
  0xff   : > { %1523 = vmatmul.mubr.f32.gmra.mrb[88].mxu1 %v437_v13  ;;  %v490_v13 = vld [vmem:[%s2918_s11 + $0x778] sm:$0xff] }
 0x100   : > { %1258 = vmatmul.mubr.f32.gmra.mrb[24].mxu0 %v363_v2  ;;  %1527 = vmatprep.mubr.f32.mxu1 %v447_v4  ;;  %v304_v4 = vld [vmem:[%s2918_s11 + $0x1a8] sm:$0xff] }
 0x101   : > { %1262 = vmatprep.mubr.f32.mxu0 %v373_v41  ;;  %2430 = vmatpush1.bf16.msra.mxu0 %v3333_v47  ;;  %v464_v47 = vld [vmem:[%s2918_s11 + $0x6a8] sm:$0xff]  ;;  %v489_v41 = vld [vmem:[%s2918_s11 + $0x770] sm:$0xff] }
 0x102   : > { %2431 = vmatprep.subr.bf16.mxu0 %v2747_v3 }
 0x103   : > { %1528 = vmatmul.mubr.f32.gmra.mrb[90].mxu1 %v446_v24  ;;  %v313_v24 = vld [vmem:[%s2918_s11 + $0x1f0] sm:$0xff] }
 0x104   : > { %1263 = vmatmul.mubr.f32.gmra.mrb[26].mxu0 %v372_v5  ;;  %1532 = vmatprep.mubr.f32.mxu1 %v456_v6  ;;  %v499_v6 = vld [vmem:[%s2918_s11 + $0x7c0] sm:$0xff] }
 0x105   : > { %1267 = vmatprep.mubr.f32.mxu0 %v382_v7  ;;  %2433 = vmatpush1.bf16.msra.mxu0 %v3354_v59  ;;  %v473_v59 = vld [vmem:[%s2918_s11 + $0x6f0] sm:$0xff] }
 0x106   : > { %2434 = vmatprep.subr.bf16.mxu0 %v2747_v3 }
 0x107   : > { %1533 = vmatmul.mubr.f32.gmra.mrb[92].mxu1 %v455_v35  ;;  %v322_v35 = vld [vmem:[%s2918_s11 + $0x238] sm:$0xff] }
 0x108   : > { %1268 = vmatmul.mubr.f32.gmra.mrb[28].mxu0 %v381_v9  ;;  %1537 = vmatprep.mubr.f32.mxu1 %v465_v10  ;;  %v498_v9 = vld [vmem:[%s2918_s11 + $0x7b8] sm:$0xff]  ;;  %v331_v10 = vld [vmem:[%s2918_s11 + $0x280] sm:$0xff] }
 0x109   : > { %1272 = vmatprep.mubr.f32.mxu0 %v391_v11  ;;  %2436 = vmatpush1.bf16.msra.mxu0 %v3375_v8  ;;  %v408_v8 = vld [vmem:[%s2918_s11 + $0x4e8] sm:$0xff] }
 0x10a   : > { %2437 = vmatprep.subr.bf16.mxu0 %v2747_v3  ;;  %v482_v3 = vld [vmem:[%s2918_s11 + $0x738] sm:$0xff] }
 0x10b   : > { %1538 = vmatmul.mubr.f32.gmra.mrb[94].mxu1 %v464_v47  ;;  %v508_v47 = vld [vmem:[%s2918_s11 + $0x808] sm:$0xff] }
 0x10c   : > { %1273 = vmatmul.mubr.f32.gmra.mrb[30].mxu0 %v390_v14  ;;  %1542 = vmatprep.mubr.f32.mxu1 %v474_v55  ;;  %v340_v55 = vld [vmem:[%s2918_s11 + $0x2c8] sm:$0xff] }
 0x10d   : > { %1277 = vmatprep.mubr.f32.mxu0 %v400_v15  ;;  %2439 = vmatpush1.bf16.msra.mxu0 %v3402_v23  ;;  %v417_v23 = vld [vmem:[%s2918_s11 + $0x530] sm:$0xff]  ;;  %v507_v15 = vld [vmem:[%s2918_s11 + $0x800] sm:$0xff] }
 0x10f   : > { %1543 = vmatmul.mubr.f32.gmra.mrb[96].mxu1 %v473_v59  ;;  %v349_v59 = vld [vmem:[%s2918_s11 + $0x310] sm:$0xff] }
 0x110   : > { %1278 = vmatmul.mubr.f32.gmra.mrb[32].mxu0 %v399_v16  ;;  %1547 = vmatprep.mubr.f32.mxu1 %v483_v17  ;;  %v517_v17 = vld [vmem:[%s2918_s11 + $0x850] sm:$0xff] }
 0x111   : > { %1282 = vmatprep.mubr.f32.mxu0 %v409_v18 }
 0x113   : > { %1548 = vmatmul.mubr.f32.gmra.mrb[98].mxu1 %v482_v3  ;;  %v358_v3 = vld [vmem:[%s2918_s11 + $0x358] sm:$0xff] }
 0x114   : > { %1283 = vmatmul.mubr.f32.gmra.mrb[34].mxu0 %v408_v8  ;;  %1552 = vmatprep.mubr.f32.mxu1 %v492_v19  ;;  %v516_v8 = vld [vmem:[%s2918_s11 + $0x848] sm:$0xff]  ;;  %v367_v19 = vld [vmem:[%s2918_s11 + $0x3a0] sm:$0xff] }
 0x115   : > { %1287 = vmatprep.mubr.f32.mxu0 %v418_v20 }
 0x117   : > { %1553 = vmatmul.mubr.f32.gmra.mrb[100].mxu1 %v491_v1  ;;  %v526_v1 = vld [vmem:[%s2918_s11 + $0x898] sm:$0xff] }
 0x118   : > { %1288 = vmatmul.mubr.f32.gmra.mrb[36].mxu0 %v417_v23  ;;  %1557 = vmatprep.mubr.f32.mxu1 %v501_v21  ;;  %v376_v21 = vld [vmem:[%s2918_s11 + $0x3e8] sm:$0xff] }
 0x119   : > { %1292 = vmatprep.mubr.f32.mxu0 %v427_v26  ;;  %v525_v26 = vld [vmem:[%s2918_s11 + $0x890] sm:$0xff] }
 0x11b   : > { %1558 = vmatmul.mubr.f32.gmra.mrb[102].mxu1 %v500_v27  ;;  %v385_v27 = vld [vmem:[%s2918_s11 + $0x430] sm:$0xff] }
 0x11c   : > { %1293 = vmatmul.mubr.f32.gmra.mrb[38].mxu0 %v426_v28  ;;  %1562 = vmatprep.mubr.f32.mxu1 %v510_v29  ;;  %v535_v29 = vld [vmem:[%s2918_s11 + $0x8e0] sm:$0xff] }
 0x11d   : > { %1297 = vmatprep.mubr.f32.mxu0 %v436_v30 }
 0x11f   : > { %1563 = vmatmul.mubr.f32.gmra.mrb[104].mxu1 %v509_v12  ;;  %v394_v12 = vld [vmem:[%s2918_s11 + $0x478] sm:$0xff] }
 0x120   : > { %1298 = vmatmul.mubr.f32.gmra.mrb[40].mxu0 %v435_v31  ;;  %1567 = vmatprep.mubr.f32.mxu1 %v519_v33  ;;  %v534_v31 = vld [vmem:[%s2918_s11 + $0x8d8] sm:$0xff]  ;;  %v403_v33 = vld [vmem:[%s2918_s11 + $0x4c0] sm:$0xff] }
 0x121   : > { %1302 = vmatprep.mubr.f32.mxu0 %v445_v34 }
 0x122   : > { %v3635_v22 = vpop.f32.mrb[0].mxu1 }
 0x123   : > { %1568 = vmatmul.mubr.f32.gmra.mrb[106].mxu1 %v518_v36  ;;  %v751_v40 = vpop.f32.mrb[1].mxu1  ;;  %v258_v36 = vld [vmem:[%s2918_s11 + $0x38] sm:$0xff] }
 0x124   : > { %1303 = vmatmul.mubr.f32.gmra.mrb[42].mxu0 %v444_v37  ;;  %1572 = vmatprep.mubr.f32.mxu1 %v528_v38  ;;  %v412_v38 = vld [vmem:[%s2918_s11 + $0x508] sm:$0xff]  ;;  %v421_v40 = vld [vmem:[%s2918_s11 + $0x550] sm:$0xff] }
 0x125   : > { %1307 = vmatprep.mubr.f32.mxu0 %v454_v39  ;;  %v257_v39 = vld [vmem:[%s2918_s11 + $0x30] sm:$0xff] }
 0x126   : > { %v3641_v46 = vpop.f32.mrb[2].mxu1 }
 0x127   : > { %1573 = vmatmul.mubr.f32.gmra.mrb[108].mxu1 %v527_v42  ;;  %v756_v32 = vpop.f32.mrb[3].mxu1 }
 0x128   : > { %1308 = vmatmul.mubr.f32.gmra.mrb[44].mxu0 %v453_v44  ;;  %1577 = vmatprep.mubr.f32.mxu1 %v537_v45  ;;  %v267_v44 = vld [vmem:[%s2918_s11 + $0x80] sm:$0xff]  ;;  %v266_v32 = vld [vmem:[%s2918_s11 + $0x78] sm:$0xff] }
 0x129   : > { %1312 = vmatprep.mubr.f32.mxu0 %v463_v48  ;;  %v430_v48 = vld [vmem:[%s2918_s11 + $0x598] sm:$0xff] }
 0x12a   : > { %v3647_v52 = vpop.f32.mrb[4].mxu1 }
 0x12b   : > { %1578 = vmatmul.mubr.f32.gmra.mrb[110].mxu1 %v536_v49  ;;  %v761_v54 = vpop.f32.mrb[5].mxu1  ;;  %v439_v49 = vld [vmem:[%s2918_s11 + $0x5e0] sm:$0xff] }
 0x12c   : > { %1313 = vmatmul.mubr.f32.gmra.mrb[46].mxu0 %v462_v50  ;;  %2200 = vmatprep.mubr.f32.mxu1 %v259_v51  ;;  %v276_v51 = vld [vmem:[%s2918_s11 + $0xc8] sm:$0xff] }
 0x12d   : > { %1317 = vmatprep.mubr.f32.mxu0 %v472_v43  ;;  %v448_v54 = vld [vmem:[%s2918_s11 + $0x628] sm:$0xff] }
 0x12e   : > { %v3653_v58 = vpop.f32.mrb[6].mxu1 }
 0x12f   : > { %2201 = vmatmul.mubr.f32.vlgmr.msra.gmra.mrb[112].mxu1 %v268_v56  ;;  %v766_v61 = vpop.f32.mrb[7].mxu1  ;;  %v275_v56 = vld [vmem:[%s2918_s11 + $0xc0] sm:$0xff] }
 0x130   : > { %1318 = vmatmul.mubr.f32.gmra.mrb[48].mxu0 %v471_v57  ;;  %2203 = vmatprep.mubr.f32.mxu1 %v277_v53  ;;  %v457_v57 = vld [vmem:[%s2918_s11 + $0x670] sm:$0xff] }
 0x131   : > { %1322 = vmatprep.mubr.f32.mxu0 %v481_v60  ;;  %v285_v60 = vld [vmem:[%s2918_s11 + $0x110] sm:$0xff] }
 0x132   : > { %v3659_v25 = vpop.f32.mrb[8].mxu1 }
 0x133   : > { %2204 = vmatmul.mubr.f32.gmra.mrb[114].mxu1 %v286_v0  ;;  %v771_v2 = vpop.f32.mrb[9].mxu1  ;;  %v466_v0 = vld [vmem:[%s2918_s11 + $0x6b8] sm:$0xff] }
 0x134   : > { %1323 = vmatmul.mubr.f32.gmra.mrb[50].mxu0 %v480_v62  ;;  %2206 = vmatprep.mubr.f32.mxu1 %v295_v63  ;;  %v284_v62 = vld [vmem:[%s2918_s11 + $0x108] sm:$0xff]  ;;  %v475_v63 = vld [vmem:[%s2918_s11 + $0x700] sm:$0xff]  ;;  %v294_v2 = vld [vmem:[%s2918_s11 + $0x158] sm:$0xff] }
 0x135   : > { %1327 = vmatprep.mubr.f32.mxu0 %v490_v13 }
 0x136   : > { %v3665_v5 = vpop.f32.mrb[10].mxu1 }
 0x137   : > { %2207 = vmatmul.mubr.f32.gmra.mrb[116].mxu1 %v304_v4  ;;  %v776_v7 = vpop.f32.mrb[11].mxu1 }
 0x138   : > { %1328 = vmatmul.mubr.f32.gmra.mrb[52].mxu0 %v489_v41  ;;  %2209 = vmatprep.mubr.f32.mxu1 %v313_v24  ;;  %v484_v41 = vld [vmem:[%s2918_s11 + $0x748] sm:$0xff]  ;;  %v293_v24 = vld [vmem:[%s2918_s11 + $0x150] sm:$0xff] }
 0x139   : > { %1332 = vmatprep.mubr.f32.mxu0 %v499_v6  ;;  %v493_v6 = vld [vmem:[%s2918_s11 + $0x790] sm:$0xff] }
 0x13a   : > { %v3671_v11 = vpop.f32.mrb[12].mxu1 }
 0x13b   : > { %2210 = vmatmul.mubr.f32.gmra.mrb[118].mxu1 %v322_v35  ;;  %v781_v14 = vpop.f32.mrb[13].mxu1  ;;  %v303_v35 = vld [vmem:[%s2918_s11 + $0x1a0] sm:$0xff] }
 0x13c   : > { %1333 = vmatmul.mubr.f32.gmra.mrb[54].mxu0 %v498_v9  ;;  %2212 = vmatprep.mubr.f32.mxu1 %v331_v10  ;;  %v502_v10 = vld [vmem:[%s2918_s11 + $0x7d8] sm:$0xff]  ;;  %v511_v14 = vld [vmem:[%s2918_s11 + $0x820] sm:$0xff] }
 0x13d   : > { %1337 = vmatprep.mubr.f32.mxu0 %v508_v47  ;;  %v302_v47 = vld [vmem:[%s2918_s11 + $0x198] sm:$0xff] }
 0x13e   : > { %v3677_v16 = vpop.f32.mrb[14].mxu1 }
 0x13f   : > { %2213 = vmatmul.mubr.f32.gmra.mrb[120].mxu1 %v340_v55  ;;  %v786_v18 = vpop.f32.mrb[15].mxu1 }
 0x140   : > { %1338 = vmatmul.mubr.f32.gmra.mrb[56].mxu0 %v507_v15  ;;  %2215 = vmatprep.mubr.f32.mxu1 %v349_v59  ;;  %v312_v15 = vld [vmem:[%s2918_s11 + $0x1e8] sm:$0xff]  ;;  %v311_v18 = vld [vmem:[%s2918_s11 + $0x1e0] sm:$0xff] }
 0x141   : > { %1342 = vmatprep.mubr.f32.mxu0 %v517_v17  ;;  %v520_v17 = vld [vmem:[%s2918_s11 + $0x868] sm:$0xff] }
 0x142   : > { %v3683_v20 = vpop.f32.mrb[16].mxu1 }
 0x143   : > { %2216 = vmatmul.mubr.f32.gmra.mrb[122].mxu1 %v358_v3  ;;  %v791_v23 = vpop.f32.mrb[17].mxu1  ;;  %v529_v3 = vld [vmem:[%s2918_s11 + $0x8b0] sm:$0xff] }
 0x144   : > { %1343 = vmatmul.mubr.f32.gmra.mrb[58].mxu0 %v516_v8  ;;  %2218 = vmatprep.mubr.f32.mxu1 %v367_v19  ;;  %v321_v19 = vld [vmem:[%s2918_s11 + $0x230] sm:$0xff]  ;;  %v538_v23 = vld [vmem:[%s2918_s11 + $0x8f8] sm:$0xff] }
 0x145   : > { %1347 = vmatprep.mubr.f32.mxu0 %v526_v1 }
 0x146   : > { %v3689_v28 = vpop.f32.mrb[18].mxu1 }
 0x147   : > { %2219 = vmatmul.mubr.f32.gmra.mrb[124].mxu1 %v376_v21  ;;  %v796_v30 = vpop.f32.mrb[19].mxu1  ;;  %v320_v21 = vld [vmem:[%s2918_s11 + $0x228] sm:$0xff]  ;;  %s2111_s11 = sshll.u32 %s4156_s30, 3  ;;  %s234_s30 = sand.u32 1, %s2737_s19  }
 0x148   : > { %1348 = vmatmul.mubr.f32.gmra.mrb[60].mxu0 %v525_v26  ;;  %2221 = vmatprep.mubr.f32.mxu1 %v385_v27  ;;  %s3863_s15 = scalar_lea.vmem %s4147_s4, %s2111_s11  ;;  %s2107_s6 = sshll.u32 %s234_s30, 8 }
 0x149   : > { %1352 = vmatprep.mubr.f32.mxu0 %v535_v29  ;;  %s3900_s7 = scalar_lea.vmem [#allocation2], %s2107_s6  ;;  %s4102_s22 = scalar_lea.sflag [#allocation3], %s234_s30 }
 0x14a   : > { %v3695_v34 = vpop.f32.mrb[20].mxu1  ;;  %s2029_s9 = sshll.u32 %s3900_s7, 4  ;;  %s4094_s9 = int_to_ptr.vmem [resolvable:$true] %s2029_s9 }
 0x14b   : > { %2222 = vmatmul.mubr.f32.gmra.mrb[126].mxu1 %v394_v12  ;;  %v801_v37 = vpop.f32.mrb[21].mxu1  ;;  %s2683_s11 = scalar_lea.vmem %s4094_s9, 4096  ;;  %p2690_p0 = scmp.lt.s32.totalorder %s4094_s9, %s2688_s16 }
 0x14c   : > { %1353 = vmatmul.mubr.f32.gmra.mrb[62].mxu0 %v534_v31  ;;  %2224 = vmatprep.mubr.f32.mxu1 %v403_v33  ;;  %p2684_p11 = scmp.ne.s32.totalorder %s4094_s9, %s2683_s11  ;;  %p2691_p1 = scmp.lt.s32.totalorder %s2689_s17, %s2683_s11 }
 0x14d   : > { %1422 = vmatprep.mubr.f32.mxu0 %v258_v36 }
 0x14e   : > { %v3701_v42 = vpop.f32.mrb[22].mxu1  ;;  %p2685_p12 = pnand %p2684_p11, %p2819_p5  ;;  %p2692_p2 = por %p2691_p1, %p2690_p0 }
 0x14f   : > { %2225 = vmatmul.mubr.f32.gmra.mrb[128].mxu1 %v412_v38  ;;  %v806_v45 = vpop.f32.mrb[23].mxu1 }
 0x150   : > { %1423 = vmatmul.mubr.f32.vlgmr.msra.gmra.mrb[0].mxu0 %v257_v39  ;;  %2227 = vmatprep.mubr.f32.mxu1 %v421_v40  ;;  %p2686_p13 = pneg %p2685_p12 }
 0x151   : > { %1427 = vmatprep.mubr.f32.mxu0 %v267_v44 }
 0x152   : > { %v3707_v50 = vpop.f32.mrb[24].mxu1  ;;  %p2693_p3 = pnand %p2692_p2, %p2686_p13 }
 0x153   : > { %2228 = vmatmul.mubr.f32.gmra.mrb[130].mxu1 %v430_v48  ;;  %v811_v43 = vpop.f32.mrb[25].mxu1 }
 0x154   : > { %1428 = vmatmul.mubr.f32.gmra.mrb[2].mxu0 %v266_v32  ;;  %2230 = vmatprep.mubr.f32.mxu1 %v439_v49 }
 0x155   : > { %1432 = vmatprep.mubr.f32.mxu0 %v276_v51 }
 0x156   : > { %v3713_v53 = vpop.f32.mrb[26].mxu1 }
 0x157   : > { %2231 = vmatmul.mubr.f32.gmra.mrb[132].mxu1 %v448_v54  ;;  %v816_v61 = vpop.f32.mrb[27].mxu1 }
 0x158   : > { %1433 = vmatmul.mubr.f32.gmra.mrb[4].mxu0 %v275_v56  ;;  %2233 = vmatprep.mubr.f32.mxu1 %v457_v57 }
 0x159   : > { %1437 = vmatprep.mubr.f32.mxu0 %v285_v60 }
 0x15a   : > { %v3719_v13 = vpop.f32.mrb[28].mxu1 }
 0x15b   : > { %2234 = vmatmul.mubr.f32.gmra.mrb[134].mxu1 %v466_v0  ;;  %v821_v4 = vpop.f32.mrb[29].mxu1 }
 0x15c   : > { %1438 = vmatmul.mubr.f32.gmra.mrb[6].mxu0 %v284_v62  ;;  %2236 = vmatprep.mubr.f32.mxu1 %v475_v63 }
 0x15d   : > { %1442 = vmatprep.mubr.f32.mxu0 %v294_v2 }
 0x15e   : > { %v3725_v7 = vpop.f32.mrb[30].mxu1 }
 0x15f   : > { %2237 = vmatmul.mubr.f32.gmra.mrb[136].mxu1 %v484_v41  ;;  %v826_v9 = vpop.f32.mrb[31].mxu1 }
 0x160   : > { %1443 = vmatmul.mubr.f32.gmra.mrb[8].mxu0 %v293_v24  ;;  %2239 = vmatprep.mubr.f32.mxu1 %v493_v6 }
 0x161   : > { %1447 = vmatprep.mubr.f32.mxu0 %v303_v35 }
 0x162   : > { %v3731_v55 = vpop.f32.mrb[32].mxu1 }
 0x163   : > { %2240 = vmatmul.mubr.f32.gmra.mrb[138].mxu1 %v502_v10  ;;  %v831_v59 = vpop.f32.mrb[33].mxu1 }
 0x164   : > { %1448 = vmatmul.mubr.f32.gmra.mrb[10].mxu0 %v302_v47  ;;  %2242 = vmatprep.mubr.f32.mxu1 %v511_v14 }
 0x165   : > { %1452 = vmatprep.mubr.f32.mxu0 %v312_v15 }
 0x166   : > { %v3737_v8 = vpop.f32.mrb[34].mxu1 }
 0x167   : > { %2243 = vmatmul.mubr.f32.gmra.mrb[140].mxu1 %v520_v17  ;;  %v836_v1 = vpop.f32.mrb[35].mxu1 }
 0x168   : > { %1453 = vmatmul.mubr.f32.gmra.mrb[12].mxu0 %v311_v18  ;;  %2245 = vmatprep.mubr.f32.mxu1 %v529_v3 }
 0x169   : > { %1457 = vmatprep.mubr.f32.mxu0 %v321_v19 }
 0x16a   : > { %v3742_v26 = vpop.f32.mrb[36].mxu1 }
 0x16b   : > { %2246 = vmatmul.mubr.f32.gmra.mrb[142].mxu1 %v538_v23  ;;  %v841_v27 = vpop.f32.mrb[37].mxu1 }
 0x16c   : > { %1458 = vmatmul.mubr.f32.gmra.mrb[14].mxu0 %v320_v21 }
 0x16e   : > { %v3744_v29 = vpop.f32.mrb[38].mxu1 }
 0x16f   : > { %v846_v30 = vpop.f32.mrb[39].mxu1 }
 0x172   : > { %v3746_v12 = vpop.f32.mrb[40].mxu1 }
 0x173   : > { %v851_v31 = vpop.f32.mrb[41].mxu1 }
 0x176   : > { %v3748_v33 = vpop.f32.mrb[42].mxu1 }
 0x177   : > { %v856_v36 = vpop.f32.mrb[43].mxu1 }
 0x17a   : > { %v3750_v37 = vpop.f32.mrb[44].mxu1 }
 0x17b   : > { %v861_v38 = vpop.f32.mrb[45].mxu1 }
 0x17e   : > { %v3752_v39 = vpop.f32.mrb[46].mxu1 }
 0x17f   : > { %v866_v40 = vpop.f32.mrb[47].mxu1 }
 0x182   : > { %v3754_v44 = vpop.f32.mrb[48].mxu1 }
 0x183   : > { %v871_v45 = vpop.f32.mrb[49].mxu1 }
 0x186   : > { %v3756_v48 = vpop.f32.mrb[50].mxu1 }
 0x187   : > { %v876_v32 = vpop.f32.mrb[51].mxu1 }
 0x18a   : > { %v3758_v49 = vpop.f32.mrb[52].mxu1 }
 0x18b   : > { %v881_v51 = vpop.f32.mrb[53].mxu1 }
 0x18e   : > { %v3760_v43 = vpop.f32.mrb[54].mxu1 }
 0x18f   : > { %v886_v54 = vpop.f32.mrb[55].mxu1 }
 0x192   : > { %v3762_v56 = vpop.f32.mrb[56].mxu1 }
 0x193   : > { %v891_v57 = vpop.f32.mrb[57].mxu1 }
 0x196   : > { %v3764_v60 = vpop.f32.mrb[58].mxu1 }
 0x197   : > { %v896_v61 = vpop.f32.mrb[59].mxu1 }
 0x19a   : > { %v3766_v0 = vpop.f32.mrb[60].mxu1 }
 0x19b   : > { %v901_v62 = vpop.f32.mrb[61].mxu1 }
 0x19e   : > { %v3768_v63 = vpop.f32.mrb[62].mxu1 }
 0x19f   : > { %v906_v2 = vpop.f32.mrb[63].mxu1 }
 0x1a2   : > { %v1464_v4 = vpop.f32.mrb[64].mxu1 }
 0x1a3   : > { %v1466_v41 = vpop.f32.mrb[65].mxu1 }
 0x1a6   : > { %v1469_v24 = vpop.f32.mrb[66].mxu1 }
 0x1a7   : > { %v1471_v6 = vpop.f32.mrb[67].mxu1 }
 0x1aa   : > { %v1474_v35 = vpop.f32.mrb[68].mxu1 }
 0x1ab   : > { %v1476_v9 = vpop.f32.mrb[69].mxu1 }
 0x1ae   : > { %v1479_v10 = vpop.f32.mrb[70].mxu1 }
 0x1af   : > { %v1481_v47 = vpop.f32.mrb[71].mxu1 }
 0x1b2   : > { %v1484_v14 = vpop.f32.mrb[72].mxu1 }
 0x1b3   : > { %v1486_v15 = vpop.f32.mrb[73].mxu1 }
 0x1b6   : > { %v1489_v59 = vpop.f32.mrb[74].mxu1 }
 0x1b7   : > { %v1491_v17 = vpop.f32.mrb[75].mxu1 }
 0x1ba   : > { %v1494_v18 = vpop.f32.mrb[76].mxu1 }
 0x1bb   : > { %v1496_v3 = vpop.f32.mrb[77].mxu1 }
 0x1be   : > { %v1499_v19 = vpop.f32.mrb[78].mxu1 }
 0x1bf   : > { %v1501_v1 = vpop.f32.mrb[79].mxu1 }
 0x1c2   : > { %v1504_v23 = vpop.f32.mrb[80].mxu1 }
 0x1c3   : > { %v1239_v21 = vpop.f32.mrb[16].mxu0  ;;  %v1506_v27 = vpop.f32.mrb[81].mxu1 }
 0x1c4   : > { %v2512_v30 = vadd.f32 %v1239_v21, %v3683_v20  ;;  %v1241_v31 = vpop.f32.mrb[17].mxu0 }
 0x1c6   : > { %v1509_v36 = vpop.f32.mrb[82].mxu1  ;;  %v3771_v38 = vadd.f32 %v2512_v30, %v1464_v4 }
 0x1c7   : > { %v1244_v40 = vpop.f32.mrb[18].mxu0  ;;  %v1511_v45 = vpop.f32.mrb[83].mxu1 }
 0x1c8   : > { %v2514_v32 = vadd.f32 %v1244_v40, %v3689_v28  ;;  %v1246_v51 = vpop.f32.mrb[19].mxu0 }
 0x1ca   : > { %v1514_v54 = vpop.f32.mrb[84].mxu1  ;;  %v3774_v57 = vadd.f32 %v2514_v32, %v1469_v24 }
 0x1cb   : > { %v1249_v61 = vpop.f32.mrb[20].mxu0  ;;  %v1516_v62 = vpop.f32.mrb[85].mxu1 }
 0x1cc   : > { %v2516_v2 = vadd.f32 %v1249_v61, %v3695_v34  ;;  %v1251_v41 = vpop.f32.mrb[21].mxu0 }
 0x1ce   : > { %v1519_v6 = vpop.f32.mrb[86].mxu1  ;;  %v3777_v9 = vadd.f32 %v2516_v2, %v1474_v35 }
 0x1cf   : > { %v1254_v20 = vpop.f32.mrb[22].mxu0  ;;  %v1521_v47 = vpop.f32.mrb[87].mxu1 }
 0x1d0   : > { %v2518_v4 = vadd.f32 %v1254_v20, %v3701_v42  ;;  %v1256_v15 = vpop.f32.mrb[23].mxu0 }
 0x1d2   : > { %v1524_v17 = vpop.f32.mrb[88].mxu1  ;;  %v3780_v3 = vadd.f32 %v2518_v4, %v1479_v10 }
 0x1d3   : > { %v1259_v28 = vpop.f32.mrb[24].mxu0  ;;  %v1526_v1 = vpop.f32.mrb[89].mxu1 }
 0x1d4   : > { %v2520_v24 = vadd.f32 %v1259_v28, %v3707_v50  ;;  %v1261_v21 = vpop.f32.mrb[25].mxu0 }
 0x1d6   : > { %v1529_v27 = vpop.f32.mrb[90].mxu1  ;;  %v3783_v30 = vadd.f32 %v2520_v24, %v1484_v14 }
 0x1d7   : > { %v1264_v34 = vpop.f32.mrb[26].mxu0  ;;  %v1531_v31 = vpop.f32.mrb[91].mxu1 }
 0x1d8   : > { %v2522_v35 = vadd.f32 %v1264_v34, %v3713_v53  ;;  %v1266_v40 = vpop.f32.mrb[27].mxu0 }
 0x1da   : > { %v1534_v45 = vpop.f32.mrb[92].mxu1  ;;  %v3786_v32 = vadd.f32 %v2522_v35, %v1489_v59 }
 0x1db   : > { %v1269_v42 = vpop.f32.mrb[28].mxu0  ;;  %v1536_v51 = vpop.f32.mrb[93].mxu1 }
 0x1dc   : > { %v2524_v10 = vadd.f32 %v1269_v42, %v3719_v13  ;;  %v1271_v61 = vpop.f32.mrb[29].mxu0 }
 0x1de   : > { %v1539_v62 = vpop.f32.mrb[94].mxu1  ;;  %v3789_v2 = vadd.f32 %v2524_v10, %v1494_v18 }
 0x1df   : > { %v1274_v50 = vpop.f32.mrb[30].mxu0  ;;  %v1541_v41 = vpop.f32.mrb[95].mxu1 }
 0x1e0   : > { %v2526_v14 = vadd.f32 %v1274_v50, %v3725_v7  ;;  %v1276_v20 = vpop.f32.mrb[31].mxu0 }
 0x1e2   : > { %v1544_v47 = vpop.f32.mrb[96].mxu1  ;;  %v3792_v4 = vadd.f32 %v2526_v14, %v1499_v19 }
 0x1e3   : > { %v1279_v53 = vpop.f32.mrb[32].mxu0  ;;  %v1546_v15 = vpop.f32.mrb[97].mxu1 }
 0x1e4   : > { %v2528_v59 = vadd.f32 %v1279_v53, %v3731_v55  ;;  %v1281_v28 = vpop.f32.mrb[33].mxu0 }
 0x1e6   : > { %v1549_v1 = vpop.f32.mrb[98].mxu1  ;;  %v3795_v24 = vadd.f32 %v2528_v59, %v1504_v23 }
 0x1e7   : > { %v1284_v13 = vpop.f32.mrb[34].mxu0  ;;  %v1551_v21 = vpop.f32.mrb[99].mxu1 }
 0x1e8   : > { %v2530_v18 = vadd.f32 %v1284_v13, %v3737_v8  ;;  %v1286_v34 = vpop.f32.mrb[35].mxu0 }
 0x1ea   : > { %v1554_v31 = vpop.f32.mrb[100].mxu1  ;;  %v3798_v35 = vadd.f32 %v2530_v18, %v1509_v36 }
 0x1eb   : > { %v1289_v7 = vpop.f32.mrb[36].mxu0  ;;  %v1556_v40 = vpop.f32.mrb[101].mxu1 }
 0x1ec   : > { %v2532_v19 = vadd.f32 %v1289_v7, %v3742_v26  ;;  %v1291_v42 = vpop.f32.mrb[37].mxu0 }
 0x1ee   : > { %v1559_v51 = vpop.f32.mrb[102].mxu1  ;;  %v3801_v10 = vadd.f32 %v2532_v19, %v1514_v54 }
 0x1ef   : > { %v1294_v55 = vpop.f32.mrb[38].mxu0  ;;  %v1561_v61 = vpop.f32.mrb[103].mxu1 }
 0x1f0   : > { %v2534_v23 = vadd.f32 %v1294_v55, %v3744_v29  ;;  %v1296_v50 = vpop.f32.mrb[39].mxu0 }
 0x1f2   : > { %v3804_v41 = vpop.f32.mrb[104].mxu1  ;;  %v3806_v8 = vadd.f32 %v2534_v23, %v1519_v6 }
 0x1f3   : > { %v1299_v14 = vpop.f32.mrb[40].mxu0  ;;  %v1566_v36 = vpop.f32.mrb[105].mxu1 }
 0x1f4   : > { %v2536_v20 = vadd.f32 %v1299_v14, %v3746_v12  ;;  %v1301_v53 = vpop.f32.mrb[41].mxu0 }
 0x1f6   : > { %v3809_v15 = vpop.f32.mrb[106].mxu1  ;;  %v3811_v26 = vadd.f32 %v2536_v20, %v1524_v17 }
 0x1f7   : > { %v1304_v54 = vpop.f32.mrb[42].mxu0  ;;  %v1571_v59 = vpop.f32.mrb[107].mxu1 }
 0x1f8   : > { %v2538_v28 = vadd.f32 %v1304_v54, %v3748_v33  ;;  %v1306_v13 = vpop.f32.mrb[43].mxu0 }
 0x1fa   : > { %v3814_v29 = vpop.f32.mrb[108].mxu1  ;;  %v3816_v21 = vadd.f32 %v2538_v28, %v1529_v27 }
 0x1fb   : > { %v1309_v6 = vpop.f32.mrb[44].mxu0  ;;  %v1576_v18 = vpop.f32.mrb[109].mxu1 }
 0x1fc   : > { %v2540_v34 = vadd.f32 %v1309_v6, %v3750_v37  ;;  %v1311_v7 = vpop.f32.mrb[45].mxu0 }
 0x1fe   : > { %v3819_v12 = vpop.f32.mrb[110].mxu1  ;;  %v3821_v40 = vadd.f32 %v2540_v34, %v1534_v45 }
 0x1ff   : > { %v1314_v17 = vpop.f32.mrb[46].mxu0  ;;  %v1581_v19 = vpop.f32.mrb[111].mxu1 }
 0x200   : > { %v2542_v42 = vadd.f32 %v1314_v17, %v3752_v39  ;;  %v1316_v55 = vpop.f32.mrb[47].mxu0  ;;  %v3856_v17 = vld [vmem:[%s4145_s2] ss:$0 sm:$0xff] }
 0x201   : > { %v3871_v55 = vld [vmem:[%s4146_s3] ss:$0 sm:$0xff] }
 0x202   : > { %v3824_v33 = vpop.f32.mrb[112].mxu1  ;;  %v3826_v61 = vadd.f32 %v2542_v42, %v1539_v62 }
 0x203   : > { %v1319_v27 = vpop.f32.mrb[48].mxu0  ;;  %v3828_v23 = vpop.f32.mrb[113].mxu1 }
 0x204   : > { %v2544_v50 = vadd.f32 %v1319_v27, %v3754_v44  ;;  %v1321_v37 = vpop.f32.mrb[49].mxu0 }
 0x205   : > { %v1895_v37 = vld [vmem:[%s3863_s15 + $0x48] sm:$0xff] }
 0x206   : > { %v3831_v14 = vpop.f32.mrb[114].mxu1  ;;  %v3833_v36 = vadd.f32 %v2544_v50, %v1544_v47 }
 0x207   : > { %v1324_v45 = vpop.f32.mrb[50].mxu0  ;;  %v3835_v20 = vpop.f32.mrb[115].mxu1 }
 0x208   : > { %v2546_v39 = vadd.f32 %v1324_v45, %v3756_v48  ;;  %v1326_v53 = vpop.f32.mrb[51].mxu0 }
 0x209   : > { %v1894_v53 = vld [vmem:[%s3863_s15 + $0x40] sm:$0xff] }
 0x20a   : > { %v3838_v54 = vpop.f32.mrb[116].mxu1  ;;  %v3840_v62 = vadd.f32 %v2546_v39, %v1549_v1 }
 0x20b   : > { %v1329_v59 = vpop.f32.mrb[52].mxu0  ;;  %v3842_v28 = vpop.f32.mrb[117].mxu1 }
 0x20c   : > { %v2548_v44 = vadd.f32 %v1329_v59, %v3758_v49  ;;  %v1331_v13 = vpop.f32.mrb[53].mxu0 }
 0x20e   : > { %v3845_v47 = vpop.f32.mrb[118].mxu1  ;;  %v3847_v6 = vadd.f32 %v2548_v44, %v1554_v31 }
 0x20f   : > { %v1334_v18 = vpop.f32.mrb[54].mxu0  ;;  %v3849_v34 = vpop.f32.mrb[119].mxu1 }
 0x210   : > { %v2550_v48 = vadd.f32 %v1334_v18, %v3760_v43  ;;  %v1336_v7 = vpop.f32.mrb[55].mxu0 }
 0x212   : > { %v2214_v1 = vpop.f32.mrb[120].mxu1  ;;  %v3858_v49 = vadd.f32 %v2550_v48, %v1559_v51 }
 0x213   : > { %v1339_v19 = vpop.f32.mrb[56].mxu0  ;;  %v1695_v43 = vadd.f32 %v3774_v57, %v2214_v1  ;;  %v1689_v31 = vpop.f32.mrb[121].mxu1 }
 0x214   : > { %v2552_v42 = vadd.f32 %v1339_v19, %v3762_v56  ;;  %v1341_v51 = vpop.f32.mrb[57].mxu0  ;;  %v1690_v27 = vadd.f32 %v3771_v38, %v1689_v31 }
 0x215   : > { %v1824_v50 = vmul.f32 %v3856_v17, %v1695_v43  ;;  %v1897_v43 = vld [vmem:[%s3863_s15 + $0x58] sm:$0xff] }
 0x216   : > { %v1823_v45 = vmul.f32 %v3856_v17, %v1690_v27  ;;  %v2217_v39 = vpop.f32.mrb[122].mxu1  ;;  %v3878_v57 = vadd.f32 %v2552_v42, %v3804_v41 }
 0x217   : > { %v1863_v56 = vadd.f32 %v3871_v55, %v1824_v50  ;;  %v1344_v59 = vpop.f32.mrb[58].mxu0  ;;  %v1705_v44 = vadd.f32 %v3780_v3, %v2217_v39  ;;  %v1699_v38 = vpop.f32.mrb[123].mxu1 }
 0x218   : > { %v1862_v13 = vadd.f32 %v3871_v55, %v1823_v45  ;;  %v2554_v18 = vadd.f32 %v1344_v59, %v3764_v60  ;;  %v1346_v48 = vpop.f32.mrb[59].mxu0  ;;  %v1700_v7 = vadd.f32 %v3777_v9, %v1699_v38  ;;  %v1896_v60 = vld [vmem:[%s3863_s15 + $0x50] sm:$0xff]  ;;  %v1899_v38 = vld [vmem:[%s3863_s15 + $0x68] sm:$0xff] }
 0x219   : > { %v1927_v1 = vadd.f32 %v1895_v37, %v1863_v56  ;;  %v1826_v41 = vmul.f32 %v3856_v17, %v1705_v44 }
 0x21a   : > { %v1926_v19 = vadd.f32 %v1894_v53, %v1862_v13  ;;  %v1825_v31 = vmul.f32 %v3856_v17, %v1700_v7  ;;  %v2220_v42 = vpop.f32.mrb[124].mxu1  ;;  %v3892_v3 = vadd.f32 %v2554_v18, %v3809_v15  ;;  %v1898_v7 = vld [vmem:[%s3863_s15 + $0x60] sm:$0xff] }
 0x21b   : > { %v1959_v51 = vmax.f32 %v1927_v1, 0.0  ;;  %v1865_v27 = vadd.f32 %v3871_v55, %v1826_v41  ;;  %v1349_v50 = vpop.f32.mrb[60].mxu0  ;;  %v1715_v9 = vadd.f32 %v3786_v32, %v2220_v42  ;;  %v1709_v37 = vpop.f32.mrb[125].mxu1 }
 0x21c   : > { %v1958_v45 = vmax.f32 %v1926_v19, 0.0  ;;  %v1864_v39 = vadd.f32 %v3871_v55, %v1825_v31  ;;  %v2556_v56 = vadd.f32 %v1349_v50, %v3766_v0  ;;  %v1351_v53 = vpop.f32.mrb[61].mxu0  ;;  %v1710_v59 = vadd.f32 %v3783_v30, %v1709_v37 }
 0x21d   : > { %1992 = vst.msk [vmem:[%s3900_s7 + $0x48] sm:$0xff] %vm1982_vm0, %v1959_v51  ;;  %v1929_v15 = vadd.f32 %v1897_v43, %v1865_v27  ;;  %v1828_v44 = vmul.f32 %v3856_v17, %v1715_v9 }
 0x21e   : > { %1991 = vst.msk [vmem:[%s3900_s7 + $0x40] sm:$0xff] %vm1982_vm0, %v1958_v45  ;;  %v1928_v32 = vadd.f32 %v1896_v60, %v1864_v39  ;;  %v1827_v13 = vmul.f32 %v3856_v17, %v1710_v59  ;;  %v2223_v0 = vpop.f32.mrb[126].mxu1  ;;  %v3910_v30 = vadd.f32 %v2556_v56, %v3814_v29  ;;  %v1900_v39 = vld [vmem:[%s3863_s15 + $0x70] sm:$0xff] }
 0x21f   : > { %v1961_v18 = vmax.f32 %v1929_v15, 0.0  ;;  %v1867_v48 = vadd.f32 %v3871_v55, %v1828_v44  ;;  %v1354_v1 = vpop.f32.mrb[62].mxu0  ;;  %v1725_v41 = vadd.f32 %v3792_v4, %v2223_v0  ;;  %v1719_v19 = vpop.f32.mrb[127].mxu1  ;;  %v1901_v4 = vld [vmem:[%s3863_s15 + $0x78] sm:$0xff] }
 0x220   : > { %v1960_v43 = vmax.f32 %v1928_v32, 0.0  ;;  %v1866_v31 = vadd.f32 %v3871_v55, %v1827_v13  ;;  %v2558_v42 = vadd.f32 %v1354_v1, %v3768_v63  ;;  %v1356_v51 = vpop.f32.mrb[63].mxu0  ;;  %v1720_v27 = vadd.f32 %v3789_v2, %v1719_v19 }
 0x221   : > { %1994 = vst.msk [vmem:[%s3900_s7 + $0x58] sm:$0xff] %vm1982_vm0, %v1961_v18  ;;  %v1931_v29 = vadd.f32 %v1899_v38, %v1867_v48  ;;  %v1830_v60 = vmul.f32 %v3856_v17, %v1725_v41  ;;  %v1903_v48 = vld [vmem:[%s3863_s15 + $0x88] sm:$0xff]  ;;  %v1902_v41 = vld [vmem:[%s3863_s15 + $0x80] sm:$0xff] }
 0x222   : > { %1993 = vst.msk [vmem:[%s3900_s7 + $0x50] sm:$0xff] %vm1982_vm0, %v1960_v43  ;;  %v1930_v50 = vadd.f32 %v1898_v7, %v1866_v31  ;;  %v1829_v9 = vmul.f32 %v3856_v17, %v1720_v27  ;;  %v2226_v37 = vpop.f32.mrb[128].mxu1  ;;  %v3926_v45 = vadd.f32 %v2558_v42, %v3819_v12 }
 0x223   : > { %v1963_v63 = vmax.f32 %v1931_v29, 0.0  ;;  %v1869_v2 = vadd.f32 %v3871_v55, %v1830_v60  ;;  %v1424_v56 = vpop.f32.mrb[0].mxu0  ;;  %v1735_v53 = vadd.f32 %v3798_v35, %v2226_v37  ;;  %v1729_v59 = vpop.f32.mrb[129].mxu1  ;;  %v1886_v60 = vld [vmem:[%s3863_s15] sm:$0xff] }
 0x224   : > { %v1962_v15 = vmax.f32 %v1930_v50, 0.0  ;;  %v1868_v44 = vadd.f32 %v3871_v55, %v1829_v9  ;;  %v2504_v32 = vadd.f32 %v1424_v56, %v3635_v22  ;;  %v1426_v38 = vpop.f32.mrb[1].mxu0  ;;  %v1730_v13 = vadd.f32 %v3795_v24, %v1729_v59 }
 0x225   : > { %1996 = vst.msk [vmem:[%s3900_s7 + $0x68] sm:$0xff] %vm1982_vm0, %v1963_v63  ;;  %v1933_v12 = vadd.f32 %v1901_v4, %v1869_v2  ;;  %v1832_v0 = vmul.f32 %v3856_v17, %v1735_v53 }
 0x226   : > { %1995 = vst.msk [vmem:[%s3900_s7 + $0x60] sm:$0xff] %vm1982_vm0, %v1962_v15  ;;  %v1932_v18 = vadd.f32 %v1900_v39, %v1868_v44  ;;  %v1650_v35 = vadd.f32 %v2504_v32, %v3828_v23  ;;  %v1831_v7 = vmul.f32 %v3856_v17, %v1730_v13  ;;  %v2229_v1 = vpop.f32.mrb[130].mxu1  ;;  %v1904_v13 = vld [vmem:[%s3863_s15 + $0x90] sm:$0xff] }
 0x227   : > { %v1965_v22 = vmax.f32 %v1933_v12, 0.0  ;;  %v1871_v24 = vadd.f32 %v3871_v55, %v1832_v0  ;;  %v1429_v19 = vpop.f32.mrb[2].mxu0  ;;  %v1745_v43 = vadd.f32 %v3806_v8, %v2229_v1  ;;  %v1739_v31 = vpop.f32.mrb[131].mxu1  ;;  %v1887_v0 = vld [vmem:[%s3863_s15 + $0x8] sm:$0xff] }
 0x228   : > { %v1964_v42 = vmax.f32 %v1932_v18, 0.0  ;;  %v1815_v51 = vmul.f32 %v3856_v17, %v1650_v35  ;;  %v1870_v23 = vadd.f32 %v3871_v55, %v1831_v7  ;;  %v2505_v27 = vadd.f32 %v1429_v19, %v3641_v46  ;;  %v1431_v29 = vpop.f32.mrb[3].mxu0  ;;  %v1905_v46 = vld [vmem:[%s3863_s15 + $0x98] sm:$0xff] }
 0x229   : > { %1998 = vst.msk [vmem:[%s3900_s7 + $0x78] sm:$0xff] %vm1982_vm0, %v1965_v22  ;;  %v1935_v50 = vadd.f32 %v1903_v48, %v1871_v24  ;;  %v1834_v4 = vmul.f32 %v3856_v17, %v1745_v43  ;;  %v1740_v9 = vadd.f32 %v3801_v10, %v1739_v31  ;;  %v1907_v22 = vld [vmem:[%s3863_s15 + $0xa8] sm:$0xff] }
 0x22a   : > { %1997 = vst.msk [vmem:[%s3900_s7 + $0x70] sm:$0xff] %vm1982_vm0, %v1964_v42  ;;  %v1854_v8 = vadd.f32 %v3871_v55, %v1815_v51  ;;  %v1934_v37 = vadd.f32 %v1902_v41, %v1870_v23  ;;  %v1655_v63 = vadd.f32 %v2505_v27, %v3824_v33  ;;  %v2232_v2 = vpop.f32.mrb[132].mxu1  ;;  %v1906_v27 = vld [vmem:[%s3863_s15 + $0xa0] sm:$0xff] }
 0x22b   : > { %v1967_v39 = vmax.f32 %v1935_v50, 0.0  ;;  %v1873_v56 = vadd.f32 %v3871_v55, %v1834_v4  ;;  %v1833_v53 = vmul.f32 %v3856_v17, %v1740_v9  ;;  %v1434_v59 = vpop.f32.mrb[4].mxu0  ;;  %v1755_v10 = vadd.f32 %v3816_v21, %v2232_v2  ;;  %v1749_v15 = vpop.f32.mrb[133].mxu1  ;;  %v1888_v4 = vld [vmem:[%s3863_s15 + $0x10] sm:$0xff] }
 0x22c   : > { %v1918_v44 = vadd.f32 %v1886_v60, %v1854_v8  ;;  %v1966_v32 = vmax.f32 %v1934_v37, 0.0  ;;  %v1816_v38 = vmul.f32 %v3856_v17, %v1655_v63  ;;  %v2506_v33 = vadd.f32 %v1434_v59, %v3647_v52  ;;  %v1436_v12 = vpop.f32.mrb[5].mxu0 }
 0x22d   : > { %2000 = vst.msk [vmem:[%s3900_s7 + $0x88] sm:$0xff] %vm1982_vm0, %v1967_v39  ;;  %v1937_v18 = vadd.f32 %v1905_v46, %v1873_v56  ;;  %v1872_v35 = vadd.f32 %v3871_v55, %v1833_v53  ;;  %v1836_v48 = vmul.f32 %v3856_v17, %v1755_v10  ;;  %v1750_v21 = vadd.f32 %v3811_v26, %v1749_v15  ;;  %v1909_v53 = vld [vmem:[%s3863_s15 + $0xb8] sm:$0xff] }
 0x22e   : > { %v1950_v7 = vmax.f32 %v1918_v44, 0.0  ;;  %1999 = vst.msk [vmem:[%s3900_s7 + $0x80] sm:$0xff] %vm1982_vm0, %v1966_v32  ;;  %v1855_v1 = vadd.f32 %v3871_v55, %v1816_v38  ;;  %v1660_v52 = vadd.f32 %v2506_v33, %v3835_v20  ;;  %v2235_v24 = vpop.f32.mrb[134].mxu1  ;;  %v1908_v38 = vld [vmem:[%s3863_s15 + $0xb0] sm:$0xff] }
 0x22f   : > { %v1969_v41 = vmax.f32 %v1937_v18, 0.0  ;;  %v1936_v19 = vadd.f32 %v1904_v13, %v1872_v35  ;;  %v1875_v43 = vadd.f32 %v3871_v55, %v1836_v48  ;;  %v1835_v31 = vmul.f32 %v3856_v17, %v1750_v21  ;;  %v1439_v42 = vpop.f32.mrb[6].mxu0  ;;  %v1759_v26 = vpop.f32.mrb[135].mxu1 }
 0x230   : > { %1983 = vst.msk [vmem:[%s3900_s7] sm:$0xff] %vm1982_vm0, %v1950_v7  ;;  %v1919_v51 = vadd.f32 %v1887_v0, %v1855_v1  ;;  %v1817_v23 = vmul.f32 %v3856_v17, %v1660_v52  ;;  %v2507_v20 = vadd.f32 %v1439_v42, %v3653_v58  ;;  %v1765_v29 = vadd.f32 %v3826_v61, %v2235_v24  ;;  %v1441_v60 = vpop.f32.mrb[7].mxu0  ;;  %v1889_v0 = vld [vmem:[%s3863_s15 + $0x18] sm:$0xff] }
 0x231   : > { %2002 = vst.msk [vmem:[%s3900_s7 + $0x98] sm:$0xff] %vm1982_vm0, %v1969_v41  ;;  %v1968_v50 = vmax.f32 %v1936_v19, 0.0  ;;  %v1939_v9 = vadd.f32 %v1907_v22, %v1875_v43  ;;  %v1874_v8 = vadd.f32 %v3871_v55, %v1835_v31  ;;  %v1760_v37 = vadd.f32 %v3821_v40, %v1759_v26  ;;  %v1910_v26 = vld [vmem:[%s3863_s15 + $0xc0] sm:$0xff] }
 0x232   : > { %v1951_v63 = vmax.f32 %v1919_v51, 0.0  ;;  %v1856_v46 = vadd.f32 %v3871_v55, %v1817_v23  ;;  %v1665_v58 = vadd.f32 %v2507_v20, %v3831_v14  ;;  %v1838_v61 = vmul.f32 %v3856_v17, %v1765_v29  ;;  %v2238_v2 = vpop.f32.mrb[136].mxu1  ;;  %v1890_v20 = vld [vmem:[%s3863_s15 + $0x20] sm:$0xff] }
 0x233   : > { %2001 = vst.msk [vmem:[%s3900_s7 + $0x90] sm:$0xff] %vm1982_vm0, %v1968_v50  ;;  %v1971_v39 = vmax.f32 %v1939_v9, 0.0  ;;  %v1938_v56 = vadd.f32 %v1906_v27, %v1874_v8  ;;  %v1837_v59 = vmul.f32 %v3856_v17, %v1760_v37  ;;  %v1444_v10 = vpop.f32.mrb[8].mxu0  ;;  %v1775_v40 = vadd.f32 %v3840_v62, %v2238_v2  ;;  %v1769_v15 = vpop.f32.mrb[137].mxu1  ;;  %v1913_v8 = vld [vmem:[%s3863_s15 + $0xd8] sm:$0xff] }
 0x234   : > { %1984 = vst.msk [vmem:[%s3900_s7 + $0x8] sm:$0xff] %vm1982_vm0, %v1951_v63  ;;  %v1920_v44 = vadd.f32 %v1888_v4, %v1856_v46  ;;  %v1818_v14 = vmul.f32 %v3856_v17, %v1665_v58  ;;  %v1877_v32 = vadd.f32 %v3871_v55, %v1838_v61  ;;  %v2508_v13 = vadd.f32 %v1444_v10, %v3659_v25  ;;  %v1446_v33 = vpop.f32.mrb[9].mxu0  ;;  %v1911_v25 = vld [vmem:[%s3863_s15 + $0xc8] sm:$0xff] }
 0x235   : > { %2004 = vst.msk [vmem:[%s3900_s7 + $0xa8] sm:$0xff] %vm1982_vm0, %v1971_v39  ;;  %v1970_v12 = vmax.f32 %v1938_v56, 0.0  ;;  %v1876_v62 = vadd.f32 %v3871_v55, %v1837_v59  ;;  %v1840_v18 = vmul.f32 %v3856_v17, %v1775_v40  ;;  %v1770_v35 = vadd.f32 %v3833_v36, %v1769_v15  ;;  %v1891_v40 = vld [vmem:[%s3863_s15 + $0x28] sm:$0xff] }
 0x236   : > { %v1952_v48 = vmax.f32 %v1920_v44, 0.0  ;;  %v1857_v21 = vadd.f32 %v3871_v55, %v1818_v14  ;;  %v1941_v7 = vadd.f32 %v1909_v53, %v1877_v32  ;;  %v1670_v1 = vadd.f32 %v2508_v13, %v3842_v28  ;;  %v2241_v52 = vpop.f32.mrb[138].mxu1  ;;  %v1912_v44 = vld [vmem:[%s3863_s15 + $0xd0] sm:$0xff]  ;;  %v1915_v33 = vld [vmem:[%s3863_s15 + $0xe8] sm:$0xff] }
 0x237   : > { %2003 = vst.msk [vmem:[%s3900_s7 + $0xa0] sm:$0xff] %vm1982_vm0, %v1970_v12  ;;  %v1940_v22 = vadd.f32 %v1908_v38, %v1876_v62  ;;  %v1879_v24 = vadd.f32 %v3871_v55, %v1840_v18  ;;  %v1839_v41 = vmul.f32 %v3856_v17, %v1770_v35  ;;  %v1449_v19 = vpop.f32.mrb[10].mxu0  ;;  %v1785_v36 = vadd.f32 %v3858_v49, %v2241_v52  ;;  %v1779_v43 = vpop.f32.mrb[139].mxu1 }
 0x238   : > { %1985 = vst.msk [vmem:[%s3900_s7 + $0x10] sm:$0xff] %vm1982_vm0, %v1952_v48  ;;  %v1921_v31 = vadd.f32 %v1889_v0, %v1857_v21  ;;  %v1973_v28 = vmax.f32 %v1941_v7, 0.0  ;;  %v1819_v42 = vmul.f32 %v3856_v17, %v1670_v1  ;;  %v2509_v51 = vadd.f32 %v1449_v19, %v3665_v5  ;;  %v1451_v23 = vpop.f32.mrb[11].mxu0  ;;  %v1914_v1 = vld [vmem:[%s3863_s15 + $0xe0] sm:$0xff] }
 0x239   : > { %v1972_v27 = vmax.f32 %v1940_v22, 0.0  ;;  %v1943_v29 = vadd.f32 %v1911_v25, %v1879_v24  ;;  %v1878_v60 = vadd.f32 %v3871_v55, %v1839_v41  ;;  %v1842_v49 = vmul.f32 %v3856_v17, %v1785_v36  ;;  %v1892_v22 = vld [vmem:[%s3863_s15 + $0x30] sm:$0xff] }
 0x23a   : > { %v1953_v50 = vmax.f32 %v1921_v31, 0.0  ;;  %2006 = vst.msk [vmem:[%s3900_s7 + $0xb8] sm:$0xff] %vm1982_vm0, %v1973_v28  ;;  %v1858_v4 = vadd.f32 %v3871_v55, %v1819_v42  ;;  %v1675_v9 = vadd.f32 %v2509_v51, %v3838_v54  ;;  %v1780_v5 = vadd.f32 %v3847_v6, %v1779_v43  ;;  %v2244_v37 = vpop.f32.mrb[140].mxu1  ;;  %v1917_v28 = vld [vmem:[%s3863_s15 + $0xf8] sm:$0xff] }
 0x23b   : > { %2005 = vst.msk [vmem:[%s3900_s7 + $0xb0] sm:$0xff] %vm1982_vm0, %v1972_v27  ;;  %v1975_v63 = vmax.f32 %v1943_v29, 0.0  ;;  %v1942_v46 = vadd.f32 %v1910_v26, %v1878_v60  ;;  %v1881_v58 = vadd.f32 %v3871_v55, %v1842_v49  ;;  %v1454_v61 = vpop.f32.mrb[12].mxu0  ;;  %v1795_v2 = vadd.f32 %v3892_v3, %v2244_v37  ;;  %v1789_v39 = vpop.f32.mrb[141].mxu1  ;;  %v1893_v29 = vld [vmem:[%s3863_s15 + $0x38] sm:$0xff] }
 0x23c   : > { %1986 = vst.msk [vmem:[%s3900_s7 + $0x18] sm:$0xff] %vm1982_vm0, %v1953_v50  ;;  %v1922_v54 = vadd.f32 %v1890_v20, %v1858_v4  ;;  %v1820_v56 = vmul.f32 %v3856_v17, %v1675_v9  ;;  %v1841_v6 = vmul.f32 %v3856_v17, %v1780_v5  ;;  %v2510_v53 = vadd.f32 %v1454_v61, %v3671_v11  ;;  %v1456_v59 = vpop.f32.mrb[13].mxu0 }
 0x23d   : > { %2008 = vst.msk [vmem:[%s3900_s7 + $0xc8] sm:$0xff] %vm1982_vm0, %v1975_v63  ;;  %v1974_v10 = vmax.f32 %v1942_v46, 0.0  ;;  %v1945_v15 = vadd.f32 %v1913_v8, %v1881_v58  ;;  %v1844_v3 = vmul.f32 %v3856_v17, %v1795_v2  ;;  %v1790_v14 = vadd.f32 %v3878_v57, %v1789_v39 }
 0x23e   : > { %v1954_v32 = vmax.f32 %v1922_v54, 0.0  ;;  %v1859_v38 = vadd.f32 %v3871_v55, %v1820_v56  ;;  %v1880_v13 = vadd.f32 %v3871_v55, %v1841_v6  ;;  %v1680_v11 = vadd.f32 %v2510_v53, %v3849_v34  ;;  %v2247_v12 = vpop.f32.mrb[142].mxu1 }
 0x23f   : > { %2007 = vst.msk [vmem:[%s3900_s7 + $0xc0] sm:$0xff] %vm1982_vm0, %v1974_v10  ;;  %v1977_v0 = vmax.f32 %v1945_v15, 0.0  ;;  %v1883_v62 = vadd.f32 %v3871_v55, %v1844_v3  ;;  %v1843_v18 = vmul.f32 %v3856_v17, %v1790_v14  ;;  %v1459_v57 = vpop.f32.mrb[14].mxu0  ;;  %v1805_v35 = vadd.f32 %v3926_v45, %v2247_v12  ;;  %v1799_v48 = vpop.f32.mrb[143].mxu1 }
 0x240   : > { %1987 = vst.msk [vmem:[%s3900_s7 + $0x20] sm:$0xff] %vm1982_vm0, %v1954_v32  ;;  %v1923_v21 = vadd.f32 %v1891_v40, %v1859_v38  ;;  %v1944_v34 = vadd.f32 %v1912_v44, %v1880_v13  ;;  %v1821_v7 = vmul.f32 %v3856_v17, %v1680_v11  ;;  %v2511_v25 = vadd.f32 %v1459_v57, %v3677_v16  ;;  %v1461_v52 = vpop.f32.mrb[15].mxu0 }
 0x241   : > { %2010 = vst.msk [vmem:[%s3900_s7 + $0xd8] sm:$0xff] %vm1982_vm0, %v1977_v0  ;;  %v1947_v24 = vadd.f32 %v1915_v33, %v1883_v62  ;;  %v1882_v45 = vadd.f32 %v3871_v55, %v1843_v18  ;;  %v1846_v41 = vmul.f32 %v3856_v17, %v1805_v35  ;;  %v1800_v19 = vadd.f32 %v3910_v30, %v1799_v48 }
 0x242   : > { %v1955_v36 = vmax.f32 %v1923_v21, 0.0  ;;  %v1976_v43 = vmax.f32 %v1944_v34, 0.0  ;;  %v1860_v16 = vadd.f32 %v3871_v55, %v1821_v7  ;;  %v1685_v31 = vadd.f32 %v2511_v25, %v3845_v47  ;;  %v1916_v47 = vld [vmem:[%s3863_s15 + $0xf0] sm:$0xff] }
 0x243   : > { %v1979_v42 = vmax.f32 %v1947_v24, 0.0  ;;  %v1946_v26 = vadd.f32 %v1914_v1, %v1882_v45  ;;  %v1885_v51 = vadd.f32 %v3871_v55, %v1846_v41  ;;  %v1845_v23 = vmul.f32 %v3856_v17, %v1800_v19 }
 0x244   : > { %1988 = vst.msk [vmem:[%s3900_s7 + $0x28] sm:$0xff] %vm1982_vm0, %v1955_v36  ;;  %2009 = vst.msk [vmem:[%s3900_s7 + $0xd0] sm:$0xff] %vm1982_vm0, %v1976_v43  ;;  %v1924_v30 = vadd.f32 %v1892_v22, %v1860_v16  ;;  %v1822_v27 = vmul.f32 %v3856_v17, %v1685_v31 }
 0x245   : > { %2012 = vst.msk [vmem:[%s3900_s7 + $0xe8] sm:$0xff] %vm1982_vm0, %v1979_v42  ;;  %v1978_v20 = vmax.f32 %v1946_v26, 0.0  ;;  %v1949_v60 = vadd.f32 %v1917_v28, %v1885_v51  ;;  %v1884_v49 = vadd.f32 %v3871_v55, %v1845_v23 }
 0x246   : > { %v1956_v50 = vmax.f32 %v1924_v30, 0.0  ;;  %v1861_v4 = vadd.f32 %v3871_v55, %v1822_v27 }
 0x247   : > { %2011 = vst.msk [vmem:[%s3900_s7 + $0xe0] sm:$0xff] %vm1982_vm0, %v1978_v20  ;;  %v1981_v17 = vmax.f32 %v1949_v60, 0.0  ;;  %v1948_v9 = vadd.f32 %v1916_v47, %v1884_v49 }
 0x248   : > { %1989 = vst.msk [vmem:[%s3900_s7 + $0x30] sm:$0xff] %vm1982_vm0, %v1956_v50  ;;  %v1925_v8 = vadd.f32 %v1893_v29, %v1861_v4 }
 0x249   : > { %2014 = vst.msk [vmem:[%s3900_s7 + $0xf8] sm:$0xff] %vm1982_vm0, %v1981_v17  ;;  %v1980_v5 = vmax.f32 %v1948_v9, 0.0 }
 0x24a   : > { %v1957_v55 = vmax.f32 %v1925_v8, 0.0 }
 0x24b   : > { %2013 = vst.msk [vmem:[%s3900_s7 + $0xf0] sm:$0xff] %vm1982_vm0, %v1980_v5 }
 0x24c   : > { %1990 = vst.msk [vmem:[%s3900_s7 + $0x38] sm:$0xff] %vm1982_vm0, %v1957_v55 }
 0x24d   : > { %2696 = shalt.err (!%p2693_p3)
}
 0x24e   : > { %s2697_s23 = scalar_lea.hbm %s4092_s13, 4096  ;;  %s2701_s25 = scalar_lea.hbm %s4148_s5, 8192 }
 0x24f   : > { %p2698_p4 = scmp.ne.s32.totalorder %s4092_s13, %s2697_s23  ;;  %p2702_p9 = scmp.lt.u32.totalorder %s4092_s13, %s4148_s5 }
 0x250   : > { %p2703_p10 = scmp.lt.u32.totalorder %s2701_s25, %s2697_s23  ;;  %p2705_p12 = scmp.lt.u32.totalorder %s2697_s23, %s4092_s13 }
 0x251   : > { %p2699_p7 = pnand %p2698_p4, %p2819_p5 }
 0x252   : > { %p2704_p11 = por %p2703_p10, %p2702_p9 }
 0x253   : > { %p2700_p8 = pneg %p2699_p7 }
 0x254   : > { %p2706_p13 = por %p2705_p12, %p2704_p11 }
 0x256   : > { %p2707_p0 = pnand %p2706_p13, %p2700_p8 }
 0x258   : > { %2710 = shalt.err (!%p2707_p0)
}
 0x259   : > { %s2749_s7 = smov 128   ;;  %s2750_s8 = smov 8  }
 0x25a   : > { %2641 = dma.vmem_to_hbm [thread:$0]  (%p2819_p5), %s4094_s9, 4096, %s4092_s13, %s4102_s22, %s2749_s7, %s2749_s7, %s2750_s8  }
 0x25b PF: > { %p2647_p1 = scmp.ge.s32.totalorder %s2745_s21, 2  ;;  %s2044_s10 = sand.u32 1, %s2733_s18  }
 0x25c   : > { %s2045_s12 = scalar_lea.sflag [#allocation3], %s2044_s10 }
 0x25d   : > { %p2644_p2 = pnand %p2647_p1, %p2823_p6 }
 0x25f   : > { %2728 = dma.done.wait (!%p2644_p2), %s2045_s12, 4096  }
 0x260   : > { %2730 = vsyncadd (!%p2644_p2), %s2045_s12, 4294963200  ;;  %p15_p3 = scmp.ge.s32.totalorder %s2806_s24, 4   ;;  %s4151_s18 = smov %s2737_s19 }
 0x261   : > { %s4152_s19 = smov %s2741_s20  ;;  %s4153_s20 = smov %s2817_s27 }
 0x262   : > { %s4154_s21 = smov %s2806_s24  ;;  %17 = sbr.rel (!%p15_p3) target bundleno = 3 (0x3), region = 78 }
 0x269   :  { %2050 = vsyncpa [#allocation3], 1 }
 0x26a   :  { %2052 = vsyncpa [#allocation3 + $0x1], 1 }

</bundles_post_ra>
